<compile_context>
chip_gen: v5e
topology: v5e:2x2
jax: 0.10.0
libtpu: 0.0.40
codegen_flags: <defaults>
</compile_context>

<pallas_src>
import numpy as np

import jax
import jax.numpy as jnp
from jax.experimental import pallas as pl
from jax.experimental.pallas import tpu as pltpu

EPS = 1e-5
VMEM_LIMIT = 32 * 1024 * 1024


def _round_up(v, m):
    return (v + m - 1) // m * m


def _out_hw(h, w, k, stride, pad):
    return (h + 2 * pad - k) // stride + 1, (w + 2 * pad - k) // stride + 1


# ---------------------- gather matrices ("implicit im2col") -----------------

def _build_sel(n, h, w, k, stride, pad):
    """Per-tap 0/1 gather matrices.

    sel[t, src, dst] == 1 iff unpadded input pixel `src` feeds output pixel
    `dst` at kernel tap t; output pixels whose tap lands in the padding get an
    all-zero column (== zero padding).  Taps that are entirely zero are dropped.
    Returns (sel (T, n*h*w, n*ho*wo) bf16, tap_ids, (ho, wo)).
    """
    ho, wo = _out_hw(h, w, k, stride, pad)
    m_in, m_out = n * h * w, n * ho * wo
    sels, tap_ids = [], []
    for dy in range(k):
        for dx in range(k):
            s = np.zeros((m_in, m_out), np.float32)
            valid = False
            for oy in range(ho):
                iy = oy * stride + dy - pad
                if not 0 <= iy < h:
                    continue
                for ox in range(wo):
                    ix = ox * stride + dx - pad
                    if not 0 <= ix < w:
                        continue
                    valid = True
                    for b in range(n):
                        s[(b * h + iy) * w + ix, (b * ho + oy) * wo + ox] = 1.0
            if valid:
                sels.append(s)
                tap_ids.append(dy * k + dx)
    sel = jnp.asarray(np.stack(sels, axis=0), jnp.bfloat16)
    return sel, tap_ids, (ho, wo)


def _im2col(x, k, stride, pad):
    # x: (C, N, H, W) -> (C*k*k, N*Ho*Wo).  Wrapper-side XLA glue, stem only.
    c, n, h, w = x.shape
    xp = jnp.pad(x, ((0, 0), (0, 0), (pad, pad), (pad, pad)))
    ho, wo = _out_hw(h, w, k, stride, pad)
    taps = []
    for dy in range(k):
        for dx in range(k):
            taps.append(xp[:, :, dy:dy + stride * (ho - 1) + 1:stride,
                               dx:dx + stride * (wo - 1) + 1:stride])
    cols = jnp.stack(taps, axis=1).reshape(c * k * k, n * ho * wo)
    return cols, (ho, wo)


# ------------------------------ model config --------------------------------

SIZES = {
    'conv1': (16, 3),
    'layer1': {0: {'conv1': (16, 16), 'conv2': (16, 16), 'indices': 16}},
    'layer2': {'downsample': (32, 16),
               0: {'conv1': (32, 16), 'conv2': (32, 32), 'indices': 32}},
    'layer3': {'downsample': (64, 32),
               0: {'conv1': (64, 32), 'conv2': (64, 64), 'indices': 64}},
    'layer4': {'downsample': (128, 64),
               0: {'conv1': (128, 64), 'conv2': (128, 128), 'indices': 128}},
    'fc': (10, 128),
}
LAYERS = [1, 1, 1, 1]                      # one BasicBlock per stage
LAYER_NAMES = ['layer1', 'layer2', 'layer3', 'layer4']


def _conv_w(key, cout, cin, k):
    return 0.05 * jax.random.normal(key, (cout, cin, k, k), jnp.float32)


def _bn_p(key, c):
    k1, k2, k3 = jax.random.split(key, 3)
    gamma = 1.0 + 0.1 * jax.random.normal(k1, (c,), jnp.float32)
    beta = 0.1 * jax.random.normal(k2, (c,), jnp.float32)
    mean = 0.1 * jax.random.normal(k3, (c,), jnp.float32)
    var = jnp.ones((c,), jnp.float32)
    return (gamma, beta, mean, var)


def make_block_params(key, bsizes, ds_sizes):
    keys = jax.random.split(key, 6)
    c1o, c1i = bsizes['conv1']
    c2o, c2i = bsizes['conv2']
    p = {
        'conv1_w': _conv_w(keys[0], c1o, c1i, 3),
        'bn1': _bn_p(keys[1], c1o),
        'conv2_w': _conv_w(keys[2], c2o, c2i, 3),
        'bn2': _bn_p(keys[3], c2o),
        # register_buffer('indices', torch.zeros(..., dtype=torch.int))
        'indices': jnp.zeros((bsizes['indices'],), jnp.int32),
    }
    if ds_sizes is not None:
        do, di = ds_sizes
        p['ds_w'] = _conv_w(keys[4], do, di, 1)
        p['ds_bn'] = _bn_p(keys[5], do)
    return p


def init_params(key):
    keys = jax.random.split(key, 16)
    params = {
        'conv1_w': _conv_w(keys[0], SIZES['conv1'][0], SIZES['conv1'][1], 7),
        'bn1': _bn_p(keys[1], SIZES['conv1'][0]),
    }
    ki = 2
    for li, lname in enumerate(LAYER_NAMES):
        lsizes = SIZES[lname]
        blocks = []
        for bi in range(LAYERS[li]):
            ds = lsizes.get('downsample') if bi == 0 else None
            blocks.append(make_block_params(keys[ki], lsizes[bi], ds))
            ki += 1
        params[lname] = blocks
    ncls, nfeat = SIZES['fc']
    params['fc_w'] = 0.05 * jax.random.normal(keys[ki], (nfeat, ncls), jnp.float32)
    params['fc_b'] = 0.01 * jax.random.normal(keys[ki + 1], (ncls,), jnp.float32)
    return params


# -------- one-time constant folding (BN scale -> W, scatter -> ds W) --------

def _fold_bn(bn):
    gamma, beta, mean, var = bn
    scale = gamma / jnp.sqrt(var + EPS)
    shift = beta - mean * scale
    return scale, shift


def _prep_conv_flat(w, bn, k_align=16):
    # stem conv as one (Cout, K) matmul, K padded to the bf16 sublane multiple
    cout = w.shape[0]
    scale, shift = _fold_bn(bn)
    wmat = w.reshape(cout, -1) * scale[:, None]
    k = wmat.shape[1]
    kp = _round_up(k, k_align)
    if kp != k:
        wmat = jnp.pad(wmat, ((0, 0), (0, kp - k)))
    return wmat.astype(jnp.bfloat16), shift.reshape(cout, 1).astype(jnp.float32)


def _prep_conv_taps(w, bn):
    # 3x3 conv as 9 per-tap (Cout, Cin) matrices, BN scale folded in
    cout, cin, kh, kw = w.shape
    scale, shift = _fold_bn(bn)
    wt = (w * scale[:, None, None, None]).transpose(2, 3, 0, 1)
    wt = wt.reshape(kh * kw, cout, cin)
    return wt.astype(jnp.bfloat16), shift.reshape(cout, 1).astype(jnp.float32)


def _prep_downsample(w, bn, indices, cout_block):
    # 1x1 conv + BN + index_add_ scatter, all folded into one (Cout, Cin) matrix
    cid = w.shape[0]
    scale, shift = _fold_bn(bn)
    wmat = w.reshape(cid, -1) * scale[:, None]
    st = jax.nn.one_hot(indices, cout_block, dtype=jnp.float32).T      # (Cout, Cid)
    return ((st @ wmat).astype(jnp.bfloat16),
            (st @ shift.reshape(cid, 1)).astype(jnp.float32))


def prepare_params(params):
    prep = {'conv1': _prep_conv_flat(params['conv1_w'], params['bn1'])}
    for lname in LAYER_NAMES:
        blocks = []
        for bp in params[lname]:
            cout = bp['conv2_w'].shape[0]
            w1t, s1 = _prep_conv_taps(bp['conv1_w'], bp['bn1'])
            w2t, s2 = _prep_conv_taps(bp['conv2_w'], bp['bn2'])
            b = {'w1_taps': w1t, 'shift1': s1, 'w2_taps': w2t, 'shift2': s2}
            if 'ds_w' in bp:
                dsw, dss = _prep_downsample(bp['ds_w'], bp['ds_bn'],
                                            bp['indices'], cout)
                b['ds_w'], b['ds_shift'] = dsw, dss
            else:
                b['st'] = jax.nn.one_hot(bp['indices'], cout,
                                         dtype=jnp.float32).T.astype(jnp.bfloat16)
            blocks.append(b)
        prep[lname] = blocks
    prep['fc_w_t'] = params['fc_w'].T.astype(jnp.float32)              # (ncls, C)
    prep['fc_b'] = params['fc_b'].reshape(-1, 1).astype(jnp.float32)   # (ncls, 1)
    return prep


# ------------------------------- forward ------------------------------------

def pruned_resnet_forward(x_nchw, prep):
    n, _, h0, w0 = x_nchw.shape
    ncls = prep['fc_w_t'].shape[0]

    # ---- stem im2col: the only wrapper-side data movement ----
    x_c = jnp.transpose(x_nchw, (1, 0, 2, 3)).astype(jnp.bfloat16)     # (C, N, H, W)
    cols1, (h1, w1) = _im2col(x_c, 7, 2, 3)
    k1p = prep['conv1'][0].shape[1]
    if cols1.shape[0] != k1p:
        cols1 = jnp.pad(cols1, ((0, k1p - cols1.shape[0]), (0, 0)))

    # ---- assemble kernel operands + static metadata ----
    args = []

    def add(a):
        args.append(a)
        return len(args) - 1

    i_cols1 = add(cols1)
    i_w1 = add(prep['conv1'][0])
    i_s1 = add(prep['conv1'][1])
    c1 = prep['conv1'][0].shape[0]
    m1 = cols1.shape[1]
    flops = 2 * c1 * k1p * m1

    pool_sel, pool_taps, (hp, wp) = _build_sel(n, h1, w1, 3, 2, 1)
    i_pool = add(pool_sel)
    mp = n * hp * wp
    flops += 2 * c1 * m1 * mp * len(pool_taps)

    geom_cache = {}

    def geom(h, w, stride):
        key = (h, w, stride)
        if key not in geom_cache:
            sel, taps, _ = _build_sel(n, h, w, 3, stride, 1)
            geom_cache[key] = (add(sel), taps)
        return geom_cache[key]

    blocks_meta = []
    h, w, c_in = hp, wp, c1
    for li, lname in enumerate(LAYER_NAMES):
        layer_stride = 1 if li == 0 else 2
        for bi, bp in enumerate(prep[lname]):
            s = layer_stride if bi == 0 else 1
            ia, taps_a = geom(h, w, s)
            ho, wo = _out_hw(h, w, 3, s, 1)
            ib, taps_b = geom(ho, wo, 1)
            m = {'sel_a': ia, 'taps_a': taps_a, 'sel_b': ib, 'taps_b': taps_b,
                 'w1': add(bp['w1_taps']), 's1': add(bp['shift1']),
                 'w2': add(bp['w2_taps']), 's2': add(bp['shift2']),
                 'has_ds': 'ds_w' in bp}
            if m['has_ds']:
                m['dsw'] = add(bp['ds_w'])
                m['dss'] = add(bp['ds_shift'])
            else:
                m['st'] = add(bp['st'])
            c1o, c1i = bp['w1_taps'].shape[1:]
            c2o, c2i = bp['w2_taps'].shape[1:]
            mi, mo = n * h * w, n * ho * wo
            flops += len(taps_a) * 2 * (c1i * mi * mo + c1o * c1i * mo)
            flops += len(taps_b) * 2 * (c2i * mo * mo + c2o * c2i * mo)
            flops += 2 * c2o * c_in * mo
            blocks_meta.append(m)
            h, w, c_in = ho, wo, c2o

    hw4 = h * w
    pool_avg = jnp.asarray(
        np.kron(np.eye(n, dtype=np.float32),
                np.full((hw4, 1), 1.0 / hw4, np.float32)), jnp.bfloat16)
    i_pavg = add(pool_avg)                 # (N*hw4, N) block-diag averaging matrix
    i_fcw = add(prep['fc_w_t'])
    i_fcb = add(prep['fc_b'])
    flops += 2 * c_in * n * hw4 * n + 2 * ncls * c_in * n

    bytes_accessed = int(sum(a.size * a.dtype.itemsize for a in args)
                         + ncls * n * 4)

    # ---- the single fused kernel ----
    def kernel(*refs):
        out_ref = refs[-1]
        R = refs

        # stem: conv1 (flat matmul on pre-built im2col) + BN shift + ReLU
        y = jnp.dot(R[i_w1][...], R[i_cols1][...],
                    preferred_element_type=jnp.float32) + R[i_s1][...]
        y = jnp.maximum(y, 0.0).astype(jnp.bfloat16)            # (C1, N*16*16)

        # maxpool 3x3/2: unrolled max over gathered taps (zero pad safe post-ReLU)
        pooled = None
        for t in range(len(pool_taps)):
            g = jnp.dot(y, R[i_pool][t], preferred_element_type=jnp.float32)
            pooled = g if pooled is None else jnp.maximum(pooled, g)
        xact = pooled.astype(jnp.bfloat16)                      # (C1, N*8*8)

        # residual stages
        for m in blocks_meta:
            w1t = R[m['w1']]
            w2t = R[m['w2']]
            # conv1 + BN + ReLU (gather-first so the centre tap is reusable)
            acc = R[m['s1']][...]
            center = None
            for j, tid in enumerate(m['taps_a']):
                g = jnp.dot(xact, R[m['sel_a']][j],
                            preferred_element_type=jnp.float32).astype(jnp.bfloat16)
                if tid == 4:
                    center = g
                acc = acc + jnp.dot(w1t[tid], g,
                                    preferred_element_type=jnp.float32)
            y1 = jnp.maximum(acc, 0.0).astype(jnp.bfloat16)
            # conv2 + BN + residual index_add_ + ReLU
            acc2 = R[m['s2']][...]
            for j, tid in enumerate(m['taps_b']):
                g = jnp.dot(y1, R[m['sel_b']][j],
                            preferred_element_type=jnp.float32).astype(jnp.bfloat16)
                acc2 = acc2 + jnp.dot(w2t[tid], g,
                                      preferred_element_type=jnp.float32)
            if m['has_ds']:
                # 1x1/s2 downsample + BN + scatter folded into dsw; reuses the
                # centre-tap gather of this block's stride-2 conv1.
                acc2 = acc2 + (jnp.dot(R[m['dsw']][...], center,
                                       preferred_element_type=jnp.float32)
                               + R[m['dss']][...])
            else:
                # out.index_add_(1, indices, identity) == one_hot(idx).T @ x
                acc2 = acc2 + jnp.dot(R[m['st']][...], xact,
                                      preferred_element_type=jnp.float32)
            xact = jnp.maximum(acc2, 0.0).astype(jnp.bfloat16)

        # AdaptiveAvgPool2d((1,1)) + flatten + Linear (logits stored (ncls, N))
        pooled_cn = jnp.dot(xact, R[i_pavg][...],
                            preferred_element_type=jnp.float32)         # (C, N)
        logits_t = jnp.dot(R[i_fcw][...], pooled_cn,
                           preferred_element_type=jnp.float32) + R[i_fcb][...]
        out_ref[...] = logits_t

    out_t = pl.pallas_call(
        kernel,
        out_shape=jax.ShapeDtypeStruct((ncls, n), jnp.float32),
        compiler_params=pltpu.CompilerParams(vmem_limit_bytes=VMEM_LIMIT),
        cost_estimate=pl.CostEstimate(flops=int(flops), transcendentals=0,
                                      bytes_accessed=bytes_accessed),
    )(*args)
    return out_t.T                                                      # (N, ncls)


if __name__ == "__main__":
    key = jax.random.PRNGKey(0)
    pkey, xkey = jax.random.split(key)
    params = init_params(pkey)
    prep = prepare_params(params)
    x = jax.random.normal(xkey, (2, 3, 32, 32), jnp.float32)   # NCHW like PyTorch
    fwd = jax.jit(pruned_resnet_forward)
    out = jax.block_until_ready(fwd(x, prep))
    assert out.shape == (2, 10)
    print("KERNEL_OK")
</pallas_src>

<mosaic_0001>
module attributes {stable_mosaic.version = 11 : i64} {
  func.func @kernel(%arg0: memref<160x512xbf16, #tpu.memory_space<vmem>>, %arg1: memref<16x160xbf16, #tpu.memory_space<vmem>>, %arg2: memref<16x1xf32, #tpu.memory_space<vmem>>, %arg3: memref<9x512x128xbf16, #tpu.memory_space<vmem>>, %arg4: memref<9x128x128xbf16, #tpu.memory_space<vmem>>, %arg5: memref<9x16x16xbf16, #tpu.memory_space<vmem>>, %arg6: memref<16x1xf32, #tpu.memory_space<vmem>>, %arg7: memref<9x16x16xbf16, #tpu.memory_space<vmem>>, %arg8: memref<16x1xf32, #tpu.memory_space<vmem>>, %arg9: memref<16x16xbf16, #tpu.memory_space<vmem>>, %arg10: memref<9x128x32xbf16, #tpu.memory_space<vmem>>, %arg11: memref<9x32x32xbf16, #tpu.memory_space<vmem>>, %arg12: memref<9x32x16xbf16, #tpu.memory_space<vmem>>, %arg13: memref<32x1xf32, #tpu.memory_space<vmem>>, %arg14: memref<9x32x32xbf16, #tpu.memory_space<vmem>>, %arg15: memref<32x1xf32, #tpu.memory_space<vmem>>, %arg16: memref<32x16xbf16, #tpu.memory_space<vmem>>, %arg17: memref<32x1xf32, #tpu.memory_space<vmem>>, %arg18: memref<9x32x8xbf16, #tpu.memory_space<vmem>>, %arg19: memref<9x8x8xbf16, #tpu.memory_space<vmem>>, %arg20: memref<9x64x32xbf16, #tpu.memory_space<vmem>>, %arg21: memref<64x1xf32, #tpu.memory_space<vmem>>, %arg22: memref<9x64x64xbf16, #tpu.memory_space<vmem>>, %arg23: memref<64x1xf32, #tpu.memory_space<vmem>>, %arg24: memref<64x32xbf16, #tpu.memory_space<vmem>>, %arg25: memref<64x1xf32, #tpu.memory_space<vmem>>, %arg26: memref<4x8x2xbf16, #tpu.memory_space<vmem>>, %arg27: memref<1x2x2xbf16, #tpu.memory_space<vmem>>, %arg28: memref<9x128x64xbf16, #tpu.memory_space<vmem>>, %arg29: memref<128x1xf32, #tpu.memory_space<vmem>>, %arg30: memref<9x128x128xbf16, #tpu.memory_space<vmem>>, %arg31: memref<128x1xf32, #tpu.memory_space<vmem>>, %arg32: memref<128x64xbf16, #tpu.memory_space<vmem>>, %arg33: memref<128x1xf32, #tpu.memory_space<vmem>>, %arg34: memref<2x2xbf16, #tpu.memory_space<vmem>>, %arg35: memref<10x128xf32, #tpu.memory_space<vmem>>, %arg36: memref<10x1xf32, #tpu.memory_space<vmem>>, %arg37: memref<10x2xf32, #tpu.memory_space<vmem>>) attributes {dimension_semantics = [], scalar_prefetch = 0 : i64, scratch_operands = 0 : i64, tpu.core_type = #tpu.core_type<tc>} {
    %c0 = arith.constant 0 : index
    %c0_0 = arith.constant 0 : index
    %0 = vector.load %arg1[%c0, %c0_0] : memref<16x160xbf16, #tpu.memory_space<vmem>>, vector<16x160xbf16>
    %c0_1 = arith.constant 0 : index
    %c0_2 = arith.constant 0 : index
    %1 = vector.load %arg0[%c0_1, %c0_2] : memref<160x512xbf16, #tpu.memory_space<vmem>>, vector<160x512xbf16>
    %cst = arith.constant dense<0.000000e+00> : vector<16x512xf32>
    %2 = tpu.matmul %0, %1, %cst {dimension_numbers = #tpu.dot_dimension_numbers<[1], [0], [0], [1], [0, 0, 1, 1], [], []>} : vector<16x160xbf16>, vector<160x512xbf16>, vector<16x512xf32> -> vector<16x512xf32>
    %c0_3 = arith.constant 0 : index
    %c0_4 = arith.constant 0 : index
    %3 = vector.load %arg2[%c0_3, %c0_4] : memref<16x1xf32, #tpu.memory_space<vmem>>, vector<16x1xf32>
    %4 = vector.broadcast %3 : vector<16x1xf32> to vector<16x512xf32>
    %5 = arith.addf %2, %4 : vector<16x512xf32>
    %cst_5 = arith.constant 0.000000e+00 : f32
    %6 = vector.broadcast %cst_5 : f32 to vector<16x512xf32>
    %7 = arith.maximumf %5, %6 : vector<16x512xf32>
    %8 = arith.truncf %7 : vector<16x512xf32> to vector<16x512xbf16>
    %c0_6 = arith.constant 0 : index
    %c0_7 = arith.constant 0 : index
    %c0_8 = arith.constant 0 : index
    %9 = vector.load %arg3[%c0_6, %c0_7, %c0_8] : memref<9x512x128xbf16, #tpu.memory_space<vmem>>, vector<1x512x128xbf16>
    %10 = vector.shape_cast %9 : vector<1x512x128xbf16> to vector<512x128xbf16>
    %cst_9 = arith.constant dense<0.000000e+00> : vector<16x128xf32>
    %11 = tpu.matmul %8, %10, %cst_9 {dimension_numbers = #tpu.dot_dimension_numbers<[1], [0], [0], [1], [0, 0, 1, 1], [], []>} : vector<16x512xbf16>, vector<512x128xbf16>, vector<16x128xf32> -> vector<16x128xf32>
    %c1 = arith.constant 1 : index
    %c0_10 = arith.constant 0 : index
    %c0_11 = arith.constant 0 : index
    %12 = vector.load %arg3[%c1, %c0_10, %c0_11] : memref<9x512x128xbf16, #tpu.memory_space<vmem>>, vector<1x512x128xbf16>
    %13 = vector.shape_cast %12 : vector<1x512x128xbf16> to vector<512x128xbf16>
    %cst_12 = arith.constant dense<0.000000e+00> : vector<16x128xf32>
    %14 = tpu.matmul %8, %13, %cst_12 {dimension_numbers = #tpu.dot_dimension_numbers<[1], [0], [0], [1], [0, 0, 1, 1], [], []>} : vector<16x512xbf16>, vector<512x128xbf16>, vector<16x128xf32> -> vector<16x128xf32>
    %15 = arith.maximumf %11, %14 : vector<16x128xf32>
    %c2 = arith.constant 2 : index
    %c0_13 = arith.constant 0 : index
    %c0_14 = arith.constant 0 : index
    %16 = vector.load %arg3[%c2, %c0_13, %c0_14] : memref<9x512x128xbf16, #tpu.memory_space<vmem>>, vector<1x512x128xbf16>
    %17 = vector.shape_cast %16 : vector<1x512x128xbf16> to vector<512x128xbf16>
    %cst_15 = arith.constant dense<0.000000e+00> : vector<16x128xf32>
    %18 = tpu.matmul %8, %17, %cst_15 {dimension_numbers = #tpu.dot_dimension_numbers<[1], [0], [0], [1], [0, 0, 1, 1], [], []>} : vector<16x512xbf16>, vector<512x128xbf16>, vector<16x128xf32> -> vector<16x128xf32>
    %19 = arith.maximumf %15, %18 : vector<16x128xf32>
    %c3 = arith.constant 3 : index
    %c0_16 = arith.constant 0 : index
    %c0_17 = arith.constant 0 : index
    %20 = vector.load %arg3[%c3, %c0_16, %c0_17] : memref<9x512x128xbf16, #tpu.memory_space<vmem>>, vector<1x512x128xbf16>
    %21 = vector.shape_cast %20 : vector<1x512x128xbf16> to vector<512x128xbf16>
    %cst_18 = arith.constant dense<0.000000e+00> : vector<16x128xf32>
    %22 = tpu.matmul %8, %21, %cst_18 {dimension_numbers = #tpu.dot_dimension_numbers<[1], [0], [0], [1], [0, 0, 1, 1], [], []>} : vector<16x512xbf16>, vector<512x128xbf16>, vector<16x128xf32> -> vector<16x128xf32>
    %23 = arith.maximumf %19, %22 : vector<16x128xf32>
    %c4 = arith.constant 4 : index
    %c0_19 = arith.constant 0 : index
    %c0_20 = arith.constant 0 : index
    %24 = vector.load %arg3[%c4, %c0_19, %c0_20] : memref<9x512x128xbf16, #tpu.memory_space<vmem>>, vector<1x512x128xbf16>
    %25 = vector.shape_cast %24 : vector<1x512x128xbf16> to vector<512x128xbf16>
    %cst_21 = arith.constant dense<0.000000e+00> : vector<16x128xf32>
    %26 = tpu.matmul %8, %25, %cst_21 {dimension_numbers = #tpu.dot_dimension_numbers<[1], [0], [0], [1], [0, 0, 1, 1], [], []>} : vector<16x512xbf16>, vector<512x128xbf16>, vector<16x128xf32> -> vector<16x128xf32>
    %27 = arith.maximumf %23, %26 : vector<16x128xf32>
    %c5 = arith.constant 5 : index
    %c0_22 = arith.constant 0 : index
    %c0_23 = arith.constant 0 : index
    %28 = vector.load %arg3[%c5, %c0_22, %c0_23] : memref<9x512x128xbf16, #tpu.memory_space<vmem>>, vector<1x512x128xbf16>
    %29 = vector.shape_cast %28 : vector<1x512x128xbf16> to vector<512x128xbf16>
    %cst_24 = arith.constant dense<0.000000e+00> : vector<16x128xf32>
    %30 = tpu.matmul %8, %29, %cst_24 {dimension_numbers = #tpu.dot_dimension_numbers<[1], [0], [0], [1], [0, 0, 1, 1], [], []>} : vector<16x512xbf16>, vector<512x128xbf16>, vector<16x128xf32> -> vector<16x128xf32>
    %31 = arith.maximumf %27, %30 : vector<16x128xf32>
    %c6 = arith.constant 6 : index
    %c0_25 = arith.constant 0 : index
    %c0_26 = arith.constant 0 : index
    %32 = vector.load %arg3[%c6, %c0_25, %c0_26] : memref<9x512x128xbf16, #tpu.memory_space<vmem>>, vector<1x512x128xbf16>
    %33 = vector.shape_cast %32 : vector<1x512x128xbf16> to vector<512x128xbf16>
    %cst_27 = arith.constant dense<0.000000e+00> : vector<16x128xf32>
    %34 = tpu.matmul %8, %33, %cst_27 {dimension_numbers = #tpu.dot_dimension_numbers<[1], [0], [0], [1], [0, 0, 1, 1], [], []>} : vector<16x512xbf16>, vector<512x128xbf16>, vector<16x128xf32> -> vector<16x128xf32>
    %35 = arith.maximumf %31, %34 : vector<16x128xf32>
    %c7 = arith.constant 7 : index
    %c0_28 = arith.constant 0 : index
    %c0_29 = arith.constant 0 : index
    %36 = vector.load %arg3[%c7, %c0_28, %c0_29] : memref<9x512x128xbf16, #tpu.memory_space<vmem>>, vector<1x512x128xbf16>
    %37 = vector.shape_cast %36 : vector<1x512x128xbf16> to vector<512x128xbf16>
    %cst_30 = arith.constant dense<0.000000e+00> : vector<16x128xf32>
    %38 = tpu.matmul %8, %37, %cst_30 {dimension_numbers = #tpu.dot_dimension_numbers<[1], [0], [0], [1], [0, 0, 1, 1], [], []>} : vector<16x512xbf16>, vector<512x128xbf16>, vector<16x128xf32> -> vector<16x128xf32>
    %39 = arith.maximumf %35, %38 : vector<16x128xf32>
    %c8 = arith.constant 8 : index
    %c0_31 = arith.constant 0 : index
    %c0_32 = arith.constant 0 : index
    %40 = vector.load %arg3[%c8, %c0_31, %c0_32] : memref<9x512x128xbf16, #tpu.memory_space<vmem>>, vector<1x512x128xbf16>
    %41 = vector.shape_cast %40 : vector<1x512x128xbf16> to vector<512x128xbf16>
    %cst_33 = arith.constant dense<0.000000e+00> : vector<16x128xf32>
    %42 = tpu.matmul %8, %41, %cst_33 {dimension_numbers = #tpu.dot_dimension_numbers<[1], [0], [0], [1], [0, 0, 1, 1], [], []>} : vector<16x512xbf16>, vector<512x128xbf16>, vector<16x128xf32> -> vector<16x128xf32>
    %43 = arith.maximumf %39, %42 : vector<16x128xf32>
    %44 = arith.truncf %43 : vector<16x128xf32> to vector<16x128xbf16>
    %c0_34 = arith.constant 0 : index
    %c0_35 = arith.constant 0 : index
    %45 = vector.load %arg6[%c0_34, %c0_35] : memref<16x1xf32, #tpu.memory_space<vmem>>, vector<16x1xf32>
    %c0_36 = arith.constant 0 : index
    %c0_37 = arith.constant 0 : index
    %c0_38 = arith.constant 0 : index
    %46 = vector.load %arg4[%c0_36, %c0_37, %c0_38] : memref<9x128x128xbf16, #tpu.memory_space<vmem>>, vector<1x128x128xbf16>
    %47 = vector.shape_cast %46 : vector<1x128x128xbf16> to vector<128x128xbf16>
    %cst_39 = arith.constant dense<0.000000e+00> : vector<16x128xf32>
    %48 = tpu.matmul %44, %47, %cst_39 {dimension_numbers = #tpu.dot_dimension_numbers<[1], [0], [0], [1], [0, 0, 1, 1], [], []>} : vector<16x128xbf16>, vector<128x128xbf16>, vector<16x128xf32> -> vector<16x128xf32>
    %49 = arith.truncf %48 : vector<16x128xf32> to vector<16x128xbf16>
    %c0_40 = arith.constant 0 : index
    %c0_41 = arith.constant 0 : index
    %c0_42 = arith.constant 0 : index
    %50 = vector.load %arg5[%c0_40, %c0_41, %c0_42] : memref<9x16x16xbf16, #tpu.memory_space<vmem>>, vector<1x16x16xbf16>
    %51 = vector.shape_cast %50 : vector<1x16x16xbf16> to vector<16x16xbf16>
    %cst_43 = arith.constant dense<0.000000e+00> : vector<16x128xf32>
    %52 = tpu.matmul %51, %49, %cst_43 {dimension_numbers = #tpu.dot_dimension_numbers<[1], [0], [0], [1], [0, 0, 1, 1], [], []>} : vector<16x16xbf16>, vector<16x128xbf16>, vector<16x128xf32> -> vector<16x128xf32>
    %53 = vector.broadcast %45 : vector<16x1xf32> to vector<16x128xf32>
    %54 = arith.addf %53, %52 : vector<16x128xf32>
    %c1_44 = arith.constant 1 : index
    %c0_45 = arith.constant 0 : index
    %c0_46 = arith.constant 0 : index
    %55 = vector.load %arg4[%c1_44, %c0_45, %c0_46] : memref<9x128x128xbf16, #tpu.memory_space<vmem>>, vector<1x128x128xbf16>
    %56 = vector.shape_cast %55 : vector<1x128x128xbf16> to vector<128x128xbf16>
    %cst_47 = arith.constant dense<0.000000e+00> : vector<16x128xf32>
    %57 = tpu.matmul %44, %56, %cst_47 {dimension_numbers = #tpu.dot_dimension_numbers<[1], [0], [0], [1], [0, 0, 1, 1], [], []>} : vector<16x128xbf16>, vector<128x128xbf16>, vector<16x128xf32> -> vector<16x128xf32>
    %58 = arith.truncf %57 : vector<16x128xf32> to vector<16x128xbf16>
    %c1_48 = arith.constant 1 : index
    %c0_49 = arith.constant 0 : index
    %c0_50 = arith.constant 0 : index
    %59 = vector.load %arg5[%c1_48, %c0_49, %c0_50] : memref<9x16x16xbf16, #tpu.memory_space<vmem>>, vector<1x16x16xbf16>
    %60 = vector.shape_cast %59 : vector<1x16x16xbf16> to vector<16x16xbf16>
    %cst_51 = arith.constant dense<0.000000e+00> : vector<16x128xf32>
    %61 = tpu.matmul %60, %58, %cst_51 {dimension_numbers = #tpu.dot_dimension_numbers<[1], [0], [0], [1], [0, 0, 1, 1], [], []>} : vector<16x16xbf16>, vector<16x128xbf16>, vector<16x128xf32> -> vector<16x128xf32>
    %62 = arith.addf %54, %61 : vector<16x128xf32>
    %c2_52 = arith.constant 2 : index
    %c0_53 = arith.constant 0 : index
    %c0_54 = arith.constant 0 : index
    %63 = vector.load %arg4[%c2_52, %c0_53, %c0_54] : memref<9x128x128xbf16, #tpu.memory_space<vmem>>, vector<1x128x128xbf16>
    %64 = vector.shape_cast %63 : vector<1x128x128xbf16> to vector<128x128xbf16>
    %cst_55 = arith.constant dense<0.000000e+00> : vector<16x128xf32>
    %65 = tpu.matmul %44, %64, %cst_55 {dimension_numbers = #tpu.dot_dimension_numbers<[1], [0], [0], [1], [0, 0, 1, 1], [], []>} : vector<16x128xbf16>, vector<128x128xbf16>, vector<16x128xf32> -> vector<16x128xf32>
    %66 = arith.truncf %65 : vector<16x128xf32> to vector<16x128xbf16>
    %c2_56 = arith.constant 2 : index
    %c0_57 = arith.constant 0 : index
    %c0_58 = arith.constant 0 : index
    %67 = vector.load %arg5[%c2_56, %c0_57, %c0_58] : memref<9x16x16xbf16, #tpu.memory_space<vmem>>, vector<1x16x16xbf16>
    %68 = vector.shape_cast %67 : vector<1x16x16xbf16> to vector<16x16xbf16>
    %cst_59 = arith.constant dense<0.000000e+00> : vector<16x128xf32>
    %69 = tpu.matmul %68, %66, %cst_59 {dimension_numbers = #tpu.dot_dimension_numbers<[1], [0], [0], [1], [0, 0, 1, 1], [], []>} : vector<16x16xbf16>, vector<16x128xbf16>, vector<16x128xf32> -> vector<16x128xf32>
    %70 = arith.addf %62, %69 : vector<16x128xf32>
    %c3_60 = arith.constant 3 : index
    %c0_61 = arith.constant 0 : index
    %c0_62 = arith.constant 0 : index
    %71 = vector.load %arg4[%c3_60, %c0_61, %c0_62] : memref<9x128x128xbf16, #tpu.memory_space<vmem>>, vector<1x128x128xbf16>
    %72 = vector.shape_cast %71 : vector<1x128x128xbf16> to vector<128x128xbf16>
    %cst_63 = arith.constant dense<0.000000e+00> : vector<16x128xf32>
    %73 = tpu.matmul %44, %72, %cst_63 {dimension_numbers = #tpu.dot_dimension_numbers<[1], [0], [0], [1], [0, 0, 1, 1], [], []>} : vector<16x128xbf16>, vector<128x128xbf16>, vector<16x128xf32> -> vector<16x128xf32>
    %74 = arith.truncf %73 : vector<16x128xf32> to vector<16x128xbf16>
    %c3_64 = arith.constant 3 : index
    %c0_65 = arith.constant 0 : index
    %c0_66 = arith.constant 0 : index
    %75 = vector.load %arg5[%c3_64, %c0_65, %c0_66] : memref<9x16x16xbf16, #tpu.memory_space<vmem>>, vector<1x16x16xbf16>
    %76 = vector.shape_cast %75 : vector<1x16x16xbf16> to vector<16x16xbf16>
    %cst_67 = arith.constant dense<0.000000e+00> : vector<16x128xf32>
    %77 = tpu.matmul %76, %74, %cst_67 {dimension_numbers = #tpu.dot_dimension_numbers<[1], [0], [0], [1], [0, 0, 1, 1], [], []>} : vector<16x16xbf16>, vector<16x128xbf16>, vector<16x128xf32> -> vector<16x128xf32>
    %78 = arith.addf %70, %77 : vector<16x128xf32>
    %c4_68 = arith.constant 4 : index
    %c0_69 = arith.constant 0 : index
    %c0_70 = arith.constant 0 : index
    %79 = vector.load %arg4[%c4_68, %c0_69, %c0_70] : memref<9x128x128xbf16, #tpu.memory_space<vmem>>, vector<1x128x128xbf16>
    %80 = vector.shape_cast %79 : vector<1x128x128xbf16> to vector<128x128xbf16>
    %cst_71 = arith.constant dense<0.000000e+00> : vector<16x128xf32>
    %81 = tpu.matmul %44, %80, %cst_71 {dimension_numbers = #tpu.dot_dimension_numbers<[1], [0], [0], [1], [0, 0, 1, 1], [], []>} : vector<16x128xbf16>, vector<128x128xbf16>, vector<16x128xf32> -> vector<16x128xf32>
    %82 = arith.truncf %81 : vector<16x128xf32> to vector<16x128xbf16>
    %c4_72 = arith.constant 4 : index
    %c0_73 = arith.constant 0 : index
    %c0_74 = arith.constant 0 : index
    %83 = vector.load %arg5[%c4_72, %c0_73, %c0_74] : memref<9x16x16xbf16, #tpu.memory_space<vmem>>, vector<1x16x16xbf16>
    %84 = vector.shape_cast %83 : vector<1x16x16xbf16> to vector<16x16xbf16>
    %cst_75 = arith.constant dense<0.000000e+00> : vector<16x128xf32>
    %85 = tpu.matmul %84, %82, %cst_75 {dimension_numbers = #tpu.dot_dimension_numbers<[1], [0], [0], [1], [0, 0, 1, 1], [], []>} : vector<16x16xbf16>, vector<16x128xbf16>, vector<16x128xf32> -> vector<16x128xf32>
    %86 = arith.addf %78, %85 : vector<16x128xf32>
    %c5_76 = arith.constant 5 : index
    %c0_77 = arith.constant 0 : index
    %c0_78 = arith.constant 0 : index
    %87 = vector.load %arg4[%c5_76, %c0_77, %c0_78] : memref<9x128x128xbf16, #tpu.memory_space<vmem>>, vector<1x128x128xbf16>
    %88 = vector.shape_cast %87 : vector<1x128x128xbf16> to vector<128x128xbf16>
    %cst_79 = arith.constant dense<0.000000e+00> : vector<16x128xf32>
    %89 = tpu.matmul %44, %88, %cst_79 {dimension_numbers = #tpu.dot_dimension_numbers<[1], [0], [0], [1], [0, 0, 1, 1], [], []>} : vector<16x128xbf16>, vector<128x128xbf16>, vector<16x128xf32> -> vector<16x128xf32>
    %90 = arith.truncf %89 : vector<16x128xf32> to vector<16x128xbf16>
    %c5_80 = arith.constant 5 : index
    %c0_81 = arith.constant 0 : index
    %c0_82 = arith.constant 0 : index
    %91 = vector.load %arg5[%c5_80, %c0_81, %c0_82] : memref<9x16x16xbf16, #tpu.memory_space<vmem>>, vector<1x16x16xbf16>
    %92 = vector.shape_cast %91 : vector<1x16x16xbf16> to vector<16x16xbf16>
    %cst_83 = arith.constant dense<0.000000e+00> : vector<16x128xf32>
    %93 = tpu.matmul %92, %90, %cst_83 {dimension_numbers = #tpu.dot_dimension_numbers<[1], [0], [0], [1], [0, 0, 1, 1], [], []>} : vector<16x16xbf16>, vector<16x128xbf16>, vector<16x128xf32> -> vector<16x128xf32>
    %94 = arith.addf %86, %93 : vector<16x128xf32>
    %c6_84 = arith.constant 6 : index
    %c0_85 = arith.constant 0 : index
    %c0_86 = arith.constant 0 : index
    %95 = vector.load %arg4[%c6_84, %c0_85, %c0_86] : memref<9x128x128xbf16, #tpu.memory_space<vmem>>, vector<1x128x128xbf16>
    %96 = vector.shape_cast %95 : vector<1x128x128xbf16> to vector<128x128xbf16>
    %cst_87 = arith.constant dense<0.000000e+00> : vector<16x128xf32>
    %97 = tpu.matmul %44, %96, %cst_87 {dimension_numbers = #tpu.dot_dimension_numbers<[1], [0], [0], [1], [0, 0, 1, 1], [], []>} : vector<16x128xbf16>, vector<128x128xbf16>, vector<16x128xf32> -> vector<16x128xf32>
    %98 = arith.truncf %97 : vector<16x128xf32> to vector<16x128xbf16>
    %c6_88 = arith.constant 6 : index
    %c0_89 = arith.constant 0 : index
    %c0_90 = arith.constant 0 : index
    %99 = vector.load %arg5[%c6_88, %c0_89, %c0_90] : memref<9x16x16xbf16, #tpu.memory_space<vmem>>, vector<1x16x16xbf16>
    %100 = vector.shape_cast %99 : vector<1x16x16xbf16> to vector<16x16xbf16>
    %cst_91 = arith.constant dense<0.000000e+00> : vector<16x128xf32>
    %101 = tpu.matmul %100, %98, %cst_91 {dimension_numbers = #tpu.dot_dimension_numbers<[1], [0], [0], [1], [0, 0, 1, 1], [], []>} : vector<16x16xbf16>, vector<16x128xbf16>, vector<16x128xf32> -> vector<16x128xf32>
    %102 = arith.addf %94, %101 : vector<16x128xf32>
    %c7_92 = arith.constant 7 : index
    %c0_93 = arith.constant 0 : index
    %c0_94 = arith.constant 0 : index
    %103 = vector.load %arg4[%c7_92, %c0_93, %c0_94] : memref<9x128x128xbf16, #tpu.memory_space<vmem>>, vector<1x128x128xbf16>
    %104 = vector.shape_cast %103 : vector<1x128x128xbf16> to vector<128x128xbf16>
    %cst_95 = arith.constant dense<0.000000e+00> : vector<16x128xf32>
    %105 = tpu.matmul %44, %104, %cst_95 {dimension_numbers = #tpu.dot_dimension_numbers<[1], [0], [0], [1], [0, 0, 1, 1], [], []>} : vector<16x128xbf16>, vector<128x128xbf16>, vector<16x128xf32> -> vector<16x128xf32>
    %106 = arith.truncf %105 : vector<16x128xf32> to vector<16x128xbf16>
    %c7_96 = arith.constant 7 : index
    %c0_97 = arith.constant 0 : index
    %c0_98 = arith.constant 0 : index
    %107 = vector.load %arg5[%c7_96, %c0_97, %c0_98] : memref<9x16x16xbf16, #tpu.memory_space<vmem>>, vector<1x16x16xbf16>
    %108 = vector.shape_cast %107 : vector<1x16x16xbf16> to vector<16x16xbf16>
    %cst_99 = arith.constant dense<0.000000e+00> : vector<16x128xf32>
    %109 = tpu.matmul %108, %106, %cst_99 {dimension_numbers = #tpu.dot_dimension_numbers<[1], [0], [0], [1], [0, 0, 1, 1], [], []>} : vector<16x16xbf16>, vector<16x128xbf16>, vector<16x128xf32> -> vector<16x128xf32>
    %110 = arith.addf %102, %109 : vector<16x128xf32>
    %c8_100 = arith.constant 8 : index
    %c0_101 = arith.constant 0 : index
    %c0_102 = arith.constant 0 : index
    %111 = vector.load %arg4[%c8_100, %c0_101, %c0_102] : memref<9x128x128xbf16, #tpu.memory_space<vmem>>, vector<1x128x128xbf16>
    %112 = vector.shape_cast %111 : vector<1x128x128xbf16> to vector<128x128xbf16>
    %cst_103 = arith.constant dense<0.000000e+00> : vector<16x128xf32>
    %113 = tpu.matmul %44, %112, %cst_103 {dimension_numbers = #tpu.dot_dimension_numbers<[1], [0], [0], [1], [0, 0, 1, 1], [], []>} : vector<16x128xbf16>, vector<128x128xbf16>, vector<16x128xf32> -> vector<16x128xf32>
    %114 = arith.truncf %113 : vector<16x128xf32> to vector<16x128xbf16>
    %c8_104 = arith.constant 8 : index
    %c0_105 = arith.constant 0 : index
    %c0_106 = arith.constant 0 : index
    %115 = vector.load %arg5[%c8_104, %c0_105, %c0_106] : memref<9x16x16xbf16, #tpu.memory_space<vmem>>, vector<1x16x16xbf16>
    %116 = vector.shape_cast %115 : vector<1x16x16xbf16> to vector<16x16xbf16>
    %cst_107 = arith.constant dense<0.000000e+00> : vector<16x128xf32>
    %117 = tpu.matmul %116, %114, %cst_107 {dimension_numbers = #tpu.dot_dimension_numbers<[1], [0], [0], [1], [0, 0, 1, 1], [], []>} : vector<16x16xbf16>, vector<16x128xbf16>, vector<16x128xf32> -> vector<16x128xf32>
    %118 = arith.addf %110, %117 : vector<16x128xf32>
    %cst_108 = arith.constant 0.000000e+00 : f32
    %119 = vector.broadcast %cst_108 : f32 to vector<16x128xf32>
    %120 = arith.maximumf %118, %119 : vector<16x128xf32>
    %121 = arith.truncf %120 : vector<16x128xf32> to vector<16x128xbf16>
    %c0_109 = arith.constant 0 : index
    %c0_110 = arith.constant 0 : index
    %122 = vector.load %arg8[%c0_109, %c0_110] : memref<16x1xf32, #tpu.memory_space<vmem>>, vector<16x1xf32>
    %c0_111 = arith.constant 0 : index
    %c0_112 = arith.constant 0 : index
    %c0_113 = arith.constant 0 : index
    %123 = vector.load %arg4[%c0_111, %c0_112, %c0_113] : memref<9x128x128xbf16, #tpu.memory_space<vmem>>, vector<1x128x128xbf16>
    %124 = vector.shape_cast %123 : vector<1x128x128xbf16> to vector<128x128xbf16>
    %cst_114 = arith.constant dense<0.000000e+00> : vector<16x128xf32>
    %125 = tpu.matmul %121, %124, %cst_114 {dimension_numbers = #tpu.dot_dimension_numbers<[1], [0], [0], [1], [0, 0, 1, 1], [], []>} : vector<16x128xbf16>, vector<128x128xbf16>, vector<16x128xf32> -> vector<16x128xf32>
    %126 = arith.truncf %125 : vector<16x128xf32> to vector<16x128xbf16>
    %c0_115 = arith.constant 0 : index
    %c0_116 = arith.constant 0 : index
    %c0_117 = arith.constant 0 : index
    %127 = vector.load %arg7[%c0_115, %c0_116, %c0_117] : memref<9x16x16xbf16, #tpu.memory_space<vmem>>, vector<1x16x16xbf16>
    %128 = vector.shape_cast %127 : vector<1x16x16xbf16> to vector<16x16xbf16>
    %cst_118 = arith.constant dense<0.000000e+00> : vector<16x128xf32>
    %129 = tpu.matmul %128, %126, %cst_118 {dimension_numbers = #tpu.dot_dimension_numbers<[1], [0], [0], [1], [0, 0, 1, 1], [], []>} : vector<16x16xbf16>, vector<16x128xbf16>, vector<16x128xf32> -> vector<16x128xf32>
    %130 = vector.broadcast %122 : vector<16x1xf32> to vector<16x128xf32>
    %131 = arith.addf %130, %129 : vector<16x128xf32>
    %c1_119 = arith.constant 1 : index
    %c0_120 = arith.constant 0 : index
    %c0_121 = arith.constant 0 : index
    %132 = vector.load %arg4[%c1_119, %c0_120, %c0_121] : memref<9x128x128xbf16, #tpu.memory_space<vmem>>, vector<1x128x128xbf16>
    %133 = vector.shape_cast %132 : vector<1x128x128xbf16> to vector<128x128xbf16>
    %cst_122 = arith.constant dense<0.000000e+00> : vector<16x128xf32>
    %134 = tpu.matmul %121, %133, %cst_122 {dimension_numbers = #tpu.dot_dimension_numbers<[1], [0], [0], [1], [0, 0, 1, 1], [], []>} : vector<16x128xbf16>, vector<128x128xbf16>, vector<16x128xf32> -> vector<16x128xf32>
    %135 = arith.truncf %134 : vector<16x128xf32> to vector<16x128xbf16>
    %c1_123 = arith.constant 1 : index
    %c0_124 = arith.constant 0 : index
    %c0_125 = arith.constant 0 : index
    %136 = vector.load %arg7[%c1_123, %c0_124, %c0_125] : memref<9x16x16xbf16, #tpu.memory_space<vmem>>, vector<1x16x16xbf16>
    %137 = vector.shape_cast %136 : vector<1x16x16xbf16> to vector<16x16xbf16>
    %cst_126 = arith.constant dense<0.000000e+00> : vector<16x128xf32>
    %138 = tpu.matmul %137, %135, %cst_126 {dimension_numbers = #tpu.dot_dimension_numbers<[1], [0], [0], [1], [0, 0, 1, 1], [], []>} : vector<16x16xbf16>, vector<16x128xbf16>, vector<16x128xf32> -> vector<16x128xf32>
    %139 = arith.addf %131, %138 : vector<16x128xf32>
    %c2_127 = arith.constant 2 : index
    %c0_128 = arith.constant 0 : index
    %c0_129 = arith.constant 0 : index
    %140 = vector.load %arg4[%c2_127, %c0_128, %c0_129] : memref<9x128x128xbf16, #tpu.memory_space<vmem>>, vector<1x128x128xbf16>
    %141 = vector.shape_cast %140 : vector<1x128x128xbf16> to vector<128x128xbf16>
    %cst_130 = arith.constant dense<0.000000e+00> : vector<16x128xf32>
    %142 = tpu.matmul %121, %141, %cst_130 {dimension_numbers = #tpu.dot_dimension_numbers<[1], [0], [0], [1], [0, 0, 1, 1], [], []>} : vector<16x128xbf16>, vector<128x128xbf16>, vector<16x128xf32> -> vector<16x128xf32>
    %143 = arith.truncf %142 : vector<16x128xf32> to vector<16x128xbf16>
    %c2_131 = arith.constant 2 : index
    %c0_132 = arith.constant 0 : index
    %c0_133 = arith.constant 0 : index
    %144 = vector.load %arg7[%c2_131, %c0_132, %c0_133] : memref<9x16x16xbf16, #tpu.memory_space<vmem>>, vector<1x16x16xbf16>
    %145 = vector.shape_cast %144 : vector<1x16x16xbf16> to vector<16x16xbf16>
    %cst_134 = arith.constant dense<0.000000e+00> : vector<16x128xf32>
    %146 = tpu.matmul %145, %143, %cst_134 {dimension_numbers = #tpu.dot_dimension_numbers<[1], [0], [0], [1], [0, 0, 1, 1], [], []>} : vector<16x16xbf16>, vector<16x128xbf16>, vector<16x128xf32> -> vector<16x128xf32>
    %147 = arith.addf %139, %146 : vector<16x128xf32>
    %c3_135 = arith.constant 3 : index
    %c0_136 = arith.constant 0 : index
    %c0_137 = arith.constant 0 : index
    %148 = vector.load %arg4[%c3_135, %c0_136, %c0_137] : memref<9x128x128xbf16, #tpu.memory_space<vmem>>, vector<1x128x128xbf16>
    %149 = vector.shape_cast %148 : vector<1x128x128xbf16> to vector<128x128xbf16>
    %cst_138 = arith.constant dense<0.000000e+00> : vector<16x128xf32>
    %150 = tpu.matmul %121, %149, %cst_138 {dimension_numbers = #tpu.dot_dimension_numbers<[1], [0], [0], [1], [0, 0, 1, 1], [], []>} : vector<16x128xbf16>, vector<128x128xbf16>, vector<16x128xf32> -> vector<16x128xf32>
    %151 = arith.truncf %150 : vector<16x128xf32> to vector<16x128xbf16>
    %c3_139 = arith.constant 3 : index
    %c0_140 = arith.constant 0 : index
    %c0_141 = arith.constant 0 : index
    %152 = vector.load %arg7[%c3_139, %c0_140, %c0_141] : memref<9x16x16xbf16, #tpu.memory_space<vmem>>, vector<1x16x16xbf16>
    %153 = vector.shape_cast %152 : vector<1x16x16xbf16> to vector<16x16xbf16>
    %cst_142 = arith.constant dense<0.000000e+00> : vector<16x128xf32>
    %154 = tpu.matmul %153, %151, %cst_142 {dimension_numbers = #tpu.dot_dimension_numbers<[1], [0], [0], [1], [0, 0, 1, 1], [], []>} : vector<16x16xbf16>, vector<16x128xbf16>, vector<16x128xf32> -> vector<16x128xf32>
    %155 = arith.addf %147, %154 : vector<16x128xf32>
    %c4_143 = arith.constant 4 : index
    %c0_144 = arith.constant 0 : index
    %c0_145 = arith.constant 0 : index
    %156 = vector.load %arg4[%c4_143, %c0_144, %c0_145] : memref<9x128x128xbf16, #tpu.memory_space<vmem>>, vector<1x128x128xbf16>
    %157 = vector.shape_cast %156 : vector<1x128x128xbf16> to vector<128x128xbf16>
    %cst_146 = arith.constant dense<0.000000e+00> : vector<16x128xf32>
    %158 = tpu.matmul %121, %157, %cst_146 {dimension_numbers = #tpu.dot_dimension_numbers<[1], [0], [0], [1], [0, 0, 1, 1], [], []>} : vector<16x128xbf16>, vector<128x128xbf16>, vector<16x128xf32> -> vector<16x128xf32>
    %159 = arith.truncf %158 : vector<16x128xf32> to vector<16x128xbf16>
    %c4_147 = arith.constant 4 : index
    %c0_148 = arith.constant 0 : index
    %c0_149 = arith.constant 0 : index
    %160 = vector.load %arg7[%c4_147, %c0_148, %c0_149] : memref<9x16x16xbf16, #tpu.memory_space<vmem>>, vector<1x16x16xbf16>
    %161 = vector.shape_cast %160 : vector<1x16x16xbf16> to vector<16x16xbf16>
    %cst_150 = arith.constant dense<0.000000e+00> : vector<16x128xf32>
    %162 = tpu.matmul %161, %159, %cst_150 {dimension_numbers = #tpu.dot_dimension_numbers<[1], [0], [0], [1], [0, 0, 1, 1], [], []>} : vector<16x16xbf16>, vector<16x128xbf16>, vector<16x128xf32> -> vector<16x128xf32>
    %163 = arith.addf %155, %162 : vector<16x128xf32>
    %c5_151 = arith.constant 5 : index
    %c0_152 = arith.constant 0 : index
    %c0_153 = arith.constant 0 : index
    %164 = vector.load %arg4[%c5_151, %c0_152, %c0_153] : memref<9x128x128xbf16, #tpu.memory_space<vmem>>, vector<1x128x128xbf16>
    %165 = vector.shape_cast %164 : vector<1x128x128xbf16> to vector<128x128xbf16>
    %cst_154 = arith.constant dense<0.000000e+00> : vector<16x128xf32>
    %166 = tpu.matmul %121, %165, %cst_154 {dimension_numbers = #tpu.dot_dimension_numbers<[1], [0], [0], [1], [0, 0, 1, 1], [], []>} : vector<16x128xbf16>, vector<128x128xbf16>, vector<16x128xf32> -> vector<16x128xf32>
    %167 = arith.truncf %166 : vector<16x128xf32> to vector<16x128xbf16>
    %c5_155 = arith.constant 5 : index
    %c0_156 = arith.constant 0 : index
    %c0_157 = arith.constant 0 : index
    %168 = vector.load %arg7[%c5_155, %c0_156, %c0_157] : memref<9x16x16xbf16, #tpu.memory_space<vmem>>, vector<1x16x16xbf16>
    %169 = vector.shape_cast %168 : vector<1x16x16xbf16> to vector<16x16xbf16>
    %cst_158 = arith.constant dense<0.000000e+00> : vector<16x128xf32>
    %170 = tpu.matmul %169, %167, %cst_158 {dimension_numbers = #tpu.dot_dimension_numbers<[1], [0], [0], [1], [0, 0, 1, 1], [], []>} : vector<16x16xbf16>, vector<16x128xbf16>, vector<16x128xf32> -> vector<16x128xf32>
    %171 = arith.addf %163, %170 : vector<16x128xf32>
    %c6_159 = arith.constant 6 : index
    %c0_160 = arith.constant 0 : index
    %c0_161 = arith.constant 0 : index
    %172 = vector.load %arg4[%c6_159, %c0_160, %c0_161] : memref<9x128x128xbf16, #tpu.memory_space<vmem>>, vector<1x128x128xbf16>
    %173 = vector.shape_cast %172 : vector<1x128x128xbf16> to vector<128x128xbf16>
    %cst_162 = arith.constant dense<0.000000e+00> : vector<16x128xf32>
    %174 = tpu.matmul %121, %173, %cst_162 {dimension_numbers = #tpu.dot_dimension_numbers<[1], [0], [0], [1], [0, 0, 1, 1], [], []>} : vector<16x128xbf16>, vector<128x128xbf16>, vector<16x128xf32> -> vector<16x128xf32>
    %175 = arith.truncf %174 : vector<16x128xf32> to vector<16x128xbf16>
    %c6_163 = arith.constant 6 : index
    %c0_164 = arith.constant 0 : index
    %c0_165 = arith.constant 0 : index
    %176 = vector.load %arg7[%c6_163, %c0_164, %c0_165] : memref<9x16x16xbf16, #tpu.memory_space<vmem>>, vector<1x16x16xbf16>
    %177 = vector.shape_cast %176 : vector<1x16x16xbf16> to vector<16x16xbf16>
    %cst_166 = arith.constant dense<0.000000e+00> : vector<16x128xf32>
    %178 = tpu.matmul %177, %175, %cst_166 {dimension_numbers = #tpu.dot_dimension_numbers<[1], [0], [0], [1], [0, 0, 1, 1], [], []>} : vector<16x16xbf16>, vector<16x128xbf16>, vector<16x128xf32> -> vector<16x128xf32>
    %179 = arith.addf %171, %178 : vector<16x128xf32>
    %c7_167 = arith.constant 7 : index
    %c0_168 = arith.constant 0 : index
    %c0_169 = arith.constant 0 : index
    %180 = vector.load %arg4[%c7_167, %c0_168, %c0_169] : memref<9x128x128xbf16, #tpu.memory_space<vmem>>, vector<1x128x128xbf16>
    %181 = vector.shape_cast %180 : vector<1x128x128xbf16> to vector<128x128xbf16>
    %cst_170 = arith.constant dense<0.000000e+00> : vector<16x128xf32>
    %182 = tpu.matmul %121, %181, %cst_170 {dimension_numbers = #tpu.dot_dimension_numbers<[1], [0], [0], [1], [0, 0, 1, 1], [], []>} : vector<16x128xbf16>, vector<128x128xbf16>, vector<16x128xf32> -> vector<16x128xf32>
    %183 = arith.truncf %182 : vector<16x128xf32> to vector<16x128xbf16>
    %c7_171 = arith.constant 7 : index
    %c0_172 = arith.constant 0 : index
    %c0_173 = arith.constant 0 : index
    %184 = vector.load %arg7[%c7_171, %c0_172, %c0_173] : memref<9x16x16xbf16, #tpu.memory_space<vmem>>, vector<1x16x16xbf16>
    %185 = vector.shape_cast %184 : vector<1x16x16xbf16> to vector<16x16xbf16>
    %cst_174 = arith.constant dense<0.000000e+00> : vector<16x128xf32>
    %186 = tpu.matmul %185, %183, %cst_174 {dimension_numbers = #tpu.dot_dimension_numbers<[1], [0], [0], [1], [0, 0, 1, 1], [], []>} : vector<16x16xbf16>, vector<16x128xbf16>, vector<16x128xf32> -> vector<16x128xf32>
    %187 = arith.addf %179, %186 : vector<16x128xf32>
    %c8_175 = arith.constant 8 : index
    %c0_176 = arith.constant 0 : index
    %c0_177 = arith.constant 0 : index
    %188 = vector.load %arg4[%c8_175, %c0_176, %c0_177] : memref<9x128x128xbf16, #tpu.memory_space<vmem>>, vector<1x128x128xbf16>
    %189 = vector.shape_cast %188 : vector<1x128x128xbf16> to vector<128x128xbf16>
    %cst_178 = arith.constant dense<0.000000e+00> : vector<16x128xf32>
    %190 = tpu.matmul %121, %189, %cst_178 {dimension_numbers = #tpu.dot_dimension_numbers<[1], [0], [0], [1], [0, 0, 1, 1], [], []>} : vector<16x128xbf16>, vector<128x128xbf16>, vector<16x128xf32> -> vector<16x128xf32>
    %191 = arith.truncf %190 : vector<16x128xf32> to vector<16x128xbf16>
    %c8_179 = arith.constant 8 : index
    %c0_180 = arith.constant 0 : index
    %c0_181 = arith.constant 0 : index
    %192 = vector.load %arg7[%c8_179, %c0_180, %c0_181] : memref<9x16x16xbf16, #tpu.memory_space<vmem>>, vector<1x16x16xbf16>
    %193 = vector.shape_cast %192 : vector<1x16x16xbf16> to vector<16x16xbf16>
    %cst_182 = arith.constant dense<0.000000e+00> : vector<16x128xf32>
    %194 = tpu.matmul %193, %191, %cst_182 {dimension_numbers = #tpu.dot_dimension_numbers<[1], [0], [0], [1], [0, 0, 1, 1], [], []>} : vector<16x16xbf16>, vector<16x128xbf16>, vector<16x128xf32> -> vector<16x128xf32>
    %195 = arith.addf %187, %194 : vector<16x128xf32>
    %c0_183 = arith.constant 0 : index
    %c0_184 = arith.constant 0 : index
    %196 = vector.load %arg9[%c0_183, %c0_184] : memref<16x16xbf16, #tpu.memory_space<vmem>>, vector<16x16xbf16>
    %cst_185 = arith.constant dense<0.000000e+00> : vector<16x128xf32>
    %197 = tpu.matmul %196, %44, %cst_185 {dimension_numbers = #tpu.dot_dimension_numbers<[1], [0], [0], [1], [0, 0, 1, 1], [], []>} : vector<16x16xbf16>, vector<16x128xbf16>, vector<16x128xf32> -> vector<16x128xf32>
    %198 = arith.addf %195, %197 : vector<16x128xf32>
    %cst_186 = arith.constant 0.000000e+00 : f32
    %199 = vector.broadcast %cst_186 : f32 to vector<16x128xf32>
    %200 = arith.maximumf %198, %199 : vector<16x128xf32>
    %201 = arith.truncf %200 : vector<16x128xf32> to vector<16x128xbf16>
    %c0_187 = arith.constant 0 : index
    %c0_188 = arith.constant 0 : index
    %202 = vector.load %arg13[%c0_187, %c0_188] : memref<32x1xf32, #tpu.memory_space<vmem>>, vector<32x1xf32>
    %c0_189 = arith.constant 0 : index
    %c0_190 = arith.constant 0 : index
    %c0_191 = arith.constant 0 : index
    %203 = vector.load %arg10[%c0_189, %c0_190, %c0_191] : memref<9x128x32xbf16, #tpu.memory_space<vmem>>, vector<1x128x32xbf16>
    %204 = vector.shape_cast %203 : vector<1x128x32xbf16> to vector<128x32xbf16>
    %cst_192 = arith.constant dense<0.000000e+00> : vector<16x32xf32>
    %205 = tpu.matmul %201, %204, %cst_192 {dimension_numbers = #tpu.dot_dimension_numbers<[1], [0], [0], [1], [0, 0, 1, 1], [], []>} : vector<16x128xbf16>, vector<128x32xbf16>, vector<16x32xf32> -> vector<16x32xf32>
    %206 = arith.truncf %205 : vector<16x32xf32> to vector<16x32xbf16>
    %c0_193 = arith.constant 0 : index
    %c0_194 = arith.constant 0 : index
    %c0_195 = arith.constant 0 : index
    %207 = vector.load %arg12[%c0_193, %c0_194, %c0_195] : memref<9x32x16xbf16, #tpu.memory_space<vmem>>, vector<1x32x16xbf16>
    %208 = vector.shape_cast %207 : vector<1x32x16xbf16> to vector<32x16xbf16>
    %cst_196 = arith.constant dense<0.000000e+00> : vector<32x32xf32>
    %209 = tpu.matmul %208, %206, %cst_196 {dimension_numbers = #tpu.dot_dimension_numbers<[1], [0], [0], [1], [0, 0, 1, 1], [], []>} : vector<32x16xbf16>, vector<16x32xbf16>, vector<32x32xf32> -> vector<32x32xf32>
    %210 = vector.broadcast %202 : vector<32x1xf32> to vector<32x32xf32>
    %211 = arith.addf %210, %209 : vector<32x32xf32>
    %c1_197 = arith.constant 1 : index
    %c0_198 = arith.constant 0 : index
    %c0_199 = arith.constant 0 : index
    %212 = vector.load %arg10[%c1_197, %c0_198, %c0_199] : memref<9x128x32xbf16, #tpu.memory_space<vmem>>, vector<1x128x32xbf16>
    %213 = vector.shape_cast %212 : vector<1x128x32xbf16> to vector<128x32xbf16>
    %cst_200 = arith.constant dense<0.000000e+00> : vector<16x32xf32>
    %214 = tpu.matmul %201, %213, %cst_200 {dimension_numbers = #tpu.dot_dimension_numbers<[1], [0], [0], [1], [0, 0, 1, 1], [], []>} : vector<16x128xbf16>, vector<128x32xbf16>, vector<16x32xf32> -> vector<16x32xf32>
    %215 = arith.truncf %214 : vector<16x32xf32> to vector<16x32xbf16>
    %c1_201 = arith.constant 1 : index
    %c0_202 = arith.constant 0 : index
    %c0_203 = arith.constant 0 : index
    %216 = vector.load %arg12[%c1_201, %c0_202, %c0_203] : memref<9x32x16xbf16, #tpu.memory_space<vmem>>, vector<1x32x16xbf16>
    %217 = vector.shape_cast %216 : vector<1x32x16xbf16> to vector<32x16xbf16>
    %cst_204 = arith.constant dense<0.000000e+00> : vector<32x32xf32>
    %218 = tpu.matmul %217, %215, %cst_204 {dimension_numbers = #tpu.dot_dimension_numbers<[1], [0], [0], [1], [0, 0, 1, 1], [], []>} : vector<32x16xbf16>, vector<16x32xbf16>, vector<32x32xf32> -> vector<32x32xf32>
    %219 = arith.addf %211, %218 : vector<32x32xf32>
    %c2_205 = arith.constant 2 : index
    %c0_206 = arith.constant 0 : index
    %c0_207 = arith.constant 0 : index
    %220 = vector.load %arg10[%c2_205, %c0_206, %c0_207] : memref<9x128x32xbf16, #tpu.memory_space<vmem>>, vector<1x128x32xbf16>
    %221 = vector.shape_cast %220 : vector<1x128x32xbf16> to vector<128x32xbf16>
    %cst_208 = arith.constant dense<0.000000e+00> : vector<16x32xf32>
    %222 = tpu.matmul %201, %221, %cst_208 {dimension_numbers = #tpu.dot_dimension_numbers<[1], [0], [0], [1], [0, 0, 1, 1], [], []>} : vector<16x128xbf16>, vector<128x32xbf16>, vector<16x32xf32> -> vector<16x32xf32>
    %223 = arith.truncf %222 : vector<16x32xf32> to vector<16x32xbf16>
    %c2_209 = arith.constant 2 : index
    %c0_210 = arith.constant 0 : index
    %c0_211 = arith.constant 0 : index
    %224 = vector.load %arg12[%c2_209, %c0_210, %c0_211] : memref<9x32x16xbf16, #tpu.memory_space<vmem>>, vector<1x32x16xbf16>
    %225 = vector.shape_cast %224 : vector<1x32x16xbf16> to vector<32x16xbf16>
    %cst_212 = arith.constant dense<0.000000e+00> : vector<32x32xf32>
    %226 = tpu.matmul %225, %223, %cst_212 {dimension_numbers = #tpu.dot_dimension_numbers<[1], [0], [0], [1], [0, 0, 1, 1], [], []>} : vector<32x16xbf16>, vector<16x32xbf16>, vector<32x32xf32> -> vector<32x32xf32>
    %227 = arith.addf %219, %226 : vector<32x32xf32>
    %c3_213 = arith.constant 3 : index
    %c0_214 = arith.constant 0 : index
    %c0_215 = arith.constant 0 : index
    %228 = vector.load %arg10[%c3_213, %c0_214, %c0_215] : memref<9x128x32xbf16, #tpu.memory_space<vmem>>, vector<1x128x32xbf16>
    %229 = vector.shape_cast %228 : vector<1x128x32xbf16> to vector<128x32xbf16>
    %cst_216 = arith.constant dense<0.000000e+00> : vector<16x32xf32>
    %230 = tpu.matmul %201, %229, %cst_216 {dimension_numbers = #tpu.dot_dimension_numbers<[1], [0], [0], [1], [0, 0, 1, 1], [], []>} : vector<16x128xbf16>, vector<128x32xbf16>, vector<16x32xf32> -> vector<16x32xf32>
    %231 = arith.truncf %230 : vector<16x32xf32> to vector<16x32xbf16>
    %c3_217 = arith.constant 3 : index
    %c0_218 = arith.constant 0 : index
    %c0_219 = arith.constant 0 : index
    %232 = vector.load %arg12[%c3_217, %c0_218, %c0_219] : memref<9x32x16xbf16, #tpu.memory_space<vmem>>, vector<1x32x16xbf16>
    %233 = vector.shape_cast %232 : vector<1x32x16xbf16> to vector<32x16xbf16>
    %cst_220 = arith.constant dense<0.000000e+00> : vector<32x32xf32>
    %234 = tpu.matmul %233, %231, %cst_220 {dimension_numbers = #tpu.dot_dimension_numbers<[1], [0], [0], [1], [0, 0, 1, 1], [], []>} : vector<32x16xbf16>, vector<16x32xbf16>, vector<32x32xf32> -> vector<32x32xf32>
    %235 = arith.addf %227, %234 : vector<32x32xf32>
    %c4_221 = arith.constant 4 : index
    %c0_222 = arith.constant 0 : index
    %c0_223 = arith.constant 0 : index
    %236 = vector.load %arg10[%c4_221, %c0_222, %c0_223] : memref<9x128x32xbf16, #tpu.memory_space<vmem>>, vector<1x128x32xbf16>
    %237 = vector.shape_cast %236 : vector<1x128x32xbf16> to vector<128x32xbf16>
    %cst_224 = arith.constant dense<0.000000e+00> : vector<16x32xf32>
    %238 = tpu.matmul %201, %237, %cst_224 {dimension_numbers = #tpu.dot_dimension_numbers<[1], [0], [0], [1], [0, 0, 1, 1], [], []>} : vector<16x128xbf16>, vector<128x32xbf16>, vector<16x32xf32> -> vector<16x32xf32>
    %239 = arith.truncf %238 : vector<16x32xf32> to vector<16x32xbf16>
    %c4_225 = arith.constant 4 : index
    %c0_226 = arith.constant 0 : index
    %c0_227 = arith.constant 0 : index
    %240 = vector.load %arg12[%c4_225, %c0_226, %c0_227] : memref<9x32x16xbf16, #tpu.memory_space<vmem>>, vector<1x32x16xbf16>
    %241 = vector.shape_cast %240 : vector<1x32x16xbf16> to vector<32x16xbf16>
    %cst_228 = arith.constant dense<0.000000e+00> : vector<32x32xf32>
    %242 = tpu.matmul %241, %239, %cst_228 {dimension_numbers = #tpu.dot_dimension_numbers<[1], [0], [0], [1], [0, 0, 1, 1], [], []>} : vector<32x16xbf16>, vector<16x32xbf16>, vector<32x32xf32> -> vector<32x32xf32>
    %243 = arith.addf %235, %242 : vector<32x32xf32>
    %c5_229 = arith.constant 5 : index
    %c0_230 = arith.constant 0 : index
    %c0_231 = arith.constant 0 : index
    %244 = vector.load %arg10[%c5_229, %c0_230, %c0_231] : memref<9x128x32xbf16, #tpu.memory_space<vmem>>, vector<1x128x32xbf16>
    %245 = vector.shape_cast %244 : vector<1x128x32xbf16> to vector<128x32xbf16>
    %cst_232 = arith.constant dense<0.000000e+00> : vector<16x32xf32>
    %246 = tpu.matmul %201, %245, %cst_232 {dimension_numbers = #tpu.dot_dimension_numbers<[1], [0], [0], [1], [0, 0, 1, 1], [], []>} : vector<16x128xbf16>, vector<128x32xbf16>, vector<16x32xf32> -> vector<16x32xf32>
    %247 = arith.truncf %246 : vector<16x32xf32> to vector<16x32xbf16>
    %c5_233 = arith.constant 5 : index
    %c0_234 = arith.constant 0 : index
    %c0_235 = arith.constant 0 : index
    %248 = vector.load %arg12[%c5_233, %c0_234, %c0_235] : memref<9x32x16xbf16, #tpu.memory_space<vmem>>, vector<1x32x16xbf16>
    %249 = vector.shape_cast %248 : vector<1x32x16xbf16> to vector<32x16xbf16>
    %cst_236 = arith.constant dense<0.000000e+00> : vector<32x32xf32>
    %250 = tpu.matmul %249, %247, %cst_236 {dimension_numbers = #tpu.dot_dimension_numbers<[1], [0], [0], [1], [0, 0, 1, 1], [], []>} : vector<32x16xbf16>, vector<16x32xbf16>, vector<32x32xf32> -> vector<32x32xf32>
    %251 = arith.addf %243, %250 : vector<32x32xf32>
    %c6_237 = arith.constant 6 : index
    %c0_238 = arith.constant 0 : index
    %c0_239 = arith.constant 0 : index
    %252 = vector.load %arg10[%c6_237, %c0_238, %c0_239] : memref<9x128x32xbf16, #tpu.memory_space<vmem>>, vector<1x128x32xbf16>
    %253 = vector.shape_cast %252 : vector<1x128x32xbf16> to vector<128x32xbf16>
    %cst_240 = arith.constant dense<0.000000e+00> : vector<16x32xf32>
    %254 = tpu.matmul %201, %253, %cst_240 {dimension_numbers = #tpu.dot_dimension_numbers<[1], [0], [0], [1], [0, 0, 1, 1], [], []>} : vector<16x128xbf16>, vector<128x32xbf16>, vector<16x32xf32> -> vector<16x32xf32>
    %255 = arith.truncf %254 : vector<16x32xf32> to vector<16x32xbf16>
    %c6_241 = arith.constant 6 : index
    %c0_242 = arith.constant 0 : index
    %c0_243 = arith.constant 0 : index
    %256 = vector.load %arg12[%c6_241, %c0_242, %c0_243] : memref<9x32x16xbf16, #tpu.memory_space<vmem>>, vector<1x32x16xbf16>
    %257 = vector.shape_cast %256 : vector<1x32x16xbf16> to vector<32x16xbf16>
    %cst_244 = arith.constant dense<0.000000e+00> : vector<32x32xf32>
    %258 = tpu.matmul %257, %255, %cst_244 {dimension_numbers = #tpu.dot_dimension_numbers<[1], [0], [0], [1], [0, 0, 1, 1], [], []>} : vector<32x16xbf16>, vector<16x32xbf16>, vector<32x32xf32> -> vector<32x32xf32>
    %259 = arith.addf %251, %258 : vector<32x32xf32>
    %c7_245 = arith.constant 7 : index
    %c0_246 = arith.constant 0 : index
    %c0_247 = arith.constant 0 : index
    %260 = vector.load %arg10[%c7_245, %c0_246, %c0_247] : memref<9x128x32xbf16, #tpu.memory_space<vmem>>, vector<1x128x32xbf16>
    %261 = vector.shape_cast %260 : vector<1x128x32xbf16> to vector<128x32xbf16>
    %cst_248 = arith.constant dense<0.000000e+00> : vector<16x32xf32>
    %262 = tpu.matmul %201, %261, %cst_248 {dimension_numbers = #tpu.dot_dimension_numbers<[1], [0], [0], [1], [0, 0, 1, 1], [], []>} : vector<16x128xbf16>, vector<128x32xbf16>, vector<16x32xf32> -> vector<16x32xf32>
    %263 = arith.truncf %262 : vector<16x32xf32> to vector<16x32xbf16>
    %c7_249 = arith.constant 7 : index
    %c0_250 = arith.constant 0 : index
    %c0_251 = arith.constant 0 : index
    %264 = vector.load %arg12[%c7_249, %c0_250, %c0_251] : memref<9x32x16xbf16, #tpu.memory_space<vmem>>, vector<1x32x16xbf16>
    %265 = vector.shape_cast %264 : vector<1x32x16xbf16> to vector<32x16xbf16>
    %cst_252 = arith.constant dense<0.000000e+00> : vector<32x32xf32>
    %266 = tpu.matmul %265, %263, %cst_252 {dimension_numbers = #tpu.dot_dimension_numbers<[1], [0], [0], [1], [0, 0, 1, 1], [], []>} : vector<32x16xbf16>, vector<16x32xbf16>, vector<32x32xf32> -> vector<32x32xf32>
    %267 = arith.addf %259, %266 : vector<32x32xf32>
    %c8_253 = arith.constant 8 : index
    %c0_254 = arith.constant 0 : index
    %c0_255 = arith.constant 0 : index
    %268 = vector.load %arg10[%c8_253, %c0_254, %c0_255] : memref<9x128x32xbf16, #tpu.memory_space<vmem>>, vector<1x128x32xbf16>
    %269 = vector.shape_cast %268 : vector<1x128x32xbf16> to vector<128x32xbf16>
    %cst_256 = arith.constant dense<0.000000e+00> : vector<16x32xf32>
    %270 = tpu.matmul %201, %269, %cst_256 {dimension_numbers = #tpu.dot_dimension_numbers<[1], [0], [0], [1], [0, 0, 1, 1], [], []>} : vector<16x128xbf16>, vector<128x32xbf16>, vector<16x32xf32> -> vector<16x32xf32>
    %271 = arith.truncf %270 : vector<16x32xf32> to vector<16x32xbf16>
    %c8_257 = arith.constant 8 : index
    %c0_258 = arith.constant 0 : index
    %c0_259 = arith.constant 0 : index
    %272 = vector.load %arg12[%c8_257, %c0_258, %c0_259] : memref<9x32x16xbf16, #tpu.memory_space<vmem>>, vector<1x32x16xbf16>
    %273 = vector.shape_cast %272 : vector<1x32x16xbf16> to vector<32x16xbf16>
    %cst_260 = arith.constant dense<0.000000e+00> : vector<32x32xf32>
    %274 = tpu.matmul %273, %271, %cst_260 {dimension_numbers = #tpu.dot_dimension_numbers<[1], [0], [0], [1], [0, 0, 1, 1], [], []>} : vector<32x16xbf16>, vector<16x32xbf16>, vector<32x32xf32> -> vector<32x32xf32>
    %275 = arith.addf %267, %274 : vector<32x32xf32>
    %cst_261 = arith.constant 0.000000e+00 : f32
    %276 = vector.broadcast %cst_261 : f32 to vector<32x32xf32>
    %277 = arith.maximumf %275, %276 : vector<32x32xf32>
    %278 = arith.truncf %277 : vector<32x32xf32> to vector<32x32xbf16>
    %c0_262 = arith.constant 0 : index
    %c0_263 = arith.constant 0 : index
    %279 = vector.load %arg15[%c0_262, %c0_263] : memref<32x1xf32, #tpu.memory_space<vmem>>, vector<32x1xf32>
    %c0_264 = arith.constant 0 : index
    %c0_265 = arith.constant 0 : index
    %c0_266 = arith.constant 0 : index
    %280 = vector.load %arg11[%c0_264, %c0_265, %c0_266] : memref<9x32x32xbf16, #tpu.memory_space<vmem>>, vector<1x32x32xbf16>
    %281 = vector.shape_cast %280 : vector<1x32x32xbf16> to vector<32x32xbf16>
    %cst_267 = arith.constant dense<0.000000e+00> : vector<32x32xf32>
    %282 = tpu.matmul %278, %281, %cst_267 {dimension_numbers = #tpu.dot_dimension_numbers<[1], [0], [0], [1], [0, 0, 1, 1], [], []>} : vector<32x32xbf16>, vector<32x32xbf16>, vector<32x32xf32> -> vector<32x32xf32>
    %283 = arith.truncf %282 : vector<32x32xf32> to vector<32x32xbf16>
    %c0_268 = arith.constant 0 : index
    %c0_269 = arith.constant 0 : index
    %c0_270 = arith.constant 0 : index
    %284 = vector.load %arg14[%c0_268, %c0_269, %c0_270] : memref<9x32x32xbf16, #tpu.memory_space<vmem>>, vector<1x32x32xbf16>
    %285 = vector.shape_cast %284 : vector<1x32x32xbf16> to vector<32x32xbf16>
    %cst_271 = arith.constant dense<0.000000e+00> : vector<32x32xf32>
    %286 = tpu.matmul %285, %283, %cst_271 {dimension_numbers = #tpu.dot_dimension_numbers<[1], [0], [0], [1], [0, 0, 1, 1], [], []>} : vector<32x32xbf16>, vector<32x32xbf16>, vector<32x32xf32> -> vector<32x32xf32>
    %287 = vector.broadcast %279 : vector<32x1xf32> to vector<32x32xf32>
    %288 = arith.addf %287, %286 : vector<32x32xf32>
    %c1_272 = arith.constant 1 : index
    %c0_273 = arith.constant 0 : index
    %c0_274 = arith.constant 0 : index
    %289 = vector.load %arg11[%c1_272, %c0_273, %c0_274] : memref<9x32x32xbf16, #tpu.memory_space<vmem>>, vector<1x32x32xbf16>
    %290 = vector.shape_cast %289 : vector<1x32x32xbf16> to vector<32x32xbf16>
    %cst_275 = arith.constant dense<0.000000e+00> : vector<32x32xf32>
    %291 = tpu.matmul %278, %290, %cst_275 {dimension_numbers = #tpu.dot_dimension_numbers<[1], [0], [0], [1], [0, 0, 1, 1], [], []>} : vector<32x32xbf16>, vector<32x32xbf16>, vector<32x32xf32> -> vector<32x32xf32>
    %292 = arith.truncf %291 : vector<32x32xf32> to vector<32x32xbf16>
    %c1_276 = arith.constant 1 : index
    %c0_277 = arith.constant 0 : index
    %c0_278 = arith.constant 0 : index
    %293 = vector.load %arg14[%c1_276, %c0_277, %c0_278] : memref<9x32x32xbf16, #tpu.memory_space<vmem>>, vector<1x32x32xbf16>
    %294 = vector.shape_cast %293 : vector<1x32x32xbf16> to vector<32x32xbf16>
    %cst_279 = arith.constant dense<0.000000e+00> : vector<32x32xf32>
    %295 = tpu.matmul %294, %292, %cst_279 {dimension_numbers = #tpu.dot_dimension_numbers<[1], [0], [0], [1], [0, 0, 1, 1], [], []>} : vector<32x32xbf16>, vector<32x32xbf16>, vector<32x32xf32> -> vector<32x32xf32>
    %296 = arith.addf %288, %295 : vector<32x32xf32>
    %c2_280 = arith.constant 2 : index
    %c0_281 = arith.constant 0 : index
    %c0_282 = arith.constant 0 : index
    %297 = vector.load %arg11[%c2_280, %c0_281, %c0_282] : memref<9x32x32xbf16, #tpu.memory_space<vmem>>, vector<1x32x32xbf16>
    %298 = vector.shape_cast %297 : vector<1x32x32xbf16> to vector<32x32xbf16>
    %cst_283 = arith.constant dense<0.000000e+00> : vector<32x32xf32>
    %299 = tpu.matmul %278, %298, %cst_283 {dimension_numbers = #tpu.dot_dimension_numbers<[1], [0], [0], [1], [0, 0, 1, 1], [], []>} : vector<32x32xbf16>, vector<32x32xbf16>, vector<32x32xf32> -> vector<32x32xf32>
    %300 = arith.truncf %299 : vector<32x32xf32> to vector<32x32xbf16>
    %c2_284 = arith.constant 2 : index
    %c0_285 = arith.constant 0 : index
    %c0_286 = arith.constant 0 : index
    %301 = vector.load %arg14[%c2_284, %c0_285, %c0_286] : memref<9x32x32xbf16, #tpu.memory_space<vmem>>, vector<1x32x32xbf16>
    %302 = vector.shape_cast %301 : vector<1x32x32xbf16> to vector<32x32xbf16>
    %cst_287 = arith.constant dense<0.000000e+00> : vector<32x32xf32>
    %303 = tpu.matmul %302, %300, %cst_287 {dimension_numbers = #tpu.dot_dimension_numbers<[1], [0], [0], [1], [0, 0, 1, 1], [], []>} : vector<32x32xbf16>, vector<32x32xbf16>, vector<32x32xf32> -> vector<32x32xf32>
    %304 = arith.addf %296, %303 : vector<32x32xf32>
    %c3_288 = arith.constant 3 : index
    %c0_289 = arith.constant 0 : index
    %c0_290 = arith.constant 0 : index
    %305 = vector.load %arg11[%c3_288, %c0_289, %c0_290] : memref<9x32x32xbf16, #tpu.memory_space<vmem>>, vector<1x32x32xbf16>
    %306 = vector.shape_cast %305 : vector<1x32x32xbf16> to vector<32x32xbf16>
    %cst_291 = arith.constant dense<0.000000e+00> : vector<32x32xf32>
    %307 = tpu.matmul %278, %306, %cst_291 {dimension_numbers = #tpu.dot_dimension_numbers<[1], [0], [0], [1], [0, 0, 1, 1], [], []>} : vector<32x32xbf16>, vector<32x32xbf16>, vector<32x32xf32> -> vector<32x32xf32>
    %308 = arith.truncf %307 : vector<32x32xf32> to vector<32x32xbf16>
    %c3_292 = arith.constant 3 : index
    %c0_293 = arith.constant 0 : index
    %c0_294 = arith.constant 0 : index
    %309 = vector.load %arg14[%c3_292, %c0_293, %c0_294] : memref<9x32x32xbf16, #tpu.memory_space<vmem>>, vector<1x32x32xbf16>
    %310 = vector.shape_cast %309 : vector<1x32x32xbf16> to vector<32x32xbf16>
    %cst_295 = arith.constant dense<0.000000e+00> : vector<32x32xf32>
    %311 = tpu.matmul %310, %308, %cst_295 {dimension_numbers = #tpu.dot_dimension_numbers<[1], [0], [0], [1], [0, 0, 1, 1], [], []>} : vector<32x32xbf16>, vector<32x32xbf16>, vector<32x32xf32> -> vector<32x32xf32>
    %312 = arith.addf %304, %311 : vector<32x32xf32>
    %c4_296 = arith.constant 4 : index
    %c0_297 = arith.constant 0 : index
    %c0_298 = arith.constant 0 : index
    %313 = vector.load %arg11[%c4_296, %c0_297, %c0_298] : memref<9x32x32xbf16, #tpu.memory_space<vmem>>, vector<1x32x32xbf16>
    %314 = vector.shape_cast %313 : vector<1x32x32xbf16> to vector<32x32xbf16>
    %cst_299 = arith.constant dense<0.000000e+00> : vector<32x32xf32>
    %315 = tpu.matmul %278, %314, %cst_299 {dimension_numbers = #tpu.dot_dimension_numbers<[1], [0], [0], [1], [0, 0, 1, 1], [], []>} : vector<32x32xbf16>, vector<32x32xbf16>, vector<32x32xf32> -> vector<32x32xf32>
    %316 = arith.truncf %315 : vector<32x32xf32> to vector<32x32xbf16>
    %c4_300 = arith.constant 4 : index
    %c0_301 = arith.constant 0 : index
    %c0_302 = arith.constant 0 : index
    %317 = vector.load %arg14[%c4_300, %c0_301, %c0_302] : memref<9x32x32xbf16, #tpu.memory_space<vmem>>, vector<1x32x32xbf16>
    %318 = vector.shape_cast %317 : vector<1x32x32xbf16> to vector<32x32xbf16>
    %cst_303 = arith.constant dense<0.000000e+00> : vector<32x32xf32>
    %319 = tpu.matmul %318, %316, %cst_303 {dimension_numbers = #tpu.dot_dimension_numbers<[1], [0], [0], [1], [0, 0, 1, 1], [], []>} : vector<32x32xbf16>, vector<32x32xbf16>, vector<32x32xf32> -> vector<32x32xf32>
    %320 = arith.addf %312, %319 : vector<32x32xf32>
    %c5_304 = arith.constant 5 : index
    %c0_305 = arith.constant 0 : index
    %c0_306 = arith.constant 0 : index
    %321 = vector.load %arg11[%c5_304, %c0_305, %c0_306] : memref<9x32x32xbf16, #tpu.memory_space<vmem>>, vector<1x32x32xbf16>
    %322 = vector.shape_cast %321 : vector<1x32x32xbf16> to vector<32x32xbf16>
    %cst_307 = arith.constant dense<0.000000e+00> : vector<32x32xf32>
    %323 = tpu.matmul %278, %322, %cst_307 {dimension_numbers = #tpu.dot_dimension_numbers<[1], [0], [0], [1], [0, 0, 1, 1], [], []>} : vector<32x32xbf16>, vector<32x32xbf16>, vector<32x32xf32> -> vector<32x32xf32>
    %324 = arith.truncf %323 : vector<32x32xf32> to vector<32x32xbf16>
    %c5_308 = arith.constant 5 : index
    %c0_309 = arith.constant 0 : index
    %c0_310 = arith.constant 0 : index
    %325 = vector.load %arg14[%c5_308, %c0_309, %c0_310] : memref<9x32x32xbf16, #tpu.memory_space<vmem>>, vector<1x32x32xbf16>
    %326 = vector.shape_cast %325 : vector<1x32x32xbf16> to vector<32x32xbf16>
    %cst_311 = arith.constant dense<0.000000e+00> : vector<32x32xf32>
    %327 = tpu.matmul %326, %324, %cst_311 {dimension_numbers = #tpu.dot_dimension_numbers<[1], [0], [0], [1], [0, 0, 1, 1], [], []>} : vector<32x32xbf16>, vector<32x32xbf16>, vector<32x32xf32> -> vector<32x32xf32>
    %328 = arith.addf %320, %327 : vector<32x32xf32>
    %c6_312 = arith.constant 6 : index
    %c0_313 = arith.constant 0 : index
    %c0_314 = arith.constant 0 : index
    %329 = vector.load %arg11[%c6_312, %c0_313, %c0_314] : memref<9x32x32xbf16, #tpu.memory_space<vmem>>, vector<1x32x32xbf16>
    %330 = vector.shape_cast %329 : vector<1x32x32xbf16> to vector<32x32xbf16>
    %cst_315 = arith.constant dense<0.000000e+00> : vector<32x32xf32>
    %331 = tpu.matmul %278, %330, %cst_315 {dimension_numbers = #tpu.dot_dimension_numbers<[1], [0], [0], [1], [0, 0, 1, 1], [], []>} : vector<32x32xbf16>, vector<32x32xbf16>, vector<32x32xf32> -> vector<32x32xf32>
    %332 = arith.truncf %331 : vector<32x32xf32> to vector<32x32xbf16>
    %c6_316 = arith.constant 6 : index
    %c0_317 = arith.constant 0 : index
    %c0_318 = arith.constant 0 : index
    %333 = vector.load %arg14[%c6_316, %c0_317, %c0_318] : memref<9x32x32xbf16, #tpu.memory_space<vmem>>, vector<1x32x32xbf16>
    %334 = vector.shape_cast %333 : vector<1x32x32xbf16> to vector<32x32xbf16>
    %cst_319 = arith.constant dense<0.000000e+00> : vector<32x32xf32>
    %335 = tpu.matmul %334, %332, %cst_319 {dimension_numbers = #tpu.dot_dimension_numbers<[1], [0], [0], [1], [0, 0, 1, 1], [], []>} : vector<32x32xbf16>, vector<32x32xbf16>, vector<32x32xf32> -> vector<32x32xf32>
    %336 = arith.addf %328, %335 : vector<32x32xf32>
    %c7_320 = arith.constant 7 : index
    %c0_321 = arith.constant 0 : index
    %c0_322 = arith.constant 0 : index
    %337 = vector.load %arg11[%c7_320, %c0_321, %c0_322] : memref<9x32x32xbf16, #tpu.memory_space<vmem>>, vector<1x32x32xbf16>
    %338 = vector.shape_cast %337 : vector<1x32x32xbf16> to vector<32x32xbf16>
    %cst_323 = arith.constant dense<0.000000e+00> : vector<32x32xf32>
    %339 = tpu.matmul %278, %338, %cst_323 {dimension_numbers = #tpu.dot_dimension_numbers<[1], [0], [0], [1], [0, 0, 1, 1], [], []>} : vector<32x32xbf16>, vector<32x32xbf16>, vector<32x32xf32> -> vector<32x32xf32>
    %340 = arith.truncf %339 : vector<32x32xf32> to vector<32x32xbf16>
    %c7_324 = arith.constant 7 : index
    %c0_325 = arith.constant 0 : index
    %c0_326 = arith.constant 0 : index
    %341 = vector.load %arg14[%c7_324, %c0_325, %c0_326] : memref<9x32x32xbf16, #tpu.memory_space<vmem>>, vector<1x32x32xbf16>
    %342 = vector.shape_cast %341 : vector<1x32x32xbf16> to vector<32x32xbf16>
    %cst_327 = arith.constant dense<0.000000e+00> : vector<32x32xf32>
    %343 = tpu.matmul %342, %340, %cst_327 {dimension_numbers = #tpu.dot_dimension_numbers<[1], [0], [0], [1], [0, 0, 1, 1], [], []>} : vector<32x32xbf16>, vector<32x32xbf16>, vector<32x32xf32> -> vector<32x32xf32>
    %344 = arith.addf %336, %343 : vector<32x32xf32>
    %c8_328 = arith.constant 8 : index
    %c0_329 = arith.constant 0 : index
    %c0_330 = arith.constant 0 : index
    %345 = vector.load %arg11[%c8_328, %c0_329, %c0_330] : memref<9x32x32xbf16, #tpu.memory_space<vmem>>, vector<1x32x32xbf16>
    %346 = vector.shape_cast %345 : vector<1x32x32xbf16> to vector<32x32xbf16>
    %cst_331 = arith.constant dense<0.000000e+00> : vector<32x32xf32>
    %347 = tpu.matmul %278, %346, %cst_331 {dimension_numbers = #tpu.dot_dimension_numbers<[1], [0], [0], [1], [0, 0, 1, 1], [], []>} : vector<32x32xbf16>, vector<32x32xbf16>, vector<32x32xf32> -> vector<32x32xf32>
    %348 = arith.truncf %347 : vector<32x32xf32> to vector<32x32xbf16>
    %c8_332 = arith.constant 8 : index
    %c0_333 = arith.constant 0 : index
    %c0_334 = arith.constant 0 : index
    %349 = vector.load %arg14[%c8_332, %c0_333, %c0_334] : memref<9x32x32xbf16, #tpu.memory_space<vmem>>, vector<1x32x32xbf16>
    %350 = vector.shape_cast %349 : vector<1x32x32xbf16> to vector<32x32xbf16>
    %cst_335 = arith.constant dense<0.000000e+00> : vector<32x32xf32>
    %351 = tpu.matmul %350, %348, %cst_335 {dimension_numbers = #tpu.dot_dimension_numbers<[1], [0], [0], [1], [0, 0, 1, 1], [], []>} : vector<32x32xbf16>, vector<32x32xbf16>, vector<32x32xf32> -> vector<32x32xf32>
    %352 = arith.addf %344, %351 : vector<32x32xf32>
    %c0_336 = arith.constant 0 : index
    %c0_337 = arith.constant 0 : index
    %353 = vector.load %arg16[%c0_336, %c0_337] : memref<32x16xbf16, #tpu.memory_space<vmem>>, vector<32x16xbf16>
    %cst_338 = arith.constant dense<0.000000e+00> : vector<32x32xf32>
    %354 = tpu.matmul %353, %239, %cst_338 {dimension_numbers = #tpu.dot_dimension_numbers<[1], [0], [0], [1], [0, 0, 1, 1], [], []>} : vector<32x16xbf16>, vector<16x32xbf16>, vector<32x32xf32> -> vector<32x32xf32>
    %c0_339 = arith.constant 0 : index
    %c0_340 = arith.constant 0 : index
    %355 = vector.load %arg17[%c0_339, %c0_340] : memref<32x1xf32, #tpu.memory_space<vmem>>, vector<32x1xf32>
    %356 = vector.broadcast %355 : vector<32x1xf32> to vector<32x32xf32>
    %357 = arith.addf %354, %356 : vector<32x32xf32>
    %358 = arith.addf %352, %357 : vector<32x32xf32>
    %cst_341 = arith.constant 0.000000e+00 : f32
    %359 = vector.broadcast %cst_341 : f32 to vector<32x32xf32>
    %360 = arith.maximumf %358, %359 : vector<32x32xf32>
    %361 = arith.truncf %360 : vector<32x32xf32> to vector<32x32xbf16>
    %c0_342 = arith.constant 0 : index
    %c0_343 = arith.constant 0 : index
    %362 = vector.load %arg21[%c0_342, %c0_343] : memref<64x1xf32, #tpu.memory_space<vmem>>, vector<64x1xf32>
    %c0_344 = arith.constant 0 : index
    %c0_345 = arith.constant 0 : index
    %c0_346 = arith.constant 0 : index
    %363 = vector.load %arg18[%c0_344, %c0_345, %c0_346] : memref<9x32x8xbf16, #tpu.memory_space<vmem>>, vector<1x32x8xbf16>
    %364 = vector.shape_cast %363 : vector<1x32x8xbf16> to vector<32x8xbf16>
    %cst_347 = arith.constant dense<0.000000e+00> : vector<32x8xf32>
    %365 = tpu.matmul %361, %364, %cst_347 {dimension_numbers = #tpu.dot_dimension_numbers<[1], [0], [0], [1], [0, 0, 1, 1], [], []>} : vector<32x32xbf16>, vector<32x8xbf16>, vector<32x8xf32> -> vector<32x8xf32>
    %366 = arith.truncf %365 : vector<32x8xf32> to vector<32x8xbf16>
    %c0_348 = arith.constant 0 : index
    %c0_349 = arith.constant 0 : index
    %c0_350 = arith.constant 0 : index
    %367 = vector.load %arg20[%c0_348, %c0_349, %c0_350] : memref<9x64x32xbf16, #tpu.memory_space<vmem>>, vector<1x64x32xbf16>
    %368 = vector.shape_cast %367 : vector<1x64x32xbf16> to vector<64x32xbf16>
    %cst_351 = arith.constant dense<0.000000e+00> : vector<64x8xf32>
    %369 = tpu.matmul %368, %366, %cst_351 {dimension_numbers = #tpu.dot_dimension_numbers<[1], [0], [0], [1], [0, 0, 1, 1], [], []>} : vector<64x32xbf16>, vector<32x8xbf16>, vector<64x8xf32> -> vector<64x8xf32>
    %370 = vector.broadcast %362 : vector<64x1xf32> to vector<64x8xf32>
    %371 = arith.addf %370, %369 : vector<64x8xf32>
    %c1_352 = arith.constant 1 : index
    %c0_353 = arith.constant 0 : index
    %c0_354 = arith.constant 0 : index
    %372 = vector.load %arg18[%c1_352, %c0_353, %c0_354] : memref<9x32x8xbf16, #tpu.memory_space<vmem>>, vector<1x32x8xbf16>
    %373 = vector.shape_cast %372 : vector<1x32x8xbf16> to vector<32x8xbf16>
    %cst_355 = arith.constant dense<0.000000e+00> : vector<32x8xf32>
    %374 = tpu.matmul %361, %373, %cst_355 {dimension_numbers = #tpu.dot_dimension_numbers<[1], [0], [0], [1], [0, 0, 1, 1], [], []>} : vector<32x32xbf16>, vector<32x8xbf16>, vector<32x8xf32> -> vector<32x8xf32>
    %375 = arith.truncf %374 : vector<32x8xf32> to vector<32x8xbf16>
    %c1_356 = arith.constant 1 : index
    %c0_357 = arith.constant 0 : index
    %c0_358 = arith.constant 0 : index
    %376 = vector.load %arg20[%c1_356, %c0_357, %c0_358] : memref<9x64x32xbf16, #tpu.memory_space<vmem>>, vector<1x64x32xbf16>
    %377 = vector.shape_cast %376 : vector<1x64x32xbf16> to vector<64x32xbf16>
    %cst_359 = arith.constant dense<0.000000e+00> : vector<64x8xf32>
    %378 = tpu.matmul %377, %375, %cst_359 {dimension_numbers = #tpu.dot_dimension_numbers<[1], [0], [0], [1], [0, 0, 1, 1], [], []>} : vector<64x32xbf16>, vector<32x8xbf16>, vector<64x8xf32> -> vector<64x8xf32>
    %379 = arith.addf %371, %378 : vector<64x8xf32>
    %c2_360 = arith.constant 2 : index
    %c0_361 = arith.constant 0 : index
    %c0_362 = arith.constant 0 : index
    %380 = vector.load %arg18[%c2_360, %c0_361, %c0_362] : memref<9x32x8xbf16, #tpu.memory_space<vmem>>, vector<1x32x8xbf16>
    %381 = vector.shape_cast %380 : vector<1x32x8xbf16> to vector<32x8xbf16>
    %cst_363 = arith.constant dense<0.000000e+00> : vector<32x8xf32>
    %382 = tpu.matmul %361, %381, %cst_363 {dimension_numbers = #tpu.dot_dimension_numbers<[1], [0], [0], [1], [0, 0, 1, 1], [], []>} : vector<32x32xbf16>, vector<32x8xbf16>, vector<32x8xf32> -> vector<32x8xf32>
    %383 = arith.truncf %382 : vector<32x8xf32> to vector<32x8xbf16>
    %c2_364 = arith.constant 2 : index
    %c0_365 = arith.constant 0 : index
    %c0_366 = arith.constant 0 : index
    %384 = vector.load %arg20[%c2_364, %c0_365, %c0_366] : memref<9x64x32xbf16, #tpu.memory_space<vmem>>, vector<1x64x32xbf16>
    %385 = vector.shape_cast %384 : vector<1x64x32xbf16> to vector<64x32xbf16>
    %cst_367 = arith.constant dense<0.000000e+00> : vector<64x8xf32>
    %386 = tpu.matmul %385, %383, %cst_367 {dimension_numbers = #tpu.dot_dimension_numbers<[1], [0], [0], [1], [0, 0, 1, 1], [], []>} : vector<64x32xbf16>, vector<32x8xbf16>, vector<64x8xf32> -> vector<64x8xf32>
    %387 = arith.addf %379, %386 : vector<64x8xf32>
    %c3_368 = arith.constant 3 : index
    %c0_369 = arith.constant 0 : index
    %c0_370 = arith.constant 0 : index
    %388 = vector.load %arg18[%c3_368, %c0_369, %c0_370] : memref<9x32x8xbf16, #tpu.memory_space<vmem>>, vector<1x32x8xbf16>
    %389 = vector.shape_cast %388 : vector<1x32x8xbf16> to vector<32x8xbf16>
    %cst_371 = arith.constant dense<0.000000e+00> : vector<32x8xf32>
    %390 = tpu.matmul %361, %389, %cst_371 {dimension_numbers = #tpu.dot_dimension_numbers<[1], [0], [0], [1], [0, 0, 1, 1], [], []>} : vector<32x32xbf16>, vector<32x8xbf16>, vector<32x8xf32> -> vector<32x8xf32>
    %391 = arith.truncf %390 : vector<32x8xf32> to vector<32x8xbf16>
    %c3_372 = arith.constant 3 : index
    %c0_373 = arith.constant 0 : index
    %c0_374 = arith.constant 0 : index
    %392 = vector.load %arg20[%c3_372, %c0_373, %c0_374] : memref<9x64x32xbf16, #tpu.memory_space<vmem>>, vector<1x64x32xbf16>
    %393 = vector.shape_cast %392 : vector<1x64x32xbf16> to vector<64x32xbf16>
    %cst_375 = arith.constant dense<0.000000e+00> : vector<64x8xf32>
    %394 = tpu.matmul %393, %391, %cst_375 {dimension_numbers = #tpu.dot_dimension_numbers<[1], [0], [0], [1], [0, 0, 1, 1], [], []>} : vector<64x32xbf16>, vector<32x8xbf16>, vector<64x8xf32> -> vector<64x8xf32>
    %395 = arith.addf %387, %394 : vector<64x8xf32>
    %c4_376 = arith.constant 4 : index
    %c0_377 = arith.constant 0 : index
    %c0_378 = arith.constant 0 : index
    %396 = vector.load %arg18[%c4_376, %c0_377, %c0_378] : memref<9x32x8xbf16, #tpu.memory_space<vmem>>, vector<1x32x8xbf16>
    %397 = vector.shape_cast %396 : vector<1x32x8xbf16> to vector<32x8xbf16>
    %cst_379 = arith.constant dense<0.000000e+00> : vector<32x8xf32>
    %398 = tpu.matmul %361, %397, %cst_379 {dimension_numbers = #tpu.dot_dimension_numbers<[1], [0], [0], [1], [0, 0, 1, 1], [], []>} : vector<32x32xbf16>, vector<32x8xbf16>, vector<32x8xf32> -> vector<32x8xf32>
    %399 = arith.truncf %398 : vector<32x8xf32> to vector<32x8xbf16>
    %c4_380 = arith.constant 4 : index
    %c0_381 = arith.constant 0 : index
    %c0_382 = arith.constant 0 : index
    %400 = vector.load %arg20[%c4_380, %c0_381, %c0_382] : memref<9x64x32xbf16, #tpu.memory_space<vmem>>, vector<1x64x32xbf16>
    %401 = vector.shape_cast %400 : vector<1x64x32xbf16> to vector<64x32xbf16>
    %cst_383 = arith.constant dense<0.000000e+00> : vector<64x8xf32>
    %402 = tpu.matmul %401, %399, %cst_383 {dimension_numbers = #tpu.dot_dimension_numbers<[1], [0], [0], [1], [0, 0, 1, 1], [], []>} : vector<64x32xbf16>, vector<32x8xbf16>, vector<64x8xf32> -> vector<64x8xf32>
    %403 = arith.addf %395, %402 : vector<64x8xf32>
    %c5_384 = arith.constant 5 : index
    %c0_385 = arith.constant 0 : index
    %c0_386 = arith.constant 0 : index
    %404 = vector.load %arg18[%c5_384, %c0_385, %c0_386] : memref<9x32x8xbf16, #tpu.memory_space<vmem>>, vector<1x32x8xbf16>
    %405 = vector.shape_cast %404 : vector<1x32x8xbf16> to vector<32x8xbf16>
    %cst_387 = arith.constant dense<0.000000e+00> : vector<32x8xf32>
    %406 = tpu.matmul %361, %405, %cst_387 {dimension_numbers = #tpu.dot_dimension_numbers<[1], [0], [0], [1], [0, 0, 1, 1], [], []>} : vector<32x32xbf16>, vector<32x8xbf16>, vector<32x8xf32> -> vector<32x8xf32>
    %407 = arith.truncf %406 : vector<32x8xf32> to vector<32x8xbf16>
    %c5_388 = arith.constant 5 : index
    %c0_389 = arith.constant 0 : index
    %c0_390 = arith.constant 0 : index
    %408 = vector.load %arg20[%c5_388, %c0_389, %c0_390] : memref<9x64x32xbf16, #tpu.memory_space<vmem>>, vector<1x64x32xbf16>
    %409 = vector.shape_cast %408 : vector<1x64x32xbf16> to vector<64x32xbf16>
    %cst_391 = arith.constant dense<0.000000e+00> : vector<64x8xf32>
    %410 = tpu.matmul %409, %407, %cst_391 {dimension_numbers = #tpu.dot_dimension_numbers<[1], [0], [0], [1], [0, 0, 1, 1], [], []>} : vector<64x32xbf16>, vector<32x8xbf16>, vector<64x8xf32> -> vector<64x8xf32>
    %411 = arith.addf %403, %410 : vector<64x8xf32>
    %c6_392 = arith.constant 6 : index
    %c0_393 = arith.constant 0 : index
    %c0_394 = arith.constant 0 : index
    %412 = vector.load %arg18[%c6_392, %c0_393, %c0_394] : memref<9x32x8xbf16, #tpu.memory_space<vmem>>, vector<1x32x8xbf16>
    %413 = vector.shape_cast %412 : vector<1x32x8xbf16> to vector<32x8xbf16>
    %cst_395 = arith.constant dense<0.000000e+00> : vector<32x8xf32>
    %414 = tpu.matmul %361, %413, %cst_395 {dimension_numbers = #tpu.dot_dimension_numbers<[1], [0], [0], [1], [0, 0, 1, 1], [], []>} : vector<32x32xbf16>, vector<32x8xbf16>, vector<32x8xf32> -> vector<32x8xf32>
    %415 = arith.truncf %414 : vector<32x8xf32> to vector<32x8xbf16>
    %c6_396 = arith.constant 6 : index
    %c0_397 = arith.constant 0 : index
    %c0_398 = arith.constant 0 : index
    %416 = vector.load %arg20[%c6_396, %c0_397, %c0_398] : memref<9x64x32xbf16, #tpu.memory_space<vmem>>, vector<1x64x32xbf16>
    %417 = vector.shape_cast %416 : vector<1x64x32xbf16> to vector<64x32xbf16>
    %cst_399 = arith.constant dense<0.000000e+00> : vector<64x8xf32>
    %418 = tpu.matmul %417, %415, %cst_399 {dimension_numbers = #tpu.dot_dimension_numbers<[1], [0], [0], [1], [0, 0, 1, 1], [], []>} : vector<64x32xbf16>, vector<32x8xbf16>, vector<64x8xf32> -> vector<64x8xf32>
    %419 = arith.addf %411, %418 : vector<64x8xf32>
    %c7_400 = arith.constant 7 : index
    %c0_401 = arith.constant 0 : index
    %c0_402 = arith.constant 0 : index
    %420 = vector.load %arg18[%c7_400, %c0_401, %c0_402] : memref<9x32x8xbf16, #tpu.memory_space<vmem>>, vector<1x32x8xbf16>
    %421 = vector.shape_cast %420 : vector<1x32x8xbf16> to vector<32x8xbf16>
    %cst_403 = arith.constant dense<0.000000e+00> : vector<32x8xf32>
    %422 = tpu.matmul %361, %421, %cst_403 {dimension_numbers = #tpu.dot_dimension_numbers<[1], [0], [0], [1], [0, 0, 1, 1], [], []>} : vector<32x32xbf16>, vector<32x8xbf16>, vector<32x8xf32> -> vector<32x8xf32>
    %423 = arith.truncf %422 : vector<32x8xf32> to vector<32x8xbf16>
    %c7_404 = arith.constant 7 : index
    %c0_405 = arith.constant 0 : index
    %c0_406 = arith.constant 0 : index
    %424 = vector.load %arg20[%c7_404, %c0_405, %c0_406] : memref<9x64x32xbf16, #tpu.memory_space<vmem>>, vector<1x64x32xbf16>
    %425 = vector.shape_cast %424 : vector<1x64x32xbf16> to vector<64x32xbf16>
    %cst_407 = arith.constant dense<0.000000e+00> : vector<64x8xf32>
    %426 = tpu.matmul %425, %423, %cst_407 {dimension_numbers = #tpu.dot_dimension_numbers<[1], [0], [0], [1], [0, 0, 1, 1], [], []>} : vector<64x32xbf16>, vector<32x8xbf16>, vector<64x8xf32> -> vector<64x8xf32>
    %427 = arith.addf %419, %426 : vector<64x8xf32>
    %c8_408 = arith.constant 8 : index
    %c0_409 = arith.constant 0 : index
    %c0_410 = arith.constant 0 : index
    %428 = vector.load %arg18[%c8_408, %c0_409, %c0_410] : memref<9x32x8xbf16, #tpu.memory_space<vmem>>, vector<1x32x8xbf16>
    %429 = vector.shape_cast %428 : vector<1x32x8xbf16> to vector<32x8xbf16>
    %cst_411 = arith.constant dense<0.000000e+00> : vector<32x8xf32>
    %430 = tpu.matmul %361, %429, %cst_411 {dimension_numbers = #tpu.dot_dimension_numbers<[1], [0], [0], [1], [0, 0, 1, 1], [], []>} : vector<32x32xbf16>, vector<32x8xbf16>, vector<32x8xf32> -> vector<32x8xf32>
    %431 = arith.truncf %430 : vector<32x8xf32> to vector<32x8xbf16>
    %c8_412 = arith.constant 8 : index
    %c0_413 = arith.constant 0 : index
    %c0_414 = arith.constant 0 : index
    %432 = vector.load %arg20[%c8_412, %c0_413, %c0_414] : memref<9x64x32xbf16, #tpu.memory_space<vmem>>, vector<1x64x32xbf16>
    %433 = vector.shape_cast %432 : vector<1x64x32xbf16> to vector<64x32xbf16>
    %cst_415 = arith.constant dense<0.000000e+00> : vector<64x8xf32>
    %434 = tpu.matmul %433, %431, %cst_415 {dimension_numbers = #tpu.dot_dimension_numbers<[1], [0], [0], [1], [0, 0, 1, 1], [], []>} : vector<64x32xbf16>, vector<32x8xbf16>, vector<64x8xf32> -> vector<64x8xf32>
    %435 = arith.addf %427, %434 : vector<64x8xf32>
    %cst_416 = arith.constant 0.000000e+00 : f32
    %436 = vector.broadcast %cst_416 : f32 to vector<64x8xf32>
    %437 = arith.maximumf %435, %436 : vector<64x8xf32>
    %438 = arith.truncf %437 : vector<64x8xf32> to vector<64x8xbf16>
    %c0_417 = arith.constant 0 : index
    %c0_418 = arith.constant 0 : index
    %439 = vector.load %arg23[%c0_417, %c0_418] : memref<64x1xf32, #tpu.memory_space<vmem>>, vector<64x1xf32>
    %c0_419 = arith.constant 0 : index
    %c0_420 = arith.constant 0 : index
    %c0_421 = arith.constant 0 : index
    %440 = vector.load %arg19[%c0_419, %c0_420, %c0_421] : memref<9x8x8xbf16, #tpu.memory_space<vmem>>, vector<1x8x8xbf16>
    %441 = vector.shape_cast %440 : vector<1x8x8xbf16> to vector<8x8xbf16>
    %cst_422 = arith.constant dense<0.000000e+00> : vector<64x8xf32>
    %442 = tpu.matmul %438, %441, %cst_422 {dimension_numbers = #tpu.dot_dimension_numbers<[1], [0], [0], [1], [0, 0, 1, 1], [], []>} : vector<64x8xbf16>, vector<8x8xbf16>, vector<64x8xf32> -> vector<64x8xf32>
    %443 = arith.truncf %442 : vector<64x8xf32> to vector<64x8xbf16>
    %c0_423 = arith.constant 0 : index
    %c0_424 = arith.constant 0 : index
    %c0_425 = arith.constant 0 : index
    %444 = vector.load %arg22[%c0_423, %c0_424, %c0_425] : memref<9x64x64xbf16, #tpu.memory_space<vmem>>, vector<1x64x64xbf16>
    %445 = vector.shape_cast %444 : vector<1x64x64xbf16> to vector<64x64xbf16>
    %cst_426 = arith.constant dense<0.000000e+00> : vector<64x8xf32>
    %446 = tpu.matmul %445, %443, %cst_426 {dimension_numbers = #tpu.dot_dimension_numbers<[1], [0], [0], [1], [0, 0, 1, 1], [], []>} : vector<64x64xbf16>, vector<64x8xbf16>, vector<64x8xf32> -> vector<64x8xf32>
    %447 = vector.broadcast %439 : vector<64x1xf32> to vector<64x8xf32>
    %448 = arith.addf %447, %446 : vector<64x8xf32>
    %c1_427 = arith.constant 1 : index
    %c0_428 = arith.constant 0 : index
    %c0_429 = arith.constant 0 : index
    %449 = vector.load %arg19[%c1_427, %c0_428, %c0_429] : memref<9x8x8xbf16, #tpu.memory_space<vmem>>, vector<1x8x8xbf16>
    %450 = vector.shape_cast %449 : vector<1x8x8xbf16> to vector<8x8xbf16>
    %cst_430 = arith.constant dense<0.000000e+00> : vector<64x8xf32>
    %451 = tpu.matmul %438, %450, %cst_430 {dimension_numbers = #tpu.dot_dimension_numbers<[1], [0], [0], [1], [0, 0, 1, 1], [], []>} : vector<64x8xbf16>, vector<8x8xbf16>, vector<64x8xf32> -> vector<64x8xf32>
    %452 = arith.truncf %451 : vector<64x8xf32> to vector<64x8xbf16>
    %c1_431 = arith.constant 1 : index
    %c0_432 = arith.constant 0 : index
    %c0_433 = arith.constant 0 : index
    %453 = vector.load %arg22[%c1_431, %c0_432, %c0_433] : memref<9x64x64xbf16, #tpu.memory_space<vmem>>, vector<1x64x64xbf16>
    %454 = vector.shape_cast %453 : vector<1x64x64xbf16> to vector<64x64xbf16>
    %cst_434 = arith.constant dense<0.000000e+00> : vector<64x8xf32>
    %455 = tpu.matmul %454, %452, %cst_434 {dimension_numbers = #tpu.dot_dimension_numbers<[1], [0], [0], [1], [0, 0, 1, 1], [], []>} : vector<64x64xbf16>, vector<64x8xbf16>, vector<64x8xf32> -> vector<64x8xf32>
    %456 = arith.addf %448, %455 : vector<64x8xf32>
    %c2_435 = arith.constant 2 : index
    %c0_436 = arith.constant 0 : index
    %c0_437 = arith.constant 0 : index
    %457 = vector.load %arg19[%c2_435, %c0_436, %c0_437] : memref<9x8x8xbf16, #tpu.memory_space<vmem>>, vector<1x8x8xbf16>
    %458 = vector.shape_cast %457 : vector<1x8x8xbf16> to vector<8x8xbf16>
    %cst_438 = arith.constant dense<0.000000e+00> : vector<64x8xf32>
    %459 = tpu.matmul %438, %458, %cst_438 {dimension_numbers = #tpu.dot_dimension_numbers<[1], [0], [0], [1], [0, 0, 1, 1], [], []>} : vector<64x8xbf16>, vector<8x8xbf16>, vector<64x8xf32> -> vector<64x8xf32>
    %460 = arith.truncf %459 : vector<64x8xf32> to vector<64x8xbf16>
    %c2_439 = arith.constant 2 : index
    %c0_440 = arith.constant 0 : index
    %c0_441 = arith.constant 0 : index
    %461 = vector.load %arg22[%c2_439, %c0_440, %c0_441] : memref<9x64x64xbf16, #tpu.memory_space<vmem>>, vector<1x64x64xbf16>
    %462 = vector.shape_cast %461 : vector<1x64x64xbf16> to vector<64x64xbf16>
    %cst_442 = arith.constant dense<0.000000e+00> : vector<64x8xf32>
    %463 = tpu.matmul %462, %460, %cst_442 {dimension_numbers = #tpu.dot_dimension_numbers<[1], [0], [0], [1], [0, 0, 1, 1], [], []>} : vector<64x64xbf16>, vector<64x8xbf16>, vector<64x8xf32> -> vector<64x8xf32>
    %464 = arith.addf %456, %463 : vector<64x8xf32>
    %c3_443 = arith.constant 3 : index
    %c0_444 = arith.constant 0 : index
    %c0_445 = arith.constant 0 : index
    %465 = vector.load %arg19[%c3_443, %c0_444, %c0_445] : memref<9x8x8xbf16, #tpu.memory_space<vmem>>, vector<1x8x8xbf16>
    %466 = vector.shape_cast %465 : vector<1x8x8xbf16> to vector<8x8xbf16>
    %cst_446 = arith.constant dense<0.000000e+00> : vector<64x8xf32>
    %467 = tpu.matmul %438, %466, %cst_446 {dimension_numbers = #tpu.dot_dimension_numbers<[1], [0], [0], [1], [0, 0, 1, 1], [], []>} : vector<64x8xbf16>, vector<8x8xbf16>, vector<64x8xf32> -> vector<64x8xf32>
    %468 = arith.truncf %467 : vector<64x8xf32> to vector<64x8xbf16>
    %c3_447 = arith.constant 3 : index
    %c0_448 = arith.constant 0 : index
    %c0_449 = arith.constant 0 : index
    %469 = vector.load %arg22[%c3_447, %c0_448, %c0_449] : memref<9x64x64xbf16, #tpu.memory_space<vmem>>, vector<1x64x64xbf16>
    %470 = vector.shape_cast %469 : vector<1x64x64xbf16> to vector<64x64xbf16>
    %cst_450 = arith.constant dense<0.000000e+00> : vector<64x8xf32>
    %471 = tpu.matmul %470, %468, %cst_450 {dimension_numbers = #tpu.dot_dimension_numbers<[1], [0], [0], [1], [0, 0, 1, 1], [], []>} : vector<64x64xbf16>, vector<64x8xbf16>, vector<64x8xf32> -> vector<64x8xf32>
    %472 = arith.addf %464, %471 : vector<64x8xf32>
    %c4_451 = arith.constant 4 : index
    %c0_452 = arith.constant 0 : index
    %c0_453 = arith.constant 0 : index
    %473 = vector.load %arg19[%c4_451, %c0_452, %c0_453] : memref<9x8x8xbf16, #tpu.memory_space<vmem>>, vector<1x8x8xbf16>
    %474 = vector.shape_cast %473 : vector<1x8x8xbf16> to vector<8x8xbf16>
    %cst_454 = arith.constant dense<0.000000e+00> : vector<64x8xf32>
    %475 = tpu.matmul %438, %474, %cst_454 {dimension_numbers = #tpu.dot_dimension_numbers<[1], [0], [0], [1], [0, 0, 1, 1], [], []>} : vector<64x8xbf16>, vector<8x8xbf16>, vector<64x8xf32> -> vector<64x8xf32>
    %476 = arith.truncf %475 : vector<64x8xf32> to vector<64x8xbf16>
    %c4_455 = arith.constant 4 : index
    %c0_456 = arith.constant 0 : index
    %c0_457 = arith.constant 0 : index
    %477 = vector.load %arg22[%c4_455, %c0_456, %c0_457] : memref<9x64x64xbf16, #tpu.memory_space<vmem>>, vector<1x64x64xbf16>
    %478 = vector.shape_cast %477 : vector<1x64x64xbf16> to vector<64x64xbf16>
    %cst_458 = arith.constant dense<0.000000e+00> : vector<64x8xf32>
    %479 = tpu.matmul %478, %476, %cst_458 {dimension_numbers = #tpu.dot_dimension_numbers<[1], [0], [0], [1], [0, 0, 1, 1], [], []>} : vector<64x64xbf16>, vector<64x8xbf16>, vector<64x8xf32> -> vector<64x8xf32>
    %480 = arith.addf %472, %479 : vector<64x8xf32>
    %c5_459 = arith.constant 5 : index
    %c0_460 = arith.constant 0 : index
    %c0_461 = arith.constant 0 : index
    %481 = vector.load %arg19[%c5_459, %c0_460, %c0_461] : memref<9x8x8xbf16, #tpu.memory_space<vmem>>, vector<1x8x8xbf16>
    %482 = vector.shape_cast %481 : vector<1x8x8xbf16> to vector<8x8xbf16>
    %cst_462 = arith.constant dense<0.000000e+00> : vector<64x8xf32>
    %483 = tpu.matmul %438, %482, %cst_462 {dimension_numbers = #tpu.dot_dimension_numbers<[1], [0], [0], [1], [0, 0, 1, 1], [], []>} : vector<64x8xbf16>, vector<8x8xbf16>, vector<64x8xf32> -> vector<64x8xf32>
    %484 = arith.truncf %483 : vector<64x8xf32> to vector<64x8xbf16>
    %c5_463 = arith.constant 5 : index
    %c0_464 = arith.constant 0 : index
    %c0_465 = arith.constant 0 : index
    %485 = vector.load %arg22[%c5_463, %c0_464, %c0_465] : memref<9x64x64xbf16, #tpu.memory_space<vmem>>, vector<1x64x64xbf16>
    %486 = vector.shape_cast %485 : vector<1x64x64xbf16> to vector<64x64xbf16>
    %cst_466 = arith.constant dense<0.000000e+00> : vector<64x8xf32>
    %487 = tpu.matmul %486, %484, %cst_466 {dimension_numbers = #tpu.dot_dimension_numbers<[1], [0], [0], [1], [0, 0, 1, 1], [], []>} : vector<64x64xbf16>, vector<64x8xbf16>, vector<64x8xf32> -> vector<64x8xf32>
    %488 = arith.addf %480, %487 : vector<64x8xf32>
    %c6_467 = arith.constant 6 : index
    %c0_468 = arith.constant 0 : index
    %c0_469 = arith.constant 0 : index
    %489 = vector.load %arg19[%c6_467, %c0_468, %c0_469] : memref<9x8x8xbf16, #tpu.memory_space<vmem>>, vector<1x8x8xbf16>
    %490 = vector.shape_cast %489 : vector<1x8x8xbf16> to vector<8x8xbf16>
    %cst_470 = arith.constant dense<0.000000e+00> : vector<64x8xf32>
    %491 = tpu.matmul %438, %490, %cst_470 {dimension_numbers = #tpu.dot_dimension_numbers<[1], [0], [0], [1], [0, 0, 1, 1], [], []>} : vector<64x8xbf16>, vector<8x8xbf16>, vector<64x8xf32> -> vector<64x8xf32>
    %492 = arith.truncf %491 : vector<64x8xf32> to vector<64x8xbf16>
    %c6_471 = arith.constant 6 : index
    %c0_472 = arith.constant 0 : index
    %c0_473 = arith.constant 0 : index
    %493 = vector.load %arg22[%c6_471, %c0_472, %c0_473] : memref<9x64x64xbf16, #tpu.memory_space<vmem>>, vector<1x64x64xbf16>
    %494 = vector.shape_cast %493 : vector<1x64x64xbf16> to vector<64x64xbf16>
    %cst_474 = arith.constant dense<0.000000e+00> : vector<64x8xf32>
    %495 = tpu.matmul %494, %492, %cst_474 {dimension_numbers = #tpu.dot_dimension_numbers<[1], [0], [0], [1], [0, 0, 1, 1], [], []>} : vector<64x64xbf16>, vector<64x8xbf16>, vector<64x8xf32> -> vector<64x8xf32>
    %496 = arith.addf %488, %495 : vector<64x8xf32>
    %c7_475 = arith.constant 7 : index
    %c0_476 = arith.constant 0 : index
    %c0_477 = arith.constant 0 : index
    %497 = vector.load %arg19[%c7_475, %c0_476, %c0_477] : memref<9x8x8xbf16, #tpu.memory_space<vmem>>, vector<1x8x8xbf16>
    %498 = vector.shape_cast %497 : vector<1x8x8xbf16> to vector<8x8xbf16>
    %cst_478 = arith.constant dense<0.000000e+00> : vector<64x8xf32>
    %499 = tpu.matmul %438, %498, %cst_478 {dimension_numbers = #tpu.dot_dimension_numbers<[1], [0], [0], [1], [0, 0, 1, 1], [], []>} : vector<64x8xbf16>, vector<8x8xbf16>, vector<64x8xf32> -> vector<64x8xf32>
    %500 = arith.truncf %499 : vector<64x8xf32> to vector<64x8xbf16>
    %c7_479 = arith.constant 7 : index
    %c0_480 = arith.constant 0 : index
    %c0_481 = arith.constant 0 : index
    %501 = vector.load %arg22[%c7_479, %c0_480, %c0_481] : memref<9x64x64xbf16, #tpu.memory_space<vmem>>, vector<1x64x64xbf16>
    %502 = vector.shape_cast %501 : vector<1x64x64xbf16> to vector<64x64xbf16>
    %cst_482 = arith.constant dense<0.000000e+00> : vector<64x8xf32>
    %503 = tpu.matmul %502, %500, %cst_482 {dimension_numbers = #tpu.dot_dimension_numbers<[1], [0], [0], [1], [0, 0, 1, 1], [], []>} : vector<64x64xbf16>, vector<64x8xbf16>, vector<64x8xf32> -> vector<64x8xf32>
    %504 = arith.addf %496, %503 : vector<64x8xf32>
    %c8_483 = arith.constant 8 : index
    %c0_484 = arith.constant 0 : index
    %c0_485 = arith.constant 0 : index
    %505 = vector.load %arg19[%c8_483, %c0_484, %c0_485] : memref<9x8x8xbf16, #tpu.memory_space<vmem>>, vector<1x8x8xbf16>
    %506 = vector.shape_cast %505 : vector<1x8x8xbf16> to vector<8x8xbf16>
    %cst_486 = arith.constant dense<0.000000e+00> : vector<64x8xf32>
    %507 = tpu.matmul %438, %506, %cst_486 {dimension_numbers = #tpu.dot_dimension_numbers<[1], [0], [0], [1], [0, 0, 1, 1], [], []>} : vector<64x8xbf16>, vector<8x8xbf16>, vector<64x8xf32> -> vector<64x8xf32>
    %508 = arith.truncf %507 : vector<64x8xf32> to vector<64x8xbf16>
    %c8_487 = arith.constant 8 : index
    %c0_488 = arith.constant 0 : index
    %c0_489 = arith.constant 0 : index
    %509 = vector.load %arg22[%c8_487, %c0_488, %c0_489] : memref<9x64x64xbf16, #tpu.memory_space<vmem>>, vector<1x64x64xbf16>
    %510 = vector.shape_cast %509 : vector<1x64x64xbf16> to vector<64x64xbf16>
    %cst_490 = arith.constant dense<0.000000e+00> : vector<64x8xf32>
    %511 = tpu.matmul %510, %508, %cst_490 {dimension_numbers = #tpu.dot_dimension_numbers<[1], [0], [0], [1], [0, 0, 1, 1], [], []>} : vector<64x64xbf16>, vector<64x8xbf16>, vector<64x8xf32> -> vector<64x8xf32>
    %512 = arith.addf %504, %511 : vector<64x8xf32>
    %c0_491 = arith.constant 0 : index
    %c0_492 = arith.constant 0 : index
    %513 = vector.load %arg24[%c0_491, %c0_492] : memref<64x32xbf16, #tpu.memory_space<vmem>>, vector<64x32xbf16>
    %cst_493 = arith.constant dense<0.000000e+00> : vector<64x8xf32>
    %514 = tpu.matmul %513, %399, %cst_493 {dimension_numbers = #tpu.dot_dimension_numbers<[1], [0], [0], [1], [0, 0, 1, 1], [], []>} : vector<64x32xbf16>, vector<32x8xbf16>, vector<64x8xf32> -> vector<64x8xf32>
    %c0_494 = arith.constant 0 : index
    %c0_495 = arith.constant 0 : index
    %515 = vector.load %arg25[%c0_494, %c0_495] : memref<64x1xf32, #tpu.memory_space<vmem>>, vector<64x1xf32>
    %516 = vector.broadcast %515 : vector<64x1xf32> to vector<64x8xf32>
    %517 = arith.addf %514, %516 : vector<64x8xf32>
    %518 = arith.addf %512, %517 : vector<64x8xf32>
    %cst_496 = arith.constant 0.000000e+00 : f32
    %519 = vector.broadcast %cst_496 : f32 to vector<64x8xf32>
    %520 = arith.maximumf %518, %519 : vector<64x8xf32>
    %521 = arith.truncf %520 : vector<64x8xf32> to vector<64x8xbf16>
    %c0_497 = arith.constant 0 : index
    %c0_498 = arith.constant 0 : index
    %522 = vector.load %arg29[%c0_497, %c0_498] : memref<128x1xf32, #tpu.memory_space<vmem>>, vector<128x1xf32>
    %c0_499 = arith.constant 0 : index
    %c0_500 = arith.constant 0 : index
    %c0_501 = arith.constant 0 : index
    %523 = vector.load %arg26[%c0_499, %c0_500, %c0_501] : memref<4x8x2xbf16, #tpu.memory_space<vmem>>, vector<1x8x2xbf16>
    %524 = vector.shape_cast %523 : vector<1x8x2xbf16> to vector<8x2xbf16>
    %cst_502 = arith.constant dense<0.000000e+00> : vector<64x2xf32>
    %525 = tpu.matmul %521, %524, %cst_502 {dimension_numbers = #tpu.dot_dimension_numbers<[1], [0], [0], [1], [0, 0, 1, 1], [], []>} : vector<64x8xbf16>, vector<8x2xbf16>, vector<64x2xf32> -> vector<64x2xf32>
    %526 = arith.truncf %525 : vector<64x2xf32> to vector<64x2xbf16>
    %c4_503 = arith.constant 4 : index
    %c0_504 = arith.constant 0 : index
    %c0_505 = arith.constant 0 : index
    %527 = vector.load %arg28[%c4_503, %c0_504, %c0_505] : memref<9x128x64xbf16, #tpu.memory_space<vmem>>, vector<1x128x64xbf16>
    %528 = vector.shape_cast %527 : vector<1x128x64xbf16> to vector<128x64xbf16>
    %cst_506 = arith.constant dense<0.000000e+00> : vector<128x2xf32>
    %529 = tpu.matmul %528, %526, %cst_506 {dimension_numbers = #tpu.dot_dimension_numbers<[1], [0], [0], [1], [0, 0, 1, 1], [], []>} : vector<128x64xbf16>, vector<64x2xbf16>, vector<128x2xf32> -> vector<128x2xf32>
    %530 = vector.broadcast %522 : vector<128x1xf32> to vector<128x2xf32>
    %531 = arith.addf %530, %529 : vector<128x2xf32>
    %c1_507 = arith.constant 1 : index
    %c0_508 = arith.constant 0 : index
    %c0_509 = arith.constant 0 : index
    %532 = vector.load %arg26[%c1_507, %c0_508, %c0_509] : memref<4x8x2xbf16, #tpu.memory_space<vmem>>, vector<1x8x2xbf16>
    %533 = vector.shape_cast %532 : vector<1x8x2xbf16> to vector<8x2xbf16>
    %cst_510 = arith.constant dense<0.000000e+00> : vector<64x2xf32>
    %534 = tpu.matmul %521, %533, %cst_510 {dimension_numbers = #tpu.dot_dimension_numbers<[1], [0], [0], [1], [0, 0, 1, 1], [], []>} : vector<64x8xbf16>, vector<8x2xbf16>, vector<64x2xf32> -> vector<64x2xf32>
    %535 = arith.truncf %534 : vector<64x2xf32> to vector<64x2xbf16>
    %c5_511 = arith.constant 5 : index
    %c0_512 = arith.constant 0 : index
    %c0_513 = arith.constant 0 : index
    %536 = vector.load %arg28[%c5_511, %c0_512, %c0_513] : memref<9x128x64xbf16, #tpu.memory_space<vmem>>, vector<1x128x64xbf16>
    %537 = vector.shape_cast %536 : vector<1x128x64xbf16> to vector<128x64xbf16>
    %cst_514 = arith.constant dense<0.000000e+00> : vector<128x2xf32>
    %538 = tpu.matmul %537, %535, %cst_514 {dimension_numbers = #tpu.dot_dimension_numbers<[1], [0], [0], [1], [0, 0, 1, 1], [], []>} : vector<128x64xbf16>, vector<64x2xbf16>, vector<128x2xf32> -> vector<128x2xf32>
    %539 = arith.addf %531, %538 : vector<128x2xf32>
    %c2_515 = arith.constant 2 : index
    %c0_516 = arith.constant 0 : index
    %c0_517 = arith.constant 0 : index
    %540 = vector.load %arg26[%c2_515, %c0_516, %c0_517] : memref<4x8x2xbf16, #tpu.memory_space<vmem>>, vector<1x8x2xbf16>
    %541 = vector.shape_cast %540 : vector<1x8x2xbf16> to vector<8x2xbf16>
    %cst_518 = arith.constant dense<0.000000e+00> : vector<64x2xf32>
    %542 = tpu.matmul %521, %541, %cst_518 {dimension_numbers = #tpu.dot_dimension_numbers<[1], [0], [0], [1], [0, 0, 1, 1], [], []>} : vector<64x8xbf16>, vector<8x2xbf16>, vector<64x2xf32> -> vector<64x2xf32>
    %543 = arith.truncf %542 : vector<64x2xf32> to vector<64x2xbf16>
    %c7_519 = arith.constant 7 : index
    %c0_520 = arith.constant 0 : index
    %c0_521 = arith.constant 0 : index
    %544 = vector.load %arg28[%c7_519, %c0_520, %c0_521] : memref<9x128x64xbf16, #tpu.memory_space<vmem>>, vector<1x128x64xbf16>
    %545 = vector.shape_cast %544 : vector<1x128x64xbf16> to vector<128x64xbf16>
    %cst_522 = arith.constant dense<0.000000e+00> : vector<128x2xf32>
    %546 = tpu.matmul %545, %543, %cst_522 {dimension_numbers = #tpu.dot_dimension_numbers<[1], [0], [0], [1], [0, 0, 1, 1], [], []>} : vector<128x64xbf16>, vector<64x2xbf16>, vector<128x2xf32> -> vector<128x2xf32>
    %547 = arith.addf %539, %546 : vector<128x2xf32>
    %c3_523 = arith.constant 3 : index
    %c0_524 = arith.constant 0 : index
    %c0_525 = arith.constant 0 : index
    %548 = vector.load %arg26[%c3_523, %c0_524, %c0_525] : memref<4x8x2xbf16, #tpu.memory_space<vmem>>, vector<1x8x2xbf16>
    %549 = vector.shape_cast %548 : vector<1x8x2xbf16> to vector<8x2xbf16>
    %cst_526 = arith.constant dense<0.000000e+00> : vector<64x2xf32>
    %550 = tpu.matmul %521, %549, %cst_526 {dimension_numbers = #tpu.dot_dimension_numbers<[1], [0], [0], [1], [0, 0, 1, 1], [], []>} : vector<64x8xbf16>, vector<8x2xbf16>, vector<64x2xf32> -> vector<64x2xf32>
    %551 = arith.truncf %550 : vector<64x2xf32> to vector<64x2xbf16>
    %c8_527 = arith.constant 8 : index
    %c0_528 = arith.constant 0 : index
    %c0_529 = arith.constant 0 : index
    %552 = vector.load %arg28[%c8_527, %c0_528, %c0_529] : memref<9x128x64xbf16, #tpu.memory_space<vmem>>, vector<1x128x64xbf16>
    %553 = vector.shape_cast %552 : vector<1x128x64xbf16> to vector<128x64xbf16>
    %cst_530 = arith.constant dense<0.000000e+00> : vector<128x2xf32>
    %554 = tpu.matmul %553, %551, %cst_530 {dimension_numbers = #tpu.dot_dimension_numbers<[1], [0], [0], [1], [0, 0, 1, 1], [], []>} : vector<128x64xbf16>, vector<64x2xbf16>, vector<128x2xf32> -> vector<128x2xf32>
    %555 = arith.addf %547, %554 : vector<128x2xf32>
    %cst_531 = arith.constant 0.000000e+00 : f32
    %556 = vector.broadcast %cst_531 : f32 to vector<128x2xf32>
    %557 = arith.maximumf %555, %556 : vector<128x2xf32>
    %558 = arith.truncf %557 : vector<128x2xf32> to vector<128x2xbf16>
    %c0_532 = arith.constant 0 : index
    %c0_533 = arith.constant 0 : index
    %559 = vector.load %arg31[%c0_532, %c0_533] : memref<128x1xf32, #tpu.memory_space<vmem>>, vector<128x1xf32>
    %c0_534 = arith.constant 0 : index
    %c0_535 = arith.constant 0 : index
    %c0_536 = arith.constant 0 : index
    %560 = vector.load %arg27[%c0_534, %c0_535, %c0_536] : memref<1x2x2xbf16, #tpu.memory_space<vmem>>, vector<1x2x2xbf16>
    %561 = vector.shape_cast %560 : vector<1x2x2xbf16> to vector<2x2xbf16>
    %cst_537 = arith.constant dense<0.000000e+00> : vector<128x2xf32>
    %562 = tpu.matmul %558, %561, %cst_537 {dimension_numbers = #tpu.dot_dimension_numbers<[1], [0], [0], [1], [0, 0, 1, 1], [], []>} : vector<128x2xbf16>, vector<2x2xbf16>, vector<128x2xf32> -> vector<128x2xf32>
    %563 = arith.truncf %562 : vector<128x2xf32> to vector<128x2xbf16>
    %c4_538 = arith.constant 4 : index
    %c0_539 = arith.constant 0 : index
    %c0_540 = arith.constant 0 : index
    %564 = vector.load %arg30[%c4_538, %c0_539, %c0_540] : memref<9x128x128xbf16, #tpu.memory_space<vmem>>, vector<1x128x128xbf16>
    %565 = vector.shape_cast %564 : vector<1x128x128xbf16> to vector<128x128xbf16>
    %cst_541 = arith.constant dense<0.000000e+00> : vector<128x2xf32>
    %566 = tpu.matmul %565, %563, %cst_541 {dimension_numbers = #tpu.dot_dimension_numbers<[1], [0], [0], [1], [0, 0, 1, 1], [], []>} : vector<128x128xbf16>, vector<128x2xbf16>, vector<128x2xf32> -> vector<128x2xf32>
    %567 = vector.broadcast %559 : vector<128x1xf32> to vector<128x2xf32>
    %568 = arith.addf %567, %566 : vector<128x2xf32>
    %c0_542 = arith.constant 0 : index
    %c0_543 = arith.constant 0 : index
    %569 = vector.load %arg32[%c0_542, %c0_543] : memref<128x64xbf16, #tpu.memory_space<vmem>>, vector<128x64xbf16>
    %cst_544 = arith.constant dense<0.000000e+00> : vector<128x2xf32>
    %570 = tpu.matmul %569, %526, %cst_544 {dimension_numbers = #tpu.dot_dimension_numbers<[1], [0], [0], [1], [0, 0, 1, 1], [], []>} : vector<128x64xbf16>, vector<64x2xbf16>, vector<128x2xf32> -> vector<128x2xf32>
    %c0_545 = arith.constant 0 : index
    %c0_546 = arith.constant 0 : index
    %571 = vector.load %arg33[%c0_545, %c0_546] : memref<128x1xf32, #tpu.memory_space<vmem>>, vector<128x1xf32>
    %572 = vector.broadcast %571 : vector<128x1xf32> to vector<128x2xf32>
    %573 = arith.addf %570, %572 : vector<128x2xf32>
    %574 = arith.addf %568, %573 : vector<128x2xf32>
    %cst_547 = arith.constant 0.000000e+00 : f32
    %575 = vector.broadcast %cst_547 : f32 to vector<128x2xf32>
    %576 = arith.maximumf %574, %575 : vector<128x2xf32>
    %577 = arith.truncf %576 : vector<128x2xf32> to vector<128x2xbf16>
    %c0_548 = arith.constant 0 : index
    %c0_549 = arith.constant 0 : index
    %578 = vector.load %arg34[%c0_548, %c0_549] : memref<2x2xbf16, #tpu.memory_space<vmem>>, vector<2x2xbf16>
    %cst_550 = arith.constant dense<0.000000e+00> : vector<128x2xf32>
    %579 = tpu.matmul %577, %578, %cst_550 {dimension_numbers = #tpu.dot_dimension_numbers<[1], [0], [0], [1], [0, 0, 1, 1], [], []>} : vector<128x2xbf16>, vector<2x2xbf16>, vector<128x2xf32> -> vector<128x2xf32>
    %c0_551 = arith.constant 0 : index
    %c0_552 = arith.constant 0 : index
    %580 = vector.load %arg35[%c0_551, %c0_552] : memref<10x128xf32, #tpu.memory_space<vmem>>, vector<10x128xf32>
    %cst_553 = arith.constant dense<0.000000e+00> : vector<10x2xf32>
    %581 = tpu.matmul %580, %579, %cst_553 {dimension_numbers = #tpu.dot_dimension_numbers<[1], [0], [0], [1], [0, 0, 1, 1], [], []>} : vector<10x128xf32>, vector<128x2xf32>, vector<10x2xf32> -> vector<10x2xf32>
    %c0_554 = arith.constant 0 : index
    %c0_555 = arith.constant 0 : index
    %582 = vector.load %arg36[%c0_554, %c0_555] : memref<10x1xf32, #tpu.memory_space<vmem>>, vector<10x1xf32>
    %583 = vector.broadcast %582 : vector<10x1xf32> to vector<10x2xf32>
    %584 = arith.addf %581, %583 : vector<10x2xf32>
    %c0_556 = arith.constant 0 : index
    %c0_557 = arith.constant 0 : index
    %585 = vector.load %arg37[%c0_556, %c0_557] : memref<10x2xf32, #tpu.memory_space<vmem>>, vector<10x2xf32>
    tpu.vector_store %arg37[%c0_556, %c0_557], %584 {strides = array<i32>} : memref<10x2xf32, #tpu.memory_space<vmem>>, vector<10x2xf32>,
    return
  }
}

</mosaic_0001>

<bundles_post_ra>
// kernel: pruned_resnet_forward.1
= control target key start
LH: loop header
LB: loop body
LE: loop exit
PB: predicated region body
PF: predicated region fallthrough
CT: control target
= control target key end

     0   :  { %v15636_v0 = vmov 0   ;;  %s15637_s3 = smov 2   ;;  %s15638_s10 = smov 1   ;;  %vm418_vm0 = vcmask 261120   ;;  %vm3467_vm1 = vcmask 130048   ;;  %vm7887_vm2 = vcmask 1043456   ;;  %s17871_s0 = inlined_call_operand.smem [shape: u32[38], index: -1, kind: input, shape index: {}] }
   0x1   :  { %15633 = vset.pattern.permute.xlu0 %v15636_v0  ;;  %s15682_s6 = sld [smem:[%s17871_s0 + %s15637_s3]]   ;;  %15634 = vset.pattern.permute.xlu1 %v15636_v0  ;;  %s15639_s14 = smov 13   ;;  %vm7874_vm3 = vcmask 64512   ;;  %vm7952_vm4 = vcmask 523264   ;;  %vm10016_vm5 = vcmask 1040384   ;;  %vm9991_vm6 = vcmask 15360  }
   0x2   :  { %s15687_s9 = sld [smem:[%s17871_s0]]   ;;  %15635 = vset.pattern.permute.xlu2 %v15636_v0  ;;  %s15640_s18 = smov 15   ;;  %vm10667_vm7 = vcmask 9216  }
   0x3   :  { %s15692_s13 = sld [smem:[%s17871_s0 + %s15638_s10]]   ;;  %s15641_s22 = smov 17  }
   0x4   :  { %s15717_s17 = sld [smem:[%s17871_s0 + %s15639_s14]]   ;;  %s15642_s26 = smov 21  }
   0x5   :  { %s15775_s21 = sld [smem:[%s17871_s0 + %s15640_s18]]   ;;  %s15643_s30 = smov 23  }
   0x6   :  { %s15796_s25 = sld [smem:[%s17871_s0 + %s15641_s22]]   ;;  %s15644_s4 = smov 25  }
   0x7   :  { %v197_v1 = vld [vmem:[%s15682_s6] sm:$0xff]  ;;  %v198_v27 = vld [vmem:[%s15682_s6 + $0x8] sm:$0xff]  ;;  %s15810_s29 = sld [smem:[%s17871_s0 + %s15642_s26]]   ;;  %s15645_s8 = smov 3  }
   0x8   :  { %201 = vperm.xlu0 %15633, %v197_v1   ;;  %v10832_v2 = vld [vmem:[%s15687_s9 + $0xe0] sm:$0xf]  ;;  %v14934_v3 = vld [vmem:[%s15687_s9 + $0xec] sm:$0xf0]  ;;  %v14932_v7 = vld [vmem:[%s15687_s9 + $0xe4] sm:$0xf]  ;;  %s15820_s3 = sld [smem:[%s17871_s0 + %s15643_s30]]  }
   0x9   :  { %v10864_v4 = vld [vmem:[%s15687_s9 + $0x120] sm:$0xf]  ;;  %v10833_v5 = vor.u32 %v14934_v3, %v10832_v2  ;;  %v14942_v6 = vld [vmem:[%s15687_s9 + $0x12c] sm:$0xf0]  ;;  %v10834_v8 = vld [vmem:[%s15687_s9 + $0xf0] sm:$0xf0]  ;;  %s15826_s7 = sld [smem:[%s17871_s0 + %s15644_s4]]  }
   0xa   :  { %v10865_v9 = vor.u32 %v14942_v6, %v10864_v4  ;;  %v10837_v10 = vor.u32 %v14932_v7, %v10834_v8  ;;  %v14940_v11 = vld [vmem:[%s15687_s9 + $0x124] sm:$0xf]  ;;  %v10866_v12 = vld [vmem:[%s15687_s9 + $0x130] sm:$0xf0]  ;;  %v10816_v13 = vld [vmem:[%s15687_s9 + $0xc0] sm:$0xf]  ;;  %s15831_s11 = sld [smem:[%s17871_s0 + %s15645_s8]]  }
   0xb   :  { %422 = vmatpush.bf16.msra.mxu0 %v10833_v5  ;;  %v10869_v14 = vor.u32 %v14940_v11, %v10866_v12  ;;  %v14930_v15 = vld [vmem:[%s15687_s9 + $0xcc] sm:$0xf0]  ;;  %v10848_v16 = vld [vmem:[%s15687_s9 + $0x100] sm:$0xf]  ;;  %v14928_v20 = vld [vmem:[%s15687_s9 + $0xc4] sm:$0xf] }
   0xc   :  { %v14938_v17 = vld [vmem:[%s15687_s9 + $0x10c] sm:$0xf0]  ;;  %442 = vmatpush.bf16.msra.mxu1 %v10865_v9  ;;  %450 = vmatpush.bf16.msra.mxu2 %v10837_v10  ;;  %v10817_v18 = vor.u32 %v14930_v15, %v10816_v13  ;;  %v10818_v21 = vld [vmem:[%s15687_s9 + $0xd0] sm:$0xf0]  ;;  %v14936_v22 = vld [vmem:[%s15687_s9 + $0x104] sm:$0xf] }
   0xd   :  { %v10849_v19 = vor.u32 %v14938_v17, %v10848_v16  ;;  %470 = vmatpush.bf16.msra.mxu3 %v10869_v14  ;;  %v10821_v23 = vor.u32 %v14928_v20, %v10818_v21  ;;  %v10850_v24 = vld [vmem:[%s15687_s9 + $0x110] sm:$0xf0]  ;;  %v10840_v25 = vld [vmem:[%s15687_s9 + $0xe8] sm:$0xf]  ;;  %v14935_v26 = vld [vmem:[%s15687_s9 + $0xf4] sm:$0xf0] }
   0xe   :  { %v10853_v28 = vor.u32 %v14936_v22, %v10850_v24  ;;  %v10841_v29 = vor.u32 %v14935_v26, %v10840_v25  ;;  %v10872_v30 = vld [vmem:[%s15687_s9 + $0x128] sm:$0xf]  ;;  %v14943_v31 = vld [vmem:[%s15687_s9 + $0x134] sm:$0xf0]  ;;  %v14902_v32 = vld [vmem:[%s15692_s13 + $0x4] sm:$0xf] }
   0xf   :  { %423 = vmatpush.bf16.msra.mxu0 %v10817_v18  ;;  %v10873_v33 = vor.u32 %v14943_v31, %v10872_v30  ;;  %v10714_v34 = vld [vmem:[%s15692_s13 + $0x8] sm:$0xf0]  ;;  %v10800_v35 = vld [vmem:[%s15687_s9 + $0xa0] sm:$0xf]  ;;  %v14926_v36 = vld [vmem:[%s15687_s9 + $0xac] sm:$0xf0] }
  0x10   :  { %443 = vmatpush.bf16.msra.mxu1 %v10849_v19  ;;  %451 = vmatpush.bf16.msra.mxu2 %v10821_v23  ;;  %v15725_v37 = vor.u32 %v14902_v32, %v10714_v34  ;;  %v10801_v38 = vor.u32 %v14926_v36, %v10800_v35  ;;  %v14924_v39 = vld [vmem:[%s15687_s9 + $0xa4] sm:$0xf]  ;;  %v10802_v40 = vld [vmem:[%s15687_s9 + $0xb0] sm:$0xf0]  ;;  %v10824_v41 = vld [vmem:[%s15687_s9 + $0xc8] sm:$0xf] }
  0x11   :  { %471 = vmatpush.bf16.msra.mxu3 %v10853_v28  ;;  %v10805_v42 = vor.u32 %v14924_v39, %v10802_v40  ;;  %v14931_v43 = vld [vmem:[%s15687_s9 + $0xd4] sm:$0xf0]  ;;  %v10856_v44 = vld [vmem:[%s15687_s9 + $0x108] sm:$0xf]  ;;  %206 = vperm.xlu0 %15633, %v198_v27   ;;  %v14933_v48 = vld [vmem:[%s15687_s9 + $0xec] sm:$0xf] }
  0x12   :  { %v14939_v45 = vld [vmem:[%s15687_s9 + $0x114] sm:$0xf0]  ;;  %v10825_v46 = vor.u32 %v14931_v43, %v10824_v41  ;;  %v10842_v49 = vld [vmem:[%s15687_s9 + $0xf8] sm:$0xf0]  ;;  %v10784_v50 = vld [vmem:[%s15687_s9 + $0x80] sm:$0xf] }
  0x13   :  { %v10857_v47 = vor.u32 %v14939_v45, %v10856_v44  ;;  %424 = vmatpush.bf16.msra.mxu0 %v10801_v38  ;;  %v10845_v51 = vor.u32 %v14933_v48, %v10842_v49  ;;  %v14922_v52 = vld [vmem:[%s15687_s9 + $0x8c] sm:$0xf0]  ;;  %10878 = vmatmul.msk.bf16.vlgmr.msra.gmra.mxu1 %vm418_vm0, %v15725_v37  ;;  %v14920_v53 = vld [vmem:[%s15687_s9 + $0x84] sm:$0xf]  ;;  %v10786_v54 = vld [vmem:[%s15687_s9 + $0x90] sm:$0xf0] }
  0x14   :  { %478 = vmatpush.bf16.msrb.mxu1 %v10841_v29  ;;  %10879 = vmatmul.msk.bf16.vlgmr.msra.gmra.mxu3 %vm418_vm0, %v15725_v37  ;;  %v10785_v55 = vor.u32 %v14922_v52, %v10784_v50  ;;  %v10789_v56 = vor.u32 %v14920_v53, %v10786_v54  ;;  %v10808_v57 = vld [vmem:[%s15687_s9 + $0xa8] sm:$0xf]  ;;  %v14927_v58 = vld [vmem:[%s15687_s9 + $0xb4] sm:$0xf0]  ;;  %v4774_v60 = vld [vmem:[%s15717_s17] sm:$0xff]  ;;  %s15646_s12 = smov 29  }
  0x15   :  { %498 = vmatpush.bf16.msrb.mxu3 %v10873_v33  ;;  %452 = vmatpush.bf16.msra.mxu2 %v10805_v42  ;;  %v10809_v59 = vor.u32 %v14927_v58, %v10808_v57  ;;  %v14929_v61 = vld [vmem:[%s15687_s9 + $0xcc] sm:$0xf]  ;;  %v10826_v62 = vld [vmem:[%s15687_s9 + $0xd8] sm:$0xf0]  ;;  %v10768_v63 = vld [vmem:[%s15687_s9 + $0x60] sm:$0xf]  ;;  %s15853_s15 = sld [smem:[%s17871_s0 + %s15646_s12]]  }
  0x16   :  { %v14918_v0 = vld [vmem:[%s15687_s9 + $0x6c] sm:$0xf0]  ;;  %v14916_v1 = vld [vmem:[%s15687_s9 + $0x64] sm:$0xf]  ;;  %v10770_v2 = vld [vmem:[%s15687_s9 + $0x70] sm:$0xf0]  ;;  %v10829_v3 = vor.u32 %v14929_v61, %v10826_v62 }
  0x17   :  { %425 = vmatpush.bf16.msra.mxu0 %v10785_v55  ;;  %v10769_v4 = vor.u32 %v14918_v0, %v10768_v63  ;;  %v10792_v5 = vld [vmem:[%s15687_s9 + $0x88] sm:$0xf]  ;;  %v14923_v6 = vld [vmem:[%s15687_s9 + $0x94] sm:$0xf0]  ;;  %v14925_v7 = vld [vmem:[%s15687_s9 + $0xac] sm:$0xf]  ;;  %v10773_v8 = vor.u32 %v14916_v1, %v10770_v2 }
  0x18   :  { %479 = vmatpush.bf16.msrb.mxu1 %v10825_v46  ;;  %v10810_v9 = vld [vmem:[%s15687_s9 + $0xb8] sm:$0xf0]  ;;  %v10752_v10 = vld [vmem:[%s15687_s9 + $0x40] sm:$0xf]  ;;  %v14914_v11 = vld [vmem:[%s15687_s9 + $0x4c] sm:$0xf0]  ;;  %v10793_v12 = vor.u32 %v14923_v6, %v10792_v5 }
  0x19   :  { %499 = vmatpush.bf16.msrb.mxu3 %v10857_v47  ;;  %453 = vmatpush.bf16.msra.mxu2 %v10789_v56  ;;  %v14912_v13 = vld [vmem:[%s15687_s9 + $0x44] sm:$0xf]  ;;  %v10754_v14 = vld [vmem:[%s15687_s9 + $0x50] sm:$0xf0]  ;;  %v10776_v15 = vld [vmem:[%s15687_s9 + $0x68] sm:$0xf]  ;;  %v10813_v17 = vor.u32 %v14925_v7, %v10810_v9  ;;  %v10753_v18 = vor.u32 %v14914_v11, %v10752_v10 }
  0x1a   :  { %4898 = vperm.xlu0 %15633, %v4774_v60   ;;  %v14919_v16 = vld [vmem:[%s15687_s9 + $0x74] sm:$0xf0]  ;;  %v14921_v19 = vld [vmem:[%s15687_s9 + $0x8c] sm:$0xf]  ;;  %v10757_v20 = vor.u32 %v14912_v13, %v10754_v14  ;;  %v10794_v21 = vld [vmem:[%s15687_s9 + $0x98] sm:$0xf0] }
  0x1b   :  { %426 = vmatpush.bf16.msra.mxu0 %v10769_v4  ;;  %v10736_v22 = vld [vmem:[%s15687_s9 + $0x20] sm:$0xf]  ;;  %v14910_v23 = vld [vmem:[%s15687_s9 + $0x2c] sm:$0xf0]  ;;  %v10777_v24 = vor.u32 %v14919_v16, %v10776_v15  ;;  %v14908_v25 = vld [vmem:[%s15687_s9 + $0x24] sm:$0xf]  ;;  %v10797_v30 = vor.u32 %v14921_v19, %v10794_v21 }
  0x1c   :  { %480 = vmatpush.bf16.msrb.mxu1 %v10809_v59  ;;  %v10738_v26 = vld [vmem:[%s15687_s9 + $0x30] sm:$0xf0]  ;;  %v10760_v27 = vld [vmem:[%s15687_s9 + $0x48] sm:$0xf]  ;;  %v14915_v28 = vld [vmem:[%s15687_s9 + $0x54] sm:$0xf0]  ;;  %v10737_v31 = vor.u32 %v14910_v23, %v10736_v22 }
  0x1d   :  { %506 = vmatpush.bf16.msra.mxu3 %v10845_v51  ;;  %454 = vmatpush.bf16.msra.mxu2 %v10773_v8  ;;  %v4777_v29 = vld [vmem:[%s15717_s17 + $0x18] sm:$0xff]  ;;  %v14917_v32 = vld [vmem:[%s15687_s9 + $0x6c] sm:$0xf]  ;;  %v10741_v33 = vor.u32 %v14908_v25, %v10738_v26  ;;  %v10720_v35 = vld [vmem:[%s15687_s9] sm:$0xf]  ;;  %v10761_v38 = vor.u32 %v14915_v28, %v10760_v27  ;;  %s15647_s16 = smov 33  }
  0x1e   :  { %v10778_v34 = vld [vmem:[%s15687_s9 + $0x78] sm:$0xf0]  ;;  %v14906_v36 = vld [vmem:[%s15687_s9 + $0xc] sm:$0xf0]  ;;  %v14904_v39 = vld [vmem:[%s15687_s9 + $0x4] sm:$0xf]  ;;  %s15912_s20 = sld [smem:[%s17871_s0 + %s15647_s16]]  }
  0x1f   :  { %427 = vmatpush.bf16.msra.mxu0 %v10753_v18  ;;  %v10722_v40 = vld [vmem:[%s15687_s9 + $0x10] sm:$0xf0]  ;;  %v10744_v41 = vld [vmem:[%s15687_s9 + $0x28] sm:$0xf]  ;;  %v14911_v42 = vld [vmem:[%s15687_s9 + $0x34] sm:$0xf0]  ;;  %v10781_v43 = vor.u32 %v14917_v32, %v10778_v34  ;;  %v10721_v44 = vor.u32 %v14906_v36, %v10720_v35 }
  0x20   :  { %481 = vmatpush.bf16.msrb.mxu1 %v10793_v12  ;;  %v10712_v45 = vld [vmem:[%s15692_s13] sm:$0xf]  ;;  %v14903_v46 = vld [vmem:[%s15692_s13 + $0x4] sm:$0xf0]  ;;  %v10725_v47 = vor.u32 %v14904_v39, %v10722_v40  ;;  %v14913_v48 = vld [vmem:[%s15687_s9 + $0x4c] sm:$0xf]  ;;  %v10745_v50 = vor.u32 %v14911_v42, %v10744_v41 }
  0x21   :  { %507 = vmatpush.bf16.msra.mxu3 %v10829_v3  ;;  %455 = vmatpush.bf16.msra.mxu2 %v10757_v20  ;;  %v10762_v49 = vld [vmem:[%s15687_s9 + $0x58] sm:$0xf0]  ;;  %v10713_v51 = vor.u32 %v14903_v46, %v10712_v45  ;;  %v10728_v52 = vld [vmem:[%s15687_s9 + $0x8] sm:$0xf]  ;;  %v14907_v53 = vld [vmem:[%s15687_s9 + $0x14] sm:$0xf0] }
  0x22   :  { %4913 = vperm.xlu0 %15633, %v4777_v29   ;;  %v5920_v54 = vld [vmem:[%s15775_s21 + $0x10] sm:$0xff]  ;;  %v10765_v55 = vor.u32 %v14913_v48, %v10762_v49  ;;  %v14941_v56 = vld [vmem:[%s15687_s9 + $0x12c] sm:$0xf]  ;;  %v10874_v57 = vld [vmem:[%s15687_s9 + $0x138] sm:$0xf0]  ;;  %v10729_v60 = vor.u32 %v14907_v53, %v10728_v52  ;;  %s15648_s22 = smov 31  }
  0x23   :  { %428 = vmatpush.bf16.msra.mxu0 %v10737_v31  ;;  %v14909_v58 = vld [vmem:[%s15687_s9 + $0x2c] sm:$0xf]  ;;  %v10746_v59 = vld [vmem:[%s15687_s9 + $0x38] sm:$0xf0]  ;;  %v10877_v61 = vor.u32 %v14941_v56, %v10874_v57  ;;  %v6757_v6 = vld [vmem:[%s15810_s29] sm:$0xff]  ;;  %s15922_s26 = sld [smem:[%s17871_s0 + %s15648_s22]]   ;;  %s15649_s27 = smov 36  }
  0x24   :  { %482 = vmatpush.bf16.msrb.mxu1 %v10777_v24  ;;  %10880 = vmatmul.msk.bf16.vlgmr.msrb.gmra.mxu3 %vm418_vm0, %v15725_v37  ;;  %v10749_v62 = vor.u32 %v14909_v58, %v10746_v59  ;;  %v14937_v63 = vld [vmem:[%s15687_s9 + $0x10c] sm:$0xf]  ;;  %v10858_v0 = vld [vmem:[%s15687_s9 + $0x118] sm:$0xf0]  ;;  %v6763_v8 = vld [vmem:[%s15810_s29 + $0x30] sm:$0xff]  ;;  %s16016_s1 = sld [smem:[%s17871_s0 + %s15649_s27]]   ;;  %s15650_s2 = smov 4  }
  0x25   :  { %508 = vmatpush.bf16.msra.mxu3 %v10813_v17  ;;  %456 = vmatpush.bf16.msra.mxu2 %v10741_v33  ;;  %v14905_v1 = vld [vmem:[%s15687_s9 + $0xc] sm:$0xf]  ;;  %v10730_v2 = vld [vmem:[%s15687_s9 + $0x18] sm:$0xf0]  ;;  %v10861_v3 = vor.u32 %v14937_v63, %v10858_v0  ;;  %v14950_v12 = vld [vmem:[%s15831_s11 + $0x30] sm:$0xff]  ;;  %s16269_s6 = sld [smem:[%s17871_s0 + %s15650_s2]]   ;;  %s15651_s8 = smov 6  }
  0x26   :  { %v6689_v4 = vld [vmem:[%s15796_s25 + $0x8] sm:$0xff]  ;;  %v10733_v5 = vor.u32 %v14905_v1, %v10730_v2  ;;  %v6760_v7 = vld [vmem:[%s15810_s29 + $0x18] sm:$0xff]  ;;  %v14966_v16 = vld [vmem:[%s15831_s11 + $0xb0] sm:$0xff]  ;;  %s15652_s12 = smov 5   ;;  %s15653_s18 = smov 7  }
  0x27   :  { %429 = vmatpush.bf16.msra.mxu0 %v10721_v44  ;;  %v7866_v9 = vld [vmem:[%s15820_s3 + $0x8] sm:$0xff]  ;;  %v14951_v10 = vld [vmem:[%s15831_s11 + $0x38] sm:$0xff]  ;;  %v14958_v17 = vld [vmem:[%s15831_s11 + $0x70] sm:$0xff]  ;;  %s16432_s16 = sld [smem:[%s17871_s0 + %s15652_s12]]   ;;  %s15654_s24 = smov 8  }
  0x28   :  { %483 = vmatpush.bf16.msrb.mxu1 %v10761_v38  ;;  %v7870_v11 = vld [vmem:[%s15820_s3 + $0x28] sm:$0xff]  ;;  %v14967_v13 = vld [vmem:[%s15831_s11 + $0xb8] sm:$0xff]  ;;  %v7871_v18 = vld [vmem:[%s15820_s3 + $0x30] sm:$0xff]  ;;  %s16720_s23 = sld [smem:[%s17871_s0 + %s15653_s18]]   ;;  %s15658_s5 = smov 11  }
  0x29   :  { %509 = vmatpush.bf16.msra.mxu3 %v10797_v30  ;;  %457 = vmatpush.bf16.msra.mxu2 %v10725_v47  ;;  %v14959_v14 = vld [vmem:[%s15831_s11 + $0x78] sm:$0xff]  ;;  %v14949_v15 = vld [vmem:[%s15831_s11 + $0x28] sm:$0xff]  ;;  %v14948_v19 = vld [vmem:[%s15831_s11 + $0x20] sm:$0xff]  ;;  %s10680_s30 = sld [smem:[%s17871_s0 + %s15654_s24]]   ;;  %s15659_s10 = smov 16  }
  0x2a   :  { %6016 = vperm.xlu0 %15633, %v5920_v54   ;;  %430 = vmatmul.bf16.vlgmr.msra.gmra.mxu0 %v10713_v51  ;;  %v14965_v20 = vld [vmem:[%s15831_s11 + $0xa8] sm:$0xff]  ;;  %v14947_v22 = vld [vmem:[%s15831_s11 + $0x18] sm:$0xff]  ;;  %v14964_v23 = vld [vmem:[%s15831_s11 + $0xa0] sm:$0xff]  ;;  %s17019_s9 = sld [smem:[%s17871_s0 + %s15658_s5]]   ;;  %s15660_s14 = smov 14  }
  0x2b   :  { %830 = vmatpush.bf16.msrb.mxu0 %v14967_v13  ;;  %v14957_v21 = vld [vmem:[%s15831_s11 + $0x68] sm:$0xff]  ;;  %v14956_v24 = vld [vmem:[%s15831_s11 + $0x60] sm:$0xff]  ;;  %v14975_v26 = vld [vmem:[%s15831_s11 + $0xf8] sm:$0xff]  ;;  %s10688_s13 = sld [smem:[%s17871_s0 + %s15659_s10]]   ;;  %s15661_s22 = smov 18  }
  0x2c   :  { %484 = vmatpush.bf16.msrb.mxu1 %v10745_v50  ;;  %458 = vmatmul.bf16.vlgmr.msra.gmra.mxu2 %v10713_v51  ;;  %v8983_v25 = vld [vmem:[%s15826_s7 + $0x28] sm:$0xff]  ;;  %v14946_v27 = vld [vmem:[%s15831_s11 + $0x10] sm:$0xff]  ;;  %v14963_v28 = vld [vmem:[%s15831_s11 + $0x98] sm:$0xff]  ;;  %s17078_s19 = sld [smem:[%s17871_s0 + %s15660_s14]]   ;;  %s15662_s28 = smov 20  }
  0x2d   :  { %510 = vmatpush.bf16.msra.mxu3 %v10781_v43  ;;  %802 = vmatpush.bf16.msrb.mxu2 %v14951_v10  ;;  %v14955_v29 = vld [vmem:[%s15831_s11 + $0x58] sm:$0xff]  ;;  %v14974_v30 = vld [vmem:[%s15831_s11 + $0xf0] sm:$0xff]  ;;  %v14945_v31 = vld [vmem:[%s15831_s11 + $0x8] sm:$0xff]  ;;  %s17119_s27 = sld [smem:[%s17871_s0 + %s15661_s22]]   ;;  %s15665_s2 = smov 24  }
  0x2e   :  { %v9107_v32 = vld [vmem:[%s15853_s15] sm:$0xff]  ;;  %v14962_v33 = vld [vmem:[%s15831_s11 + $0x90] sm:$0xff]  ;;  %v14973_v35 = vld [vmem:[%s15831_s11 + $0xe8] sm:$0xff]  ;;  %s15667_s12 = smov 28   ;;  %s15668_s18 = smov 32  }
  0x2f   :  { %831 = vmatpush.bf16.msrb.mxu0 %v14966_v16  ;;  %v14954_v34 = vld [vmem:[%s15831_s11 + $0x50] sm:$0xff]  ;;  %v14944_v36 = vld [vmem:[%s15831_s11] sm:$0xff]  ;;  %v14961_v38 = vld [vmem:[%s15831_s11 + $0x88] sm:$0xff]  ;;  %s15669_s24 = smov 27   ;;  %s15673_s5 = smov 37  }
  0x30   :  { %485 = vmatpush.bf16.msrb.mxu1 %v10729_v60  ;;  %v14983_v39 = vld [vmem:[%s15831_s11 + $0x138] sm:$0xff]  ;;  %v14953_v40 = vld [vmem:[%s15831_s11 + $0x48] sm:$0xff]  ;;  %v14972_v41 = vld [vmem:[%s15831_s11 + $0xe0] sm:$0xff] }
  0x31   :  { %511 = vmatpush.bf16.msra.mxu3 %v10765_v55  ;;  %803 = vmatpush.bf16.msrb.mxu2 %v14950_v12  ;;  %v9110_v42 = vld [vmem:[%s15853_s15 + $0x18] sm:$0xff]  ;;  %v14960_v43 = vld [vmem:[%s15831_s11 + $0x80] sm:$0xff]  ;;  %v14982_v44 = vld [vmem:[%s15831_s11 + $0x130] sm:$0xff] }
  0x32   :  { %6699 = vperm.xlu0 %15633, %v6689_v4   ;;  %v14952_v45 = vld [vmem:[%s15831_s11 + $0x40] sm:$0xff]  ;;  %v14999_v46 = vld [vmem:[%s15831_s11 + $0x1b8] sm:$0xff]  ;;  %v14981_v49 = vld [vmem:[%s15831_s11 + $0x128] sm:$0xff] }
  0x33   :  { %486 = vmatmul.bf16.vlgmr.msrb.gmra.mxu1 %v10713_v51  ;;  %832 = vmatpush.bf16.msrb.mxu0 %v14965_v20  ;;  %v14971_v47 = vld [vmem:[%s15831_s11 + $0xd8] sm:$0xff]  ;;  %v14998_v50 = vld [vmem:[%s15831_s11 + $0x1b0] sm:$0xff]  ;;  %v14980_v54 = vld [vmem:[%s15831_s11 + $0x120] sm:$0xff] }
  0x34   :  { %526 = vmatpush.bf16.msra.mxu1 %v10877_v61  ;;  %v14991_v48 = vld [vmem:[%s15831_s11 + $0x178] sm:$0xff]  ;;  %v14990_v52 = vld [vmem:[%s15831_s11 + $0x170] sm:$0xff]  ;;  %v14997_v55 = vld [vmem:[%s15831_s11 + $0x1a8] sm:$0xff] }
  0x35   :  { %512 = vmatpush.bf16.msra.mxu3 %v10749_v62  ;;  %804 = vmatpush.bf16.msrb.mxu2 %v14949_v15  ;;  %v9113_v53 = vld [vmem:[%s15853_s15 + $0x30] sm:$0xff]  ;;  %v14969_v56 = vld [vmem:[%s15831_s11 + $0xc8] sm:$0xff]  ;;  %v14979_v58 = vld [vmem:[%s15831_s11 + $0x118] sm:$0xff] }
  0x36   :  { %v14989_v57 = vld [vmem:[%s15831_s11 + $0x168] sm:$0xff]  ;;  %v14996_v59 = vld [vmem:[%s15831_s11 + $0x1a0] sm:$0xff]  ;;  %v15007_v62 = vld [vmem:[%s15831_s11 + $0x1f8] sm:$0xff] }
  0x37   :  { %833 = vmatpush.bf16.msrb.mxu0 %v14964_v23  ;;  %v14968_v60 = vld [vmem:[%s15831_s11 + $0xc0] sm:$0xff]  ;;  %v9116_v63 = vld [vmem:[%s15853_s15 + $0x48] sm:$0xff]  ;;  %v14978_v0 = vld [vmem:[%s15831_s11 + $0x110] sm:$0xff] }
  0x38   :  { %527 = vmatpush.bf16.msra.mxu1 %v10861_v3  ;;  %v14988_v61 = vld [vmem:[%s15831_s11 + $0x160] sm:$0xff]  ;;  %v14995_v1 = vld [vmem:[%s15831_s11 + $0x198] sm:$0xff]  ;;  %v15006_v3 = vld [vmem:[%s15831_s11 + $0x1f0] sm:$0xff] }
  0x39   :  { %513 = vmatpush.bf16.msra.mxu3 %v10733_v5  ;;  %805 = vmatpush.bf16.msrb.mxu2 %v14948_v19  ;;  %v14987_v2 = vld [vmem:[%s15831_s11 + $0x158] sm:$0xff]  ;;  %v14977_v4 = vld [vmem:[%s15831_s11 + $0x108] sm:$0xff]  ;;  %v14994_v5 = vld [vmem:[%s15831_s11 + $0x190] sm:$0xff] }
  0x3a   :  { %6879 = vperm.xlu0 %15633, %v6757_v6   ;;  %v14986_v6 = vld [vmem:[%s15831_s11 + $0x150] sm:$0xff]  ;;  %v14993_v10 = vld [vmem:[%s15831_s11 + $0x188] sm:$0xff]  ;;  %v15004_v12 = vld [vmem:[%s15831_s11 + $0x1e0] sm:$0xff] }
  0x3b   :  { %834 = vmatpush.bf16.msrb.mxu0 %v14963_v28  ;;  %v14984_v15 = vld [vmem:[%s15831_s11 + $0x140] sm:$0xff]  ;;  %v15003_v16 = vld [vmem:[%s15831_s11 + $0x1d8] sm:$0xff]  ;;  %v15002_v19 = vld [vmem:[%s15831_s11 + $0x1d0] sm:$0xff] }
  0x3c   :  { %514 = vmatmul.bf16.vlgmr.msra.gmra.mxu3 %v10713_v51  ;;  %816 = vmatpush.bf16.msrb.mxu1 %v14959_v14  ;;  %v14970_v51 = vld [vmem:[%s15831_s11 + $0xd0] sm:$0xff]  ;;  %v14992_v14 = vld [vmem:[%s15831_s11 + $0x180] sm:$0xff] }
  0x3d   :  { %806 = vmatpush.bf16.msrb.mxu2 %v14947_v22  ;;  %844 = vmatpush.bf16.msrb.mxu3 %v14975_v26  ;;  %v15001_v22 = vld [vmem:[%s15831_s11 + $0x1c8] sm:$0xff]  ;;  %v15000_v26 = vld [vmem:[%s15831_s11 + $0x1c0] sm:$0xff] }
  0x3f   :  { %835 = vmatpush.bf16.msrb.mxu0 %v14962_v33 }
  0x40   :  { %817 = vmatpush.bf16.msrb.mxu1 %v14958_v17 }
  0x41   :  { %807 = vmatpush.bf16.msrb.mxu2 %v14946_v27  ;;  %845 = vmatpush.bf16.msrb.mxu3 %v14974_v30 }
  0x42   :  { %6894 = vperm.xlu0 %15633, %v6760_v7   ;;  %v15005_v7 = vld [vmem:[%s15831_s11 + $0x1e8] sm:$0xff] }
  0x43   :  { %10881 = vmatmul.msk.bf16.vlgmr.msra.gmra.mxu1 %vm418_vm0, %v15725_v37  ;;  %v8978_v37 = vld [vmem:[%s15826_s7] sm:$0xff]  ;;  %836 = vmatpush.bf16.msrb.mxu0 %v14961_v38 }
  0x44   :  { %818 = vmatpush.bf16.msrb.mxu1 %v14957_v21 }
  0x45   :  { %808 = vmatpush.bf16.msrb.mxu2 %v14945_v31  ;;  %846 = vmatpush.bf16.msrb.mxu3 %v14973_v35 }
  0x47   :  { %837 = vmatpush.bf16.msrb.mxu0 %v14960_v43  ;;  %v15015_v43 = vld [vmem:[%s15831_s11 + $0x238] sm:$0xff] }
  0x48   :  { %819 = vmatpush.bf16.msrb.mxu1 %v14956_v24 }
  0x49   :  { %809 = vmatpush.bf16.msrb.mxu2 %v14944_v36  ;;  %847 = vmatpush.bf16.msrb.mxu3 %v14972_v41 }
  0x4a   :  { %6909 = vperm.xlu0 %15633, %v6763_v8  }
  0x4b   :  { %1143 = vmatpush.bf16.msra.mxu0 %v14999_v46 }
  0x4c   :  { %820 = vmatpush.bf16.msrb.mxu1 %v14955_v29 }
  0x4d   :  { %1115 = vmatpush.bf16.msra.mxu2 %v14983_v39  ;;  %848 = vmatpush.bf16.msrb.mxu3 %v14971_v47 }
  0x4f   :  { %1144 = vmatpush.bf16.msra.mxu0 %v14998_v50  ;;  %v9978_v50 = vld [vmem:[%s15922_s26 + $0x20] sm:$0xff] }
  0x50   :  { %821 = vmatpush.bf16.msrb.mxu1 %v14954_v34 }
  0x51   :  { %1116 = vmatpush.bf16.msra.mxu2 %v14982_v44  ;;  %849 = vmatpush.bf16.msrb.mxu3 %v14970_v51 }
  0x52   :  { %8001 = vperm.xlu0 %15633, %v7866_v9   ;;  %v9119_v9 = vld [vmem:[%s15853_s15 + $0x60] sm:$0xff] }
  0x53   :  { %1145 = vmatpush.bf16.msra.mxu0 %v14997_v55 }
  0x54   :  { %822 = vmatpush.bf16.msrb.mxu1 %v14953_v40 }
  0x55   :  { %1117 = vmatpush.bf16.msra.mxu2 %v14981_v49  ;;  %850 = vmatpush.bf16.msrb.mxu3 %v14969_v56 }
  0x57   :  { %1146 = vmatpush.bf16.msra.mxu0 %v14996_v59  ;;  %v15031_v59 = vld [vmem:[%s15831_s11 + $0x2b8] sm:$0xff] }
  0x58   :  { %823 = vmatpush.bf16.msrb.mxu1 %v14952_v45 }
  0x59   :  { %1118 = vmatpush.bf16.msra.mxu2 %v14980_v54  ;;  %851 = vmatpush.bf16.msrb.mxu3 %v14968_v60  ;;  %v15014_v54 = vld [vmem:[%s15831_s11 + $0x230] sm:$0xff] }
  0x5a   :  { %8988 = vperm.xlu0 %15633, %v8978_v37   ;;  %v14976_v37 = vld [vmem:[%s15831_s11 + $0x100] sm:$0xff] }
  0x5b   :  { %1147 = vmatpush.bf16.msra.mxu0 %v14995_v1  ;;  %v10308_v1 = vld [vmem:[%s15912_s20 + $0x28] sm:$0xff] }
  0x5c   :  { %1129 = vmatpush.bf16.msra.mxu1 %v14991_v48 }
  0x5d   :  { %1119 = vmatpush.bf16.msra.mxu2 %v14979_v58  ;;  %1157 = vmatpush.bf16.msra.mxu3 %v15007_v62 }
  0x5f   :  { %1148 = vmatpush.bf16.msra.mxu0 %v14994_v5  ;;  %v15012_v5 = vld [vmem:[%s15831_s11 + $0x220] sm:$0xff] }
  0x60   :  { %1130 = vmatpush.bf16.msra.mxu1 %v14990_v52 }
  0x61   :  { %1120 = vmatpush.bf16.msra.mxu2 %v14978_v0  ;;  %1158 = vmatpush.bf16.msra.mxu3 %v15006_v3  ;;  %v15013_v0 = vld [vmem:[%s15831_s11 + $0x228] sm:$0xff]  ;;  %v15022_v3 = vld [vmem:[%s15831_s11 + $0x270] sm:$0xff] }
  0x62   :  { %8021 = vperm.xlu0 %15633, %v7870_v11   ;;  %v14985_v11 = vld [vmem:[%s15831_s11 + $0x148] sm:$0xff] }
  0x63   :  { %1149 = vmatpush.bf16.msra.mxu0 %v14993_v10 }
  0x64   :  { %1131 = vmatpush.bf16.msra.mxu1 %v14989_v57 }
  0x65   :  { %1121 = vmatpush.bf16.msra.mxu2 %v14977_v4  ;;  %1159 = vmatpush.bf16.msra.mxu3 %v15005_v7  ;;  %v15029_v7 = vld [vmem:[%s15831_s11 + $0x2a8] sm:$0xff] }
  0x67   :  { %1150 = vmatpush.bf16.msra.mxu0 %v14992_v14  ;;  %v15028_v14 = vld [vmem:[%s15831_s11 + $0x2a0] sm:$0xff] }
  0x68   :  { %1132 = vmatpush.bf16.msra.mxu1 %v14988_v61  ;;  %v15023_v61 = vld [vmem:[%s15831_s11 + $0x278] sm:$0xff] }
  0x69   :  { %1122 = vmatpush.bf16.msra.mxu2 %v14976_v37  ;;  %1160 = vmatpush.bf16.msra.mxu3 %v15004_v12  ;;  %v15021_v37 = vld [vmem:[%s15831_s11 + $0x268] sm:$0xff] }
  0x6a   :  { %8026 = vperm.xlu0 %15633, %v7871_v18   ;;  %v9122_v18 = vld [vmem:[%s15853_s15 + $0x78] sm:$0xff] }
  0x6c   :  { %1133 = vmatpush.bf16.msra.mxu1 %v14987_v2  ;;  %v15030_v2 = vld [vmem:[%s15831_s11 + $0x2b0] sm:$0xff] }
  0x6d   :  { %1161 = vmatpush.bf16.msra.mxu3 %v15003_v16 }
  0x70   :  { %1134 = vmatpush.bf16.msra.mxu1 %v14986_v6 }
  0x71   :  { %1162 = vmatpush.bf16.msra.mxu3 %v15002_v19  ;;  %v15010_v19 = vld [vmem:[%s15831_s11 + $0x210] sm:$0xff] }
  0x72   :  { %9013 = vperm.xlu0 %15633, %v8983_v25   ;;  %v10303_v25 = vld [vmem:[%s15912_s20] sm:$0xff] }
  0x74   :  { %1135 = vmatpush.bf16.msra.mxu1 %v14985_v11  ;;  %v15011_v11 = vld [vmem:[%s15831_s11 + $0x218] sm:$0xff] }
  0x75   :  { %1163 = vmatpush.bf16.msra.mxu3 %v15001_v22  ;;  %v15019_v22 = vld [vmem:[%s15831_s11 + $0x258] sm:$0xff] }
  0x78   :  { %1136 = vmatpush.bf16.msra.mxu1 %v14984_v15 }
  0x79   :  { %1164 = vmatpush.bf16.msra.mxu3 %v15000_v26  ;;  %v15026_v26 = vld [vmem:[%s15831_s11 + $0x290] sm:$0xff] }
  0x7a   :  { %9304 = vperm.xlu0 %15633, %v9107_v32   ;;  %v15915_v20 = vpop.permute.xlu0 %201  ;;  %v9977_v32 = vld [vmem:[%s15922_s26 + $0x18] sm:$0xff] }
  0x82   :  { %9319 = vperm.xlu0 %15633, %v9110_v42  }
  0x83   :  { %v207_v30 = vpop.permute.xlu0 %206 }
  0x8a   :  { %9334 = vperm.xlu0 %15633, %v9113_v53  }
  0x90   :  { %v445_v13 = vpop.f32.mrf.mxu1 }
  0x92   :  { %9349 = vperm.xlu0 %15633, %v9116_v63  }
  0x97   :  { %v473_v8 = vpop.f32.mrf.mxu3 }
  0x98   :  { %v447_v21 = vpop.f32.mrf.mxu1 }
  0x9a   :  { %9364 = vperm.xlu0 %15633, %v9119_v9  }
  0x9f   :  { %v475_v17 = vpop.f32.mrf.mxu3 }
  0xa2   :  { %9379 = vperm.xlu0 %15633, %v9122_v18   ;;  %v15039_v18 = vld [vmem:[%s15831_s11 + $0x2f8] sm:$0xff] }
  0xa7   :  { %v501_v23 = vpop.f32.mrf.mxu3  ;;  %v431_v24 = vpop.f32.mrf.mxu0 }
  0xa8   :  { %v432_v27 = vadd.f32 %v431_v24, %v15915_v20  ;;  %v15009_v24 = vld [vmem:[%s15831_s11 + $0x208] sm:$0xff] }
  0xaa   :  { %10321 = vperm.xlu0 %15633, %v10303_v25   ;;  %v446_v33 = vadd.f32 %v445_v13, %v432_v27  ;;  %v10309_v13 = vld [vmem:[%s15912_s20 + $0x30] sm:$0xff]  ;;  %v9983_v25 = vld [vmem:[%s15922_s26 + $0x48] sm:$0xff] }
  0xab   :  { %v15018_v27 = vld [vmem:[%s15831_s11 + $0x250] sm:$0xff] }
  0xac   :  { %v534_v40 = vmax.f32 %v446_v33, 0.0  ;;  %v15036_v33 = vld [vmem:[%s15831_s11 + $0x2e0] sm:$0xff] }
  0xaf   :  { %v459_v29 = vpop.f32.mrf.mxu2  ;;  %v433_v31 = vpop.f32.mrf.mxu0 }
  0xb0   :  { %v487_v28 = vpop.f32.mrf.mxu1  ;;  %v434_v34 = vadd.f32 %v433_v31, %v207_v30  ;;  %v503_v35 = vpop.f32.mrf.mxu3  ;;  %v460_v39 = vadd.f32 %v459_v29, %v15915_v20  ;;  %v15008_v29 = vld [vmem:[%s15831_s11 + $0x200] sm:$0xff]  ;;  %v15025_v31 = vld [vmem:[%s15831_s11 + $0x288] sm:$0xff] }
  0xb1   :  { %v488_v36 = vadd.f32 %v487_v28, %v15915_v20  ;;  %v15037_v28 = vld [vmem:[%s15831_s11 + $0x2e8] sm:$0xff] }
  0xb2   :  { %v448_v38 = vadd.f32 %v447_v21, %v434_v34  ;;  %10208 = vperm.xlu0 %15633, %v9977_v32   ;;  %v474_v48 = vadd.f32 %v473_v8, %v460_v39  ;;  %v15027_v21 = vld [vmem:[%s15831_s11 + $0x298] sm:$0xff]  ;;  %v15017_v32 = vld [vmem:[%s15831_s11 + $0x248] sm:$0xff]  ;;  %v15046_v34 = vld [vmem:[%s15831_s11 + $0x330] sm:$0xff] }
  0xb3   :  { %v502_v44 = vadd.f32 %v501_v23, %v488_v36  ;;  %v15038_v23 = vld [vmem:[%s15831_s11 + $0x2f0] sm:$0xff]  ;;  %v15024_v36 = vld [vmem:[%s15831_s11 + $0x280] sm:$0xff]  ;;  %v15063_v39 = vld [vmem:[%s15831_s11 + $0x3b8] sm:$0xff] }
  0xb4   :  { %v538_v41 = vmax.f32 %v448_v38, 0.0  ;;  %v535_v57 = vmax.f32 %v474_v48, 0.0  ;;  %v15016_v38 = vld [vmem:[%s15831_s11 + $0x240] sm:$0xff] }
  0xb5   :  { %v536_v55 = vmax.f32 %v502_v44, 0.0  ;;  %v15054_v44 = vld [vmem:[%s15831_s11 + $0x370] sm:$0xff]  ;;  %v15044_v48 = vld [vmem:[%s15831_s11 + $0x320] sm:$0xff] }
  0xb6   :  { %v15930_v45 = vpack.c.bf16 %v538_v41, %v534_v40  ;;  %v15055_v40 = vld [vmem:[%s15831_s11 + $0x378] sm:$0xff] }
  0xb7   :  { %v461_v47 = vpop.f32.mrf.mxu2  ;;  %v15035_v41 = vld [vmem:[%s15831_s11 + $0x2d8] sm:$0xff] }
  0xb8   :  { %v489_v42 = vpop.f32.mrf.mxu1  ;;  %v462_v49 = vadd.f32 %v461_v47, %v207_v30  ;;  %810 = vmatmul.bf16.vlgmr.msrb.gmra.mxu2 %v15930_v45  ;;  %v10314_v47 = vld [vmem:[%s15912_s20 + $0x58] sm:$0xff] }
  0xb9   :  { %v490_v46 = vadd.f32 %v489_v42, %v207_v30  ;;  %1430 = vmatpush.bf16.msrb.mxu2 %v15015_v43  ;;  %v15045_v42 = vld [vmem:[%s15831_s11 + $0x328] sm:$0xff]  ;;  %v15062_v43 = vld [vmem:[%s15831_s11 + $0x3b0] sm:$0xff] }
  0xba   :  { %v476_v52 = vadd.f32 %v475_v17, %v462_v49  ;;  %10213 = vperm.xlu0 %15633, %v9978_v50   ;;  %v15020_v17 = vld [vmem:[%s15831_s11 + $0x260] sm:$0xff]  ;;  %v15061_v49 = vld [vmem:[%s15831_s11 + $0x3a8] sm:$0xff] }
  0xbb   :  { %v504_v51 = vadd.f32 %v503_v35, %v490_v46  ;;  %v9984_v35 = vld [vmem:[%s15922_s26 + $0x50] sm:$0xff]  ;;  %v15053_v50 = vld [vmem:[%s15831_s11 + $0x368] sm:$0xff] }
  0xbc   :  { %v539_v58 = vmax.f32 %v476_v52, 0.0  ;;  %v15034_v46 = vld [vmem:[%s15831_s11 + $0x2d0] sm:$0xff]  ;;  %v15043_v52 = vld [vmem:[%s15831_s11 + $0x318] sm:$0xff] }
  0xbd   :  { %v540_v56 = vmax.f32 %v504_v51, 0.0  ;;  %1431 = vmatpush.bf16.msrb.mxu2 %v15014_v54  ;;  %v15033_v51 = vld [vmem:[%s15831_s11 + $0x2c8] sm:$0xff]  ;;  %v15052_v54 = vld [vmem:[%s15831_s11 + $0x360] sm:$0xff] }
  0xbe   :  { %v15939_v62 = vpack.c.bf16 %v539_v58, %v535_v57  ;;  %v10315_v57 = vld [vmem:[%s15912_s20 + $0x60] sm:$0xff]  ;;  %v15042_v58 = vld [vmem:[%s15831_s11 + $0x310] sm:$0xff] }
  0xbf   :  { %v515_v53 = vpop.f32.mrf.mxu3  ;;  %v15936_v60 = vpack.c.bf16 %v540_v56, %v536_v55  ;;  %v15032_v55 = vld [vmem:[%s15831_s11 + $0x2c0] sm:$0xff]  ;;  %v15071_v56 = vld [vmem:[%s15831_s11 + $0x3f8] sm:$0xff] }
  0xc0   :  { %v529_v63 = vpop.f32.mrf.mxu1  ;;  %824 = vmatmul.bf16.vlgmr.msrb.gmra.mxu1 %v15939_v62  ;;  %v516_v6 = vadd.f32 %v515_v53, %v15915_v20  ;;  %v15060_v53 = vld [vmem:[%s15831_s11 + $0x3a0] sm:$0xff] }
  0xc1   :  { %838 = vmatmul.bf16.vlgmr.msrb.gmra.mxu0 %v15936_v60  ;;  %1444 = vmatpush.bf16.msrb.mxu1 %v15023_v61  ;;  %v15051_v61 = vld [vmem:[%s15831_s11 + $0x358] sm:$0xff] }
  0xc2   :  { %1458 = vmatpush.bf16.msrb.mxu0 %v15031_v59  ;;  %1432 = vmatpush.bf16.msrb.mxu2 %v15013_v0  ;;  %v530_v8 = vadd.f32 %v529_v63, %v516_v6  ;;  %v15059_v59 = vld [vmem:[%s15831_s11 + $0x398] sm:$0xff]  ;;  %v15070_v63 = vld [vmem:[%s15831_s11 + $0x3f0] sm:$0xff]  ;;  %v15041_v0 = vld [vmem:[%s15831_s11 + $0x308] sm:$0xff] }
  0xc3   :  { %10346 = vperm.xlu0 %15633, %v10308_v1   ;;  %v15058_v1 = vld [vmem:[%s15831_s11 + $0x390] sm:$0xff]  ;;  %v15057_v6 = vld [vmem:[%s15831_s11 + $0x388] sm:$0xff] }
  0xc4   :  { %v537_v15 = vmax.f32 %v530_v8, 0.0  ;;  %v15049_v8 = vld [vmem:[%s15831_s11 + $0x348] sm:$0xff] }
  0xc5   :  { %1445 = vmatpush.bf16.msrb.mxu1 %v15022_v3  ;;  %v15069_v3 = vld [vmem:[%s15831_s11 + $0x3e8] sm:$0xff] }
  0xc6   :  { %1459 = vmatpush.bf16.msrb.mxu0 %v15030_v2  ;;  %1433 = vmatpush.bf16.msrb.mxu2 %v15012_v5  ;;  %v15050_v2 = vld [vmem:[%s15831_s11 + $0x350] sm:$0xff]  ;;  %v15040_v5 = vld [vmem:[%s15831_s11 + $0x300] sm:$0xff] }
  0xc7   :  { %v517_v4 = vpop.f32.mrf.mxu3 }
  0xc8   :  { %v518_v9 = vadd.f32 %v517_v4, %v207_v30  ;;  %v531_v10 = vpop.f32.mrf.mxu1  ;;  %1123 = vmatmul.bf16.vlgmr.msra.gmra.mxu2 %v15930_v45  ;;  %v15047_v30 = vld [vmem:[%s15831_s11 + $0x338] sm:$0xff] }
  0xc9   :  { %1446 = vmatpush.bf16.msrb.mxu1 %v15021_v37  ;;  %v9989_v4 = vld [vmem:[%s15922_s26 + $0x78] sm:$0xff]  ;;  %v15056_v37 = vld [vmem:[%s15831_s11 + $0x380] sm:$0xff] }
  0xca   :  { %v532_v12 = vadd.f32 %v531_v10, %v518_v9  ;;  %1460 = vmatpush.bf16.msrb.mxu0 %v15029_v7  ;;  %1434 = vmatpush.bf16.msrb.mxu2 %v15011_v11  ;;  %v15079_v7 = vld [vmem:[%s15831_s11 + $0x438] sm:$0xff]  ;;  %v15068_v9 = vld [vmem:[%s15831_s11 + $0x3e0] sm:$0xff]  ;;  %v15078_v10 = vld [vmem:[%s15831_s11 + $0x430] sm:$0xff] }
  0xcb   :  { %10351 = vperm.xlu0 %15633, %v10309_v13   ;;  %v15048_v11 = vld [vmem:[%s15831_s11 + $0x340] sm:$0xff]  ;;  %v15087_v13 = vld [vmem:[%s15831_s11 + $0x478] sm:$0xff] }
  0xcc   :  { %v541_v16 = vmax.f32 %v532_v12, 0.0  ;;  %v15095_v12 = vld [vmem:[%s15831_s11 + $0x4b8] sm:$0xff] }
  0xcd   :  { %1447 = vmatpush.bf16.msrb.mxu1 %v15020_v17  ;;  %v15094_v17 = vld [vmem:[%s15831_s11 + $0x4b0] sm:$0xff] }
  0xce   :  { %v15958_v20 = vpack.c.bf16 %v541_v16, %v537_v15  ;;  %1461 = vmatpush.bf16.msrb.mxu0 %v15028_v14  ;;  %1435 = vmatpush.bf16.msrb.mxu2 %v15010_v19  ;;  %v15067_v14 = vld [vmem:[%s15831_s11 + $0x3d8] sm:$0xff]  ;;  %v10631_v15 = vld [vmem:[%s16016_s1] sm:$0xff]  ;;  %v15077_v16 = vld [vmem:[%s15831_s11 + $0x428] sm:$0xff] }
  0xcf   :  { %v15066_v19 = vld [vmem:[%s15831_s11 + $0x3d0] sm:$0xff] }
  0xd0   :  { %852 = vmatmul.bf16.vlgmr.msrb.gmra.mxu3 %v15958_v20  ;;  %1137 = vmatmul.bf16.vlgmr.msra.gmra.mxu1 %v15939_v62 }
  0xd1   :  { %1472 = vmatpush.bf16.msrb.mxu3 %v15039_v18  ;;  %1151 = vmatmul.bf16.vlgmr.msra.gmra.mxu0 %v15936_v60  ;;  %v15086_v18 = vld [vmem:[%s15831_s11 + $0x470] sm:$0xff] }
  0xd2   :  { %1462 = vmatpush.bf16.msrb.mxu0 %v15027_v21  ;;  %1448 = vmatpush.bf16.msrb.mxu1 %v15019_v22  ;;  %v15076_v21 = vld [vmem:[%s15831_s11 + $0x420] sm:$0xff]  ;;  %v15093_v22 = vld [vmem:[%s15831_s11 + $0x4a8] sm:$0xff] }
  0xd3   :  { %1436 = vmatpush.bf16.msrb.mxu2 %v15009_v24  ;;  %10238 = vperm.xlu0 %15633, %v9983_v25   ;;  %v15065_v24 = vld [vmem:[%s15831_s11 + $0x3c8] sm:$0xff]  ;;  %v15075_v25 = vld [vmem:[%s15831_s11 + $0x418] sm:$0xff] }
  0xd5   :  { %1473 = vmatpush.bf16.msrb.mxu3 %v15038_v23  ;;  %v15085_v23 = vld [vmem:[%s15831_s11 + $0x468] sm:$0xff] }
  0xd6   :  { %1463 = vmatpush.bf16.msrb.mxu0 %v15026_v26  ;;  %1449 = vmatpush.bf16.msrb.mxu1 %v15018_v27  ;;  %v15092_v26 = vld [vmem:[%s15831_s11 + $0x4a0] sm:$0xff] }
  0xd7   :  { %1437 = vmatpush.bf16.msrb.mxu2 %v15008_v29  ;;  %v15084_v27 = vld [vmem:[%s15831_s11 + $0x460] sm:$0xff]  ;;  %v15103_v29 = vld [vmem:[%s15831_s11 + $0x4f8] sm:$0xff] }
  0xd9   :  { %1474 = vmatpush.bf16.msrb.mxu3 %v15037_v28  ;;  %v15064_v28 = vld [vmem:[%s15831_s11 + $0x3c0] sm:$0xff] }
  0xda   :  { %1464 = vmatpush.bf16.msrb.mxu0 %v15025_v31  ;;  %1450 = vmatpush.bf16.msrb.mxu1 %v15017_v32  ;;  %v15091_v31 = vld [vmem:[%s15831_s11 + $0x498] sm:$0xff] }
  0xdb   :  { %1745 = vmatpush.bf16.msra.mxu2 %v15047_v30  ;;  %10243 = vperm.xlu0 %15633, %v9984_v35   ;;  %v15074_v30 = vld [vmem:[%s15831_s11 + $0x410] sm:$0xff]  ;;  %v15083_v32 = vld [vmem:[%s15831_s11 + $0x458] sm:$0xff] }
  0xdc   :  { %1438 = vmatmul.bf16.vlgmr.msrb.gmra.mxu2 %v15930_v45  ;;  %v15090_v35 = vld [vmem:[%s15831_s11 + $0x490] sm:$0xff] }
  0xdd   :  { %1475 = vmatpush.bf16.msrb.mxu3 %v15036_v33  ;;  %v15102_v33 = vld [vmem:[%s15831_s11 + $0x4f0] sm:$0xff] }
  0xde   :  { %1465 = vmatpush.bf16.msrb.mxu0 %v15024_v36  ;;  %1451 = vmatpush.bf16.msrb.mxu1 %v15016_v38  ;;  %v15082_v36 = vld [vmem:[%s15831_s11 + $0x450] sm:$0xff]  ;;  %v15101_v38 = vld [vmem:[%s15831_s11 + $0x4e8] sm:$0xff] }
  0xdf   :  { %1746 = vmatpush.bf16.msra.mxu2 %v15046_v34  ;;  %v15073_v34 = vld [vmem:[%s15831_s11 + $0x408] sm:$0xff] }
  0xe0   :  { %1165 = vmatmul.bf16.vlgmr.msra.gmra.mxu3 %v15958_v20 }
  0xe1   :  { %1476 = vmatpush.bf16.msrb.mxu3 %v15035_v41  ;;  %1466 = vmatmul.bf16.vlgmr.msrb.gmra.mxu0 %v15936_v60  ;;  %v15111_v41 = vld [vmem:[%s15831_s11 + $0x538] sm:$0xff] }
  0xe2   :  { %1773 = vmatpush.bf16.msra.mxu0 %v15063_v39  ;;  %1759 = vmatpush.bf16.msra.mxu1 %v15055_v40  ;;  %v15072_v39 = vld [vmem:[%s15831_s11 + $0x400] sm:$0xff]  ;;  %v15089_v40 = vld [vmem:[%s15831_s11 + $0x488] sm:$0xff] }
  0xe3   :  { %1747 = vmatpush.bf16.msra.mxu2 %v15045_v42  ;;  %1452 = vmatmul.bf16.vlgmr.msrb.gmra.mxu1 %v15939_v62  ;;  %v15081_v42 = vld [vmem:[%s15831_s11 + $0x448] sm:$0xff] }
  0xe4   :  { %10376 = vperm.xlu0 %15633, %v10314_v47   ;;  %v15080_v47 = vld [vmem:[%s15831_s11 + $0x440] sm:$0xff] }
  0xe5   :  { %1477 = vmatpush.bf16.msrb.mxu3 %v15034_v46  ;;  %v15110_v46 = vld [vmem:[%s15831_s11 + $0x530] sm:$0xff] }
  0xe6   :  { %1774 = vmatpush.bf16.msra.mxu0 %v15062_v43  ;;  %1760 = vmatpush.bf16.msra.mxu1 %v15054_v44  ;;  %v15100_v43 = vld [vmem:[%s15831_s11 + $0x4e0] sm:$0xff] }
  0xe7   :  { %1748 = vmatpush.bf16.msra.mxu2 %v15044_v48  ;;  %v15088_v44 = vld [vmem:[%s15831_s11 + $0x480] sm:$0xff]  ;;  %v15127_v48 = vld [vmem:[%s15831_s11 + $0x5b8] sm:$0xff] }
  0xe9   :  { %1478 = vmatpush.bf16.msrb.mxu3 %v15033_v51  ;;  %v15109_v51 = vld [vmem:[%s15831_s11 + $0x528] sm:$0xff] }
  0xea   :  { %1775 = vmatpush.bf16.msra.mxu0 %v15061_v49  ;;  %1761 = vmatpush.bf16.msra.mxu1 %v15053_v50  ;;  %v15119_v49 = vld [vmem:[%s15831_s11 + $0x578] sm:$0xff] }
  0xeb   :  { %1749 = vmatpush.bf16.msra.mxu2 %v15043_v52  ;;  %v15099_v50 = vld [vmem:[%s15831_s11 + $0x4d8] sm:$0xff]  ;;  %v15126_v52 = vld [vmem:[%s15831_s11 + $0x5b0] sm:$0xff] }
  0xec   :  { %10381 = vperm.xlu0 %15633, %v10315_v57   ;;  %v15117_v57 = vld [vmem:[%s15831_s11 + $0x568] sm:$0xff] }
  0xed   :  { %1479 = vmatpush.bf16.msrb.mxu3 %v15032_v55  ;;  %v15108_v55 = vld [vmem:[%s15831_s11 + $0x520] sm:$0xff] }
  0xee   :  { %1776 = vmatpush.bf16.msra.mxu0 %v15060_v53  ;;  %1762 = vmatpush.bf16.msra.mxu1 %v15052_v54  ;;  %v15118_v53 = vld [vmem:[%s15831_s11 + $0x570] sm:$0xff] }
  0xef   :  { %1750 = vmatpush.bf16.msra.mxu2 %v15042_v58  ;;  %v15098_v54 = vld [vmem:[%s15831_s11 + $0x4d0] sm:$0xff]  ;;  %v15097_v58 = vld [vmem:[%s15831_s11 + $0x4c8] sm:$0xff] }
  0xf0   :  { %1480 = vmatmul.bf16.vlgmr.msrb.gmra.mxu3 %v15958_v20 }
  0xf1   :  { %1787 = vmatpush.bf16.msra.mxu3 %v15071_v56  ;;  %v15125_v56 = vld [vmem:[%s15831_s11 + $0x5a8] sm:$0xff] }
  0xf2   :  { %1777 = vmatpush.bf16.msra.mxu0 %v15059_v59  ;;  %1763 = vmatpush.bf16.msra.mxu1 %v15051_v61  ;;  %v15107_v59 = vld [vmem:[%s15831_s11 + $0x518] sm:$0xff]  ;;  %v15124_v61 = vld [vmem:[%s15831_s11 + $0x5a0] sm:$0xff] }
  0xf3   :  { %1751 = vmatpush.bf16.msra.mxu2 %v15041_v0  ;;  %v15096_v0 = vld [vmem:[%s15831_s11 + $0x4c0] sm:$0xff] }
  0xf4   :  { %10268 = vperm.xlu0 %15633, %v9989_v4   ;;  %v15115_v4 = vld [vmem:[%s15831_s11 + $0x558] sm:$0xff] }
  0xf5   :  { %1788 = vmatpush.bf16.msra.mxu3 %v15070_v63  ;;  %v15116_v63 = vld [vmem:[%s15831_s11 + $0x560] sm:$0xff] }
  0xf6   :  { %1778 = vmatpush.bf16.msra.mxu0 %v15058_v1  ;;  %1764 = vmatpush.bf16.msra.mxu1 %v15050_v2  ;;  %v15135_v1 = vld [vmem:[%s15831_s11 + $0x5f8] sm:$0xff]  ;;  %v15106_v2 = vld [vmem:[%s15831_s11 + $0x510] sm:$0xff] }
  0xf7   :  { %1752 = vmatpush.bf16.msra.mxu2 %v15040_v5  ;;  %v15134_v5 = vld [vmem:[%s15831_s11 + $0x5f0] sm:$0xff] }
  0xf9   :  { %1789 = vmatpush.bf16.msra.mxu3 %v15069_v3  ;;  %v15123_v3 = vld [vmem:[%s15831_s11 + $0x598] sm:$0xff] }
  0xfa   :  { %1779 = vmatpush.bf16.msra.mxu0 %v15057_v6  ;;  %1765 = vmatpush.bf16.msra.mxu1 %v15049_v8  ;;  %v15105_v6 = vld [vmem:[%s15831_s11 + $0x508] sm:$0xff]  ;;  %v15114_v8 = vld [vmem:[%s15831_s11 + $0x550] sm:$0xff] }
  0xfb   :  { %2060 = vmatpush.bf16.msrb.mxu2 %v15079_v7  ;;  %v15122_v7 = vld [vmem:[%s15831_s11 + $0x590] sm:$0xff] }
  0xfc   :  { %1753 = vmatmul.bf16.vlgmr.msra.gmra.mxu2 %v15930_v45  ;;  %10635 = vperm.xlu0 %15633, %v10631_v15   ;;  %v15142_v15 = vld [vmem:[%s15831_s11 + $0x630] sm:$0xff] }
  0xfd   :  { %1790 = vmatpush.bf16.msra.mxu3 %v15068_v9  ;;  %v15133_v9 = vld [vmem:[%s15831_s11 + $0x5e8] sm:$0xff] }
  0xfe   :  { %1780 = vmatpush.bf16.msra.mxu0 %v15056_v37  ;;  %1766 = vmatpush.bf16.msra.mxu1 %v15048_v11  ;;  %v15104_v37 = vld [vmem:[%s15831_s11 + $0x500] sm:$0xff]  ;;  %v15143_v11 = vld [vmem:[%s15831_s11 + $0x638] sm:$0xff] }
  0xff   :  { %2061 = vmatpush.bf16.msrb.mxu2 %v15078_v10  ;;  %v15121_v10 = vld [vmem:[%s15831_s11 + $0x588] sm:$0xff] }
 0x101   :  { %1791 = vmatpush.bf16.msra.mxu3 %v15067_v14  ;;  %1781 = vmatmul.bf16.vlgmr.msra.gmra.mxu0 %v15936_v60  ;;  %v15120_v14 = vld [vmem:[%s15831_s11 + $0x580] sm:$0xff] }
 0x102   :  { %2088 = vmatpush.bf16.msrb.mxu0 %v15095_v12  ;;  %2074 = vmatpush.bf16.msrb.mxu1 %v15087_v13  ;;  %v15113_v12 = vld [vmem:[%s15831_s11 + $0x548] sm:$0xff]  ;;  %v15132_v13 = vld [vmem:[%s15831_s11 + $0x5e0] sm:$0xff] }
 0x103   :  { %1767 = vmatmul.bf16.vlgmr.msra.gmra.mxu1 %v15939_v62  ;;  %2062 = vmatpush.bf16.msrb.mxu2 %v15077_v16  ;;  %v15112_v16 = vld [vmem:[%s15831_s11 + $0x540] sm:$0xff] }
 0x105   :  { %1792 = vmatpush.bf16.msra.mxu3 %v15066_v19  ;;  %v15131_v19 = vld [vmem:[%s15831_s11 + $0x5d8] sm:$0xff] }
 0x106   :  { %2089 = vmatpush.bf16.msrb.mxu0 %v15094_v17  ;;  %2075 = vmatpush.bf16.msrb.mxu1 %v15086_v18  ;;  %v15159_v17 = vld [vmem:[%s15831_s11 + $0x6b8] sm:$0xff] }
 0x107   :  { %2063 = vmatpush.bf16.msrb.mxu2 %v15076_v21  ;;  %v15151_v18 = vld [vmem:[%s15831_s11 + $0x678] sm:$0xff]  ;;  %v15141_v21 = vld [vmem:[%s15831_s11 + $0x628] sm:$0xff] }
 0x109   :  { %1793 = vmatpush.bf16.msra.mxu3 %v15065_v24  ;;  %v15130_v24 = vld [vmem:[%s15831_s11 + $0x5d0] sm:$0xff] }
 0x10a   :  { %2090 = vmatpush.bf16.msrb.mxu0 %v15093_v22  ;;  %2076 = vmatpush.bf16.msrb.mxu1 %v15085_v23  ;;  %v15158_v22 = vld [vmem:[%s15831_s11 + $0x6b0] sm:$0xff] }
 0x10b   :  { %2064 = vmatpush.bf16.msrb.mxu2 %v15075_v25  ;;  %v15150_v23 = vld [vmem:[%s15831_s11 + $0x670] sm:$0xff]  ;;  %v15140_v25 = vld [vmem:[%s15831_s11 + $0x620] sm:$0xff] }
 0x10d   :  { %1794 = vmatpush.bf16.msra.mxu3 %v15064_v28  ;;  %v15129_v28 = vld [vmem:[%s15831_s11 + $0x5c8] sm:$0xff] }
 0x10e   :  { %2091 = vmatpush.bf16.msrb.mxu0 %v15092_v26  ;;  %2077 = vmatpush.bf16.msrb.mxu1 %v15084_v27  ;;  %v15157_v26 = vld [vmem:[%s15831_s11 + $0x6a8] sm:$0xff] }
 0x10f   :  { %2065 = vmatpush.bf16.msrb.mxu2 %v15074_v30  ;;  %v15149_v27 = vld [vmem:[%s15831_s11 + $0x668] sm:$0xff] }
 0x110   :  { %1795 = vmatmul.bf16.vlgmr.msra.gmra.mxu3 %v15958_v20 }
 0x111   :  { %2102 = vmatpush.bf16.msrb.mxu3 %v15103_v29  ;;  %v15139_v29 = vld [vmem:[%s15831_s11 + $0x618] sm:$0xff] }
 0x112   :  { %2092 = vmatpush.bf16.msrb.mxu0 %v15091_v31  ;;  %2078 = vmatpush.bf16.msrb.mxu1 %v15083_v32  ;;  %v15156_v32 = vld [vmem:[%s15831_s11 + $0x6a0] sm:$0xff] }
 0x113   :  { %2066 = vmatpush.bf16.msrb.mxu2 %v15073_v34  ;;  %v15148_v34 = vld [vmem:[%s15831_s11 + $0x660] sm:$0xff] }
 0x115   :  { %2103 = vmatpush.bf16.msrb.mxu3 %v15102_v33 }
 0x116   :  { %2093 = vmatpush.bf16.msrb.mxu0 %v15090_v35  ;;  %2079 = vmatpush.bf16.msrb.mxu1 %v15082_v36  ;;  %v15128_v36 = vld [vmem:[%s15831_s11 + $0x5c0] sm:$0xff] }
 0x117   :  { %2067 = vmatpush.bf16.msrb.mxu2 %v15072_v39  ;;  %v15138_v39 = vld [vmem:[%s15831_s11 + $0x610] sm:$0xff] }
 0x119   :  { %2104 = vmatpush.bf16.msrb.mxu3 %v15101_v38  ;;  %v15167_v38 = vld [vmem:[%s15831_s11 + $0x6f8] sm:$0xff] }
 0x11a   :  { %2094 = vmatpush.bf16.msrb.mxu0 %v15089_v40  ;;  %2080 = vmatpush.bf16.msrb.mxu1 %v15081_v42  ;;  %v15155_v40 = vld [vmem:[%s15831_s11 + $0x698] sm:$0xff] }
 0x11b   :  { %2375 = vmatpush.bf16.msra.mxu2 %v15111_v41  ;;  %v15147_v42 = vld [vmem:[%s15831_s11 + $0x658] sm:$0xff] }
 0x11c   :  { %2068 = vmatmul.bf16.vlgmr.msrb.gmra.mxu2 %v15930_v45 }
 0x11d   :  { %2105 = vmatpush.bf16.msrb.mxu3 %v15100_v43  ;;  %v15166_v43 = vld [vmem:[%s15831_s11 + $0x6f0] sm:$0xff] }
 0x11e   :  { %2095 = vmatpush.bf16.msrb.mxu0 %v15088_v44  ;;  %2081 = vmatpush.bf16.msrb.mxu1 %v15080_v47  ;;  %v15137_v44 = vld [vmem:[%s15831_s11 + $0x608] sm:$0xff] }
 0x11f   :  { %2376 = vmatpush.bf16.msra.mxu2 %v15110_v46 }
 0x121   :  { %2106 = vmatpush.bf16.msrb.mxu3 %v15099_v50  ;;  %2096 = vmatmul.bf16.vlgmr.msrb.gmra.mxu0 %v15936_v60  ;;  %v15146_v50 = vld [vmem:[%s15831_s11 + $0x650] sm:$0xff] }
 0x122   :  { %2403 = vmatpush.bf16.msra.mxu0 %v15127_v48  ;;  %2389 = vmatpush.bf16.msra.mxu1 %v15119_v49  ;;  %v15154_v48 = vld [vmem:[%s15831_s11 + $0x690] sm:$0xff] }
 0x123   :  { %2082 = vmatmul.bf16.vlgmr.msrb.gmra.mxu1 %v15939_v62  ;;  %2377 = vmatpush.bf16.msra.mxu2 %v15109_v51  ;;  %v15165_v51 = vld [vmem:[%s15831_s11 + $0x6e8] sm:$0xff] }
 0x125   :  { %2107 = vmatpush.bf16.msrb.mxu3 %v15098_v54  ;;  %v15175_v54 = vld [vmem:[%s15831_s11 + $0x738] sm:$0xff] }
 0x126   :  { %2404 = vmatpush.bf16.msra.mxu0 %v15126_v52  ;;  %2390 = vmatpush.bf16.msra.mxu1 %v15118_v53  ;;  %v15136_v52 = vld [vmem:[%s15831_s11 + $0x600] sm:$0xff]  ;;  %v15153_v53 = vld [vmem:[%s15831_s11 + $0x688] sm:$0xff] }
 0x127   :  { %2378 = vmatpush.bf16.msra.mxu2 %v15108_v55  ;;  %v15145_v55 = vld [vmem:[%s15831_s11 + $0x648] sm:$0xff] }
 0x129   :  { %2108 = vmatpush.bf16.msrb.mxu3 %v15097_v58 }
 0x12a   :  { %2405 = vmatpush.bf16.msra.mxu0 %v15125_v56  ;;  %2391 = vmatpush.bf16.msra.mxu1 %v15117_v57  ;;  %v15164_v56 = vld [vmem:[%s15831_s11 + $0x6e0] sm:$0xff] }
 0x12b   :  { %2379 = vmatpush.bf16.msra.mxu2 %v15107_v59  ;;  %v15152_v59 = vld [vmem:[%s15831_s11 + $0x680] sm:$0xff] }
 0x12d   :  { %2109 = vmatpush.bf16.msrb.mxu3 %v15096_v0  ;;  %v15144_v0 = vld [vmem:[%s15831_s11 + $0x640] sm:$0xff] }
 0x12e   :  { %2406 = vmatpush.bf16.msra.mxu0 %v15124_v61  ;;  %2392 = vmatpush.bf16.msra.mxu1 %v15116_v63  ;;  %v15174_v61 = vld [vmem:[%s15831_s11 + $0x730] sm:$0xff] }
 0x12f   :  { %2380 = vmatpush.bf16.msra.mxu2 %v15106_v2 }
 0x130   :  { %2110 = vmatmul.bf16.vlgmr.msrb.gmra.mxu3 %v15958_v20 }
 0x131   :  { %2417 = vmatpush.bf16.msra.mxu3 %v15135_v1  ;;  %v15191_v1 = vld [vmem:[%s15831_s11 + $0x7b8] sm:$0xff] }
 0x132   :  { %2407 = vmatpush.bf16.msra.mxu0 %v15123_v3  ;;  %2393 = vmatpush.bf16.msra.mxu1 %v15115_v4  ;;  %v15183_v3 = vld [vmem:[%s15831_s11 + $0x778] sm:$0xff] }
 0x133   :  { %2381 = vmatpush.bf16.msra.mxu2 %v15105_v6  ;;  %v15163_v4 = vld [vmem:[%s15831_s11 + $0x6d8] sm:$0xff]  ;;  %v15173_v6 = vld [vmem:[%s15831_s11 + $0x728] sm:$0xff] }
 0x135   :  { %2418 = vmatpush.bf16.msra.mxu3 %v15134_v5 }
 0x136   :  { %2408 = vmatpush.bf16.msra.mxu0 %v15122_v7  ;;  %2394 = vmatpush.bf16.msra.mxu1 %v15114_v8 }
 0x137   :  { %2382 = vmatpush.bf16.msra.mxu2 %v15104_v37  ;;  %v15182_v37 = vld [vmem:[%s15831_s11 + $0x770] sm:$0xff] }
 0x139   :  { %2419 = vmatpush.bf16.msra.mxu3 %v15133_v9  ;;  %v15190_v9 = vld [vmem:[%s15831_s11 + $0x7b0] sm:$0xff] }
 0x13a   :  { %2409 = vmatpush.bf16.msra.mxu0 %v15121_v10  ;;  %2395 = vmatpush.bf16.msra.mxu1 %v15113_v12  ;;  %v15162_v10 = vld [vmem:[%s15831_s11 + $0x6d0] sm:$0xff]  ;;  %v15172_v12 = vld [vmem:[%s15831_s11 + $0x720] sm:$0xff] }
 0x13b   :  { %2690 = vmatpush.bf16.msrb.mxu2 %v15143_v11  ;;  %v811_v31 = vpop.f32.mrf.mxu2 }
 0x13c   :  { %2383 = vmatmul.bf16.vlgmr.msra.gmra.mxu2 %v15930_v45 }
 0x13d   :  { %2420 = vmatpush.bf16.msra.mxu3 %v15132_v13  ;;  %v825_v33 = vpop.f32.mrf.mxu1 }
 0x13e   :  { %2410 = vmatpush.bf16.msra.mxu0 %v15120_v14  ;;  %2396 = vmatpush.bf16.msra.mxu1 %v15112_v16  ;;  %v839_v30 = vpop.f32.mrf.mxu0  ;;  %v826_v35 = vadd.f32 %v825_v33, %v811_v31  ;;  %v15181_v16 = vld [vmem:[%s15831_s11 + $0x768] sm:$0xff] }
 0x13f   :  { %2691 = vmatpush.bf16.msrb.mxu2 %v15142_v15  ;;  %v15189_v15 = vld [vmem:[%s15831_s11 + $0x7a8] sm:$0xff] }
 0x140   :  { %v840_v41 = vadd.f32 %v839_v30, %v826_v35  ;;  %v15179_v30 = vld [vmem:[%s15831_s11 + $0x758] sm:$0xff]  ;;  %v15169_v33 = vld [vmem:[%s15831_s11 + $0x708] sm:$0xff] }
 0x141   :  { %2421 = vmatpush.bf16.msra.mxu3 %v15131_v19  ;;  %2411 = vmatmul.bf16.vlgmr.msra.gmra.mxu0 %v15936_v60  ;;  %v15171_v19 = vld [vmem:[%s15831_s11 + $0x718] sm:$0xff] }
 0x142   :  { %2718 = vmatpush.bf16.msrb.mxu0 %v15159_v17  ;;  %2704 = vmatpush.bf16.msrb.mxu1 %v15151_v18  ;;  %v15161_v17 = vld [vmem:[%s15831_s11 + $0x6c8] sm:$0xff] }
 0x143   :  { %2397 = vmatmul.bf16.vlgmr.msra.gmra.mxu1 %v15939_v62  ;;  %2692 = vmatpush.bf16.msrb.mxu2 %v15141_v21  ;;  %v16124_v47 = vpop.f32.mrf.mxu2  ;;  %v15188_v21 = vld [vmem:[%s15831_s11 + $0x7a0] sm:$0xff] }
 0x145   :  { %2422 = vmatpush.bf16.msra.mxu3 %v15130_v24  ;;  %v16128_v49 = vpop.f32.mrf.mxu1 }
 0x146   :  { %2719 = vmatpush.bf16.msrb.mxu0 %v15158_v22  ;;  %2705 = vmatpush.bf16.msrb.mxu1 %v15150_v23  ;;  %v16122_v46 = vpop.f32.mrf.mxu0  ;;  %v15180_v22 = vld [vmem:[%s15831_s11 + $0x760] sm:$0xff] }
 0x147   :  { %2693 = vmatpush.bf16.msrb.mxu2 %v15140_v25  ;;  %v15160_v23 = vld [vmem:[%s15831_s11 + $0x6c0] sm:$0xff]  ;;  %v15199_v25 = vld [vmem:[%s15831_s11 + $0x7f8] sm:$0xff] }
 0x149   :  { %2423 = vmatpush.bf16.msra.mxu3 %v15129_v28  ;;  %v15187_v28 = vld [vmem:[%s15831_s11 + $0x798] sm:$0xff] }
 0x14a   :  { %2720 = vmatpush.bf16.msrb.mxu0 %v15157_v26  ;;  %2706 = vmatpush.bf16.msrb.mxu1 %v15149_v27  ;;  %v15170_v26 = vld [vmem:[%s15831_s11 + $0x710] sm:$0xff] }
 0x14b   :  { %2694 = vmatpush.bf16.msrb.mxu2 %v15139_v29  ;;  %v1124_v58 = vpop.f32.mrf.mxu2 }
 0x14d   :  { %2424 = vmatpush.bf16.msra.mxu3 %v15128_v36  ;;  %v1138_v63 = vpop.f32.mrf.mxu1  ;;  %v15186_v36 = vld [vmem:[%s15831_s11 + $0x790] sm:$0xff] }
 0x14e   :  { %2721 = vmatpush.bf16.msrb.mxu0 %v15156_v32  ;;  %2707 = vmatpush.bf16.msrb.mxu1 %v15148_v34  ;;  %v1152_v57 = vpop.f32.mrf.mxu0  ;;  %v1139_v2 = vadd.f32 %v1138_v63, %v1124_v58  ;;  %v15198_v32 = vld [vmem:[%s15831_s11 + $0x7f0] sm:$0xff]  ;;  %v15205_v58 = vld [vmem:[%s15831_s11 + $0x828] sm:$0xff] }
 0x14f   :  { %2695 = vmatpush.bf16.msrb.mxu2 %v15138_v39  ;;  %v15178_v39 = vld [vmem:[%s15831_s11 + $0x750] sm:$0xff] }
 0x150   :  { %2425 = vmatmul.bf16.vlgmr.msra.gmra.mxu3 %v15958_v20  ;;  %v1153_v7 = vadd.f32 %v1152_v57, %v1139_v2  ;;  %v15195_v57 = vld [vmem:[%s15831_s11 + $0x7d8] sm:$0xff]  ;;  %v15194_v63 = vld [vmem:[%s15831_s11 + $0x7d0] sm:$0xff] }
 0x151   :  { %2732 = vmatpush.bf16.msrb.mxu3 %v15167_v38 }
 0x152   :  { %2722 = vmatpush.bf16.msrb.mxu0 %v15155_v40  ;;  %2708 = vmatpush.bf16.msrb.mxu1 %v15147_v42  ;;  %v15168_v42 = vld [vmem:[%s15831_s11 + $0x700] sm:$0xff] }
 0x153   :  { %2696 = vmatpush.bf16.msrb.mxu2 %v15137_v44  ;;  %v853_v5 = vpop.f32.mrf.mxu3  ;;  %v16152_v11 = vpop.f32.mrf.mxu2  ;;  %v15207_v44 = vld [vmem:[%s15831_s11 + $0x838] sm:$0xff] }
 0x154   :  { %v16145_v8 = vadd.f32 %v853_v5, %v840_v41  ;;  %v15197_v41 = vld [vmem:[%s15831_s11 + $0x7e8] sm:$0xff] }
 0x155   :  { %2733 = vmatpush.bf16.msrb.mxu3 %v15166_v43  ;;  %v16157_v14 = vpop.f32.mrf.mxu1  ;;  %v15185_v43 = vld [vmem:[%s15831_s11 + $0x788] sm:$0xff] }
 0x156   :  { %2723 = vmatpush.bf16.msrb.mxu0 %v15154_v48  ;;  %2709 = vmatpush.bf16.msrb.mxu1 %v15146_v50  ;;  %v16155_v13 = vpop.f32.mrf.mxu0  ;;  %v15177_v48 = vld [vmem:[%s15831_s11 + $0x748] sm:$0xff]  ;;  %v15196_v50 = vld [vmem:[%s15831_s11 + $0x7e0] sm:$0xff] }
 0x157   :  { %2697 = vmatpush.bf16.msrb.mxu2 %v15136_v52  ;;  %v15184_v52 = vld [vmem:[%s15831_s11 + $0x780] sm:$0xff]  ;;  %v15221_v5 = vld [vmem:[%s15831_s11 + $0x8a8] sm:$0xff] }
 0x159   :  { %2734 = vmatpush.bf16.msrb.mxu3 %v15165_v51 }
 0x15a   :  { %2724 = vmatpush.bf16.msrb.mxu0 %v15153_v53  ;;  %2710 = vmatpush.bf16.msrb.mxu1 %v15145_v55  ;;  %v15206_v53 = vld [vmem:[%s15831_s11 + $0x830] sm:$0xff]  ;;  %v15223_v55 = vld [vmem:[%s15831_s11 + $0x8b8] sm:$0xff] }
 0x15b   :  { %3005 = vmatpush.bf16.msra.mxu2 %v15175_v54  ;;  %v16162_v18 = vpop.f32.mrf.mxu3  ;;  %v15176_v54 = vld [vmem:[%s15831_s11 + $0x740] sm:$0xff] }
 0x15c   :  { %2698 = vmatmul.bf16.vlgmr.msrb.gmra.mxu2 %v15930_v45 }
 0x15d   :  { %2735 = vmatpush.bf16.msrb.mxu3 %v15164_v56  ;;  %v15215_v56 = vld [vmem:[%s15831_s11 + $0x878] sm:$0xff] }
 0x15e   :  { %2725 = vmatpush.bf16.msrb.mxu0 %v15152_v59  ;;  %2711 = vmatpush.bf16.msrb.mxu1 %v15144_v0  ;;  %v1467_v31 = vpop.f32.mrf.mxu0  ;;  %v15222_v59 = vld [vmem:[%s15831_s11 + $0x8b0] sm:$0xff] }
 0x15f   :  { %3006 = vmatpush.bf16.msra.mxu2 %v15174_v61  ;;  %v1439_v24 = vpop.f32.mrf.mxu2  ;;  %v15214_v61 = vld [vmem:[%s15831_s11 + $0x870] sm:$0xff] }
 0x160   :  { %v1453_v27 = vpop.f32.mrf.mxu1 }
 0x161   :  { %2736 = vmatpush.bf16.msrb.mxu3 %v15163_v4  ;;  %2726 = vmatmul.bf16.vlgmr.msrb.gmra.mxu0 %v15936_v60  ;;  %v1454_v29 = vadd.f32 %v1453_v27, %v1439_v24  ;;  %v15211_v24 = vld [vmem:[%s15831_s11 + $0x858] sm:$0xff]  ;;  %v15201_v27 = vld [vmem:[%s15831_s11 + $0x808] sm:$0xff] }
 0x162   :  { %3033 = vmatpush.bf16.msra.mxu0 %v15191_v1  ;;  %3019 = vmatpush.bf16.msra.mxu1 %v15183_v3  ;;  %v15204_v1 = vld [vmem:[%s15831_s11 + $0x820] sm:$0xff] }
 0x163   :  { %2712 = vmatmul.bf16.vlgmr.msrb.gmra.mxu1 %v15939_v62  ;;  %3007 = vmatpush.bf16.msra.mxu2 %v15173_v6  ;;  %v1468_v34 = vadd.f32 %v1467_v31, %v1454_v29  ;;  %v1166_v35 = vpop.f32.mrf.mxu3  ;;  %v15213_v6 = vld [vmem:[%s15831_s11 + $0x868] sm:$0xff]  ;;  %v15218_v29 = vld [vmem:[%s15831_s11 + $0x890] sm:$0xff] }
 0x164   :  { %v1167_v38 = vadd.f32 %v1166_v35, %v1153_v7  ;;  %v15229_v31 = vld [vmem:[%s15831_s11 + $0x8e8] sm:$0xff]  ;;  %v15228_v35 = vld [vmem:[%s15831_s11 + $0x8e0] sm:$0xff] }
 0x165   :  { %2737 = vmatpush.bf16.msrb.mxu3 %v15162_v10  ;;  %v15220_v10 = vld [vmem:[%s15831_s11 + $0x8a0] sm:$0xff] }
 0x166   :  { %3034 = vmatpush.bf16.msra.mxu0 %v15190_v9  ;;  %3020 = vmatpush.bf16.msra.mxu1 %v15182_v37  ;;  %v1171_v40 = vmax.f32 %v16145_v8, %v1167_v38  ;;  %v16206_v7 = vpop.f32.mrf.mxu0  ;;  %v15193_v9 = vld [vmem:[%s15831_s11 + $0x7c8] sm:$0xff]  ;;  %v15203_v37 = vld [vmem:[%s15831_s11 + $0x818] sm:$0xff]  ;;  %v15216_v38 = vld [vmem:[%s15831_s11 + $0x880] sm:$0xff] }
 0x167   :  { %3008 = vmatpush.bf16.msra.mxu2 %v15172_v12  ;;  %v16200_v2 = vpop.f32.mrf.mxu2  ;;  %v15212_v12 = vld [vmem:[%s15831_s11 + $0x860] sm:$0xff] }
 0x168   :  { %v16202_v3 = vpop.f32.mrf.mxu1 }
 0x169   :  { %2738 = vmatpush.bf16.msrb.mxu3 %v15161_v17  ;;  %v15202_v17 = vld [vmem:[%s15831_s11 + $0x810] sm:$0xff] }
 0x16a   :  { %3035 = vmatpush.bf16.msra.mxu0 %v15189_v15  ;;  %3021 = vmatpush.bf16.msra.mxu1 %v15181_v16  ;;  %v15192_v15 = vld [vmem:[%s15831_s11 + $0x7c0] sm:$0xff]  ;;  %v15231_v16 = vld [vmem:[%s15831_s11 + $0x8f8] sm:$0xff] }
 0x16b   :  { %3009 = vmatpush.bf16.msra.mxu2 %v15171_v19  ;;  %v16184_v51 = vpop.f32.mrf.mxu3 }
 0x16d   :  { %2739 = vmatpush.bf16.msrb.mxu3 %v15160_v23 }
 0x16e   :  { %3036 = vmatpush.bf16.msra.mxu0 %v15188_v21  ;;  %3022 = vmatpush.bf16.msra.mxu1 %v15180_v22  ;;  %v15219_v22 = vld [vmem:[%s15831_s11 + $0x898] sm:$0xff] }
 0x16f   :  { %3010 = vmatpush.bf16.msra.mxu2 %v15170_v26  ;;  %v15230_v26 = vld [vmem:[%s15831_s11 + $0x8f0] sm:$0xff] }
 0x170   :  { %2740 = vmatmul.bf16.vlgmr.msrb.gmra.mxu3 %v15958_v20 }
 0x171   :  { %3047 = vmatpush.bf16.msra.mxu3 %v15199_v25 }
 0x172   :  { %3037 = vmatpush.bf16.msra.mxu0 %v15187_v28  ;;  %3023 = vmatpush.bf16.msra.mxu1 %v15179_v30  ;;  %v15210_v30 = vld [vmem:[%s15831_s11 + $0x850] sm:$0xff] }
 0x173   :  { %3011 = vmatpush.bf16.msra.mxu2 %v15169_v33  ;;  %v1481_v0 = vpop.f32.mrf.mxu3  ;;  %v15217_v33 = vld [vmem:[%s15831_s11 + $0x888] sm:$0xff] }
 0x174   :  { %v1482_v4 = vadd.f32 %v1481_v0, %v1468_v34  ;;  %v15209_v34 = vld [vmem:[%s15831_s11 + $0x848] sm:$0xff] }
 0x175   :  { %3048 = vmatpush.bf16.msra.mxu3 %v15198_v32  ;;  %v15200_v32 = vld [vmem:[%s15831_s11 + $0x800] sm:$0xff] }
 0x176   :  { %3038 = vmatpush.bf16.msra.mxu0 %v15186_v36  ;;  %3024 = vmatpush.bf16.msra.mxu1 %v15178_v39  ;;  %v16208_v8 = vmax.f32 %v1171_v40, %v1482_v4  ;;  %v15208_v39 = vld [vmem:[%s15831_s11 + $0x840] sm:$0xff]  ;;  %v15227_v40 = vld [vmem:[%s15831_s11 + $0x8d8] sm:$0xff] }
 0x177   :  { %3012 = vmatpush.bf16.msra.mxu2 %v15168_v42 }
 0x179   :  { %3049 = vmatpush.bf16.msra.mxu3 %v15197_v41  ;;  %v15226_v41 = vld [vmem:[%s15831_s11 + $0x8d0] sm:$0xff] }
 0x17a   :  { %3039 = vmatpush.bf16.msra.mxu0 %v15185_v43  ;;  %3025 = vmatpush.bf16.msra.mxu1 %v15177_v48 }
 0x17b   :  { %3320 = vmatpush.bf16.msrb.mxu2 %v15207_v44  ;;  %v16229_v36 = vpop.f32.mrf.mxu3 }
 0x17c   :  { %3013 = vmatmul.bf16.vlgmr.msra.gmra.mxu2 %v15930_v45 }
 0x17d   :  { %3050 = vmatpush.bf16.msra.mxu3 %v15196_v50 }
 0x17e   :  { %3040 = vmatpush.bf16.msra.mxu0 %v15184_v52  ;;  %3026 = vmatpush.bf16.msra.mxu1 %v15176_v54  ;;  %v1782_v25 = vpop.f32.mrf.mxu0  ;;  %v15225_v52 = vld [vmem:[%s15831_s11 + $0x8c8] sm:$0xff] }
 0x17f   :  { %3321 = vmatpush.bf16.msrb.mxu2 %v15206_v53  ;;  %v1754_v19 = vpop.f32.mrf.mxu2  ;;  %v15224_v53 = vld [vmem:[%s15831_s11 + $0x8c0] sm:$0xff]  ;;  %s10678_s11 = sld [smem:[%s17871_s0 + %s15651_s8]]   ;;  %s15666_s8 = smov 26  }
 0x180   :  { %v1768_v21 = vpop.f32.mrf.mxu1 }
 0x181   :  { %3051 = vmatpush.bf16.msra.mxu3 %v15195_v57  ;;  %3041 = vmatmul.bf16.vlgmr.msra.gmra.mxu0 %v15936_v60  ;;  %v1769_v23 = vadd.f32 %v1768_v21, %v1754_v19  ;;  %v16296_v21 = vld [vmem:[%s16269_s6 + $0x30] sm:$0xff] }
 0x182   :  { %3348 = vmatpush.bf16.msrb.mxu0 %v15223_v55  ;;  %3334 = vmatpush.bf16.msrb.mxu1 %v15215_v56 }
 0x183   :  { %3027 = vmatmul.bf16.vlgmr.msra.gmra.mxu1 %v15939_v62  ;;  %3322 = vmatpush.bf16.msrb.mxu2 %v15205_v58  ;;  %v1783_v28 = vadd.f32 %v1782_v25, %v1769_v23  ;;  %v16302_v23 = vld [vmem:[%s16269_s6 + $0xb0] sm:$0xff]  ;;  %v16310_v25 = vld [vmem:[%s16269_s6 + $0x28] sm:$0xff] }
 0x184   :  { %17902 = vst [vmem:[#allocation3_spill] sm:$0xff] %v16302_v23 }
 0x185   :  { %3052 = vmatpush.bf16.msra.mxu3 %v15194_v63 }
 0x186   :  { %3349 = vmatpush.bf16.msrb.mxu0 %v15222_v59  ;;  %3335 = vmatpush.bf16.msrb.mxu1 %v15214_v61  ;;  %v16242_v50 = vpop.f32.mrf.mxu0 }
 0x187   :  { %3323 = vmatpush.bf16.msrb.mxu2 %v15204_v1  ;;  %v16238_v43 = vpop.f32.mrf.mxu2 }
 0x188   :  { %v16240_v44 = vpop.f32.mrf.mxu1 }
 0x189   :  { %3053 = vmatpush.bf16.msra.mxu3 %v15193_v9 }
 0x18a   :  { %3350 = vmatpush.bf16.msrb.mxu0 %v15221_v5  ;;  %3336 = vmatpush.bf16.msrb.mxu1 %v15213_v6 }
 0x18b   :  { %3324 = vmatpush.bf16.msrb.mxu2 %v15203_v37 }
 0x18d   :  { %3054 = vmatpush.bf16.msra.mxu3 %v15192_v15  ;;  %v16284_v15 = vld [vmem:[%s16269_s6 + $0xb8] sm:$0xff] }
 0x18e   :  { %3351 = vmatpush.bf16.msrb.mxu0 %v15220_v10  ;;  %3337 = vmatpush.bf16.msrb.mxu1 %v15212_v12  ;;  %v16278_v10 = vld [vmem:[%s16269_s6 + $0x38] sm:$0xff]  ;;  %17901 = vst [vmem:[#allocation2_spill] sm:$0xff] %v16284_v15 }
 0x18f   :  { %3325 = vmatpush.bf16.msrb.mxu2 %v15202_v17  ;;  %v16281_v12 = vld [vmem:[%s16269_s6 + $0x78] sm:$0xff] }
 0x190   :  { %3055 = vmatmul.bf16.vlgmr.msra.gmra.mxu3 %v15958_v20 }
 0x191   :  { %3362 = vmatpush.bf16.msrb.mxu3 %v15231_v16 }
 0x192   :  { %3352 = vmatpush.bf16.msrb.mxu0 %v15219_v22  ;;  %3338 = vmatpush.bf16.msrb.mxu1 %v15211_v24  ;;  %v16299_v22 = vld [vmem:[%s16269_s6 + $0x70] sm:$0xff] }
 0x193   :  { %3326 = vmatpush.bf16.msrb.mxu2 %v15201_v27  ;;  %v1796_v42 = vpop.f32.mrf.mxu3  ;;  %v16316_v27 = vld [vmem:[%s16269_s6 + $0xa8] sm:$0xff] }
 0x194   :  { %v1797_v48 = vadd.f32 %v1796_v42, %v1783_v28  ;;  %17903 = vst [vmem:[#allocation4_spill] sm:$0xff] %v16316_v27  ;;  %v16355_v42 = vld [vmem:[%s16269_s6 + $0x50] sm:$0xff] }
 0x195   :  { %3363 = vmatpush.bf16.msrb.mxu3 %v15230_v26  ;;  %v16313_v26 = vld [vmem:[%s16269_s6 + $0x68] sm:$0xff]  ;;  %17907 = vst [vmem:[#allocation8_spill] sm:$0xff] %v16355_v42 }
 0x196   :  { %3353 = vmatpush.bf16.msrb.mxu0 %v15218_v29  ;;  %3339 = vmatpush.bf16.msrb.mxu1 %v15210_v30  ;;  %v16323_v29 = vld [vmem:[%s16269_s6 + $0x20] sm:$0xff] }
 0x197   :  { %3327 = vmatpush.bf16.msrb.mxu2 %v15200_v32  ;;  %v16326_v30 = vld [vmem:[%s16269_s6 + $0x60] sm:$0xff] }
 0x199   :  { %3364 = vmatpush.bf16.msrb.mxu3 %v15229_v31  ;;  %v16330_v31 = vld [vmem:[%s16269_s6 + $0xa0] sm:$0xff] }
 0x19a   :  { %3354 = vmatpush.bf16.msrb.mxu0 %v15217_v33  ;;  %3340 = vmatpush.bf16.msrb.mxu1 %v15209_v34  ;;  %17904 = vst [vmem:[#allocation5_spill] sm:$0xff] %v16330_v31 }
 0x19b   :  { %3328 = vmatmul.bf16.vlgmr.msrb.gmra.mxu2 %v15930_v45  ;;  %v1801_v45 = vmax.f32 %v16208_v8, %v1797_v48  ;;  %v16358_v48 = vld [vmem:[%s16269_s6 + $0x90] sm:$0xff] }
 0x19c   :  { %3445 = vmatpush.bf16.msra.mxu2 %v16278_v10  ;;  %17908 = vst [vmem:[#allocation9_spill] sm:$0xff] %v16358_v48 }
 0x19d   :  { %3365 = vmatpush.bf16.msrb.mxu3 %v15228_v35  ;;  %v16338_v35 = vld [vmem:[%s16269_s6 + $0x18] sm:$0xff] }
 0x19e   :  { %3355 = vmatpush.bf16.msrb.mxu0 %v15216_v38  ;;  %3341 = vmatpush.bf16.msrb.mxu1 %v15208_v39  ;;  %v2097_v56 = vpop.f32.mrf.mxu0  ;;  %v16341_v38 = vld [vmem:[%s16269_s6 + $0x58] sm:$0xff] }
 0x19f   :  { %v2069_v54 = vpop.f32.mrf.mxu2  ;;  %17905 = vst [vmem:[#allocation6_spill] sm:$0xff] %v16341_v38  ;;  %v16344_v39 = vld [vmem:[%s16269_s6 + $0x98] sm:$0xff] }
 0x1a0   :  { %v2083_v55 = vpop.f32.mrf.mxu1  ;;  %3446 = vmatpush.bf16.msra.mxu2 %v16296_v21  ;;  %17906 = vst [vmem:[#allocation7_spill] sm:$0xff] %v16344_v39 }
 0x1a1   :  { %3366 = vmatpush.bf16.msrb.mxu3 %v15227_v40  ;;  %3356 = vmatmul.bf16.vlgmr.msrb.gmra.mxu0 %v15936_v60  ;;  %v2084_v60 = vadd.f32 %v2083_v55, %v2069_v54  ;;  %v16364_v54 = vld [vmem:[%s16269_s6 + $0x8] sm:$0xff] }
 0x1a2   :  { %3342 = vmatmul.bf16.vlgmr.msrb.gmra.mxu1 %v15939_v62  ;;  %v16248_v62 = vpop.f32.mrf.mxu3  ;;  %3562 = vmatpush.bf16.msra.mxu0 %v16281_v12  ;;  %v16367_v55 = vld [vmem:[%s16269_s6 + $0x48] sm:$0xff] }
 0x1a3   :  { %v2098_v57 = vadd.f32 %v2097_v56, %v2084_v60  ;;  %17909 = vst [vmem:[#allocation10_spill] sm:$0xff] %v16367_v55  ;;  %v16370_v60 = vld [vmem:[%s16269_s6 + $0x88] sm:$0xff] }
 0x1a4   :  { %3447 = vmatpush.bf16.msra.mxu2 %v16310_v25  ;;  %17910 = vst [vmem:[#allocation11_spill] sm:$0xff] %v16370_v60 }
 0x1a5   :  { %3367 = vmatpush.bf16.msrb.mxu3 %v15226_v41  ;;  %v16352_v41 = vld [vmem:[%s16269_s6 + $0x10] sm:$0xff] }
 0x1a6   :  { %v16256_v1 = vpop.f32.mrf.mxu0  ;;  %3563 = vmatpush.bf16.msra.mxu0 %v16299_v22 }
 0x1a7   :  { %v16252_v63 = vpop.f32.mrf.mxu2 }
 0x1a8   :  { %v16254_v0 = vpop.f32.mrf.mxu1  ;;  %3448 = vmatpush.bf16.msra.mxu2 %v16323_v29 }
 0x1a9   :  { %3368 = vmatpush.bf16.msrb.mxu3 %v15225_v52 }
 0x1aa   :  { %3564 = vmatpush.bf16.msra.mxu0 %v16313_v26 }
 0x1ac   :  { %3449 = vmatpush.bf16.msra.mxu2 %v16338_v35 }
 0x1ad   :  { %3369 = vmatpush.bf16.msrb.mxu3 %v15224_v53 }
 0x1ae   :  { %3565 = vmatpush.bf16.msra.mxu0 %v16326_v30 }
 0x1b0   :  { %3370 = vmatmul.bf16.vlgmr.msrb.gmra.mxu3 %v15958_v20  ;;  %3450 = vmatpush.bf16.msra.mxu2 %v16352_v41 }
 0x1b1   :  { %3669 = vmatpush.bf16.msra.mxu3 %v16284_v15 }
 0x1b2   :  { %3566 = vmatpush.bf16.msra.mxu0 %v16341_v38 }
 0x1b3   :  { %v2111_v58 = vpop.f32.mrf.mxu3 }
 0x1b4   :  { %v2112_v59 = vadd.f32 %v2111_v58, %v2098_v57  ;;  %3451 = vmatpush.bf16.msra.mxu2 %v16364_v54  ;;  %v16376_v57 = vld [vmem:[%s16269_s6] sm:$0xff] }
 0x1b5   :  { %3670 = vmatpush.bf16.msra.mxu3 %v16302_v23  ;;  %17911 = vst [vmem:[#allocation12_spill] sm:$0xff] %v16376_v57  ;;  %v16379_v58 = vld [vmem:[%s16269_s6 + $0x40] sm:$0xff]  ;;  %v1456_v23 = vadd.f32 %v16202_v3, %v16200_v2 }
 0x1b6   :  { %v16250_v61 = vmax.f32 %v1801_v45, %v2112_v59  ;;  %3567 = vmatpush.bf16.msra.mxu0 %v16355_v42  ;;  %17912 = vst [vmem:[#allocation13_spill] sm:$0xff] %v16379_v58  ;;  %v16382_v59 = vld [vmem:[%s16269_s6 + $0x80] sm:$0xff] }
 0x1b7   :  { %17913 = vst [vmem:[#allocation14_spill] sm:$0xff] %v16382_v59 }
 0x1b8   :  { %3452 = vmatpush.bf16.msra.mxu2 %v16376_v57 }
 0x1b9   :  { %3671 = vmatpush.bf16.msra.mxu3 %v16316_v27  ;;  %v1141_v27 = vadd.f32 %v16157_v14, %v16152_v11  ;;  %v1470_v11 = vadd.f32 %v16206_v7, %v1456_v23 }
 0x1ba   :  { %3568 = vmatpush.bf16.msra.mxu0 %v16367_v55 }
 0x1bb   :  { %v16262_v6 = vpop.f32.mrf.mxu3  ;;  %v1155_v42 = vadd.f32 %v16155_v13, %v1141_v27  ;;  %v1484_v2 = vadd.f32 %v16229_v36, %v1470_v11 }
 0x1bd   :  { %3672 = vmatpush.bf16.msra.mxu3 %v16330_v31  ;;  %v1169_v57 = vadd.f32 %v16184_v51, %v1155_v42 }
 0x1be   :  { %v16264_v8 = vpop.f32.mrf.mxu0  ;;  %3569 = vmatpush.bf16.msra.mxu0 %v16379_v58  ;;  %v1771_v58 = vadd.f32 %v16240_v44, %v16238_v43 }
 0x1bf   :  { %v16258_v4 = vpop.f32.mrf.mxu2 }
 0x1c0   :  { %v16260_v5 = vpop.f32.mrf.mxu1  ;;  %v1785_v13 = vadd.f32 %v16242_v50, %v1771_v58 }
 0x1c1   :  { %3673 = vmatpush.bf16.msra.mxu3 %v16344_v39  ;;  %v2399_v3 = vadd.f32 %v16260_v5, %v16258_v4 }
 0x1c2   :  { %v1799_v51 = vadd.f32 %v16248_v62, %v1785_v13 }
 0x1c3   :  { %v2413_v50 = vadd.f32 %v16264_v8, %v2399_v3 }
 0x1c5   :  { %3674 = vmatpush.bf16.msra.mxu3 %v16358_v48 }
 0x1c6   :  { %v16286_v16 = vpop.f32.mrf.mxu0 }
 0x1c7   :  { %v16271_v20 = vpop.f32.mrf.mxu2 }
 0x1c8   :  { %v16273_v9 = vpop.f32.mrf.mxu1 }
 0x1c9   :  { %3675 = vmatpush.bf16.msra.mxu3 %v16370_v60  ;;  %v828_v60 = vadd.f32 %v16128_v49, %v16124_v47  ;;  %v2086_v47 = vadd.f32 %v16254_v0, %v16252_v63 }
 0x1cb   :  { %v2100_v7 = vadd.f32 %v16256_v1, %v2086_v47 }
 0x1cd   :  { %3676 = vmatpush.bf16.msra.mxu3 %v16382_v59  ;;  %v842_v59 = vadd.f32 %v16122_v46, %v828_v60  ;;  %v2401_v46 = vadd.f32 %v16273_v9, %v16271_v20  ;;  %v2114_v36 = vadd.f32 %v16262_v6, %v2100_v7  ;;  %v15240_v7 = vld [vmem:[%s16432_s16] sm:$0xff] }
 0x1cf   :  { %v856_v14 = vadd.f32 %v16162_v18, %v842_v59  ;;  %v2415_v4 = vadd.f32 %v16286_v16, %v2401_v46  ;;  %v16435_v46 = vld [vmem:[%s16269_s6 + $0x138] sm:$0xff] }
 0x1d1   :  { %v1172_v43 = vmax.f32 %v856_v14, %v1169_v57 }
 0x1d3   :  { %v16275_v37 = vpop.f32.mrf.mxu3  ;;  %v1487_v0 = vmax.f32 %v1172_v43, %v1484_v2 }
 0x1d4   :  { %v2427_v62 = vadd.f32 %v16275_v37, %v2413_v50  ;;  %v16454_v50 = vld [vmem:[%s16269_s6 + $0x128] sm:$0xff] }
 0x1d5   :  { %v1802_v9 = vmax.f32 %v1487_v0, %v1799_v51  ;;  %v16444_v0 = vld [vmem:[%s16269_s6 + $0x130] sm:$0xff] }
 0x1d7   :  { %v2117_v6 = vmax.f32 %v1802_v9, %v2114_v36  ;;  %v16450_v36 = vld [vmem:[%s16269_s6 + $0xf0] sm:$0xff]  ;;  %v15249_v9 = vld [vmem:[%s16432_s16 + $0x8] sm:$0xff] }
 0x1db   :  { %v16304_v24 = vpop.f32.mrf.mxu3 }
 0x1de   :  { %v16318_v28 = vpop.f32.mrf.mxu0 }
 0x1df   :  { %v16290_v17 = vpop.f32.mrf.mxu2 }
 0x1e0   :  { %v16293_v19 = vpop.f32.mrf.mxu1 }
 0x1e1   :  { %v2714_v44 = vadd.f32 %v16293_v19, %v16290_v17  ;;  %v2429_v17 = vadd.f32 %v16304_v24, %v2415_v4  ;;  %v16458_v4 = vld [vmem:[%s16269_s6 + $0xe8] sm:$0xff] }
 0x1e3   :  { %v2728_v1 = vadd.f32 %v16318_v28, %v2714_v44  ;;  %v16439_v44 = vld [vmem:[%s16269_s6 + $0xf8] sm:$0xff] }
 0x1e6   :  { %v16349_v40 = vpop.f32.mrf.mxu0 }
 0x1e7   :  { %v2701_v32 = vpop.f32.mrf.mxu2 }
 0x1e8   :  { %v2715_v33 = vpop.f32.mrf.mxu1 }
 0x1e9   :  { %v2716_v18 = vadd.f32 %v2715_v33, %v2701_v32 }
 0x1eb   :  { %v2730_v19 = vadd.f32 %v16349_v40, %v2716_v18  ;;  %v3380_v18 = vld [vmem:[%s10678_s11 + $0x8] sm:$0xff] }
 0x1f3   :  { %v16332_v34 = vpop.f32.mrf.mxu3 }
 0x1f4   :  { %v2742_v8 = vadd.f32 %v16332_v34, %v2728_v1  ;;  %v16479_v1 = vld [vmem:[%s16269_s6 + $0x110] sm:$0xff] }
 0x1fb   :  { %v2743_v53 = vpop.f32.mrf.mxu3 }
 0x1fc   :  { %v2744_v33 = vadd.f32 %v2743_v53, %v2730_v19  ;;  %v16496_v19 = vld [vmem:[%s16269_s6 + $0x100] sm:$0xff] }
 0x1fe   :  { %v3042_v56 = vpop.f32.mrf.mxu0 }
 0x1ff   :  { %v3014_v45 = vpop.f32.mrf.mxu2 }
 0x200   :  { %v3028_v52 = vpop.f32.mrf.mxu1 }
 0x201   :  { %v3029_v5 = vadd.f32 %v3028_v52, %v3014_v45  ;;  %v2432_v52 = vmax.f32 %v2117_v6, %v2429_v17  ;;  %v16492_v17 = vld [vmem:[%s16269_s6 + $0xc8] sm:$0xff] }
 0x203   :  { %v3043_v16 = vadd.f32 %v3042_v56, %v3029_v5  ;;  %v2747_v59 = vmax.f32 %v2432_v52, %v2744_v33  ;;  %v16462_v5 = vld [vmem:[%s16269_s6 + $0x120] sm:$0xff] }
 0x206   :  { %v3044_v15 = vpop.f32.mrf.mxu0 }
 0x207   :  { %v3016_v48 = vpop.f32.mrf.mxu2 }
 0x208   :  { %v3030_v39 = vpop.f32.mrf.mxu1 }
 0x209   :  { %v3031_v23 = vadd.f32 %v3030_v39, %v3016_v48  ;;  %v2431_v48 = vmax.f32 %v16250_v61, %v2427_v62  ;;  %v16475_v62 = vld [vmem:[%s16269_s6 + $0xd8] sm:$0xff] }
 0x20b   :  { %v3045_v45 = vadd.f32 %v3044_v15, %v3031_v23  ;;  %v2746_v58 = vmax.f32 %v2431_v48, %v2742_v8  ;;  %v16466_v23 = vld [vmem:[%s16269_s6 + $0xe0] sm:$0xff] }
 0x213   :  { %v3056_v31 = vpop.f32.mrf.mxu3 }
 0x214   :  { %v3057_v37 = vadd.f32 %v3056_v31, %v3043_v16 }
 0x21b   :  { %v3058_v49 = vpop.f32.mrf.mxu3 }
 0x21c   :  { %v3059_v60 = vadd.f32 %v3058_v49, %v3045_v45  ;;  %v3379_v49 = vld [vmem:[%s10678_s11] sm:$0xff]  ;;  %s17635_s11 = sld [smem:[%s17871_s0 + %s15666_s8]]  }
 0x21d   :  { %3487 = vperm.xlu1 %15634, %v3379_v49   ;;  %v16545_v49 = vld [vmem:[%s16269_s6 + $0x1a0] sm:$0xff] }
 0x21e   :  { %v3329_v55 = vpop.f32.mrf.mxu2  ;;  %v3357_v63 = vpop.f32.mrf.mxu0 }
 0x21f   :  { %v3343_v38 = vpop.f32.mrf.mxu1 }
 0x220   :  { %v3344_v32 = vadd.f32 %v3343_v38, %v3329_v55  ;;  %v3061_v38 = vmax.f32 %v2746_v58, %v3057_v37  ;;  %v3062_v55 = vmax.f32 %v2747_v59, %v3059_v60  ;;  %v16513_v59 = vld [vmem:[%s16269_s6 + $0x178] sm:$0xff] }
 0x222   :  { %v3358_v28 = vadd.f32 %v3357_v63, %v3344_v32  ;;  %v15258_v63 = vld [vmem:[%s16432_s16 + $0x10] sm:$0xff]  ;;  %v16500_v32 = vld [vmem:[%s16269_s6 + $0xc0] sm:$0xff] }
 0x225   :  { %3492 = vperm.xlu1 %15634, %v3380_v18   ;;  %v4775_v18 = vld [vmem:[%s15717_s17 + $0x8] sm:$0xff] }
 0x226   :  { %v3331_v20 = vpop.f32.mrf.mxu2  ;;  %v3359_v57 = vpop.f32.mrf.mxu0 }
 0x227   :  { %v3345_v27 = vpop.f32.mrf.mxu1 }
 0x228   :  { %v3346_v39 = vadd.f32 %v3345_v27, %v3331_v20  ;;  %v16470_v20 = vld [vmem:[%s16269_s6 + $0x118] sm:$0xff]  ;;  %v16484_v27 = vld [vmem:[%s16269_s6 + $0xd0] sm:$0xff] }
 0x22a   :  { %v3360_v11 = vadd.f32 %v3359_v57, %v3346_v39 }
 0x22d   :  { %4903 = vperm.xlu1 %15634, %v4775_v18   ;;  %v16598_v18 = vld [vmem:[%s16269_s6 + $0x1f8] sm:$0xff] }
 0x233   :  { %v3371_v42 = vpop.f32.mrf.mxu3 }
 0x234   :  { %v3372_v24 = vadd.f32 %v3371_v42, %v3358_v28  ;;  %v16488_v42 = vld [vmem:[%s16269_s6 + $0x108] sm:$0xff] }
 0x236   :  { %v3376_v34 = vmax.f32 %v3061_v38, %v3372_v24  ;;  %v16518_v38 = vld [vmem:[%s16269_s6 + $0x1b8] sm:$0xff] }
 0x23b   :  { %v3373_v40 = vpop.f32.mrf.mxu3 }
 0x23c   :  { %v3374_v47 = vadd.f32 %v3373_v40, %v3360_v11  ;;  %v15267_v11 = vld [vmem:[%s16432_s16 + $0x18] sm:$0xff] }
 0x23e   :  { %v3377_v53 = vmax.f32 %v3062_v55, %v3374_v47  ;;  %v16521_v55 = vld [vmem:[%s16269_s6 + $0x170] sm:$0xff] }
 0x240   :  { %v16421_v56 = vpack.c.bf16 %v3377_v53, %v3376_v34  ;;  %v15276_v34 = vld [vmem:[%s16432_s16 + $0x20] sm:$0xff]  ;;  %v16528_v53 = vld [vmem:[%s16269_s6 + $0x1b0] sm:$0xff] }
 0x242   :  { %17914 = vst [vmem:[#allocation15_spill] sm:$0xff] %v16421_v56  ;;  %3453 = vmatmul.bf16.vlgmr.msra.gmra.mxu2 %v16421_v56  ;;  %3570 = vmatmul.bf16.vlgmr.msra.gmra.mxu0 %v16421_v56 }
 0x243   :  { %3677 = vmatmul.bf16.vlgmr.msra.gmra.mxu3 %v16421_v56 }
 0x28f   :  { %v3488_v33 = vpop.permute.xlu1 %3487 }
 0x2bf   :  { %v3571_v61 = vpop.f32.mrf.mxu0 }
 0x2c5   :  { %v3454_v15 = vpop.f32.mrf.mxu2 }
 0x2c6   :  { %v3678_v31 = vpop.f32.mrf.mxu3 }
 0x2c7   :  { %v3573_v14 = vpop.f32.mrf.mxu0 }
 0x2c8   :  { %v3576_v43 = vpack.c.bf16 %v3573_v14, %v3571_v61  ;;  %v16531_v61 = vld [vmem:[%s16269_s6 + $0x168] sm:$0xff]  ;;  %v16548_v14 = vld [vmem:[%s16269_s6 + $0x158] sm:$0xff] }
 0x2cd   :  { %v3456_v2 = vpop.f32.mrf.mxu2 }
 0x2ce   :  { %v3459_v13 = vpack.c.bf16 %v3456_v2, %v3454_v15  ;;  %v3680_v3 = vpop.f32.mrf.mxu3  ;;  %v16537_v15 = vld [vmem:[%s16269_s6 + $0x1a8] sm:$0xff]  ;;  %v16553_v2 = vld [vmem:[%s16269_s6 + $0x198] sm:$0xff] }
 0x2cf   :  { %v3683_v51 = vpack.c.bf16 %v3680_v3, %v3678_v31  ;;  %v16540_v31 = vld [vmem:[%s16269_s6 + $0x160] sm:$0xff]  ;;  %v16561_v3 = vld [vmem:[%s16269_s6 + $0x190] sm:$0xff] }
 0x2d0   :  { %3478 = vmatpush.bf16.msra.mxu1 %v3459_v13  ;;  %v16556_v13 = vld [vmem:[%s16269_s6 + $0x150] sm:$0xff] }
 0x2d1   :  { %3702 = vmatpush.bf16.msrb.mxu2 %v3683_v51  ;;  %v16569_v51 = vld [vmem:[%s16269_s6 + $0x188] sm:$0xff] }
 0x2d3   :  { %12582 = vmatmul.msk.bf16.vlgmr.msra.gmra.mxu1 %vm3467_vm1, %v15240_v7  ;;  %v16572_v7 = vld [vmem:[%s16269_s6 + $0x140] sm:$0xff] }
 0x2d4   :  { %3595 = vmatpush.bf16.msrb.mxu1 %v3576_v43  ;;  %12692 = vmatmul.msk.bf16.vlgmr.msrb.gmra.mxu2 %vm3467_vm1, %v15258_v63  ;;  %v16564_v43 = vld [vmem:[%s16269_s6 + $0x148] sm:$0xff]  ;;  %v16577_v63 = vld [vmem:[%s16269_s6 + $0x180] sm:$0xff] }
 0x2d5   :  { %3883 = vmatpush.bf16.msra.mxu2 %v16435_v46  ;;  %17915 = vst [vmem:[#allocation16_spill] sm:$0xff] %v16577_v63 }
 0x2d8   :  { %3776 = vmatpush.bf16.msra.mxu1 %v16439_v44 }
 0x2d9   :  { %3884 = vmatpush.bf16.msra.mxu2 %v16444_v0 }
 0x2dc   :  { %3777 = vmatpush.bf16.msra.mxu1 %v16450_v36 }
 0x2dd   :  { %3885 = vmatpush.bf16.msra.mxu2 %v16454_v50 }
 0x2e0   :  { %3778 = vmatpush.bf16.msra.mxu1 %v16458_v4 }
 0x2e1   :  { %3886 = vmatpush.bf16.msra.mxu2 %v16462_v5 }
 0x2e3   :  { %12637 = vmatmul.msk.bf16.vlgmr.msrb.gmra.mxu1 %vm3467_vm1, %v15249_v9  ;;  %v5918_v9 = vld [vmem:[%s15775_s21] sm:$0xff] }
 0x2e4   :  { %3779 = vmatpush.bf16.msra.mxu1 %v16466_v23  ;;  %6006 = vperm.xlu1 %15634, %v5918_v9  }
 0x2e5   :  { %3887 = vmatpush.bf16.msra.mxu2 %v16470_v20 }
 0x2e8   :  { %3780 = vmatpush.bf16.msra.mxu1 %v16475_v62 }
 0x2e9   :  { %3888 = vmatpush.bf16.msra.mxu2 %v16479_v1 }
 0x2ec   :  { %3781 = vmatpush.bf16.msra.mxu1 %v16484_v27 }
 0x2ed   :  { %3889 = vmatpush.bf16.msra.mxu2 %v16488_v42 }
 0x2f0   :  { %3782 = vmatpush.bf16.msra.mxu1 %v16492_v17 }
 0x2f1   :  { %3890 = vmatpush.bf16.msra.mxu2 %v16496_v19 }
 0x2f4   :  { %3783 = vmatpush.bf16.msra.mxu1 %v16500_v32  ;;  %3891 = vmatmul.bf16.vlgmr.msra.gmra.mxu2 %v16421_v56 }
 0x2f7   :  { %3784 = vmatmul.bf16.vlgmr.msra.gmra.mxu1 %v16421_v56 }
 0x350   :  { %v3480_v6 = vpop.f32.mrf.mxu1 }
 0x351   :  { %v3495_v16 = vadd.f32 %v3488_v33, %v3480_v6  ;;  %v5921_v6 = vld [vmem:[%s15775_s21 + $0x18] sm:$0xff]  ;;  %v6690_v33 = vld [vmem:[%s15796_s25 + $0x10] sm:$0xff] }
 0x352   :  { %6021 = vperm.xlu1 %15634, %v5921_v6  }
 0x357   :  { %v3704_v48 = vpop.f32.mrf.mxu2 }
 0x358   :  { %v16506_v8 = vpop.f32.mrf.mxu1 }
 0x35a   :  { %6704 = vperm.xlu1 %15634, %v6690_v33   ;;  %v15285_v33 = vld [vmem:[%s16432_s16 + $0x28] sm:$0xff] }
 0x35f   :  { %v16510_v60 = vpop.f32.mrf.mxu2 }
 0x360   :  { %v3597_v45 = vpop.f32.mrf.mxu1 }
 0x361   :  { %v3602_v39 = vadd.f32 %v3597_v45, %v3495_v16 }
 0x363   :  { %v3709_v52 = vadd.f32 %v3704_v48, %v3602_v39  ;;  %v6758_v39 = vld [vmem:[%s15810_s29 + $0x8] sm:$0xff]  ;;  %v6761_v48 = vld [vmem:[%s15810_s29 + $0x20] sm:$0xff] }
 0x364   :  { %6884 = vperm.xlu1 %15634, %v6758_v39   ;;  %v16609_v39 = vld [vmem:[%s16269_s6 + $0x1e8] sm:$0xff] }
 0x365   :  { %17916 = vst [vmem:[#allocation17_spill] sm:$0xff] %v16609_v39 }
 0x368   :  { %v16508_v37 = vpop.f32.mrf.mxu1 }
 0x36c   :  { %6899 = vperm.xlu1 %15634, %v6761_v48  }
 0x374   :  { %v3785_v28 = vpop.f32.mrf.mxu1 }
 0x377   :  { %v3892_v57 = vpop.f32.mrf.mxu2 }
 0x37c   :  { %v3787_v58 = vpop.f32.mrf.mxu1 }
 0x37d   :  { %v3790_v24 = vpack.c.bf16 %v3787_v58, %v3785_v28  ;;  %v6764_v58 = vld [vmem:[%s15810_s29 + $0x38] sm:$0xff] }
 0x37e   :  { %6914 = vperm.xlu1 %15634, %v6764_v58  }
 0x37f   :  { %3809 = vmatpush.bf16.msrb.mxu0 %v3790_v24  ;;  %v3894_v40 = vpop.f32.mrf.mxu2 }
 0x380   :  { %v3897_v47 = vpack.c.bf16 %v3894_v40, %v3892_v57 }
 0x382   :  { %12747 = vmatmul.msk.bf16.vlgmr.msrb.gmra.mxu0 %vm3467_vm1, %v15267_v11  ;;  %3916 = vmatpush.bf16.msrb.mxu3 %v3897_v47  ;;  %v7867_v11 = vld [vmem:[%s15820_s3 + $0x10] sm:$0xff]  ;;  %v8979_v47 = vld [vmem:[%s15826_s7 + $0x8] sm:$0xff] }
 0x383   :  { %3990 = vmatpush.bf16.msra.mxu0 %v16513_v59 }
 0x385   :  { %12802 = vmatmul.msk.bf16.vlgmr.msrb.gmra.mxu3 %vm3467_vm1, %v15276_v34 }
 0x386   :  { %4097 = vmatpush.bf16.msra.mxu3 %v16518_v38  ;;  %8006 = vperm.xlu1 %15634, %v7867_v11   ;;  %v15294_v11 = vld [vmem:[%s16432_s16 + $0x30] sm:$0xff] }
 0x387   :  { %3991 = vmatpush.bf16.msra.mxu0 %v16521_v55 }
 0x38a   :  { %4098 = vmatpush.bf16.msra.mxu3 %v16528_v53 }
 0x38b   :  { %3992 = vmatpush.bf16.msra.mxu0 %v16531_v61 }
 0x38e   :  { %4099 = vmatpush.bf16.msra.mxu3 %v16537_v15  ;;  %8993 = vperm.xlu1 %15634, %v8979_v47   ;;  %v7872_v47 = vld [vmem:[%s15820_s3 + $0x38] sm:$0xff] }
 0x38f   :  { %3993 = vmatpush.bf16.msra.mxu0 %v16540_v31 }
 0x392   :  { %4100 = vmatpush.bf16.msra.mxu3 %v16545_v49 }
 0x393   :  { %3994 = vmatpush.bf16.msra.mxu0 %v16548_v14 }
 0x396   :  { %4101 = vmatpush.bf16.msra.mxu3 %v16553_v2 }
 0x397   :  { %3995 = vmatpush.bf16.msra.mxu0 %v16556_v13 }
 0x39a   :  { %4102 = vmatpush.bf16.msra.mxu3 %v16561_v3 }
 0x39b   :  { %3996 = vmatpush.bf16.msra.mxu0 %v16564_v43 }
 0x39e   :  { %4103 = vmatpush.bf16.msra.mxu3 %v16569_v51 }
 0x39f   :  { %3997 = vmatpush.bf16.msra.mxu0 %v16572_v7 }
 0x3a2   :  { %3998 = vmatmul.bf16.vlgmr.msra.gmra.mxu0 %v16421_v56  ;;  %4104 = vmatpush.bf16.msra.mxu3 %v16577_v63 }
 0x3a5   :  { %4105 = vmatmul.bf16.vlgmr.msra.gmra.mxu3 %v16421_v56 }
 0x3ff   :  { %v3811_v16 = vpop.f32.mrf.mxu0 }
 0x400   :  { %v3816_v45 = vadd.f32 %v3811_v16, %v3709_v52  ;;  %v16603_v16 = vld [vmem:[%s16269_s6 + $0x1f0] sm:$0xff] }
 0x407   :  { %v16591_v24 = vpop.f32.mrf.mxu0 }
 0x408   :  { %v3918_v28 = vpop.f32.mrf.mxu3 }
 0x409   :  { %v16588_v57 = vadd.f32 %v3918_v28, %v3816_v45  ;;  %v8980_v45 = vld [vmem:[%s15826_s7 + $0x10] sm:$0xff]  ;;  %v16612_v28 = vld [vmem:[%s16269_s6 + $0x238] sm:$0xff] }
 0x40a   :  { %8998 = vperm.xlu1 %15634, %v8980_v45   ;;  %17917 = vst [vmem:[#allocation18_spill] sm:$0xff] %v16612_v28  ;;  %v8984_v45 = vld [vmem:[%s15826_s7 + $0x30] sm:$0xff] }
 0x410   :  { %v16594_v52 = vpop.f32.mrf.mxu3 }
 0x412   :  { %8031 = vperm.xlu1 %15634, %v7872_v47   ;;  %v16652_v47 = vld [vmem:[%s16269_s6 + $0x1c0] sm:$0xff] }
 0x413   :  { %17926 = vst [vmem:[#allocation27_spill] sm:$0xff] %v16652_v47 }
 0x41a   :  { %9018 = vperm.xlu1 %15634, %v8984_v45   ;;  %v16662_v45 = vld [vmem:[%s16269_s6 + $0x208] sm:$0xff] }
 0x41b   :  { %17928 = vst [vmem:[#allocation29_spill] sm:$0xff] %v16662_v45 }
 0x41f   :  { %v3999_v40 = vpop.f32.mrf.mxu0 }
 0x427   :  { %v4001_v34 = vpop.f32.mrf.mxu0 }
 0x428   :  { %v4004_v9 = vpack.c.bf16 %v4001_v34, %v3999_v40  ;;  %v4106_v6 = vpop.f32.mrf.mxu3  ;;  %v16617_v40 = vld [vmem:[%s16269_s6 + $0x1e0] sm:$0xff]  ;;  %v16622_v34 = vld [vmem:[%s16269_s6 + $0x230] sm:$0xff] }
 0x429   :  { %17918 = vst [vmem:[#allocation19_spill] sm:$0xff] %v16617_v40 }
 0x42a   :  { %4023 = vmatpush.bf16.msrb.mxu1 %v4004_v9  ;;  %17919 = vst [vmem:[#allocation20_spill] sm:$0xff] %v16622_v34  ;;  %v16627_v9 = vld [vmem:[%s16269_s6 + $0x1d8] sm:$0xff] }
 0x42b   :  { %17920 = vst [vmem:[#allocation21_spill] sm:$0xff] %v16627_v9 }
 0x42d   :  { %12857 = vmatmul.msk.bf16.vlgmr.msrb.gmra.mxu1 %vm3467_vm1, %v15285_v33  ;;  %v16635_v33 = vld [vmem:[%s16269_s6 + $0x1d0] sm:$0xff] }
 0x42e   :  { %4204 = vmatpush.bf16.msra.mxu1 %v16598_v18  ;;  %17922 = vst [vmem:[#allocation23_spill] sm:$0xff] %v16635_v33 }
 0x430   :  { %v4108_v48 = vpop.f32.mrf.mxu3 }
 0x431   :  { %v4111_v58 = vpack.c.bf16 %v4108_v48, %v4106_v6  ;;  %v16631_v6 = vld [vmem:[%s16269_s6 + $0x228] sm:$0xff]  ;;  %v16640_v48 = vld [vmem:[%s16269_s6 + $0x220] sm:$0xff] }
 0x432   :  { %4205 = vmatpush.bf16.msra.mxu1 %v16603_v16  ;;  %17921 = vst [vmem:[#allocation22_spill] sm:$0xff] %v16631_v6 }
 0x433   :  { %4130 = vmatpush.bf16.msrb.mxu2 %v4111_v58  ;;  %17923 = vst [vmem:[#allocation24_spill] sm:$0xff] %v16640_v48  ;;  %v16644_v58 = vld [vmem:[%s16269_s6 + $0x1c8] sm:$0xff] }
 0x434   :  { %17924 = vst [vmem:[#allocation25_spill] sm:$0xff] %v16644_v58 }
 0x436   :  { %4206 = vmatpush.bf16.msra.mxu1 %v16609_v39  ;;  %12912 = vmatmul.msk.bf16.vlgmr.msrb.gmra.mxu2 %vm3467_vm1, %v15294_v11  ;;  %v16648_v11 = vld [vmem:[%s16269_s6 + $0x218] sm:$0xff] }
 0x437   :  { %4311 = vmatpush.bf16.msra.mxu2 %v16612_v28  ;;  %17925 = vst [vmem:[#allocation26_spill] sm:$0xff] %v16648_v11  ;;  %v16668_v28 = vld [vmem:[%s16269_s6 + $0x200] sm:$0xff]  ;;  %v15303_v39 = vld [vmem:[%s16432_s16 + $0x38] sm:$0xff] }
 0x438   :  { %17929 = vst [vmem:[#allocation30_spill] sm:$0xff] %v16668_v28 }
 0x43a   :  { %4207 = vmatpush.bf16.msra.mxu1 %v16617_v40  ;;  %v10632_v40 = vld [vmem:[%s16016_s1 + $0x8] sm:$0x3] }
 0x43b   :  { %4312 = vmatpush.bf16.msra.mxu2 %v16622_v34  ;;  %v9108_v34 = vld [vmem:[%s15853_s15 + $0x8] sm:$0xff] }
 0x43c   :  { %9309 = vperm.xlu1 %15634, %v9108_v34   ;;  %v9114_v34 = vld [vmem:[%s15853_s15 + $0x38] sm:$0xff] }
 0x43e   :  { %4208 = vmatpush.bf16.msra.mxu1 %v16627_v9  ;;  %v10317_v9 = vld [vmem:[%s15912_s20 + $0x70] sm:$0xff] }
 0x43f   :  { %4313 = vmatpush.bf16.msra.mxu2 %v16631_v6  ;;  %v16657_v6 = vld [vmem:[%s16269_s6 + $0x210] sm:$0xff]  ;;  %s17474_s6 = sld [smem:[%s17871_s0 + %s15665_s2]]  }
 0x440   :  { %17927 = vst [vmem:[#allocation28_spill] sm:$0xff] %v16657_v6 }
 0x442   :  { %4209 = vmatpush.bf16.msra.mxu1 %v16635_v33  ;;  %v10316_v33 = vld [vmem:[%s15912_s20 + $0x68] sm:$0xff] }
 0x443   :  { %4314 = vmatpush.bf16.msra.mxu2 %v16640_v48  ;;  %v9111_v48 = vld [vmem:[%s15853_s15 + $0x20] sm:$0xff] }
 0x444   :  { %9324 = vperm.xlu1 %15634, %v9111_v48   ;;  %v10305_v48 = vld [vmem:[%s15912_s20 + $0x10] sm:$0xff] }
 0x446   :  { %4210 = vmatpush.bf16.msra.mxu1 %v16644_v58  ;;  %v9980_v58 = vld [vmem:[%s15922_s26 + $0x30] sm:$0xff] }
 0x447   :  { %4315 = vmatpush.bf16.msra.mxu2 %v16648_v11  ;;  %v9120_v11 = vld [vmem:[%s15853_s15 + $0x68] sm:$0xff] }
 0x44a   :  { %4211 = vmatpush.bf16.msra.mxu1 %v16652_v47  ;;  %v9974_v47 = vld [vmem:[%s15922_s26] sm:$0xff] }
 0x44b   :  { %4316 = vmatpush.bf16.msra.mxu2 %v16657_v6  ;;  %v9117_v6 = vld [vmem:[%s15853_s15 + $0x50] sm:$0xff] }
 0x44c   :  { %9339 = vperm.xlu1 %15634, %v9114_v34   ;;  %v10310_v34 = vld [vmem:[%s15912_s20 + $0x38] sm:$0xff] }
 0x44d   :  { %4212 = vmatmul.bf16.vlgmr.msra.gmra.mxu1 %v16421_v56 }
 0x44f   :  { %4317 = vmatpush.bf16.msra.mxu2 %v16662_v45  ;;  %v10304_v45 = vld [vmem:[%s15912_s20 + $0x8] sm:$0xff] }
 0x453   :  { %4318 = vmatpush.bf16.msra.mxu2 %v16668_v28  ;;  %v9979_v28 = vld [vmem:[%s15922_s26 + $0x28] sm:$0xff] }
 0x454   :  { %9354 = vperm.xlu1 %15634, %v9117_v6   ;;  %v10311_v6 = vld [vmem:[%s15912_s20 + $0x40] sm:$0xff] }
 0x456   :  { %4319 = vmatmul.bf16.vlgmr.msra.gmra.mxu2 %v16421_v56  ;;  %v9985_v56 = vld [vmem:[%s15922_s26 + $0x58] sm:$0xff] }
 0x45c   :  { %9369 = vperm.xlu1 %15634, %v9120_v11  }
 0x464   :  { %10193 = vperm.xlu1 %15634, %v9974_v47  }
 0x46c   :  { %10326 = vperm.xlu1 %15634, %v10304_v45   ;;  %v9986_v45 = vld [vmem:[%s15922_s26 + $0x60] sm:$0xff] }
 0x474   :  { %10331 = vperm.xlu1 %15634, %v10305_v48  }
 0x47c   :  { %10218 = vperm.xlu1 %15634, %v9979_v28  }
 0x484   :  { %10223 = vperm.xlu1 %15634, %v9980_v58  }
 0x48c   :  { %10356 = vperm.xlu1 %15634, %v10310_v34  }
 0x494   :  { %10361 = vperm.xlu1 %15634, %v10311_v6  }
 0x49c   :  { %10248 = vperm.xlu1 %15634, %v9985_v56  }
 0x4a4   :  { %10253 = vperm.xlu1 %15634, %v9986_v45  }
 0x4aa   :  { %v4025_v11 = vpop.f32.mrf.mxu1 }
 0x4ab   :  { %v4030_v47 = vadd.f32 %v4025_v11, %v16588_v57 }
 0x4ac   :  { %10386 = vperm.xlu1 %15634, %v10316_v33  }
 0x4b2   :  { %v4027_v58 = vpop.f32.mrf.mxu1 }
 0x4b4   :  { %10391 = vperm.xlu1 %15634, %v10317_v9  }
 0x4b9   :  { %v4132_v48 = vpop.f32.mrf.mxu2 }
 0x4ba   :  { %v4137_v28 = vadd.f32 %v4132_v48, %v4030_v47 }
 0x4bc   :  { %10640 = vperm.xlu1 %15634, %v10632_v40   ;;  %v15312_v40 = vld [vmem:[%s16432_s16 + $0x40] sm:$0xff]  ;;  %s17702_s16 = sld [smem:[%s17871_s0 + %s15667_s12]]  }
 0x4c1   :  { %v4134_v6 = vpop.f32.mrf.mxu2 }
 0x4ca   :  { %v4213_v34 = vpop.f32.mrf.mxu1 }
 0x4d2   :  { %v4215_v63 = vpop.f32.mrf.mxu1 }
 0x4d3   :  { %v4218_v56 = vpack.c.bf16 %v4215_v63, %v4213_v34 }
 0x4d5   :  { %4237 = vmatpush.bf16.msrb.mxu0 %v4218_v56 }
 0x4d8   :  { %12967 = vmatmul.msk.bf16.vlgmr.msrb.gmra.mxu0 %vm3467_vm1, %v15303_v39 }
 0x4d9   :  { %4358 = vmatpush.bf16.msra.mxu0 %v16278_v10  ;;  %v4320_v57 = vpop.f32.mrf.mxu2  ;;  %v17930_v10 = vld [vmem:[#allocation12_spill] sm:$0xff] }
 0x4dd   :  { %4359 = vmatpush.bf16.msra.mxu0 %v16296_v21  ;;  %v17931_v21 = vld [vmem:[#allocation6_spill] sm:$0xff] }
 0x4e1   :  { %4360 = vmatpush.bf16.msra.mxu0 %v16310_v25  ;;  %v4322_v9 = vpop.f32.mrf.mxu2  ;;  %v17932_v25 = vld [vmem:[#allocation8_spill] sm:$0xff] }
 0x4e2   :  { %v4325_v33 = vpack.c.bf16 %v4322_v9, %v4320_v57 }
 0x4e4   :  { %4344 = vmatpush.bf16.msrb.mxu3 %v4325_v33 }
 0x4e5   :  { %4361 = vmatpush.bf16.msra.mxu0 %v16323_v29  ;;  %v17934_v29 = vld [vmem:[#allocation13_spill] sm:$0xff] }
 0x4e7   :  { %13022 = vmatmul.msk.bf16.vlgmr.msrb.gmra.mxu3 %vm3467_vm1, %v15312_v40 }
 0x4e8   :  { %4409 = vmatpush.bf16.msra.mxu3 %v16281_v12  ;;  %v17933_v12 = vld [vmem:[#allocation10_spill] sm:$0xff] }
 0x4e9   :  { %4362 = vmatpush.bf16.msra.mxu0 %v16338_v35  ;;  %v3493_v35 = vpop.permute.xlu1 %3492 }
 0x4ec   :  { %4410 = vmatpush.bf16.msra.mxu3 %v16299_v22  ;;  %v3496_v22 = vadd.f32 %v3493_v35, %v16506_v8  ;;  %v4357_v35 = vld [vmem:[%s10680_s30 + $0x8] sm:$0xff] }
 0x4ed   :  { %4363 = vmatpush.bf16.msra.mxu0 %v16352_v41 }
 0x4ee   :  { %v3603_v41 = vadd.f32 %v16508_v37, %v3496_v22  ;;  %v17938_v22 = vld [vmem:[#allocation5_spill] sm:$0xff] }
 0x4f0   :  { %4411 = vmatpush.bf16.msra.mxu3 %v16313_v26 }
 0x4f1   :  { %4364 = vmatpush.bf16.msra.mxu0 %v16364_v54  ;;  %v3710_v54 = vadd.f32 %v16510_v60, %v3603_v41  ;;  %v17939_v41 = vld [vmem:[#allocation7_spill] sm:$0xff] }
 0x4f4   :  { %4412 = vmatpush.bf16.msra.mxu3 %v16326_v30  ;;  %v3817_v30 = vadd.f32 %v16591_v24, %v3710_v54  ;;  %v17942_v54 = vld [vmem:[#allocation14_spill] sm:$0xff] }
 0x4f5   :  { %4365 = vmatpush.bf16.msra.mxu0 %v17930_v10 }
 0x4f6   :  { %v3924_v39 = vadd.f32 %v16594_v52, %v3817_v30 }
 0x4f8   :  { %4413 = vmatpush.bf16.msra.mxu3 %v17931_v21  ;;  %v4031_v11 = vadd.f32 %v4027_v58, %v3924_v39  ;;  %v17935_v58 = vld [vmem:[#allocation2_spill] sm:$0xff]  ;;  %v17936_v21 = vld [vmem:[#allocation3_spill] sm:$0xff] }
 0x4fa   :  { %v4138_v45 = vadd.f32 %v4134_v6, %v4031_v11 }
 0x4fc   :  { %4414 = vmatpush.bf16.msra.mxu3 %v17932_v25  ;;  %v15314_v25 = vld [vmem:[%s16720_s23 + $0x8] sm:$0xff] }
 0x500   :  { %4415 = vmatpush.bf16.msra.mxu3 %v17933_v12  ;;  %v4356_v12 = vld [vmem:[%s10680_s30] sm:$0xff]  ;;  %s10699_s30 = sld [smem:[%s17871_s0 + %s15669_s24]]  }
 0x501   :  { %4399 = vperm.xlu2 %15635, %v4356_v12  }
 0x504   :  { %4416 = vmatpush.bf16.msra.mxu3 %v17934_v29  ;;  %v17937_v29 = vld [vmem:[#allocation4_spill] sm:$0xff] }
 0x509   :  { %4404 = vperm.xlu2 %15635, %v4357_v35   ;;  %v17952_v35 = vld [vmem:[#allocation22_spill] sm:$0xff] }
 0x555   :  { %v4239_v26 = vpop.f32.mrf.mxu0 }
 0x556   :  { %v4244_v48 = vadd.f32 %v4239_v26, %v4137_v28  ;;  %v15313_v28 = vld [vmem:[%s16720_s23] sm:$0xff]  ;;  %v17940_v26 = vld [vmem:[#allocation9_spill] sm:$0xff] }
 0x55d   :  { %v4241_v47 = vpop.f32.mrf.mxu0 }
 0x55e   :  { %v4245_v34 = vadd.f32 %v4241_v47, %v4138_v45 }
 0x56a   :  { %v4346_v63 = vpop.f32.mrf.mxu3 }
 0x56b   :  { %v4351_v56 = vadd.f32 %v4346_v63, %v4244_v48 }
 0x56d   :  { %v4353_v33 = vmax.f32 %v4351_v56, 0.0 }
 0x572   :  { %v4348_v57 = vpop.f32.mrf.mxu3 }
 0x573   :  { %v4352_v9 = vadd.f32 %v4348_v57, %v4245_v34  ;;  %v15316_v34 = vld [vmem:[%s16720_s23 + $0x18] sm:$0xff] }
 0x574   :  { %v6691_v57 = vld [vmem:[%s15796_s25 + $0x18] sm:$0xff] }
 0x575   :  { %v4354_v8 = vmax.f32 %v4352_v9, 0.0  ;;  %v6759_v9 = vld [vmem:[%s15810_s29 + $0x10] sm:$0xff] }
 0x577   :  { %v16713_v40 = vpack.c.bf16 %v4354_v8, %v4353_v33  ;;  %v6762_v8 = vld [vmem:[%s15810_s29 + $0x28] sm:$0xff] }
 0x579   :  { %4366 = vmatmul.bf16.vlgmr.msra.gmra.mxu0 %v16713_v40  ;;  %4417 = vmatmul.bf16.vlgmr.msra.gmra.mxu3 %v16713_v40 }
 0x5f6   :  { %v4367_v37 = vpop.f32.mrf.mxu0 }
 0x5fc   :  { %v4418_v60 = vpop.f32.mrf.mxu3 }
 0x5fe   :  { %v4369_v24 = vpop.f32.mrf.mxu0 }
 0x5ff   :  { %v4372_v52 = vpack.c.bf16 %v4369_v24, %v4367_v37 }
 0x601   :  { %4390 = vmatpush.bf16.msrb.mxu1 %v4372_v52  ;;  %v7865_v52 = vld [vmem:[%s15820_s3] sm:$0xff] }
 0x604   :  { %v4420_v6 = vpop.f32.mrf.mxu3  ;;  %13027 = vmatmul.msk.bf16.vlgmr.msrb.gmra.mxu1 %vm3467_vm1, %v15313_v28 }
 0x605   :  { %4451 = vmatpush.bf16.msra.mxu1 %v17935_v58  ;;  %v4423_v10 = vpack.c.bf16 %v4420_v6, %v4418_v60  ;;  %v7868_v58 = vld [vmem:[%s15820_s3 + $0x18] sm:$0xff] }
 0x607   :  { %4442 = vmatpush.bf16.msrb.mxu2 %v4423_v10  ;;  %v15319_v10 = vld [vmem:[%s16720_s23 + $0x30] sm:$0xff] }
 0x609   :  { %4452 = vmatpush.bf16.msra.mxu1 %v17936_v21  ;;  %v17950_v21 = vld [vmem:[#allocation18_spill] sm:$0xff] }
 0x60a   :  { %13034 = vmatmul.msk.bf16.vlgmr.msrb.gmra.mxu2 %vm3467_vm1, %v15314_v25  ;;  %v7869_v25 = vld [vmem:[%s15820_s3 + $0x20] sm:$0xff]  ;;  %s15656_s3 = smov 10  }
 0x60b   :  { %4493 = vmatpush.bf16.msra.mxu2 %v16439_v44  ;;  %v17941_v44 = vld [vmem:[#allocation11_spill] sm:$0xff]  ;;  %s16857_s1 = sld [smem:[%s17871_s0 + %s15656_s3]]   ;;  %s15671_s3 = smov 34  }
 0x60d   :  { %4453 = vmatpush.bf16.msra.mxu1 %v17937_v29  ;;  %v17951_v29 = vld [vmem:[#allocation20_spill] sm:$0xff] }
 0x60f   :  { %4494 = vmatpush.bf16.msra.mxu2 %v16450_v36  ;;  %v4400_v36 = vpop.permute.xlu2 %4399 }
 0x611   :  { %4454 = vmatpush.bf16.msra.mxu1 %v17938_v22  ;;  %v8981_v22 = vld [vmem:[%s15826_s7 + $0x18] sm:$0xff] }
 0x613   :  { %4495 = vmatpush.bf16.msra.mxu2 %v16458_v4 }
 0x615   :  { %4455 = vmatpush.bf16.msra.mxu1 %v17939_v41 }
 0x617   :  { %4496 = vmatpush.bf16.msra.mxu2 %v16466_v23 }
 0x619   :  { %4456 = vmatpush.bf16.msra.mxu1 %v17940_v26  ;;  %v17953_v26 = vld [vmem:[#allocation24_spill] sm:$0xff] }
 0x61b   :  { %4497 = vmatpush.bf16.msra.mxu2 %v16475_v62 }
 0x61d   :  { %4457 = vmatpush.bf16.msra.mxu1 %v17941_v44  ;;  %v17954_v44 = vld [vmem:[#allocation26_spill] sm:$0xff] }
 0x61f   :  { %4498 = vmatpush.bf16.msra.mxu2 %v16484_v27 }
 0x621   :  { %4458 = vmatpush.bf16.msra.mxu1 %v17942_v54  ;;  %v8982_v54 = vld [vmem:[%s15826_s7 + $0x20] sm:$0xff] }
 0x623   :  { %4499 = vmatpush.bf16.msra.mxu2 %v16492_v17  ;;  %v15315_v17 = vld [vmem:[%s16720_s23 + $0x10] sm:$0xff] }
 0x624   :  { %4459 = vmatmul.bf16.vlgmr.msra.gmra.mxu1 %v16713_v40 }
 0x627   :  { %4500 = vmatpush.bf16.msra.mxu2 %v16500_v32 }
 0x62a   :  { %4501 = vmatmul.bf16.vlgmr.msra.gmra.mxu2 %v16713_v40 }
 0x681   :  { %v4392_v4 = vpop.f32.mrf.mxu1 }
 0x682   :  { %v4407_v23 = vadd.f32 %v4400_v36, %v4392_v4  ;;  %v17955_v4 = vld [vmem:[#allocation28_spill] sm:$0xff] }
 0x689   :  { %v16747_v63 = vpop.f32.mrf.mxu1 }
 0x68d   :  { %v4444_v30 = vpop.f32.mrf.mxu2 }
 0x68e   :  { %v4449_v62 = vadd.f32 %v4444_v30, %v4407_v23  ;;  %v15320_v30 = vld [vmem:[%s16720_s23 + $0x38] sm:$0xff] }
 0x695   :  { %v16749_v39 = vpop.f32.mrf.mxu2 }
 0x6a1   :  { %v4460_v27 = vpop.f32.mrf.mxu1 }
 0x6a9   :  { %v4462_v11 = vpop.f32.mrf.mxu1 }
 0x6aa   :  { %v4465_v47 = vpack.c.bf16 %v4462_v11, %v4460_v27  ;;  %v17957_v27 = vld [vmem:[#allocation15_spill] sm:$0xff]  ;;  %v8985_v11 = vld [vmem:[%s15826_s7 + $0x38] sm:$0xff] }
 0x6ac   :  { %4484 = vmatpush.bf16.msrb.mxu0 %v4465_v47  ;;  %v17958_v47 = vld [vmem:[#allocation30_spill] sm:$0xff] }
 0x6ad   :  { %v4502_v45 = vpop.f32.mrf.mxu2 }
 0x6af   :  { %13041 = vmatmul.msk.bf16.vlgmr.msrb.gmra.mxu0 %vm3467_vm1, %v15315_v17  ;;  %v9109_v17 = vld [vmem:[%s15853_s15 + $0x10] sm:$0xff] }
 0x6b0   :  { %4535 = vmatpush.bf16.msra.mxu0 %v16435_v46 }
 0x6b4   :  { %4536 = vmatpush.bf16.msra.mxu0 %v16444_v0 }
 0x6b5   :  { %v4504_v32 = vpop.f32.mrf.mxu2 }
 0x6b6   :  { %v4507_v48 = vpack.c.bf16 %v4504_v32, %v4502_v45  ;;  %v9112_v45 = vld [vmem:[%s15853_s15 + $0x28] sm:$0xff]  ;;  %v9115_v32 = vld [vmem:[%s15853_s15 + $0x40] sm:$0xff] }
 0x6b8   :  { %4537 = vmatpush.bf16.msra.mxu0 %v16454_v50  ;;  %4526 = vmatpush.bf16.msrb.mxu3 %v4507_v48  ;;  %v9118_v48 = vld [vmem:[%s15853_s15 + $0x58] sm:$0xff] }
 0x6bb   :  { %13048 = vmatmul.msk.bf16.vlgmr.msrb.gmra.mxu3 %vm3467_vm1, %v15316_v34  ;;  %v9121_v34 = vld [vmem:[%s15853_s15 + $0x70] sm:$0xff]  ;;  %s15664_s15 = smov 22  }
 0x6bc   :  { %4538 = vmatpush.bf16.msra.mxu0 %v16462_v5  ;;  %4577 = vmatpush.bf16.msra.mxu3 %v16513_v59 }
 0x6c0   :  { %4539 = vmatpush.bf16.msra.mxu0 %v16470_v20  ;;  %4578 = vmatpush.bf16.msra.mxu3 %v16521_v55  ;;  %v15317_v55 = vld [vmem:[%s16720_s23 + $0x20] sm:$0xff] }
 0x6c4   :  { %4540 = vmatpush.bf16.msra.mxu0 %v16479_v1  ;;  %4579 = vmatpush.bf16.msra.mxu3 %v16531_v61 }
 0x6c8   :  { %4541 = vmatpush.bf16.msra.mxu0 %v16488_v42  ;;  %4580 = vmatpush.bf16.msra.mxu3 %v16540_v31 }
 0x6cc   :  { %4542 = vmatpush.bf16.msra.mxu0 %v16496_v19  ;;  %4581 = vmatpush.bf16.msra.mxu3 %v16548_v14 }
 0x6cf   :  { %4543 = vmatmul.bf16.vlgmr.msra.gmra.mxu0 %v16713_v40 }
 0x6d0   :  { %4582 = vmatpush.bf16.msra.mxu3 %v16556_v13  ;;  %v15318_v13 = vld [vmem:[%s16720_s23 + $0x28] sm:$0xff] }
 0x6d4   :  { %4583 = vmatpush.bf16.msra.mxu3 %v16564_v43  ;;  %v17949_v43 = vld [vmem:[#allocation27_spill] sm:$0xff] }
 0x6d8   :  { %4584 = vmatpush.bf16.msra.mxu3 %v16572_v7  ;;  %v5919_v7 = vld [vmem:[%s15775_s21 + $0x8] sm:$0xff]  ;;  %s17152_s21 = sld [smem:[%s17871_s0 + %s15662_s28]]  }
 0x6db   :  { %4585 = vmatmul.bf16.vlgmr.msra.gmra.mxu3 %v16713_v40 }
 0x72c   :  { %v4486_v46 = vpop.f32.mrf.mxu0 }
 0x72d   :  { %v4491_v0 = vadd.f32 %v4486_v46, %v4449_v62  ;;  %v17956_v62 = vld [vmem:[#allocation29_spill] sm:$0xff]  ;;  %v9975_v46 = vld [vmem:[%s15922_s26 + $0x8] sm:$0xff] }
 0x734   :  { %v16773_v20 = vpop.f32.mrf.mxu0 }
 0x73e   :  { %v4528_v50 = vpop.f32.mrf.mxu3 }
 0x73f   :  { %v4533_v5 = vadd.f32 %v4528_v50, %v4491_v0  ;;  %v9976_v0 = vld [vmem:[%s15922_s26 + $0x10] sm:$0xff]  ;;  %v10306_v50 = vld [vmem:[%s15912_s20 + $0x18] sm:$0xff] }
 0x746   :  { %v16775_v59 = vpop.f32.mrf.mxu3 }
 0x74c   :  { %v4544_v1 = vpop.f32.mrf.mxu0 }
 0x754   :  { %v4546_v42 = vpop.f32.mrf.mxu0 }
 0x755   :  { %v4549_v19 = vpack.c.bf16 %v4546_v42, %v4544_v1  ;;  %v9982_v1 = vld [vmem:[%s15922_s26 + $0x40] sm:$0xff]  ;;  %v10312_v42 = vld [vmem:[%s15912_s20 + $0x48] sm:$0xff] }
 0x757   :  { %4568 = vmatpush.bf16.msrb.mxu1 %v4549_v19 }
 0x75a   :  { %13055 = vmatmul.msk.bf16.vlgmr.msrb.gmra.mxu1 %vm3467_vm1, %v15317_v55 }
 0x75b   :  { %4619 = vmatpush.bf16.msra.mxu1 %v16518_v38  ;;  %v17943_v38 = vld [vmem:[#allocation17_spill] sm:$0xff] }
 0x75e   :  { %v4586_v61 = vpop.f32.mrf.mxu3 }
 0x75f   :  { %4620 = vmatpush.bf16.msra.mxu1 %v16528_v53  ;;  %v17944_v53 = vld [vmem:[#allocation16_spill] sm:$0xff] }
 0x763   :  { %4621 = vmatpush.bf16.msra.mxu1 %v16537_v15  ;;  %v17945_v15 = vld [vmem:[#allocation19_spill] sm:$0xff] }
 0x766   :  { %v4588_v31 = vpop.f32.mrf.mxu3 }
 0x767   :  { %4622 = vmatpush.bf16.msra.mxu1 %v16545_v49  ;;  %v4591_v14 = vpack.c.bf16 %v4588_v31, %v4586_v61  ;;  %v17946_v49 = vld [vmem:[#allocation21_spill] sm:$0xff]  ;;  %v10313_v31 = vld [vmem:[%s15912_s20 + $0x50] sm:$0xff] }
 0x769   :  { %4610 = vmatpush.bf16.msrb.mxu2 %v4591_v14  ;;  %v9987_v14 = vld [vmem:[%s15922_s26 + $0x68] sm:$0xff] }
 0x76b   :  { %4623 = vmatpush.bf16.msra.mxu1 %v16553_v2  ;;  %v17947_v2 = vld [vmem:[#allocation23_spill] sm:$0xff] }
 0x76c   :  { %13062 = vmatmul.msk.bf16.vlgmr.msrb.gmra.mxu2 %vm3467_vm1, %v15318_v13  ;;  %v9988_v13 = vld [vmem:[%s15922_s26 + $0x70] sm:$0xff] }
 0x76d   :  { %4661 = vmatpush.bf16.msra.mxu2 %v16598_v18  ;;  %v6688_v18 = vld [vmem:[%s15796_s25] sm:$0xff]  ;;  %s15663_s25 = smov 19  }
 0x76e   :  { %s17325_s7 = sld [smem:[%s17871_s0 + %s15663_s25]]  }
 0x76f   :  { %4624 = vmatpush.bf16.msra.mxu1 %v16561_v3  ;;  %v17948_v3 = vld [vmem:[#allocation25_spill] sm:$0xff] }
 0x771   :  { %4662 = vmatpush.bf16.msra.mxu2 %v16603_v16 }
 0x773   :  { %4625 = vmatpush.bf16.msra.mxu1 %v16569_v51  ;;  %v4776_v51 = vld [vmem:[%s15717_s17 + $0x10] sm:$0xff]  ;;  %s15655_s17 = smov 9  }
 0x774   :  { %4908 = vperm.xlu2 %15635, %v4776_v51   ;;  %s10681_s29 = sld [smem:[%s17871_s0 + %s15655_s17]]   ;;  %v15340_v51 = vld [vmem:[%s16857_s1 + $0x78] sm:$0xff]  ;;  %s15670_s17 = smov 30  }
 0x775   :  { %4663 = vmatpush.bf16.msra.mxu2 %v17943_v38 }
 0x777   :  { %4626 = vmatpush.bf16.msra.mxu1 %v17944_v53  ;;  %v10318_v53 = vld [vmem:[%s15912_s20 + $0x78] sm:$0xff] }
 0x779   :  { %4664 = vmatpush.bf16.msra.mxu2 %v17945_v15 }
 0x77a   :  { %4627 = vmatmul.bf16.vlgmr.msra.gmra.mxu1 %v16713_v40  ;;  %v15322_v19 = vld [vmem:[%s10681_s29] sm:$0xff]  ;;  %s10702_s29 = sld [smem:[%s17871_s0 + %s15670_s17]]  }
 0x77c   :  { %6011 = vperm.xlu2 %15635, %v5919_v7   ;;  %v15329_v7 = vld [vmem:[%s16857_s1 + $0x30] sm:$0xff] }
 0x77d   :  { %4665 = vmatpush.bf16.msra.mxu2 %v17946_v49 }
 0x781   :  { %4666 = vmatpush.bf16.msra.mxu2 %v17947_v2 }
 0x784   :  { %6694 = vperm.xlu2 %15635, %v6688_v18   ;;  %v15339_v18 = vld [vmem:[%s16857_s1 + $0x70] sm:$0xff] }
 0x785   :  { %4667 = vmatpush.bf16.msra.mxu2 %v17948_v3  ;;  %v15321_v3 = vld [vmem:[%s16720_s23 + $0x40] sm:$0xff]  ;;  %s17777_s23 = sld [smem:[%s17871_s0 + %s15668_s18]]  }
 0x789   :  { %4668 = vmatpush.bf16.msra.mxu2 %v17949_v43  ;;  %v15330_v43 = vld [vmem:[%s16857_s1 + $0x38] sm:$0xff] }
 0x78c   :  { %4669 = vmatmul.bf16.vlgmr.msra.gmra.mxu2 %v16713_v40  ;;  %6709 = vperm.xlu2 %15635, %v6691_v57   ;;  %v15327_v57 = vld [vmem:[%s16857_s1 + $0x20] sm:$0xff] }
 0x78d   :  { %4842 = vmatpush.bf16.msrb.mxu2 %v15330_v43  ;;  %v15353_v43 = vld [vmem:[%s16857_s1 + $0xc0] sm:$0xff] }
 0x791   :  { %4843 = vmatpush.bf16.msrb.mxu2 %v15329_v7 }
 0x794   :  { %6889 = vperm.xlu2 %15635, %v6759_v9   ;;  %v15337_v9 = vld [vmem:[%s16857_s1 + $0x60] sm:$0xff] }
 0x79c   :  { %6904 = vperm.xlu2 %15635, %v6762_v8   ;;  %v15326_v8 = vld [vmem:[%s16857_s1 + $0x18] sm:$0xff] }
 0x7a4   :  { %7996 = vperm.xlu2 %15635, %v7865_v52   ;;  %v15324_v52 = vld [vmem:[%s16857_s1 + $0x8] sm:$0xff] }
 0x7ac   :  { %8011 = vperm.xlu2 %15635, %v7868_v58   ;;  %v15323_v58 = vld [vmem:[%s16857_s1] sm:$0xff] }
 0x7b4   :  { %8016 = vperm.xlu2 %15635, %v7869_v25  }
 0x7bc   :  { %9003 = vperm.xlu2 %15635, %v8981_v22  }
 0x7c4   :  { %9008 = vperm.xlu2 %15635, %v8982_v54  }
 0x7cc   :  { %9023 = vperm.xlu2 %15635, %v8985_v11  }
 0x7d4   :  { %9314 = vperm.xlu2 %15635, %v9109_v17  }
 0x7d7   :  { %v4570_v16 = vpop.f32.mrf.mxu1 }
 0x7d8   :  { %v4575_v56 = vadd.f32 %v4570_v16, %v4533_v5  ;;  %v9981_v5 = vld [vmem:[%s15922_s26 + $0x38] sm:$0xff]  ;;  %v15328_v16 = vld [vmem:[%s16857_s1 + $0x28] sm:$0xff]  ;;  %s17436_s26 = sld [smem:[%s17871_s0 + %s15664_s15]]  }
 0x7d9   :  { %4844 = vmatpush.bf16.msrb.mxu2 %v15328_v16 }
 0x7dc   :  { %9329 = vperm.xlu2 %15635, %v9112_v45  }
 0x7dd   :  { %4845 = vmatpush.bf16.msrb.mxu2 %v15327_v57 }
 0x7df   :  { %v16804_v33 = vpop.f32.mrf.mxu1 }
 0x7e1   :  { %4846 = vmatpush.bf16.msrb.mxu2 %v15326_v8 }
 0x7e4   :  { %9344 = vperm.xlu2 %15635, %v9115_v32  }
 0x7ec   :  { %9359 = vperm.xlu2 %15635, %v9118_v48   ;;  %v15350_v48 = vld [vmem:[%s16857_s1 + $0xb8] sm:$0xff] }
 0x7ef   :  { %v4612_v37 = vpop.f32.mrf.mxu2 }
 0x7f0   :  { %v16807_v60 = vadd.f32 %v4612_v37, %v4575_v56  ;;  %v15338_v56 = vld [vmem:[%s16857_s1 + $0x68] sm:$0xff]  ;;  %v15336_v37 = vld [vmem:[%s16857_s1 + $0x58] sm:$0xff] }
 0x7f4   :  { %9374 = vperm.xlu2 %15635, %v9121_v34   ;;  %v15360_v34 = vld [vmem:[%s16857_s1 + $0xf8] sm:$0xff] }
 0x7f7   :  { %v4628_v24 = vpop.f32.mrf.mxu1  ;;  %v16815_v12 = vpop.f32.mrf.mxu2 }
 0x7fc   :  { %10198 = vperm.xlu2 %15635, %v9975_v46  }
 0x7ff   :  { %v4630_v28 = vpop.f32.mrf.mxu1 }
 0x800   :  { %v4633_v6 = vpack.c.bf16 %v4630_v28, %v4628_v24  ;;  %v15335_v24 = vld [vmem:[%s16857_s1 + $0x50] sm:$0xff]  ;;  %v15334_v28 = vld [vmem:[%s16857_s1 + $0x48] sm:$0xff] }
 0x802   :  { %4652 = vmatpush.bf16.msrb.mxu0 %v4633_v6  ;;  %v15333_v6 = vld [vmem:[%s16857_s1 + $0x40] sm:$0xff] }
 0x804   :  { %10203 = vperm.xlu2 %15635, %v9976_v0  }
 0x805   :  { %13069 = vmatmul.msk.bf16.vlgmr.msrb.gmra.mxu0 %vm3467_vm1, %v15319_v10 }
 0x806   :  { %4703 = vmatpush.bf16.msra.mxu0 %v17950_v21  ;;  %v4405_v21 = vpop.permute.xlu2 %4404 }
 0x80a   :  { %4704 = vmatpush.bf16.msra.mxu0 %v17951_v29  ;;  %v4408_v29 = vadd.f32 %v4405_v21, %v16747_v63 }
 0x80c   :  { %10336 = vperm.xlu2 %15635, %v10306_v50  }
 0x80e   :  { %4705 = vmatpush.bf16.msra.mxu0 %v17952_v35  ;;  %v4450_v35 = vadd.f32 %v16749_v39, %v4408_v29  ;;  %v4909_v8 = vpop.permute.xlu2 %4908  ;;  %v15370_v29 = vld [vmem:[%s16857_s1 + $0x138] sm:$0xff] }
 0x80f   :  { %v4670_v41 = vpop.f32.mrf.mxu2 }
 0x810   :  { %v4492_v22 = vadd.f32 %v16773_v20, %v4450_v35  ;;  %v15380_v35 = vld [vmem:[%s16857_s1 + $0x178] sm:$0xff] }
 0x812   :  { %4706 = vmatpush.bf16.msra.mxu0 %v17953_v26 }
 0x816   :  { %4707 = vmatpush.bf16.msra.mxu0 %v17954_v44 }
 0x817   :  { %v4672_v36 = vpop.f32.mrf.mxu2 }
 0x818   :  { %v4675_v23 = vpack.c.bf16 %v4672_v36, %v4670_v41  ;;  %v4534_v41 = vadd.f32 %v16775_v59, %v4492_v22 }
 0x81a   :  { %4708 = vmatpush.bf16.msra.mxu0 %v17955_v4  ;;  %4694 = vmatpush.bf16.msrb.mxu3 %v4675_v23  ;;  %v4576_v54 = vadd.f32 %v16804_v33, %v4534_v41 }
 0x81c   :  { %v4618_v36 = vadd.f32 %v16815_v12, %v4576_v54  ;;  %v15369_v54 = vld [vmem:[%s16857_s1 + $0x130] sm:$0xff] }
 0x81d   :  { %13076 = vmatmul.msk.bf16.vlgmr.msrb.gmra.mxu3 %vm3467_vm1, %v15320_v30 }
 0x81e   :  { %4709 = vmatpush.bf16.msra.mxu0 %v17956_v62  ;;  %4762 = vmatpush.bf16.msra.mxu3 %v17957_v27 }
 0x822   :  { %4710 = vmatpush.bf16.msra.mxu0 %v17958_v47  ;;  %4985 = vmatpush.bf16.msrb.mxu3 %v15340_v51  ;;  %v4899_v51 = vpop.permute.xlu0 %4898 }
 0x825   :  { %4711 = vmatmul.bf16.vlgmr.msra.gmra.mxu0 %v16713_v40  ;;  %v10307_v40 = vld [vmem:[%s15912_s20 + $0x20] sm:$0xff]  ;;  %s15657_s20 = smov 12  }
 0x826   :  { %10341 = vperm.xlu2 %15635, %v10307_v40   ;;  %4986 = vmatpush.bf16.msrb.mxu3 %v15339_v18  ;;  %s16888_s4 = sld [smem:[%s17871_s0 + %s15657_s20]]   ;;  %s15672_s20 = smov 35  }
 0x82a   :  { %4987 = vmatpush.bf16.msrb.mxu3 %v15338_v56 }
 0x82c   :  { %v15331_v50 = vld [vmem:[%s16888_s4] sm:$0xff]  ;;  %v15341_v40 = vld [vmem:[%s16888_s4 + $0x10] sm:$0xff] }
 0x82d   :  { %13088 = vmatmul.msk.bf16.vlgmr.msra.gmra.mxu3 %vm3467_vm1, %v15322_v19  ;;  %v15358_v19 = vld [vmem:[%s16857_s1 + $0xe8] sm:$0xff] }
 0x82e   :  { %10228 = vperm.xlu2 %15635, %v9981_v5   ;;  %4988 = vmatpush.bf16.msrb.mxu3 %v15337_v9  ;;  %v15349_v5 = vld [vmem:[%s16857_s1 + $0xb0] sm:$0xff] }
 0x832   :  { %4989 = vmatpush.bf16.msrb.mxu3 %v15336_v37 }
 0x836   :  { %10233 = vperm.xlu2 %15635, %v9982_v1   ;;  %4990 = vmatpush.bf16.msrb.mxu3 %v15335_v24  ;;  %v15359_v1 = vld [vmem:[%s16857_s1 + $0xf0] sm:$0xff] }
 0x83a   :  { %4991 = vmatpush.bf16.msrb.mxu3 %v15334_v28 }
 0x83e   :  { %10366 = vperm.xlu2 %15635, %v10312_v42   ;;  %4992 = vmatpush.bf16.msrb.mxu3 %v15333_v6  ;;  %v15348_v42 = vld [vmem:[%s16857_s1 + $0xa8] sm:$0xff] }
 0x846   :  { %10371 = vperm.xlu2 %15635, %v10313_v31   ;;  %v15346_v31 = vld [vmem:[%s16857_s1 + $0x98] sm:$0xff] }
 0x84e   :  { %10258 = vperm.xlu2 %15635, %v9987_v14   ;;  %v15356_v14 = vld [vmem:[%s16857_s1 + $0xd8] sm:$0xff] }
 0x856   :  { %10263 = vperm.xlu2 %15635, %v9988_v13   ;;  %v15332_v13 = vld [vmem:[%s16888_s4 + $0x8] sm:$0xff] }
 0x85e   :  { %10396 = vperm.xlu2 %15635, %v10318_v53   ;;  %v15345_v53 = vld [vmem:[%s16857_s1 + $0x90] sm:$0xff] }
 0x882   :  { %v4654_v55 = vpop.f32.mrf.mxu0 }
 0x883   :  { %v4659_v61 = vadd.f32 %v4654_v55, %v16807_v60  ;;  %v15325_v60 = vld [vmem:[%s16857_s1 + $0x10] sm:$0xff]  ;;  %v15347_v55 = vld [vmem:[%s16857_s1 + $0xa0] sm:$0xff] }
 0x884   :  { %4847 = vmatpush.bf16.msrb.mxu2 %v15325_v60 }
 0x888   :  { %4848 = vmatpush.bf16.msrb.mxu2 %v15324_v52 }
 0x88a   :  { %v4656_v38 = vpop.f32.mrf.mxu0 }
 0x88b   :  { %v4660_v23 = vadd.f32 %v4656_v38, %v4618_v36  ;;  %v15342_v38 = vld [vmem:[%s16888_s4 + $0x18] sm:$0xff]  ;;  %v15379_v36 = vld [vmem:[%s16857_s1 + $0x170] sm:$0xff] }
 0x88c   :  { %4849 = vmatpush.bf16.msrb.mxu2 %v15323_v58 }
 0x8a0   :  { %v4696_v10 = vpop.f32.mrf.mxu3 }
 0x8a1   :  { %v4701_v4 = vadd.f32 %v4696_v10, %v4659_v61  ;;  %v15357_v61 = vld [vmem:[%s16857_s1 + $0xe0] sm:$0xff] }
 0x8a2   :  { %v4712_v15 = vpop.f32.mrf.mxu0 }
 0x8a8   :  { %v4698_v25 = vpop.f32.mrf.mxu3 }
 0x8a9   :  { %v4702_v62 = vadd.f32 %v4698_v25, %v4660_v23  ;;  %v15378_v23 = vld [vmem:[%s16857_s1 + $0x168] sm:$0xff] }
 0x8aa   :  { %v4714_v49 = vpop.f32.mrf.mxu0 }
 0x8ab   :  { %v4717_v2 = vpack.c.bf16 %v4714_v49, %v4712_v15  ;;  %v15355_v15 = vld [vmem:[%s16857_s1 + $0xd0] sm:$0xff]  ;;  %v15344_v49 = vld [vmem:[%s16857_s1 + $0x88] sm:$0xff] }
 0x8ad   :  { %4736 = vmatpush.bf16.msrb.mxu1 %v4717_v2  ;;  %v15354_v2 = vld [vmem:[%s16857_s1 + $0xc8] sm:$0xff] }
 0x8b0   :  { %13083 = vmatmul.msk.bf16.vlgmr.msrb.gmra.mxu1 %vm3467_vm1, %v15321_v3  ;;  %v4764_v26 = vpop.f32.mrf.mxu3  ;;  %v15343_v3 = vld [vmem:[%s16857_s1 + $0x80] sm:$0xff] }
 0x8b8   :  { %v4766_v39 = vpop.f32.mrf.mxu3 }
 0x92d   :  { %v4738_v44 = vpop.f32.mrf.mxu1 }
 0x92e   :  { %v4743_v30 = vadd.f32 %v4738_v44, %v4701_v4  ;;  %v15361_v44 = vld [vmem:[%s16888_s4 + $0x30] sm:$0xff]  ;;  %v15368_v4 = vld [vmem:[%s16857_s1 + $0x128] sm:$0xff] }
 0x930   :  { %v4769_v11 = vadd.f32 %v4764_v26, %v4743_v30  ;;  %v15351_v26 = vld [vmem:[%s16888_s4 + $0x20] sm:$0xff] }
 0x931   :  { %v15367_v30 = vld [vmem:[%s16857_s1 + $0x120] sm:$0xff] }
 0x932   :  { %v4771_v20 = vmax.f32 %v4769_v11, 0.0  ;;  %v15376_v11 = vld [vmem:[%s16857_s1 + $0x158] sm:$0xff] }
 0x935   :  { %v4740_v27 = vpop.f32.mrf.mxu1 }
 0x936   :  { %v4744_v63 = vadd.f32 %v4740_v27, %v4702_v62  ;;  %v15377_v62 = vld [vmem:[%s16857_s1 + $0x160] sm:$0xff]  ;;  %v15366_v27 = vld [vmem:[%s16857_s1 + $0x118] sm:$0xff] }
 0x938   :  { %v4770_v47 = vadd.f32 %v4766_v39, %v4744_v63  ;;  %v15352_v63 = vld [vmem:[%s16888_s4 + $0x28] sm:$0xff]  ;;  %v15362_v39 = vld [vmem:[%s16888_s4 + $0x38] sm:$0xff] }
 0x93a   :  { %v4772_v17 = vmax.f32 %v4770_v47, 0.0  ;;  %v15365_v47 = vld [vmem:[%s16857_s1 + $0x110] sm:$0xff] }
 0x93c   :  { %v16881_v59 = vpack.c.bf16 %v4772_v17, %v4771_v20  ;;  %v15375_v20 = vld [vmem:[%s16857_s1 + $0x150] sm:$0xff]  ;;  %v15364_v17 = vld [vmem:[%s16857_s1 + $0x108] sm:$0xff] }
 0x93e   :  { %4850 = vmatmul.bf16.vlgmr.msrb.gmra.mxu2 %v16881_v59  ;;  %4993 = vmatmul.bf16.vlgmr.msrb.gmra.mxu3 %v16881_v59 }
 0x9c1   :  { %v4851_v33 = vpop.f32.mrf.mxu2  ;;  %v4994_v12 = vpop.f32.mrf.mxu3 }
 0x9c9   :  { %v4853_v45 = vpop.f32.mrf.mxu2  ;;  %v4996_v32 = vpop.f32.mrf.mxu3 }
 0x9ca   :  { %v4856_v46 = vpack.c.bf16 %v4853_v45, %v4851_v33  ;;  %v4999_v0 = vpack.c.bf16 %v4996_v32, %v4994_v12  ;;  %v15374_v33 = vld [vmem:[%s16857_s1 + $0x148] sm:$0xff]  ;;  %v15363_v12 = vld [vmem:[%s16857_s1 + $0x100] sm:$0xff] }
 0x9cb   :  { %v15373_v45 = vld [vmem:[%s16857_s1 + $0x140] sm:$0xff] }
 0x9cc   :  { %4884 = vmatpush.bf16.msra.mxu1 %v4856_v46  ;;  %5028 = vmatpush.bf16.msrb.mxu0 %v4999_v0 }
 0x9cf   :  { %13129 = vmatmul.msk.bf16.vlgmr.msra.gmra.mxu1 %vm3467_vm1, %v15331_v50  ;;  %13191 = vmatmul.msk.bf16.vlgmr.msrb.gmra.mxu0 %vm3467_vm1, %v15341_v40 }
 0x9d0   :  { %5109 = vmatpush.bf16.msrb.mxu1 %v15350_v48  ;;  %5233 = vmatpush.bf16.msra.mxu0 %v15360_v34 }
 0x9d4   :  { %5110 = vmatpush.bf16.msrb.mxu1 %v15349_v5  ;;  %5234 = vmatpush.bf16.msra.mxu0 %v15359_v1 }
 0x9d8   :  { %5111 = vmatpush.bf16.msrb.mxu1 %v15348_v42  ;;  %5235 = vmatpush.bf16.msra.mxu0 %v15358_v19 }
 0x9dc   :  { %5112 = vmatpush.bf16.msrb.mxu1 %v15347_v55  ;;  %5236 = vmatpush.bf16.msra.mxu0 %v15357_v61 }
 0x9df   :  { %13130 = vmatmul.msk.bf16.gmra.mxu1 %vm3467_vm1, %v15332_v13  ;;  %13192 = vmatmul.msk.bf16.gmra.mxu0 %vm3467_vm1, %v15342_v38  ;;  %v15390_v38 = vld [vmem:[%s16857_s1 + $0x1b8] sm:$0xff] }
 0x9e0   :  { %5113 = vmatpush.bf16.msrb.mxu1 %v15346_v31  ;;  %5237 = vmatpush.bf16.msra.mxu0 %v15356_v14 }
 0x9e4   :  { %5114 = vmatpush.bf16.msrb.mxu1 %v15345_v53  ;;  %5238 = vmatpush.bf16.msra.mxu0 %v15355_v15  ;;  %v15400_v53 = vld [vmem:[%s16857_s1 + $0x1f8] sm:$0xff] }
 0x9e8   :  { %5115 = vmatpush.bf16.msrb.mxu1 %v15344_v49  ;;  %5239 = vmatpush.bf16.msra.mxu0 %v15354_v2  ;;  %v15371_v2 = vld [vmem:[%s16888_s4 + $0x40] sm:$0xff] }
 0x9ec   :  { %5116 = vmatpush.bf16.msrb.mxu1 %v15343_v3  ;;  %5240 = vmatpush.bf16.msra.mxu0 %v15353_v43  ;;  %v15381_v3 = vld [vmem:[%s16888_s4 + $0x50] sm:$0xff] }
 0x9ed   :  { %v15389_v43 = vld [vmem:[%s16857_s1 + $0x1b0] sm:$0xff] }
 0x9ef   :  { %5117 = vmatmul.bf16.vlgmr.msrb.gmra.mxu1 %v16881_v59  ;;  %5241 = vmatmul.bf16.vlgmr.msra.gmra.mxu0 %v16881_v59 }
 0xa4c   :  { %v4886_v7 = vpop.f32.mrf.mxu1  ;;  %v5030_v18 = vpop.f32.mrf.mxu0 }
 0xa4d   :  { %v4916_v16 = vadd.f32 %v4899_v51, %v4886_v7  ;;  %v15399_v51 = vld [vmem:[%s16857_s1 + $0x1f0] sm:$0xff]  ;;  %v15388_v7 = vld [vmem:[%s16857_s1 + $0x1a8] sm:$0xff] }
 0xa4f   :  { %v5040_v56 = vadd.f32 %v5030_v18, %v4916_v16  ;;  %v15398_v18 = vld [vmem:[%s16857_s1 + $0x1e8] sm:$0xff]  ;;  %v15387_v16 = vld [vmem:[%s16857_s1 + $0x1a0] sm:$0xff] }
 0xa54   :  { %v16916_v57 = vpop.f32.mrf.mxu1  ;;  %v16918_v9 = vpop.f32.mrf.mxu0 }
 0xa5c   :  { %v4891_v37 = vpop.f32.mrf.mxu1  ;;  %v5035_v60 = vpop.f32.mrf.mxu0 }
 0xa5d   :  { %v4918_v24 = vadd.f32 %v4909_v8, %v4891_v37  ;;  %v15386_v8 = vld [vmem:[%s16857_s1 + $0x198] sm:$0xff] }
 0xa5e   :  { %v15396_v37 = vld [vmem:[%s16857_s1 + $0x1d8] sm:$0xff] }
 0xa5f   :  { %v5042_v52 = vadd.f32 %v5035_v60, %v4918_v24  ;;  %v15372_v60 = vld [vmem:[%s16888_s4 + $0x48] sm:$0xff]  ;;  %v15382_v24 = vld [vmem:[%s16888_s4 + $0x58] sm:$0xff] }
 0xa64   :  { %v16920_v28 = vpop.f32.mrf.mxu1  ;;  %v16922_v58 = vpop.f32.mrf.mxu0 }
 0xa6c   :  { %v5118_v6 = vpop.f32.mrf.mxu1  ;;  %v5242_v10 = vpop.f32.mrf.mxu0 }
 0xa74   :  { %v5120_v21 = vpop.f32.mrf.mxu1  ;;  %v5244_v25 = vpop.f32.mrf.mxu0 }
 0xa75   :  { %v5123_v22 = vpack.c.bf16 %v5120_v21, %v5118_v6  ;;  %v5247_v41 = vpack.c.bf16 %v5244_v25, %v5242_v10  ;;  %v15395_v6 = vld [vmem:[%s16857_s1 + $0x1d0] sm:$0xff]  ;;  %v15384_v10 = vld [vmem:[%s16857_s1 + $0x188] sm:$0xff]  ;;  %v15383_v25 = vld [vmem:[%s16857_s1 + $0x180] sm:$0xff] }
 0xa76   :  { %v15394_v21 = vld [vmem:[%s16857_s1 + $0x1c8] sm:$0xff] }
 0xa77   :  { %5152 = vmatpush.bf16.msra.mxu2 %v5123_v22  ;;  %5276 = vmatpush.bf16.msra.mxu3 %v5247_v41 }
 0xa7a   :  { %13253 = vmatmul.msk.bf16.vlgmr.msra.gmra.mxu2 %vm3467_vm1, %v15351_v26  ;;  %13315 = vmatmul.msk.bf16.vlgmr.msra.gmra.mxu3 %vm3467_vm1, %v15361_v44 }
 0xa7b   :  { %5357 = vmatpush.bf16.msrb.mxu2 %v15370_v29  ;;  %5481 = vmatpush.bf16.msrb.mxu3 %v15380_v35  ;;  %v15393_v29 = vld [vmem:[%s16857_s1 + $0x1c0] sm:$0xff] }
 0xa7f   :  { %5358 = vmatpush.bf16.msrb.mxu2 %v15369_v54  ;;  %5482 = vmatpush.bf16.msrb.mxu3 %v15379_v36 }
 0xa83   :  { %5359 = vmatpush.bf16.msrb.mxu2 %v15368_v4  ;;  %5483 = vmatpush.bf16.msrb.mxu3 %v15378_v23 }
 0xa87   :  { %5360 = vmatpush.bf16.msrb.mxu2 %v15367_v30  ;;  %5484 = vmatpush.bf16.msrb.mxu3 %v15377_v62 }
 0xa8a   :  { %13254 = vmatmul.msk.bf16.gmra.mxu2 %vm3467_vm1, %v15352_v63  ;;  %13316 = vmatmul.msk.bf16.gmra.mxu3 %vm3467_vm1, %v15362_v39 }
 0xa8b   :  { %5361 = vmatpush.bf16.msrb.mxu2 %v15366_v27  ;;  %5485 = vmatpush.bf16.msrb.mxu3 %v15376_v11 }
 0xa8f   :  { %5362 = vmatpush.bf16.msrb.mxu2 %v15365_v47  ;;  %5486 = vmatpush.bf16.msrb.mxu3 %v15375_v20  ;;  %v15410_v20 = vld [vmem:[%s16857_s1 + $0x238] sm:$0xff] }
 0xa93   :  { %5363 = vmatpush.bf16.msrb.mxu2 %v15364_v17  ;;  %5487 = vmatpush.bf16.msrb.mxu3 %v15374_v33 }
 0xa97   :  { %5364 = vmatpush.bf16.msrb.mxu2 %v15363_v12  ;;  %5488 = vmatpush.bf16.msrb.mxu3 %v15373_v45  ;;  %v15391_v12 = vld [vmem:[%s16888_s4 + $0x60] sm:$0xff]  ;;  %v15401_v45 = vld [vmem:[%s16888_s4 + $0x70] sm:$0xff] }
 0xa9a   :  { %5365 = vmatmul.bf16.vlgmr.msrb.gmra.mxu2 %v16881_v59  ;;  %5489 = vmatmul.bf16.vlgmr.msrb.gmra.mxu3 %v16881_v59 }
 0xafd   :  { %v5154_v32 = vpop.f32.mrf.mxu2  ;;  %v5278_v48 = vpop.f32.mrf.mxu3 }
 0xafe   :  { %v5164_v34 = vadd.f32 %v5154_v32, %v5040_v56  ;;  %v15397_v56 = vld [vmem:[%s16857_s1 + $0x1e0] sm:$0xff]  ;;  %v15409_v32 = vld [vmem:[%s16857_s1 + $0x230] sm:$0xff] }
 0xb00   :  { %v5288_v46 = vadd.f32 %v5278_v48, %v5164_v34  ;;  %v15408_v48 = vld [vmem:[%s16857_s1 + $0x228] sm:$0xff]  ;;  %v15407_v34 = vld [vmem:[%s16857_s1 + $0x220] sm:$0xff] }
 0xb05   :  { %v16950_v0 = vpop.f32.mrf.mxu2  ;;  %v16952_v50 = vpop.f32.mrf.mxu3 }
 0xb0d   :  { %v5159_v40 = vpop.f32.mrf.mxu2  ;;  %v5283_v5 = vpop.f32.mrf.mxu3 }
 0xb0e   :  { %v5166_v1 = vadd.f32 %v5159_v40, %v5042_v52  ;;  %v15385_v52 = vld [vmem:[%s16857_s1 + $0x190] sm:$0xff]  ;;  %v15392_v40 = vld [vmem:[%s16888_s4 + $0x68] sm:$0xff] }
 0xb10   :  { %v5290_v42 = vadd.f32 %v5283_v5, %v5166_v1  ;;  %v15402_v5 = vld [vmem:[%s16888_s4 + $0x78] sm:$0xff]  ;;  %v15405_v1 = vld [vmem:[%s16857_s1 + $0x210] sm:$0xff] }
 0xb15   :  { %v16954_v19 = vpop.f32.mrf.mxu2  ;;  %v16956_v55 = vpop.f32.mrf.mxu3 }
 0xb1d   :  { %v5366_v61 = vpop.f32.mrf.mxu2  ;;  %v5490_v31 = vpop.f32.mrf.mxu3 }
 0xb25   :  { %v5368_v14 = vpop.f32.mrf.mxu2  ;;  %v5492_v13 = vpop.f32.mrf.mxu3 }
 0xb26   :  { %v16960_v15 = vpack.c.bf16 %v5368_v14, %v5366_v61  ;;  %v5495_v49 = vpack.c.bf16 %v5492_v13, %v5490_v31  ;;  %v15403_v61 = vld [vmem:[%s16857_s1 + $0x200] sm:$0xff] }
 0xb28   :  { %5400 = vmatpush.bf16.msra.mxu1 %v16960_v15  ;;  %5524 = vmatpush.bf16.msrb.mxu0 %v5495_v49 }
 0xb2b   :  { %13377 = vmatmul.msk.bf16.vlgmr.msra.gmra.mxu1 %vm3467_vm1, %v15371_v2  ;;  %13439 = vmatmul.msk.bf16.vlgmr.msrb.gmra.mxu0 %vm3467_vm1, %v15381_v3 }
 0xb2c   :  { %5605 = vmatpush.bf16.msrb.mxu1 %v15390_v38  ;;  %5729 = vmatpush.bf16.msra.mxu0 %v15400_v53 }
 0xb30   :  { %5606 = vmatpush.bf16.msrb.mxu1 %v15389_v43  ;;  %5730 = vmatpush.bf16.msra.mxu0 %v15399_v51  ;;  %v15411_v51 = vld [vmem:[%s16888_s4 + $0x80] sm:$0xff] }
 0xb34   :  { %5607 = vmatpush.bf16.msrb.mxu1 %v15388_v7  ;;  %5731 = vmatpush.bf16.msra.mxu0 %v15398_v18  ;;  %v15412_v7 = vld [vmem:[%s16888_s4 + $0x88] sm:$0xff]  ;;  %v15418_v18 = vld [vmem:[%s17019_s9 + $0x18] sm:$0xff]  ;;  %s10707_s4 = sld [smem:[%s17871_s0 + %s15672_s20]]  }
 0xb38   :  { %5608 = vmatpush.bf16.msrb.mxu1 %v15387_v16  ;;  %5732 = vmatpush.bf16.msra.mxu0 %v15397_v56  ;;  %v15413_v16 = vld [vmem:[%s17019_s9] sm:$0xff]  ;;  %v15417_v56 = vld [vmem:[%s17019_s9 + $0x10] sm:$0xff] }
 0xb3b   :  { %13378 = vmatmul.msk.bf16.gmra.mxu1 %vm3467_vm1, %v15372_v60  ;;  %13440 = vmatmul.msk.bf16.gmra.mxu0 %vm3467_vm1, %v15382_v24 }
 0xb3c   :  { %5609 = vmatpush.bf16.msrb.mxu1 %v15386_v8  ;;  %5733 = vmatpush.bf16.msra.mxu0 %v15396_v37  ;;  %v4904_v8 = vpop.permute.xlu1 %4903 }
 0xb3d   :  { %v4917_v37 = vadd.f32 %v4904_v8, %v16916_v57  ;;  %v15421_v57 = vld [vmem:[%s17019_s9 + $0x20] sm:$0xff] }
 0xb3e   :  { %v15415_v8 = vld [vmem:[%s17078_s19] sm:$0xff] }
 0xb3f   :  { %v5041_v60 = vadd.f32 %v16918_v9, %v4917_v37  ;;  %v15425_v9 = vld [vmem:[%s17019_s9 + $0x30] sm:$0xff] }
 0xb40   :  { %5610 = vmatpush.bf16.msrb.mxu1 %v15385_v52  ;;  %5734 = vmatpush.bf16.msra.mxu0 %v15395_v6 }
 0xb41   :  { %v5165_v52 = vadd.f32 %v16950_v0, %v5041_v60 }
 0xb43   :  { %v5289_v6 = vadd.f32 %v16952_v50, %v5165_v52  ;;  %v15419_v52 = vld [vmem:[%s17078_s19 + $0x10] sm:$0xff] }
 0xb44   :  { %5611 = vmatpush.bf16.msrb.mxu1 %v15384_v10  ;;  %5735 = vmatpush.bf16.msra.mxu0 %v15394_v21  ;;  %v4914_v21 = vpop.permute.xlu0 %4913 }
 0xb48   :  { %5612 = vmatpush.bf16.msrb.mxu1 %v15383_v25  ;;  %5736 = vmatpush.bf16.msra.mxu0 %v15393_v29  ;;  %v15422_v25 = vld [vmem:[%s17019_s9 + $0x28] sm:$0xff]  ;;  %v15426_v29 = vld [vmem:[%s17019_s9 + $0x38] sm:$0xff] }
 0xb4b   :  { %5613 = vmatmul.bf16.vlgmr.msrb.gmra.mxu1 %v16881_v59  ;;  %5737 = vmatmul.bf16.vlgmr.msra.gmra.mxu0 %v16881_v59 }
 0xba8   :  { %v5402_v35 = vpop.f32.mrf.mxu1  ;;  %v5526_v22 = vpop.f32.mrf.mxu0 }
 0xba9   :  { %v5412_v41 = vadd.f32 %v5402_v35, %v5288_v46  ;;  %v15406_v46 = vld [vmem:[%s16857_s1 + $0x218] sm:$0xff] }
 0xbab   :  { %v5536_v26 = vadd.f32 %v5526_v22, %v5412_v41  ;;  %v4919_v41 = vadd.f32 %v4914_v21, %v16920_v28 }
 0xbad   :  { %v5043_v0 = vadd.f32 %v16922_v58, %v4919_v41 }
 0xbaf   :  { %v5167_v50 = vadd.f32 %v16954_v19, %v5043_v0 }
 0xbb0   :  { %v16987_v44 = vpop.f32.mrf.mxu1  ;;  %v16989_v54 = vpop.f32.mrf.mxu0 }
 0xbb1   :  { %v5413_v10 = vadd.f32 %v16987_v44, %v5289_v6  ;;  %v5291_v28 = vadd.f32 %v16956_v55, %v5167_v50 }
 0xbb8   :  { %v5407_v36 = vpop.f32.mrf.mxu1  ;;  %v5531_v4 = vpop.f32.mrf.mxu0 }
 0xbb9   :  { %v5414_v23 = vadd.f32 %v5407_v36, %v5290_v42  ;;  %v15404_v42 = vld [vmem:[%s16857_s1 + $0x208] sm:$0xff]  ;;  %s10706_s1 = sld [smem:[%s17871_s0 + %s15671_s3]]  }
 0xbbb   :  { %v5538_v30 = vadd.f32 %v5531_v4, %v5414_v23 }
 0xbc0   :  { %v16991_v62 = vpop.f32.mrf.mxu1  ;;  %v16993_v27 = vpop.f32.mrf.mxu0 }
 0xbc8   :  { %v5614_v11 = vpop.f32.mrf.mxu1  ;;  %v5738_v63 = vpop.f32.mrf.mxu0 }
 0xbd0   :  { %v5616_v39 = vpop.f32.mrf.mxu1  ;;  %v5740_v47 = vpop.f32.mrf.mxu0 }
 0xbd1   :  { %v5619_v17 = vpack.c.bf16 %v5616_v39, %v5614_v11  ;;  %v5743_v33 = vpack.c.bf16 %v5740_v47, %v5738_v63  ;;  %v5415_v47 = vadd.f32 %v16991_v62, %v5291_v28 }
 0xbd3   :  { %5648 = vmatpush.bf16.msra.mxu2 %v5619_v17  ;;  %5772 = vmatpush.bf16.msra.mxu3 %v5743_v33  ;;  %v5539_v19 = vadd.f32 %v16993_v27, %v5415_v47  ;;  %v15430_v27 = vld [vmem:[%s17019_s9 + $0x48] sm:$0xff] }
 0xbd6   :  { %13501 = vmatmul.msk.bf16.vlgmr.msra.gmra.mxu2 %vm3467_vm1, %v15391_v12  ;;  %13563 = vmatmul.msk.bf16.vlgmr.msra.gmra.mxu3 %vm3467_vm1, %v15401_v45 }
 0xbd7   :  { %5853 = vmatpush.bf16.msrb.mxu2 %v15410_v20 }
 0xbdb   :  { %5854 = vmatpush.bf16.msrb.mxu2 %v15409_v32 }
 0xbdf   :  { %5855 = vmatpush.bf16.msrb.mxu2 %v15408_v48 }
 0xbe3   :  { %5856 = vmatpush.bf16.msrb.mxu2 %v15407_v34 }
 0xbe6   :  { %13502 = vmatmul.msk.bf16.gmra.mxu2 %vm3467_vm1, %v15392_v40  ;;  %13564 = vmatmul.msk.bf16.gmra.mxu3 %vm3467_vm1, %v15402_v5  ;;  %v15434_v40 = vld [vmem:[%s17019_s9 + $0x58] sm:$0xff]  ;;  %v15433_v5 = vld [vmem:[%s17019_s9 + $0x50] sm:$0xff] }
 0xbe7   :  { %5857 = vmatpush.bf16.msrb.mxu2 %v15406_v46 }
 0xbeb   :  { %5858 = vmatpush.bf16.msrb.mxu2 %v15405_v1  ;;  %v15429_v1 = vld [vmem:[%s17019_s9 + $0x40] sm:$0xff] }
 0xbef   :  { %5859 = vmatpush.bf16.msrb.mxu2 %v15404_v42  ;;  %v15442_v42 = vld [vmem:[%s17019_s9 + $0x78] sm:$0xff] }
 0xbf3   :  { %5860 = vmatpush.bf16.msrb.mxu2 %v15403_v61  ;;  %v15441_v61 = vld [vmem:[%s17019_s9 + $0x70] sm:$0xff] }
 0xbf6   :  { %5861 = vmatmul.bf16.vlgmr.msrb.gmra.mxu2 %v16881_v59  ;;  %v15414_v59 = vld [vmem:[%s17019_s9 + $0x8] sm:$0xff] }
 0xbf7   :  { %5950 = vmatpush.bf16.msrb.mxu0 %v15414_v59  ;;  %6051 = vmatpush.bf16.msra.mxu2 %v15418_v18 }
 0xbfb   :  { %5951 = vmatpush.bf16.msrb.mxu0 %v15413_v16  ;;  %6052 = vmatpush.bf16.msra.mxu2 %v15417_v56 }
 0xbff   :  { %6133 = vmatpush.bf16.msra.mxu0 %v15422_v25  ;;  %6215 = vmatpush.bf16.msrb.mxu2 %v15426_v29  ;;  %v15416_v25 = vld [vmem:[%s17078_s19 + $0x8] sm:$0xff] }
 0xc03   :  { %6134 = vmatpush.bf16.msra.mxu0 %v15421_v57  ;;  %6216 = vmatpush.bf16.msrb.mxu2 %v15425_v9 }
 0xc59   :  { %v5650_v31 = vpop.f32.mrf.mxu2  ;;  %v5774_v24 = vpop.f32.mrf.mxu3 }
 0xc5a   :  { %v5660_v14 = vadd.f32 %v5650_v31, %v5536_v26  ;;  %v5537_v26 = vadd.f32 %v16989_v54, %v5413_v10  ;;  %v15438_v31 = vld [vmem:[%s17019_s9 + $0x68] sm:$0xff] }
 0xc5c   :  { %v5784_v4 = vadd.f32 %v5774_v24, %v5660_v14  ;;  %v15437_v14 = vld [vmem:[%s17019_s9 + $0x60] sm:$0xff] }
 0xc61   :  { %v5652_v13 = vpop.f32.mrf.mxu2  ;;  %v5776_v35 = vpop.f32.mrf.mxu3 }
 0xc62   :  { %v5661_v36 = vadd.f32 %v5652_v13, %v5537_v26  ;;  %v15446_v13 = vld [vmem:[%s17019_s9 + $0x88] sm:$0xff] }
 0xc64   :  { %v5785_v44 = vadd.f32 %v5776_v35, %v5661_v36  ;;  %v15420_v35 = vld [vmem:[%s17078_s19 + $0x18] sm:$0xff]  ;;  %v15423_v36 = vld [vmem:[%s17078_s19 + $0x20] sm:$0xff] }
 0xc69   :  { %v5655_v38 = vpop.f32.mrf.mxu2  ;;  %v5779_v63 = vpop.f32.mrf.mxu3 }
 0xc6a   :  { %v5662_v53 = vadd.f32 %v5655_v38, %v5538_v30  ;;  %v15445_v38 = vld [vmem:[%s17019_s9 + $0x80] sm:$0xff]  ;;  %s10709_s9 = sld [smem:[%s17871_s0 + %s15673_s5]]  }
 0xc6c   :  { %v5786_v12 = vadd.f32 %v5779_v63, %v5662_v53  ;;  %v15424_v63 = vld [vmem:[%s17078_s19 + $0x28] sm:$0xff] }
 0xc71   :  { %v5657_v49 = vpop.f32.mrf.mxu2  ;;  %v5781_v33 = vpop.f32.mrf.mxu3 }
 0xc72   :  { %v5663_v17 = vadd.f32 %v5657_v49, %v5539_v19 }
 0xc74   :  { %v5787_v55 = vadd.f32 %v5781_v33, %v5663_v17  ;;  %v15431_v17 = vld [vmem:[%s17078_s19 + $0x40] sm:$0xff] }
 0xc79   :  { %v5862_v2 = vpop.f32.mrf.mxu2 }
 0xc81   :  { %v5864_v3 = vpop.f32.mrf.mxu2 }
 0xc82   :  { %v5867_v43 = vpack.c.bf16 %v5864_v3, %v5862_v2 }
 0xc84   :  { %5896 = vmatpush.bf16.msra.mxu1 %v5867_v43  ;;  %v15450_v43 = vld [vmem:[%s10688_s13 + $0x8] sm:$0xff] }
 0xc87   :  { %13625 = vmatmul.msk.bf16.vlgmr.msra.gmra.mxu1 %vm3467_vm1, %v15411_v51 }
 0xc97   :  { %13626 = vmatmul.msk.bf16.gmra.mxu1 %vm3467_vm1, %v15412_v7 }
 0xd04   :  { %v5898_v22 = vpop.f32.mrf.mxu1 }
 0xd05   :  { %v5908_v23 = vadd.f32 %v5898_v22, %v5784_v4 }
 0xd07   :  { %v5912_v54 = vmax.f32 %v5908_v23, 0.0 }
 0xd0c   :  { %v5900_v30 = vpop.f32.mrf.mxu1 }
 0xd0d   :  { %v5909_v11 = vadd.f32 %v5900_v30, %v5785_v44  ;;  %v15427_v44 = vld [vmem:[%s17078_s19 + $0x30] sm:$0xff] }
 0xd0f   :  { %v5913_v39 = vmax.f32 %v5909_v11, 0.0 }
 0xd11   :  { %v5916_v20 = vpack.c.bf16 %v5913_v39, %v5912_v54  ;;  %v15428_v54 = vld [vmem:[%s17078_s19 + $0x38] sm:$0xff] }
 0xd13   :  { %13635 = vmatmul.msk.bf16.vlgmr.msrb.gmra.mxu0 %vm418_vm0, %v5916_v20  ;;  %13659 = vmatmul.msk.bf16.vlgmr.msra.gmra.mxu2 %vm418_vm0, %v5916_v20 }
 0xd14   :  { %v5903_v58 = vpop.f32.mrf.mxu1  ;;  %6379 = vmatpush.bf16.msra.mxu2 %v15434_v40  ;;  %6297 = vmatpush.bf16.msrb.mxu0 %v15430_v27  ;;  %v15436_v40 = vld [vmem:[%s17078_s19 + $0x58] sm:$0xff] }
 0xd15   :  { %v5910_v45 = vadd.f32 %v5903_v58, %v5786_v12 }
 0xd17   :  { %v5914_v48 = vmax.f32 %v5910_v45, 0.0  ;;  %v15435_v45 = vld [vmem:[%s17078_s19 + $0x50] sm:$0xff] }
 0xd18   :  { %6380 = vmatpush.bf16.msra.mxu2 %v15433_v5  ;;  %6298 = vmatpush.bf16.msrb.mxu0 %v15429_v1 }
 0xd1c   :  { %v5905_v32 = vpop.f32.mrf.mxu1 }
 0xd1d   :  { %v5911_v62 = vadd.f32 %v5905_v32, %v5787_v55 }
 0xd1f   :  { %v5915_v34 = vmax.f32 %v5911_v62, 0.0 }
 0xd21   :  { %v5917_v46 = vpack.c.bf16 %v5915_v34, %v5914_v48  ;;  %v15432_v34 = vld [vmem:[%s17078_s19 + $0x48] sm:$0xff] }
 0xd23   :  { %13636 = vmatmul.msk.bf16.gmra.mxu0 %vm418_vm0, %v5917_v46  ;;  %13660 = vmatmul.msk.bf16.gmra.mxu2 %vm418_vm0, %v5917_v46 }
 0xd33   :  { %13687 = vmatmul.msk.bf16.vlgmr.msra.gmra.mxu0 %vm418_vm0, %v5916_v20  ;;  %13715 = vmatmul.msk.bf16.vlgmr.msrb.gmra.mxu2 %vm418_vm0, %v5916_v20 }
 0xd34   :  { %6543 = vmatpush.bf16.msrb.mxu2 %v15442_v42  ;;  %6461 = vmatpush.bf16.msra.mxu0 %v15438_v31  ;;  %v15439_v31 = vld [vmem:[%s17078_s19 + $0x60] sm:$0xff] }
 0xd38   :  { %6544 = vmatpush.bf16.msrb.mxu2 %v15441_v61  ;;  %6462 = vmatpush.bf16.msra.mxu0 %v15437_v14 }
 0xd43   :  { %13688 = vmatmul.msk.bf16.gmra.mxu0 %vm418_vm0, %v5917_v46  ;;  %13716 = vmatmul.msk.bf16.gmra.mxu2 %vm418_vm0, %v5917_v46 }
 0xd53   :  { %13743 = vmatmul.msk.bf16.vlgmr.msrb.gmra.mxu0 %vm418_vm0, %v5916_v20  ;;  %13771 = vmatmul.msk.bf16.vlgmr.msra.gmra.mxu2 %vm418_vm0, %v5916_v20 }
 0xd54   :  { %6735 = vmatpush.bf16.msra.mxu2 %v16960_v15  ;;  %6625 = vmatpush.bf16.msrb.mxu0 %v15446_v13  ;;  %v15449_v15 = vld [vmem:[%s10688_s13] sm:$0xff] }
 0xd58   :  { %6626 = vmatpush.bf16.msrb.mxu0 %v15445_v38 }
 0xd63   :  { %13744 = vmatmul.msk.bf16.gmra.mxu0 %vm418_vm0, %v5917_v46  ;;  %13772 = vmatmul.msk.bf16.gmra.mxu2 %vm418_vm0, %v5917_v46 }
 0xd73   :  { %13799 = vmatmul.msk.bf16.vlgmr.msra.gmra.mxu0 %vm418_vm0, %v5916_v20  ;;  %13827 = vmatmul.msk.bf16.vlgmr.msrb.gmra.mxu2 %vm418_vm0, %v5916_v20 }
 0xd83   :  { %13800 = vmatmul.msk.bf16.gmra.mxu0 %vm418_vm0, %v5917_v46  ;;  %13828 = vmatmul.msk.bf16.gmra.mxu2 %vm418_vm0, %v5917_v46 }
 0xd90   :  { %v5953_v53 = vpop.f32.mrf.mxu0 }
 0xd93   :  { %13855 = vmatmul.msk.bf16.vlgmr.msrb.gmra.mxu0 %vm418_vm0, %v5916_v20  ;;  %13879 = vmatmul.msk.bf16.vlgmr.msra.gmra.mxu2 %vm3467_vm1, %v15449_v15  ;;  %v15443_v15 = vld [vmem:[%s17078_s19 + $0x70] sm:$0xff] }
 0xd96   :  { %v6054_v49 = vpop.f32.mrf.mxu2 }
 0xd98   :  { %v5955_v2 = vpop.f32.mrf.mxu0 }
 0xd99   :  { %v5963_v16 = vpack.c.bf16 %v5955_v2, %v5953_v53 }
 0xd9e   :  { %v6056_v3 = vpop.f32.mrf.mxu2 }
 0xd9f   :  { %v6064_v24 = vpack.c.bf16 %v6056_v3, %v6054_v49  ;;  %v15440_v49 = vld [vmem:[%s17078_s19 + $0x68] sm:$0xff]  ;;  %v15444_v3 = vld [vmem:[%s17078_s19 + $0x78] sm:$0xff] }
 0xda0   :  { %v5958_v51 = vpop.f32.mrf.mxu0 }
 0xda3   :  { %13856 = vmatmul.msk.bf16.gmra.mxu0 %vm418_vm0, %v5917_v46  ;;  %13880 = vmatmul.msk.bf16.gmra.mxu2 %vm3467_vm1, %v15450_v43 }
 0xda6   :  { %v6059_v7 = vpop.f32.mrf.mxu2 }
 0xda8   :  { %v5960_v59 = vpop.f32.mrf.mxu0 }
 0xda9   :  { %v5964_v18 = vpack.c.bf16 %v5960_v59, %v5958_v51  ;;  %v15447_v59 = vld [vmem:[%s17078_s19 + $0x80] sm:$0xff] }
 0xdab   :  { %5991 = vmatpush.bf16.msrb.mxu3 %v5964_v18  ;;  %v6007_v18 = vpop.permute.xlu1 %6006 }
 0xdae   :  { %v6061_v56 = vpop.f32.mrf.mxu2 }
 0xdaf   :  { %v6065_v37 = vpack.c.bf16 %v6061_v56, %v6059_v7  ;;  %5992 = vmatpush.bf16.msrb.mxu3 %v5963_v16 }
 0xdb0   :  { %v6136_v60 = vpop.f32.mrf.mxu0 }
 0xdb1   :  { %6093 = vmatpush.bf16.msrb.mxu1 %v6065_v37 }
 0xdb2   :  { %13645 = vmatmul.msk.bf16.vlgmr.msrb.gmra.mxu3 %vm418_vm0, %v15415_v8 }
 0xdb5   :  { %6094 = vmatpush.bf16.msrb.mxu1 %v6064_v24 }
 0xdb6   :  { %v6218_v6 = vpop.f32.mrf.mxu2 }
 0xdb8   :  { %v6138_v10 = vpop.f32.mrf.mxu0  ;;  %13673 = vmatmul.msk.bf16.vlgmr.msrb.gmra.mxu1 %vm418_vm0, %v15419_v52  ;;  %v15448_v52 = vld [vmem:[%s17078_s19 + $0x88] sm:$0xff] }
 0xdb9   :  { %v6146_v57 = vpack.c.bf16 %v6138_v10, %v6136_v60 }
 0xdbe   :  { %v6220_v21 = vpop.f32.mrf.mxu2 }
 0xdbf   :  { %v6228_v50 = vpack.c.bf16 %v6220_v21, %v6218_v6  ;;  %v6017_v6 = vpop.permute.xlu0 %6016 }
 0xdc0   :  { %v6141_v29 = vpop.f32.mrf.mxu0 }
 0xdc2   :  { %13646 = vmatmul.msk.bf16.gmra.mxu3 %vm418_vm0, %v15416_v25 }
 0xdc6   :  { %v6223_v22 = vpop.f32.mrf.mxu2 }
 0xdc8   :  { %v6143_v41 = vpop.f32.mrf.mxu0  ;;  %13674 = vmatmul.msk.bf16.gmra.mxu1 %vm418_vm0, %v15420_v35 }
 0xdc9   :  { %v6147_v26 = vpack.c.bf16 %v6143_v41, %v6141_v29 }
 0xdcb   :  { %6175 = vmatpush.bf16.msra.mxu3 %v6147_v26 }
 0xdce   :  { %v6225_v9 = vpop.f32.mrf.mxu2 }
 0xdcf   :  { %v6229_v0 = vpack.c.bf16 %v6225_v9, %v6223_v22  ;;  %6176 = vmatpush.bf16.msra.mxu3 %v6146_v57 }
 0xdd0   :  { %v6300_v4 = vpop.f32.mrf.mxu0 }
 0xdd1   :  { %6257 = vmatpush.bf16.msra.mxu1 %v6229_v0 }
 0xdd2   :  { %13701 = vmatmul.msk.bf16.vlgmr.msra.gmra.mxu3 %vm418_vm0, %v15423_v36 }
 0xdd5   :  { %6258 = vmatpush.bf16.msra.mxu1 %v6228_v50 }
 0xdd6   :  { %v6382_v23 = vpop.f32.mrf.mxu2 }
 0xdd8   :  { %v6302_v30 = vpop.f32.mrf.mxu0  ;;  %13729 = vmatmul.msk.bf16.vlgmr.msra.gmra.mxu1 %vm418_vm0, %v15427_v44 }
 0xdd9   :  { %v6310_v58 = vpack.c.bf16 %v6302_v30, %v6300_v4 }
 0xdde   :  { %v6384_v11 = vpop.f32.mrf.mxu2 }
 0xddf   :  { %v6392_v55 = vpack.c.bf16 %v6384_v11, %v6382_v23 }
 0xde0   :  { %v6305_v28 = vpop.f32.mrf.mxu0 }
 0xde2   :  { %13702 = vmatmul.msk.bf16.gmra.mxu3 %vm418_vm0, %v15424_v63 }
 0xde6   :  { %v6387_v39 = vpop.f32.mrf.mxu2 }
 0xde8   :  { %v6307_v47 = vpop.f32.mrf.mxu0  ;;  %13730 = vmatmul.msk.bf16.gmra.mxu1 %vm418_vm0, %v15428_v54 }
 0xde9   :  { %v6311_v20 = vpack.c.bf16 %v6307_v47, %v6305_v28 }
 0xdeb   :  { %6339 = vmatpush.bf16.msrb.mxu3 %v6311_v20 }
 0xdee   :  { %v6389_v19 = vpop.f32.mrf.mxu2 }
 0xdef   :  { %v6393_v33 = vpack.c.bf16 %v6389_v19, %v6387_v39  ;;  %6340 = vmatpush.bf16.msrb.mxu3 %v6310_v58 }
 0xdf0   :  { %v6464_v12 = vpop.f32.mrf.mxu0 }
 0xdf1   :  { %6421 = vmatpush.bf16.msrb.mxu1 %v6393_v33 }
 0xdf2   :  { %13757 = vmatmul.msk.bf16.vlgmr.msrb.gmra.mxu3 %vm418_vm0, %v15431_v17 }
 0xdf5   :  { %6422 = vmatpush.bf16.msrb.mxu1 %v6392_v55  ;;  %v15452_v55 = vld [vmem:[%s17119_s27 + $0x8] sm:$0xff] }
 0xdf6   :  { %v6546_v32 = vpop.f32.mrf.mxu2 }
 0xdf8   :  { %v6466_v62 = vpop.f32.mrf.mxu0  ;;  %13785 = vmatmul.msk.bf16.vlgmr.msrb.gmra.mxu1 %vm418_vm0, %v15435_v45  ;;  %v15458_v45 = vld [vmem:[%s17119_s27 + $0x18] sm:$0xff] }
 0xdf9   :  { %v6474_v42 = vpack.c.bf16 %v6466_v62, %v6464_v12  ;;  %v15451_v62 = vld [vmem:[%s17119_s27] sm:$0xff] }
 0xdfe   :  { %v6548_v48 = vpop.f32.mrf.mxu2 }
 0xdff   :  { %v6556_v38 = vpack.c.bf16 %v6548_v48, %v6546_v32  ;;  %v15457_v48 = vld [vmem:[%s17119_s27 + $0x10] sm:$0xff] }
 0xe00   :  { %v6469_v46 = vpop.f32.mrf.mxu0 }
 0xe02   :  { %13758 = vmatmul.msk.bf16.gmra.mxu3 %vm418_vm0, %v15432_v34  ;;  %v6012_v34 = vpop.permute.xlu2 %6011 }
 0xe06   :  { %v6551_v27 = vpop.f32.mrf.mxu2 }
 0xe08   :  { %v6471_v5 = vpop.f32.mrf.mxu0  ;;  %13786 = vmatmul.msk.bf16.gmra.mxu1 %vm418_vm0, %v15436_v40 }
 0xe09   :  { %v6475_v1 = vpack.c.bf16 %v6471_v5, %v6469_v46 }
 0xe0b   :  { %6503 = vmatpush.bf16.msra.mxu3 %v6475_v1 }
 0xe0e   :  { %v6553_v61 = vpop.f32.mrf.mxu2 }
 0xe0f   :  { %v6557_v14 = vpack.c.bf16 %v6553_v61, %v6551_v27  ;;  %6504 = vmatpush.bf16.msra.mxu3 %v6474_v42 }
 0xe10   :  { %v6628_v13 = vpop.f32.mrf.mxu0 }
 0xe11   :  { %6585 = vmatpush.bf16.msra.mxu1 %v6557_v14 }
 0xe12   :  { %13813 = vmatmul.msk.bf16.vlgmr.msra.gmra.mxu3 %vm418_vm0, %v15439_v31 }
 0xe15   :  { %6586 = vmatpush.bf16.msra.mxu1 %v6556_v38  ;;  %v6022_v38 = vpop.permute.xlu1 %6021 }
 0xe16   :  { %v6737_v42 = vpop.f32.mrf.mxu2 }
 0xe18   :  { %v6630_v53 = vpop.f32.mrf.mxu0  ;;  %13841 = vmatmul.msk.bf16.vlgmr.msra.gmra.mxu1 %vm418_vm0, %v15443_v15 }
 0xe19   :  { %v6638_v7 = vpack.c.bf16 %v6630_v53, %v6628_v13  ;;  %6793 = vmatpush.bf16.msrb.mxu1 %v15452_v55 }
 0xe1d   :  { %6794 = vmatpush.bf16.msrb.mxu1 %v15451_v62  ;;  %v15470_v62 = vld [vmem:[%s17119_s27 + $0x38] sm:$0xff] }
 0xe20   :  { %v6633_v2 = vpop.f32.mrf.mxu0 }
 0xe22   :  { %13814 = vmatmul.msk.bf16.gmra.mxu3 %vm418_vm0, %v15440_v49 }
 0xe28   :  { %v6635_v43 = vpop.f32.mrf.mxu0  ;;  %13842 = vmatmul.msk.bf16.gmra.mxu1 %vm418_vm0, %v15444_v3 }
 0xe29   :  { %v6639_v51 = vpack.c.bf16 %v6635_v43, %v6633_v2  ;;  %v15464_v43 = vld [vmem:[%s17119_s27 + $0x28] sm:$0xff] }
 0xe2a   :  { %7064 = vmatpush.bf16.msra.mxu1 %v15464_v43 }
 0xe2b   :  { %6667 = vmatpush.bf16.msrb.mxu3 %v6639_v51  ;;  %v6739_v51 = vpop.f32.mrf.mxu2 }
 0xe2f   :  { %6668 = vmatpush.bf16.msrb.mxu3 %v6638_v7 }
 0xe32   :  { %13869 = vmatmul.msk.bf16.vlgmr.msrb.gmra.mxu3 %vm418_vm0, %v15447_v59 }
 0xe33   :  { %6948 = vmatpush.bf16.msra.mxu3 %v15458_v45 }
 0xe35   :  { %v5994_v16 = vpop.f32.mrf.mxu3  ;;  %v6096_v56 = vpop.f32.mrf.mxu1 }
 0xe36   :  { %v6024_v8 = vadd.f32 %v6007_v18, %v5994_v16  ;;  %v15463_v18 = vld [vmem:[%s17119_s27 + $0x20] sm:$0xff] }
 0xe37   :  { %6949 = vmatpush.bf16.msra.mxu3 %v15457_v48  ;;  %7065 = vmatpush.bf16.msra.mxu1 %v15463_v18  ;;  %v15469_v48 = vld [vmem:[%s17119_s27 + $0x30] sm:$0xff]  ;;  %v15482_v18 = vld [vmem:[%s17119_s27 + $0x58] sm:$0xff] }
 0xe38   :  { %v6106_v37 = vadd.f32 %v6096_v56, %v6024_v8  ;;  %v6695_v8 = vpop.permute.xlu2 %6694 }
 0xe3d   :  { %v5996_v60 = vpop.f32.mrf.mxu3  ;;  %v6098_v24 = vpop.f32.mrf.mxu1 }
 0xe3e   :  { %v6025_v40 = vadd.f32 %v6012_v34, %v5996_v60 }
 0xe40   :  { %v6107_v27 = vadd.f32 %v6098_v24, %v6025_v40 }
 0xe42   :  { %13870 = vmatmul.msk.bf16.gmra.mxu3 %vm418_vm0, %v15448_v52  ;;  %v6700_v52 = vpop.permute.xlu0 %6699 }
 0xe45   :  { %v5999_v10 = vpop.f32.mrf.mxu3  ;;  %v6101_v21 = vpop.f32.mrf.mxu1 }
 0xe46   :  { %v6026_v25 = vadd.f32 %v6017_v6, %v5999_v10  ;;  %v6740_v10 = vadd.f32 %v6739_v51, %v6700_v52  ;;  %v15460_v51 = vld [vmem:[%s17152_s21 + $0x28] sm:$0xff]  ;;  %v15475_v52 = vld [vmem:[%s17119_s27 + $0x40] sm:$0xff] }
 0xe48   :  { %v6108_v29 = vadd.f32 %v6101_v21, %v6026_v25 }
 0xe4d   :  { %v6001_v35 = vpop.f32.mrf.mxu3  ;;  %v6103_v22 = vpop.f32.mrf.mxu1 }
 0xe4e   :  { %v6027_v2 = vadd.f32 %v6022_v38, %v6001_v35 }
 0xe50   :  { %v6109_v16 = vadd.f32 %v6103_v22, %v6027_v2 }
 0xe55   :  { %v6178_v41 = vpop.f32.mrf.mxu3  ;;  %v6260_v26 = vpop.f32.mrf.mxu1 }
 0xe56   :  { %v6188_v57 = vadd.f32 %v6178_v41, %v6106_v37  ;;  %v6738_v37 = vadd.f32 %v6737_v42, %v6695_v8  ;;  %v15468_v8 = vld [vmem:[%s17152_s21 + $0x58] sm:$0xff] }
 0xe58   :  { %v6270_v9 = vadd.f32 %v6260_v26, %v6188_v57  ;;  %v6742_v26 = vpop.f32.mrf.mxu2 }
 0xe5d   :  { %v6180_v36 = vpop.f32.mrf.mxu3  ;;  %v6262_v0 = vpop.f32.mrf.mxu1 }
 0xe5e   :  { %v6189_v1 = vadd.f32 %v6180_v36, %v6107_v27 }
 0xe60   :  { %v6271_v31 = vadd.f32 %v6262_v0, %v6189_v1 }
 0xe65   :  { %v6183_v4 = vpop.f32.mrf.mxu3  ;;  %v6265_v50 = vpop.f32.mrf.mxu1 }
 0xe66   :  { %v6190_v44 = vadd.f32 %v6183_v4, %v6108_v29 }
 0xe68   :  { %v6272_v23 = vadd.f32 %v6265_v50, %v6190_v44 }
 0xe6d   :  { %v6185_v30 = vpop.f32.mrf.mxu3  ;;  %v6267_v28 = vpop.f32.mrf.mxu1 }
 0xe6e   :  { %v6191_v60 = vadd.f32 %v6185_v30, %v6109_v16 }
 0xe70   :  { %v6273_v35 = vadd.f32 %v6267_v28, %v6191_v60  ;;  %v6705_v28 = vpop.permute.xlu1 %6704 }
 0xe75   :  { %v6342_v11 = vpop.f32.mrf.mxu3  ;;  %v6424_v39 = vpop.f32.mrf.mxu1 }
 0xe76   :  { %v6352_v63 = vadd.f32 %v6342_v11, %v6270_v9 }
 0xe78   :  { %v6434_v14 = vadd.f32 %v6424_v39, %v6352_v63  ;;  %v6743_v39 = vadd.f32 %v6742_v26, %v6705_v28 }
 0xe7d   :  { %v6344_v54 = vpop.f32.mrf.mxu3  ;;  %v6426_v58 = vpop.f32.mrf.mxu1 }
 0xe7e   :  { %v6353_v13 = vadd.f32 %v6344_v54, %v6271_v31  ;;  %v6744_v54 = vpop.f32.mrf.mxu2 }
 0xe80   :  { %v6435_v3 = vadd.f32 %v6426_v58, %v6353_v13  ;;  %v15453_v13 = vld [vmem:[%s17152_s21] sm:$0xff] }
 0xe85   :  { %v6347_v47 = vpop.f32.mrf.mxu3  ;;  %v6429_v33 = vpop.f32.mrf.mxu1 }
 0xe86   :  { %v6354_v20 = vadd.f32 %v6347_v47, %v6272_v23 }
 0xe88   :  { %v6436_v57 = vadd.f32 %v6429_v33, %v6354_v20  ;;  %v6710_v20 = vpop.permute.xlu2 %6709 }
 0xe8d   :  { %v6349_v19 = vpop.f32.mrf.mxu3  ;;  %v6431_v32 = vpop.f32.mrf.mxu1 }
 0xe8e   :  { %v6355_v9 = vadd.f32 %v6349_v19, %v6273_v35  ;;  %v6745_v19 = vadd.f32 %v6744_v54, %v6710_v20  ;;  %v15473_v54 = vld [vmem:[%s17152_s21 + $0x70] sm:$0xff] }
 0xe90   :  { %v6437_v44 = vadd.f32 %v6431_v32, %v6355_v9  ;;  %v15466_v9 = vld [vmem:[%s17152_s21 + $0x48] sm:$0xff] }
 0xe95   :  { %v6506_v17 = vpop.f32.mrf.mxu3  ;;  %v6588_v5 = vpop.f32.mrf.mxu1 }
 0xe96   :  { %v6516_v15 = vadd.f32 %v6506_v17, %v6434_v14 }
 0xe98   :  { %v6598_v7 = vadd.f32 %v6588_v5, %v6516_v15 }
 0xe9d   :  { %v6508_v12 = vpop.f32.mrf.mxu3  ;;  %v6590_v53 = vpop.f32.mrf.mxu1 }
 0xe9e   :  { %v6517_v59 = vadd.f32 %v6508_v12, %v6435_v3  ;;  %v15454_v3 = vld [vmem:[%s17152_s21 + $0x8] sm:$0xff] }
 0xea0   :  { %v6599_v24 = vadd.f32 %v6590_v53, %v6517_v59 }
 0xea5   :  { %v6511_v46 = vpop.f32.mrf.mxu3  ;;  %v6593_v29 = vpop.f32.mrf.mxu1 }
 0xea6   :  { %v6518_v22 = vadd.f32 %v6511_v46, %v6436_v57  ;;  %v15465_v57 = vld [vmem:[%s17152_s21 + $0x40] sm:$0xff] }
 0xea8   :  { %v6600_v23 = vadd.f32 %v6593_v29, %v6518_v22  ;;  %v15462_v29 = vld [vmem:[%s17152_s21 + $0x38] sm:$0xff]  ;;  %v15472_v22 = vld [vmem:[%s17152_s21 + $0x68] sm:$0xff] }
 0xead   :  { %v6513_v61 = vpop.f32.mrf.mxu3  ;;  %v6595_v11 = vpop.f32.mrf.mxu1 }
 0xeae   :  { %v6519_v30 = vadd.f32 %v6513_v61, %v6437_v44 }
 0xeb0   :  { %v6601_v47 = vadd.f32 %v6595_v11, %v6519_v30  ;;  %v15488_v11 = vld [vmem:[%s17119_s27 + $0x68] sm:$0xff] }
 0xeb5   :  { %v6670_v49 = vpop.f32.mrf.mxu3 }
 0xeb6   :  { %v6680_v56 = vadd.f32 %v6670_v49, %v6598_v7  ;;  %v15459_v49 = vld [vmem:[%s17152_s21 + $0x20] sm:$0xff] }
 0xeb8   :  { %v6747_v21 = vadd.f32 %v6738_v37, %v6680_v56  ;;  %v15455_v56 = vld [vmem:[%s17152_s21 + $0x10] sm:$0xff]  ;;  %v15476_v37 = vld [vmem:[%s17119_s27 + $0x48] sm:$0xff] }
 0xeba   :  { %v6751_v36 = vmax.f32 %v6747_v21, 0.0  ;;  %v15456_v21 = vld [vmem:[%s17152_s21 + $0x18] sm:$0xff] }
 0xebd   :  { %v6672_v6 = vpop.f32.mrf.mxu3 }
 0xebe   :  { %v6681_v25 = vadd.f32 %v6672_v6, %v6599_v24  ;;  %v15481_v24 = vld [vmem:[%s17119_s27 + $0x50] sm:$0xff] }
 0xebf   :  { %v15461_v6 = vld [vmem:[%s17152_s21 + $0x30] sm:$0xff] }
 0xec0   :  { %v6748_v41 = vadd.f32 %v6740_v10, %v6681_v25 }
 0xec2   :  { %v6752_v0 = vmax.f32 %v6748_v41, 0.0 }
 0xec4   :  { %v17127_v4 = vpack.c.bf16 %v6752_v0, %v6751_v36  ;;  %v15467_v36 = vld [vmem:[%s17152_s21 + $0x50] sm:$0xff]  ;;  %v15471_v0 = vld [vmem:[%s17152_s21 + $0x60] sm:$0xff] }
 0xec5   :  { %v6675_v50 = vpop.f32.mrf.mxu3 }
 0xec6   :  { %13889 = vmatmul.msk.bf16.vlgmr.msrb.gmra.mxu1 %vm418_vm0, %v17127_v4  ;;  %13923 = vmatmul.msk.bf16.vlgmr.msra.gmra.mxu3 %vm418_vm0, %v17127_v4  ;;  %v6682_v63 = vadd.f32 %v6675_v50, %v6600_v23  ;;  %v6880_v23 = vpop.permute.xlu0 %6879 }
 0xec7   :  { %7180 = vmatpush.bf16.msrb.mxu1 %v15470_v62 }
 0xec8   :  { %v6749_v17 = vadd.f32 %v6743_v39, %v6682_v63  ;;  %v15487_v39 = vld [vmem:[%s17119_s27 + $0x60] sm:$0xff] }
 0xeca   :  { %v6753_v55 = vmax.f32 %v6749_v17, 0.0 }
 0xecb   :  { %7181 = vmatpush.bf16.msrb.mxu1 %v15469_v48 }
 0xecd   :  { %v6677_v58 = vpop.f32.mrf.mxu3 }
 0xece   :  { %v6683_v33 = vadd.f32 %v6677_v58, %v6601_v47 }
 0xed0   :  { %v6750_v12 = vadd.f32 %v6745_v19, %v6683_v33  ;;  %v6890_v19 = vpop.permute.xlu2 %6889 }
 0xed2   :  { %v6754_v45 = vmax.f32 %v6750_v12, 0.0 }
 0xed4   :  { %v17133_v32 = vpack.c.bf16 %v6754_v45, %v6753_v55  ;;  %v15474_v55 = vld [vmem:[%s17152_s21 + $0x78] sm:$0xff]  ;;  %v17205_v45 = vpop.permute.xlu1 %6884 }
 0xed6   :  { %13890 = vmatmul.msk.bf16.gmra.mxu1 %vm418_vm0, %v17133_v32  ;;  %13924 = vmatmul.msk.bf16.gmra.mxu3 %vm418_vm0, %v17133_v32 }
 0xee6   :  { %13965 = vmatmul.msk.bf16.vlgmr.msra.gmra.mxu1 %vm418_vm0, %v17127_v4 }
 0xef6   :  { %13966 = vmatmul.msk.bf16.gmra.mxu1 %vm418_vm0, %v17133_v32 }
 0xf06   :  { %14007 = vmatmul.msk.bf16.vlgmr.msrb.gmra.mxu1 %vm418_vm0, %v17127_v4 }
 0xf16   :  { %14008 = vmatmul.msk.bf16.gmra.mxu1 %vm418_vm0, %v17133_v32 }
 0xf43   :  { %v6796_v34 = vpop.f32.mrf.mxu1 }
 0xf49   :  { %v6951_v46 = vpop.f32.mrf.mxu3 }
 0xf4b   :  { %v6798_v40 = vpop.f32.mrf.mxu1 }
 0xf4c   :  { %v6806_v31 = vpack.c.bf16 %v6798_v40, %v6796_v34  ;;  %v6900_v40 = vpop.permute.xlu1 %6899 }
 0xf51   :  { %v6953_v27 = vpop.f32.mrf.mxu3 }
 0xf52   :  { %v6961_v53 = vpack.c.bf16 %v6953_v27, %v6951_v46 }
 0xf53   :  { %v6801_v5 = vpop.f32.mrf.mxu1 }
 0xf59   :  { %v6956_v1 = vpop.f32.mrf.mxu3 }
 0xf5b   :  { %v6803_v42 = vpop.f32.mrf.mxu1 }
 0xf5c   :  { %v6807_v61 = vpack.c.bf16 %v6803_v42, %v6801_v5 }
 0xf5e   :  { %6854 = vmatpush.bf16.msra.mxu0 %v6807_v61  ;;  %v17214_v61 = vpop.permute.xlu0 %6894 }
 0xf61   :  { %v6958_v14 = vpop.f32.mrf.mxu3 }
 0xf62   :  { %v6962_v38 = vpack.c.bf16 %v6958_v14, %v6956_v1  ;;  %6855 = vmatpush.bf16.msra.mxu0 %v6806_v31 }
 0xf63   :  { %v7067_v15 = vpop.f32.mrf.mxu1 }
 0xf64   :  { %7010 = vmatpush.bf16.msrb.mxu2 %v6962_v38 }
 0xf65   :  { %13907 = vmatmul.msk.bf16.vlgmr.msra.gmra.mxu0 %vm418_vm0, %v15453_v13 }
 0xf68   :  { %7011 = vmatpush.bf16.msrb.mxu2 %v6961_v53 }
 0xf6b   :  { %13949 = vmatmul.msk.bf16.vlgmr.msrb.gmra.mxu2 %vm418_vm0, %v15459_v49  ;;  %v7069_v2 = vpop.f32.mrf.mxu1 }
 0xf6c   :  { %v7077_v16 = vpack.c.bf16 %v7069_v2, %v7067_v15  ;;  %7296 = vmatpush.bf16.msra.mxu2 %v15476_v37  ;;  %v6910_v15 = vpop.permute.xlu0 %6909 }
 0xf70   :  { %7297 = vmatpush.bf16.msra.mxu2 %v15475_v52 }
 0xf73   :  { %v7072_v43 = vpop.f32.mrf.mxu1 }
 0xf75   :  { %13908 = vmatmul.msk.bf16.gmra.mxu0 %vm418_vm0, %v15454_v3 }
 0xf7b   :  { %13950 = vmatmul.msk.bf16.gmra.mxu2 %vm418_vm0, %v15460_v51  ;;  %v7074_v7 = vpop.f32.mrf.mxu1 }
 0xf7c   :  { %v7078_v59 = vpack.c.bf16 %v7074_v7, %v7072_v43 }
 0xf7e   :  { %7126 = vmatpush.bf16.msrb.mxu0 %v7078_v59  ;;  %15593 = vmatpush.bf16.msrb.mxu3 %v7078_v59 }
 0xf82   :  { %7127 = vmatpush.bf16.msrb.mxu0 %v7077_v16  ;;  %15594 = vmatpush.bf16.msrb.mxu3 %v7077_v16 }
 0xf83   :  { %v7183_v60 = vpop.f32.mrf.mxu1 }
 0xf85   :  { %13909 = vmatmul.msk.bf16.gmra.mxu0 %vm418_vm0, %v15455_v56  ;;  %13994 = vmatmul.msk.bf16.vlgmr.msrb.gmra.mxu3 %vm418_vm0, %v15468_v8 }
 0xf86   :  { %7412 = vmatpush.bf16.msra.mxu3 %v15482_v18 }
 0xf8a   :  { %7413 = vmatpush.bf16.msra.mxu3 %v15481_v24 }
 0xf8b   :  { %13951 = vmatmul.msk.bf16.gmra.mxu2 %vm418_vm0, %v15461_v6  ;;  %v7185_v10 = vpop.f32.mrf.mxu1 }
 0xf8c   :  { %v7193_v26 = vpack.c.bf16 %v7185_v10, %v7183_v60  ;;  %v15483_v10 = vld [vmem:[%s17152_s21 + $0xa0] sm:$0xff] }
 0xf93   :  { %v7188_v25 = vpop.f32.mrf.mxu1 }
 0xf95   :  { %13910 = vmatmul.msk.bf16.gmra.mxu0 %vm418_vm0, %v15456_v21  ;;  %14091 = vmatmul.msk.bf16.vlgmr.msra.gmra.mxu3 %vm418_vm0, %v17127_v4 }
 0xf9b   :  { %13952 = vmatmul.msk.bf16.gmra.mxu2 %vm418_vm0, %v15462_v29  ;;  %v7190_v35 = vpop.f32.mrf.mxu1 }
 0xf9c   :  { %v7194_v41 = vpack.c.bf16 %v7190_v35, %v7188_v25 }
 0xf9e   :  { %7242 = vmatpush.bf16.msra.mxu0 %v7194_v41 }
 0xfa2   :  { %7243 = vmatpush.bf16.msra.mxu0 %v7193_v26  ;;  %v15484_v26 = vld [vmem:[%s17152_s21 + $0xa8] sm:$0xff] }
 0xfa5   :  { %13991 = vmatmul.msk.bf16.vlgmr.msrb.gmra.mxu0 %vm418_vm0, %v15465_v57  ;;  %14092 = vmatmul.msk.bf16.gmra.mxu3 %vm418_vm0, %v17133_v32 }
 0xfa6   :  { %7528 = vmatpush.bf16.msrb.mxu0 %v15488_v11  ;;  %v15485_v11 = vld [vmem:[%s17152_s21 + $0xb0] sm:$0xff] }
 0xfaa   :  { %7529 = vmatpush.bf16.msrb.mxu0 %v15487_v39 }
 0xfab   :  { %14049 = vmatmul.msk.bf16.vlgmr.msra.gmra.mxu2 %vm418_vm0, %v17127_v4 }
 0xfb5   :  { %13992 = vmatmul.msk.bf16.gmra.mxu0 %vm418_vm0, %v15466_v9 }
 0xfbb   :  { %14050 = vmatmul.msk.bf16.gmra.mxu2 %vm418_vm0, %v17133_v32 }
 0xfc5   :  { %13993 = vmatmul.msk.bf16.gmra.mxu0 %vm418_vm0, %v15467_v36 }
 0xfd5   :  { %14033 = vmatmul.msk.bf16.vlgmr.msra.gmra.mxu0 %vm418_vm0, %v15471_v0  ;;  %v15477_v0 = vld [vmem:[%s17152_s21 + $0x80] sm:$0xff] }
 0xfe2   :  { %v6857_v50 = vpop.f32.mrf.mxu0 }
 0xfe3   :  { %v6917_v30 = vadd.f32 %v6880_v23, %v6857_v50  ;;  %v15500_v50 = vld [vmem:[%s17119_s27 + $0x88] sm:$0xff] }
 0xfe5   :  { %14034 = vmatmul.msk.bf16.gmra.mxu0 %vm418_vm0, %v15472_v22 }
 0xfea   :  { %v17194_v44 = vpop.f32.mrf.mxu0 }
 0xfee   :  { %v7013_v63 = vpop.f32.mrf.mxu2 }
 0xfef   :  { %v7033_v28 = vadd.f32 %v7013_v63, %v6917_v30  ;;  %v15499_v30 = vld [vmem:[%s17119_s27 + $0x80] sm:$0xff] }
 0xff2   :  { %v6862_v47 = vpop.f32.mrf.mxu0 }
 0xff3   :  { %v6919_v17 = vadd.f32 %v6890_v19, %v6862_v47  ;;  %v15494_v47 = vld [vmem:[%s17119_s27 + $0x78] sm:$0xff] }
 0xff4   :  { %v15486_v19 = vld [vmem:[%s17152_s21 + $0xb8] sm:$0xff] }
 0xff5   :  { %14035 = vmatmul.msk.bf16.gmra.mxu0 %vm418_vm0, %v15473_v54 }
 0xff6   :  { %v17200_v20 = vpop.f32.mrf.mxu2 }
 0xffa   :  { %v17202_v58 = vpop.f32.mrf.mxu0 }
 0xffe   :  { %v7018_v33 = vpop.f32.mrf.mxu2 }
 0xfff   :  { %v7035_v12 = vadd.f32 %v7018_v33, %v6919_v17  ;;  %v15493_v33 = vld [vmem:[%s17119_s27 + $0x70] sm:$0xff] }
0x1002   :  { %v6867_v62 = vpop.f32.mrf.mxu0 }
0x1003   :  { %v6921_v27 = vadd.f32 %v6900_v40, %v6867_v62  ;;  %v15480_v40 = vld [vmem:[%s17152_s21 + $0x98] sm:$0xff] }
0x1005   :  { %14036 = vmatmul.msk.bf16.gmra.mxu0 %vm418_vm0, %v15474_v55 }
0x1006   :  { %v17208_v48 = vpop.f32.mrf.mxu2 }
0x1008   :  { %v7144_v34 = vpop.f32.mrf.mxu3 }
0x100a   :  { %v17210_v46 = vpop.f32.mrf.mxu0 }
0x100e   :  { %v7023_v5 = vpop.f32.mrf.mxu2 }
0x100f   :  { %v7037_v1 = vadd.f32 %v7023_v5, %v6921_v27 }
0x1010   :  { %v17212_v42 = vpop.f32.mrf.mxu3 }
0x1012   :  { %v6872_v31 = vpop.f32.mrf.mxu0 }
0x1013   :  { %v6923_v53 = vadd.f32 %v6910_v15, %v6872_v31 }
0x1015   :  { %14133 = vmatmul.msk.bf16.vlgmr.msrb.gmra.mxu0 %vm418_vm0, %v17127_v4 }
0x1016   :  { %v17218_v14 = vpop.f32.mrf.mxu2 }
0x1018   :  { %v7415_v13 = vpop.f32.mrf.mxu3 }
0x101a   :  { %v17220_v38 = vpop.f32.mrf.mxu0 }
0x101e   :  { %v7028_v49 = vpop.f32.mrf.mxu2 }
0x101f   :  { %v7039_v2 = vadd.f32 %v7028_v49, %v6923_v53 }
0x1020   :  { %v7417_v3 = vpop.f32.mrf.mxu3 }
0x1021   :  { %v7155_v43 = vadd.f32 %v7144_v34, %v7039_v2  ;;  %v7425_v52 = vpack.c.bf16 %v7417_v3, %v7415_v13  ;;  %v15489_v3 = vld [vmem:[%s17152_s21 + $0xc0] sm:$0xff] }
0x1022   :  { %v7129_v51 = vpop.f32.mrf.mxu0 }
0x1023   :  { %v7149_v7 = vadd.f32 %v7129_v51, %v7033_v28  ;;  %v15478_v28 = vld [vmem:[%s17152_s21 + $0x88] sm:$0xff] }
0x1024   :  { %v15490_v51 = vld [vmem:[%s17152_s21 + $0xc8] sm:$0xff] }
0x1025   :  { %14134 = vmatmul.msk.bf16.gmra.mxu0 %vm418_vm0, %v17133_v32 }
0x1026   :  { %v17224_v59 = vpop.f32.mrf.mxu2 }
0x1028   :  { %v7420_v18 = vpop.f32.mrf.mxu3 }
0x102a   :  { %v17226_v16 = vpop.f32.mrf.mxu0 }
0x102e   :  { %v7299_v56 = vpop.f32.mrf.mxu2 }
0x1030   :  { %v7422_v8 = vpop.f32.mrf.mxu3 }
0x1031   :  { %v7426_v37 = vpack.c.bf16 %v7422_v8, %v7420_v18 }
0x1032   :  { %v7134_v60 = vpop.f32.mrf.mxu0 }
0x1033   :  { %v7151_v24 = vadd.f32 %v7134_v60, %v7035_v12  ;;  %7474 = vmatpush.bf16.msrb.mxu2 %v7426_v37  ;;  %v15479_v12 = vld [vmem:[%s17152_s21 + $0x90] sm:$0xff] }
0x1036   :  { %v7301_v6 = vpop.f32.mrf.mxu2 }
0x1037   :  { %7475 = vmatpush.bf16.msrb.mxu2 %v7425_v52  ;;  %v17239_v36 = vpack.c.bf16 %v7301_v6, %v7299_v56  ;;  %v15491_v56 = vld [vmem:[%s17152_s21 + $0xd0] sm:$0xff] }
0x103a   :  { %v17229_v21 = vpop.f32.mrf.mxu0  ;;  %14117 = vmatmul.msk.bf16.vlgmr.msrb.gmra.mxu2 %vm418_vm0, %v15483_v10  ;;  %v15492_v10 = vld [vmem:[%s17152_s21 + $0xd8] sm:$0xff] }
0x103b   :  { %7760 = vmatpush.bf16.msra.mxu2 %v15500_v50 }
0x103e   :  { %v7304_v25 = vpop.f32.mrf.mxu2 }
0x103f   :  { %7761 = vmatpush.bf16.msra.mxu2 %v15499_v30 }
0x1042   :  { %v7139_v29 = vpop.f32.mrf.mxu0 }
0x1043   :  { %v7153_v35 = vadd.f32 %v7139_v29, %v7037_v1 }
0x1046   :  { %v7306_v41 = vpop.f32.mrf.mxu2 }
0x1047   :  { %v17233_v57 = vpack.c.bf16 %v7306_v41, %v7304_v25 }
0x1049   :  { %7358 = vmatpush.bf16.msra.mxu1 %v17233_v57 }
0x104a   :  { %v17236_v9 = vpop.f32.mrf.mxu0  ;;  %14118 = vmatmul.msk.bf16.gmra.mxu2 %vm418_vm0, %v15484_v26 }
0x104d   :  { %7359 = vmatpush.bf16.msra.mxu1 %v17239_v36 }
0x1050   :  { %14075 = vmatmul.msk.bf16.vlgmr.msra.gmra.mxu1 %vm418_vm0, %v15477_v0 }
0x1051   :  { %7644 = vmatpush.bf16.msrb.mxu1 %v15494_v47 }
0x1052   :  { %v7245_v22 = vpop.f32.mrf.mxu0 }
0x1053   :  { %v7265_v23 = vadd.f32 %v7245_v22, %v7149_v7 }
0x1055   :  { %7645 = vmatpush.bf16.msrb.mxu1 %v15493_v33 }
0x105a   :  { %v17247_v63 = vpop.f32.mrf.mxu0  ;;  %14119 = vmatmul.msk.bf16.gmra.mxu2 %vm418_vm0, %v15485_v11 }
0x1060   :  { %14076 = vmatmul.msk.bf16.gmra.mxu1 %vm418_vm0, %v15478_v28 }
0x1062   :  { %v7250_v54 = vpop.f32.mrf.mxu0 }
0x1063   :  { %v7267_v39 = vadd.f32 %v7250_v54, %v7151_v24 }
0x106a   :  { %v17254_v17 = vpop.f32.mrf.mxu0  ;;  %14120 = vmatmul.msk.bf16.gmra.mxu2 %vm418_vm0, %v15486_v19 }
0x1070   :  { %14077 = vmatmul.msk.bf16.gmra.mxu1 %vm418_vm0, %v15479_v12 }
0x1072   :  { %v7255_v55 = vpop.f32.mrf.mxu0 }
0x1073   :  { %v7269_v62 = vadd.f32 %v7255_v55, %v7153_v35 }
0x107a   :  { %v17260_v34 = vpop.f32.mrf.mxu0  ;;  %14217 = vmatmul.msk.bf16.vlgmr.msra.gmra.mxu2 %vm418_vm0, %v17127_v4 }
0x1080   :  { %14078 = vmatmul.msk.bf16.gmra.mxu1 %vm418_vm0, %v15480_v40 }
0x1082   :  { %v7260_v27 = vpop.f32.mrf.mxu0 }
0x1083   :  { %v7271_v5 = vadd.f32 %v7260_v27, %v7155_v43  ;;  %v15501_v27 = vld [vmem:[%s17152_s21 + $0x100] sm:$0xff] }
0x108a   :  { %v17266_v1 = vpop.f32.mrf.mxu0  ;;  %14218 = vmatmul.msk.bf16.gmra.mxu2 %vm418_vm0, %v17133_v32 }
0x1090   :  { %14175 = vmatmul.msk.bf16.vlgmr.msrb.gmra.mxu1 %vm418_vm0, %v17127_v4 }
0x1092   :  { %v7531_v31 = vpop.f32.mrf.mxu0 }
0x109a   :  { %v7533_v13 = vpop.f32.mrf.mxu0 }
0x109b   :  { %v7541_v2 = vpack.c.bf16 %v7533_v13, %v7531_v31 }
0x10a0   :  { %14176 = vmatmul.msk.bf16.gmra.mxu1 %vm418_vm0, %v17133_v32 }
0x10a2   :  { %v7536_v15 = vpop.f32.mrf.mxu0 }
0x10aa   :  { %v7538_v53 = vpop.f32.mrf.mxu0 }
0x10ab   :  { %v7542_v49 = vpack.c.bf16 %v7538_v53, %v7536_v15  ;;  %v15495_v53 = vld [vmem:[%s17152_s21 + $0xe0] sm:$0xff] }
0x10ad   :  { %7590 = vmatpush.bf16.msrb.mxu3 %v7542_v49  ;;  %v15502_v49 = vld [vmem:[%s17152_s21 + $0x108] sm:$0xff] }
0x10b1   :  { %7591 = vmatpush.bf16.msrb.mxu3 %v7541_v2  ;;  %v15496_v2 = vld [vmem:[%s17152_s21 + $0xe8] sm:$0xff] }
0x10b4   :  { %14159 = vmatmul.msk.bf16.vlgmr.msrb.gmra.mxu3 %vm418_vm0, %v15489_v3  ;;  %v15503_v3 = vld [vmem:[%s17152_s21 + $0x110] sm:$0xff] }
0x10bd   :  { %v7477_v43 = vpop.f32.mrf.mxu2 }
0x10c4   :  { %14160 = vmatmul.msk.bf16.gmra.mxu3 %vm418_vm0, %v15490_v51  ;;  %v15504_v51 = vld [vmem:[%s17152_s21 + $0x118] sm:$0xff] }
0x10c5   :  { %v17278_v4 = vpop.f32.mrf.mxu2 }
0x10cd   :  { %v7361_v7 = vpop.f32.mrf.mxu1  ;;  %v7482_v18 = vpop.f32.mrf.mxu2 }
0x10ce   :  { %v7381_v32 = vadd.f32 %v7361_v7, %v7265_v23  ;;  %v15498_v7 = vld [vmem:[%s17152_s21 + $0xf8] sm:$0xff] }
0x10d0   :  { %v17281_v8 = vadd.f32 %v7477_v43, %v7381_v32  ;;  %v15497_v43 = vld [vmem:[%s17152_s21 + $0xf0] sm:$0xff]  ;;  %v14271_v32 = vld [vmem:[%s17325_s7 + $0x4] sm:$0xf] }
0x10d4   :  { %14161 = vmatmul.msk.bf16.gmra.mxu3 %vm418_vm0, %v15491_v56 }
0x10d5   :  { %v17284_v37 = vpop.f32.mrf.mxu1  ;;  %v17286_v60 = vpop.f32.mrf.mxu2 }
0x10dd   :  { %v7366_v24 = vpop.f32.mrf.mxu1  ;;  %v7487_v52 = vpop.f32.mrf.mxu2 }
0x10de   :  { %v7383_v6 = vadd.f32 %v7366_v24, %v7267_v39 }
0x10e0   :  { %v17289_v25 = vadd.f32 %v7482_v18, %v7383_v6  ;;  %v7873_v18 = vld [vmem:[%s17325_s7] sm:$0xf] }
0x10e1   :  { %v7889_v24 = vsel %vm7887_vm2, %v7873_v18, 0 }
0x10e2   :  { %7898 = vmatpush.bf16.msra.mxu3 %v7889_v24 }
0x10e4   :  { %14162 = vmatmul.msk.bf16.gmra.mxu3 %vm418_vm0, %v15492_v10 }
0x10e5   :  { %v17292_v29 = vpop.f32.mrf.mxu1  ;;  %v17294_v35 = vpop.f32.mrf.mxu2 }
0x10ed   :  { %v7371_v41 = vpop.f32.mrf.mxu1  ;;  %v7492_v26 = vpop.f32.mrf.mxu2 }
0x10ee   :  { %v7385_v0 = vadd.f32 %v7371_v41, %v7269_v62  ;;  %v6918_v41 = vadd.f32 %v17205_v45, %v17194_v44  ;;  %v6920_v44 = vadd.f32 %v17214_v61, %v17202_v58 }
0x10f0   :  { %v17296_v22 = vadd.f32 %v7487_v52, %v7385_v0  ;;  %v8045_v52 = vsel %vm7887_vm2, %v14271_v32, 0 }
0x10f5   :  { %v17298_v50 = vpop.f32.mrf.mxu1  ;;  %v17300_v23 = vpop.f32.mrf.mxu2 }
0x10fd   :  { %v7376_v30 = vpop.f32.mrf.mxu1  ;;  %v7763_v11 = vpop.f32.mrf.mxu2 }
0x10fe   :  { %v7387_v28 = vadd.f32 %v7376_v30, %v7271_v5 }
0x1100   :  { %v17302_v54 = vadd.f32 %v7492_v26, %v7387_v28  ;;  %v7034_v26 = vadd.f32 %v17200_v20, %v6918_v41  ;;  %v14337_v41 = vld [vmem:[%s17325_s7 + $0xc] sm:$0xf] }
0x1102   :  { %v7150_v0 = vadd.f32 %v17226_v16, %v7034_v26  ;;  %v7036_v16 = vadd.f32 %v17208_v48, %v6920_v44  ;;  %v8277_v26 = vsel %vm7887_vm2, %v14337_v41, 0 }
0x1105   :  { %v17304_v39 = vpop.f32.mrf.mxu1  ;;  %v7765_v47 = vpop.f32.mrf.mxu2 }
0x1106   :  { %v7773_v40 = vpack.c.bf16 %v7765_v47, %v7763_v11  ;;  %v7266_v11 = vadd.f32 %v17247_v63, %v7150_v0 }
0x1108   :  { %v7382_v47 = vadd.f32 %v17284_v37, %v7266_v11  ;;  %v7152_v37 = vadd.f32 %v17229_v21, %v7036_v16 }
0x110d   :  { %v7647_v19 = vpop.f32.mrf.mxu1  ;;  %v7768_v33 = vpop.f32.mrf.mxu2 }
0x1115   :  { %v7649_v12 = vpop.f32.mrf.mxu1  ;;  %v7770_v55 = vpop.f32.mrf.mxu2 }
0x1116   :  { %v7774_v62 = vpack.c.bf16 %v7770_v55, %v7768_v33  ;;  %v7657_v15 = vpack.c.bf16 %v7649_v12, %v7647_v19  ;;  %v7498_v12 = vadd.f32 %v17278_v4, %v7382_v47  ;;  %v7268_v4 = vadd.f32 %v17254_v17, %v7152_v37  ;;  %v6905_v17 = vpop.permute.xlu2 %6904 }
0x1118   :  { %7822 = vmatpush.bf16.msra.mxu1 %v7774_v62 }
0x111c   :  { %7823 = vmatpush.bf16.msra.mxu1 %v7773_v40 }
0x111d   :  { %v7652_v5 = vpop.f32.mrf.mxu1 }
0x111f   :  { %14243 = vmatmul.msk.bf16.vlgmr.msra.gmra.mxu1 %vm418_vm0, %v15501_v27 }
0x1125   :  { %v7654_v31 = vpop.f32.mrf.mxu1 }
0x1126   :  { %v7658_v13 = vpack.c.bf16 %v7654_v31, %v7652_v5 }
0x1128   :  { %7706 = vmatpush.bf16.msra.mxu0 %v7658_v13 }
0x112c   :  { %7707 = vmatpush.bf16.msra.mxu0 %v7657_v15 }
0x112f   :  { %14201 = vmatmul.msk.bf16.vlgmr.msra.gmra.mxu0 %vm418_vm0, %v15495_v53  ;;  %14244 = vmatmul.msk.bf16.gmra.mxu1 %vm418_vm0, %v15502_v49  ;;  %v7384_v53 = vadd.f32 %v17292_v29, %v7268_v4 }
0x1130   :  { %8054 = vmatpush.bf16.msrb.mxu0 %v8045_v52 }
0x1131   :  { %v7500_v61 = vadd.f32 %v17286_v60, %v7384_v53 }
0x1134   :  { %8286 = vmatpush.bf16.msra.mxu0 %v8277_v26 }
0x1137   :  { %v7593_v56 = vpop.f32.mrf.mxu3 }
0x1138   :  { %v7613_v33 = vadd.f32 %v7593_v56, %v17281_v8 }
0x113f   :  { %14202 = vmatmul.msk.bf16.gmra.mxu0 %vm418_vm0, %v15496_v2  ;;  %14245 = vmatmul.msk.bf16.gmra.mxu1 %vm418_vm0, %v15503_v3  ;;  %v7595_v10 = vpop.f32.mrf.mxu3 }
0x1140   :  { %v7614_v62 = vadd.f32 %v7595_v10, %v7498_v12 }
0x1147   :  { %v7598_v19 = vpop.f32.mrf.mxu3 }
0x1148   :  { %v7615_v48 = vadd.f32 %v7598_v19, %v17289_v25 }
0x114f   :  { %14203 = vmatmul.msk.bf16.gmra.mxu0 %vm418_vm0, %v15497_v43  ;;  %14246 = vmatmul.msk.bf16.gmra.mxu1 %vm418_vm0, %v15504_v51  ;;  %v7600_v5 = vpop.f32.mrf.mxu3  ;;  %v6922_v43 = vadd.f32 %v6905_v17, %v17210_v46 }
0x1150   :  { %v7616_v2 = vadd.f32 %v7600_v5, %v7500_v61 }
0x1157   :  { %v7603_v49 = vpop.f32.mrf.mxu3 }
0x115f   :  { %14204 = vmatmul.msk.bf16.gmra.mxu0 %vm418_vm0, %v15498_v7  ;;  %v7038_v7 = vadd.f32 %v17218_v14, %v6922_v43  ;;  %v14304_v14 = vld [vmem:[%s17325_s7 + $0x8] sm:$0xf] }
0x1161   :  { %v7154_v56 = vadd.f32 %v17236_v9, %v7038_v7  ;;  %v8161_v9 = vsel %vm7887_vm2, %v14304_v14, 0 }
0x1162   :  { %8170 = vmatpush.bf16.msrb.mxu3 %v8161_v9 }
0x1163   :  { %v7270_v60 = vadd.f32 %v17260_v34, %v7154_v56  ;;  %v7617_v34 = vadd.f32 %v7603_v49, %v17296_v22 }
0x1165   :  { %v7386_v46 = vadd.f32 %v17298_v50, %v7270_v60  ;;  %v6915_v50 = vpop.permute.xlu1 %6914 }
0x1167   :  { %v7502_v0 = vadd.f32 %v17294_v35, %v7386_v46 }
0x119c   :  { %v7825_v6 = vpop.f32.mrf.mxu1 }
0x11a4   :  { %v7827_v30 = vpop.f32.mrf.mxu1 }
0x11ac   :  { %v7709_v28 = vpop.f32.mrf.mxu0  ;;  %v7830_v27 = vpop.f32.mrf.mxu1 }
0x11ad   :  { %v7729_v55 = vadd.f32 %v7709_v28, %v7613_v33  ;;  %v6924_v28 = vadd.f32 %v6915_v50, %v17220_v38 }
0x11af   :  { %v7845_v20 = vadd.f32 %v7825_v6, %v7729_v55  ;;  %v7605_v6 = vpop.f32.mrf.mxu3  ;;  %v7040_v33 = vadd.f32 %v17224_v59, %v6924_v28 }
0x11b0   :  { %v7618_v47 = vadd.f32 %v7605_v6, %v7502_v0 }
0x11b1   :  { %v7853_v31 = vmax.f32 %v7845_v20, 0.0 }
0x11b4   :  { %v7711_v40 = vpop.f32.mrf.mxu0  ;;  %v7832_v58 = vpop.f32.mrf.mxu1 }
0x11b5   :  { %v7730_v45 = vadd.f32 %v7711_v40, %v7614_v62 }
0x11b7   :  { %v7846_v63 = vadd.f32 %v7827_v30, %v7730_v45  ;;  %v7608_v62 = vpop.f32.mrf.mxu3 }
0x11b8   :  { %v7619_v59 = vadd.f32 %v7608_v62, %v17302_v54 }
0x11b9   :  { %v7854_v13 = vmax.f32 %v7846_v63, 0.0 }
0x11bb   :  { %v17344_v8 = vpack.c.bf16 %v7854_v13, %v7853_v31 }
0x11bc   :  { %v7714_v15 = vpop.f32.mrf.mxu0  ;;  %v7835_v32 = vpop.f32.mrf.mxu1 }
0x11bd   :  { %14247 = vmatmul.msk.bf16.vlgmr.msra.gmra.mxu3 %vm7874_vm3, %v17344_v8  ;;  %14272 = vmatmul.msk.bf16.vlgmr.msrb.gmra.mxu0 %vm7874_vm3, %v17344_v8  ;;  %v7731_v21 = vadd.f32 %v7714_v15, %v7615_v48  ;;  %v14370_v48 = vld [vmem:[%s17325_s7 + $0x10] sm:$0xf] }
0x11be   :  { %v8393_v61 = vsel %vm7887_vm2, %v14370_v48, 0  ;;  %v15541_v48 = vld [vmem:[%s17474_s6] sm:$0xff] }
0x11bf   :  { %v7847_v29 = vadd.f32 %v7830_v27, %v7731_v21  ;;  %v7156_v27 = vadd.f32 %v17212_v42, %v7040_v33  ;;  %v7610_v63 = vpop.f32.mrf.mxu3  ;;  %v14469_v21 = vld [vmem:[%s17325_s7 + $0x1c] sm:$0xf]  ;;  %8402 = vmatpush.bf16.msra.mxu3 %v8393_v61  ;;  %v15505_v33 = vld [vmem:[%s17436_s26] sm:$0xff] }
0x11c0   :  { %v8741_v49 = vsel %vm7887_vm2, %v14469_v21, 0 }
0x11c1   :  { %v7855_v25 = vmax.f32 %v7847_v29, 0.0  ;;  %v7272_v20 = vadd.f32 %v17266_v1, %v7156_v27 }
0x11c3   :  { %v7388_v38 = vadd.f32 %v17304_v39, %v7272_v20  ;;  %v14502_v20 = vld [vmem:[%s17325_s7 + $0x20] sm:$0xf] }
0x11c4   :  { %v7716_v3 = vpop.f32.mrf.mxu0  ;;  %v7837_v11 = vpop.f32.mrf.mxu1 }
0x11c5   :  { %v7732_v51 = vadd.f32 %v7716_v3, %v7616_v2  ;;  %v7504_v42 = vadd.f32 %v17300_v23, %v7388_v38  ;;  %v14403_v23 = vld [vmem:[%s17325_s7 + $0x14] sm:$0xf] }
0x11c6   :  { %v8509_v54 = vsel %vm7887_vm2, %v14403_v23, 0 }
0x11c7   :  { %v7848_v18 = vadd.f32 %v7832_v58, %v7732_v51  ;;  %v7620_v1 = vadd.f32 %v7610_v63, %v7504_v42  ;;  %8518 = vmatpush.bf16.msrb.mxu0 %v8509_v54  ;;  %v15507_v42 = vld [vmem:[%s17436_s26 + $0x10] sm:$0xff] }
0x11c9   :  { %v7856_v24 = vmax.f32 %v7848_v18, 0.0 }
0x11cb   :  { %v17357_v52 = vpack.c.bf16 %v7856_v24, %v7855_v25 }
0x11cc   :  { %v7719_v10 = vpop.f32.mrf.mxu0  ;;  %v7840_v45 = vpop.f32.mrf.mxu1 }
0x11cd   :  { %14248 = vmatmul.msk.bf16.gmra.mxu3 %vm7874_vm3, %v17357_v52  ;;  %14273 = vmatmul.msk.bf16.gmra.mxu0 %vm7874_vm3, %v17357_v52  ;;  %v7733_v30 = vadd.f32 %v7719_v10, %v7617_v34 }
0x11cf   :  { %v7849_v12 = vadd.f32 %v7835_v32, %v7733_v30  ;;  %v14436_v32 = vld [vmem:[%s17325_s7 + $0x18] sm:$0xf] }
0x11d0   :  { %v8625_v25 = vsel %vm7887_vm2, %v14436_v32, 0 }
0x11d1   :  { %v7857_v22 = vmax.f32 %v7849_v12, 0.0 }
0x11d4   :  { %v7721_v19 = vpop.f32.mrf.mxu0  ;;  %v7842_v4 = vpop.f32.mrf.mxu1 }
0x11d5   :  { %v7734_v55 = vadd.f32 %v7721_v19, %v7618_v47 }
0x11d7   :  { %v7850_v40 = vadd.f32 %v7837_v11, %v7734_v55  ;;  %v15509_v11 = vld [vmem:[%s17436_s26 + $0x20] sm:$0xff] }
0x11d9   :  { %v7858_v44 = vmax.f32 %v7850_v40, 0.0  ;;  %v15510_v40 = vld [vmem:[%s17436_s26 + $0x28] sm:$0xff] }
0x11db   :  { %v17374_v35 = vpack.c.bf16 %v7858_v44, %v7857_v22  ;;  %v15506_v22 = vld [vmem:[%s17436_s26 + $0x8] sm:$0xff] }
0x11dc   :  { %v7724_v16 = vpop.f32.mrf.mxu0 }
0x11dd   :  { %14249 = vmatmul.msk.bf16.gmra.mxu3 %vm7874_vm3, %v17374_v35  ;;  %14274 = vmatmul.msk.bf16.gmra.mxu0 %vm7874_vm3, %v17374_v35  ;;  %v7735_v5 = vadd.f32 %v7724_v16, %v7619_v59  ;;  %v8857_v16 = vsel %vm7887_vm2, %v14502_v20, 0  ;;  %v15511_v59 = vld [vmem:[%s17436_s26 + $0x30] sm:$0xff] }
0x11df   :  { %v7851_v31 = vadd.f32 %v7840_v45, %v7735_v5 }
0x11e1   :  { %v7859_v15 = vmax.f32 %v7851_v31, 0.0  ;;  %v15512_v31 = vld [vmem:[%s17436_s26 + $0x38] sm:$0xff] }
0x11e4   :  { %v7726_v37 = vpop.f32.mrf.mxu0 }
0x11e5   :  { %v7736_v13 = vadd.f32 %v7726_v37, %v7620_v1 }
0x11e7   :  { %v7852_v39 = vadd.f32 %v7842_v4, %v7736_v13 }
0x11e9   :  { %v7860_v53 = vmax.f32 %v7852_v39, 0.0  ;;  %v15508_v39 = vld [vmem:[%s17436_s26 + $0x18] sm:$0xff] }
0x11eb   :  { %v17383_v58 = vpack.c.bf16 %v7860_v53, %v7859_v15 }
0x11ed   :  { %14250 = vmatmul.msk.bf16.gmra.mxu3 %vm7874_vm3, %v17383_v58  ;;  %14275 = vmatmul.msk.bf16.gmra.mxu0 %vm7874_vm3, %v17383_v58 }
0x11fd   :  { %14305 = vmatmul.msk.bf16.vlgmr.msrb.gmra.mxu3 %vm7874_vm3, %v17344_v8  ;;  %14338 = vmatmul.msk.bf16.vlgmr.msra.gmra.mxu0 %vm7874_vm3, %v17344_v8 }
0x11fe   :  { %8750 = vmatpush.bf16.msra.mxu0 %v8741_v49  ;;  %8634 = vmatpush.bf16.msrb.mxu3 %v8625_v25 }
0x120d   :  { %14306 = vmatmul.msk.bf16.gmra.mxu3 %vm7874_vm3, %v17357_v52  ;;  %14339 = vmatmul.msk.bf16.gmra.mxu0 %vm7874_vm3, %v17357_v52 }
0x121d   :  { %14307 = vmatmul.msk.bf16.gmra.mxu3 %vm7874_vm3, %v17374_v35  ;;  %14340 = vmatmul.msk.bf16.gmra.mxu0 %vm7874_vm3, %v17374_v35 }
0x122d   :  { %14308 = vmatmul.msk.bf16.gmra.mxu3 %vm7874_vm3, %v17383_v58  ;;  %14341 = vmatmul.msk.bf16.gmra.mxu0 %vm7874_vm3, %v17383_v58 }
0x123a   :  { %v8056_v2 = vpop.f32.mrf.mxu0 }
0x123d   :  { %14371 = vmatmul.msk.bf16.vlgmr.msra.gmra.mxu3 %vm7874_vm3, %v17344_v8  ;;  %14404 = vmatmul.msk.bf16.vlgmr.msrb.gmra.mxu0 %vm7874_vm3, %v17344_v8 }
0x123e   :  { %9064 = vmatpush.bf16.msrb.mxu0 %v17233_v57  ;;  %8866 = vmatpush.bf16.msra.mxu3 %v8857_v16 }
0x1240   :  { %v7900_v17 = vpop.f32.mrf.mxu3 }
0x1242   :  { %9065 = vmatpush.bf16.msrb.mxu0 %v17239_v36  ;;  %v8058_v3 = vpop.f32.mrf.mxu0 }
0x1243   :  { %v8076_v30 = vpack.c.bf16 %v8058_v3, %v8056_v2 }
0x1248   :  { %v7902_v43 = vpop.f32.mrf.mxu3 }
0x1249   :  { %v7920_v19 = vpack.c.bf16 %v7902_v43, %v7900_v17  ;;  %v15517_v17 = vld [vmem:[%s17436_s26 + $0x60] sm:$0xff] }
0x124a   :  { %v8061_v29 = vpop.f32.mrf.mxu0 }
0x124d   :  { %14372 = vmatmul.msk.bf16.gmra.mxu3 %vm7874_vm3, %v17357_v52  ;;  %14405 = vmatmul.msk.bf16.gmra.mxu0 %vm7874_vm3, %v17357_v52 }
0x1250   :  { %v7905_v51 = vpop.f32.mrf.mxu3 }
0x1252   :  { %v8063_v7 = vpop.f32.mrf.mxu0 }
0x1253   :  { %v8077_v34 = vpack.c.bf16 %v8063_v7, %v8061_v29 }
0x1258   :  { %v7907_v18 = vpop.f32.mrf.mxu3 }
0x1259   :  { %v7921_v28 = vpack.c.bf16 %v7907_v18, %v7905_v51  ;;  %v15542_v18 = vld [vmem:[%s17474_s6 + $0x8] sm:$0xff] }
0x125a   :  { %v8066_v56 = vpop.f32.mrf.mxu0 }
0x125d   :  { %14373 = vmatmul.msk.bf16.gmra.mxu3 %vm7874_vm3, %v17374_v35  ;;  %14406 = vmatmul.msk.bf16.gmra.mxu0 %vm7874_vm3, %v17374_v35 }
0x1260   :  { %v7910_v57 = vpop.f32.mrf.mxu3 }
0x1262   :  { %v8068_v36 = vpop.f32.mrf.mxu0 }
0x1263   :  { %v8078_v14 = vpack.c.bf16 %v8068_v36, %v8066_v56  ;;  %v15518_v56 = vld [vmem:[%s17436_s26 + $0x68] sm:$0xff] }
0x1268   :  { %v7912_v24 = vpop.f32.mrf.mxu3 }
0x1269   :  { %v7922_v0 = vpack.c.bf16 %v7912_v24, %v7910_v57  ;;  %v15514_v57 = vld [vmem:[%s17436_s26 + $0x48] sm:$0xff] }
0x126a   :  { %v8071_v60 = vpop.f32.mrf.mxu0 }
0x126d   :  { %14374 = vmatmul.msk.bf16.gmra.mxu3 %vm7874_vm3, %v17383_v58  ;;  %14407 = vmatmul.msk.bf16.gmra.mxu0 %vm7874_vm3, %v17383_v58 }
0x1270   :  { %v7915_v6 = vpop.f32.mrf.mxu3 }
0x1272   :  { %v8073_v10 = vpop.f32.mrf.mxu0 }
0x1273   :  { %v8079_v46 = vpack.c.bf16 %v8073_v10, %v8071_v60  ;;  %v15543_v60 = vld [vmem:[%s17474_s6 + $0x10] sm:$0xff] }
0x1275   :  { %8125 = vmatpush.bf16.msrb.mxu1 %v8079_v46  ;;  %v15515_v46 = vld [vmem:[%s17436_s26 + $0x50] sm:$0xff] }
0x1278   :  { %v7917_v41 = vpop.f32.mrf.mxu3 }
0x1279   :  { %v7923_v9 = vpack.c.bf16 %v7917_v41, %v7915_v6  ;;  %8126 = vmatpush.bf16.msrb.mxu1 %v8078_v14  ;;  %v15519_v6 = vld [vmem:[%s17436_s26 + $0x70] sm:$0xff] }
0x127a   :  { %v17431_v26 = vpop.f32.mrf.mxu0 }
0x127b   :  { %7969 = vmatpush.bf16.msrb.mxu2 %v7923_v9  ;;  %v15544_v9 = vld [vmem:[%s17474_s6 + $0x18] sm:$0xff] }
0x127d   :  { %8127 = vmatpush.bf16.msrb.mxu1 %v8077_v34  ;;  %14437 = vmatmul.msk.bf16.vlgmr.msrb.gmra.mxu3 %vm7874_vm3, %v17344_v8 }
0x127e   :  { %14470 = vmatmul.msk.bf16.vlgmr.msra.gmra.mxu0 %vm7874_vm3, %v17344_v8 }
0x127f   :  { %7970 = vmatpush.bf16.msrb.mxu2 %v7922_v0 }
0x1280   :  { %v17442_v50 = vpop.f32.mrf.mxu3 }
0x1281   :  { %8128 = vmatpush.bf16.msrb.mxu1 %v8076_v30  ;;  %v15516_v30 = vld [vmem:[%s17436_s26 + $0x58] sm:$0xff] }
0x1282   :  { %v8290_v47 = vpop.f32.mrf.mxu0 }
0x1283   :  { %7971 = vmatpush.bf16.msrb.mxu2 %v7921_v28  ;;  %v8308_v49 = vpack.c.bf16 %v8290_v47, %v17431_v26  ;;  %v15520_v26 = vld [vmem:[%s17436_s26 + $0x78] sm:$0xff] }
0x1284   :  { %14300 = vmatmul.msk.bf16.vlgmr.msrb.gmra.mxu1 %vm7952_vm4, %v15509_v11 }
0x1287   :  { %7972 = vmatpush.bf16.msrb.mxu2 %v7920_v19 }
0x1288   :  { %v8174_v12 = vpop.f32.mrf.mxu3 }
0x1289   :  { %v8192_v29 = vpack.c.bf16 %v8174_v12, %v17442_v50 }
0x128a   :  { %14267 = vmatmul.msk.bf16.vlgmr.msrb.gmra.mxu2 %vm7952_vm4, %v15505_v33  ;;  %v8293_v55 = vpop.f32.mrf.mxu0 }
0x128d   :  { %14438 = vmatmul.msk.bf16.gmra.mxu3 %vm7874_vm3, %v17357_v52 }
0x128e   :  { %14471 = vmatmul.msk.bf16.gmra.mxu0 %vm7874_vm3, %v17357_v52 }
0x1290   :  { %v8177_v62 = vpop.f32.mrf.mxu3 }
0x1292   :  { %v8295_v27 = vpop.f32.mrf.mxu0 }
0x1293   :  { %v8309_v61 = vpack.c.bf16 %v8295_v27, %v8293_v55  ;;  %v15525_v55 = vld [vmem:[%s17436_s26 + $0xa0] sm:$0xff] }
0x1294   :  { %14301 = vmatmul.msk.bf16.gmra.mxu1 %vm7952_vm4, %v15510_v40 }
0x1298   :  { %v8179_v44 = vpop.f32.mrf.mxu3 }
0x1299   :  { %v8193_v3 = vpack.c.bf16 %v8179_v44, %v8177_v62  ;;  %v15521_v44 = vld [vmem:[%s17436_s26 + $0x80] sm:$0xff] }
0x129a   :  { %14268 = vmatmul.msk.bf16.gmra.mxu2 %vm7952_vm4, %v15506_v22  ;;  %v8298_v45 = vpop.f32.mrf.mxu0 }
0x129d   :  { %14439 = vmatmul.msk.bf16.gmra.mxu3 %vm7874_vm3, %v17374_v35 }
0x129e   :  { %14472 = vmatmul.msk.bf16.gmra.mxu0 %vm7874_vm3, %v17374_v35 }
0x12a0   :  { %v8182_v38 = vpop.f32.mrf.mxu3 }
0x12a2   :  { %v8300_v63 = vpop.f32.mrf.mxu0 }
0x12a3   :  { %v8310_v15 = vpack.c.bf16 %v8300_v63, %v8298_v45 }
0x12a4   :  { %14302 = vmatmul.msk.bf16.gmra.mxu1 %vm7952_vm4, %v15511_v59 }
0x12a8   :  { %v8184_v5 = vpop.f32.mrf.mxu3 }
0x12a9   :  { %v8194_v21 = vpack.c.bf16 %v8184_v5, %v8182_v38  ;;  %v7997_v38 = vpop.permute.xlu2 %7996 }
0x12aa   :  { %14269 = vmatmul.msk.bf16.gmra.mxu2 %vm7952_vm4, %v15507_v42  ;;  %v8303_v1 = vpop.f32.mrf.mxu0 }
0x12ad   :  { %14440 = vmatmul.msk.bf16.gmra.mxu3 %vm7874_vm3, %v17383_v58 }
0x12ae   :  { %14473 = vmatmul.msk.bf16.gmra.mxu0 %vm7874_vm3, %v17383_v58 }
0x12b0   :  { %v8187_v37 = vpop.f32.mrf.mxu3 }
0x12b2   :  { %v8305_v13 = vpop.f32.mrf.mxu0 }
0x12b3   :  { %v8311_v4 = vpack.c.bf16 %v8305_v13, %v8303_v1  ;;  %v15526_v1 = vld [vmem:[%s17436_s26 + $0xa8] sm:$0xff]  ;;  %v8002_v13 = vpop.permute.xlu0 %8001 }
0x12b4   :  { %14303 = vmatmul.msk.bf16.gmra.mxu1 %vm7952_vm4, %v15512_v31 }
0x12b5   :  { %8357 = vmatpush.bf16.msra.mxu1 %v8311_v4 }
0x12b8   :  { %v8189_v53 = vpop.f32.mrf.mxu3 }
0x12b9   :  { %v8195_v23 = vpack.c.bf16 %v8189_v53, %v8187_v37  ;;  %8358 = vmatpush.bf16.msra.mxu1 %v8310_v15  ;;  %v15522_v15 = vld [vmem:[%s17436_s26 + $0x88] sm:$0xff] }
0x12ba   :  { %14270 = vmatmul.msk.bf16.gmra.mxu2 %vm7952_vm4, %v15508_v39  ;;  %v17479_v54 = vpop.f32.mrf.mxu0 }
0x12bb   :  { %8241 = vmatpush.bf16.msra.mxu2 %v8195_v23 }
0x12bd   :  { %8359 = vmatpush.bf16.msra.mxu1 %v8309_v61  ;;  %14503 = vmatmul.msk.bf16.vlgmr.msra.gmra.mxu3 %vm7874_vm3, %v17344_v8  ;;  %v15513_v8 = vld [vmem:[%s17436_s26 + $0x40] sm:$0xff]  ;;  %v8007_v61 = vpop.permute.xlu1 %8006 }
0x12be   :  { %14551 = vmatmul.msk.bf16.vlgmr.msrb.gmra.mxu0 %vm418_vm0, %v15541_v48 }
0x12bf   :  { %8242 = vmatpush.bf16.msra.mxu2 %v8194_v21 }
0x12c0   :  { %v17486_v2 = vpop.f32.mrf.mxu3 }
0x12c1   :  { %8360 = vmatpush.bf16.msra.mxu1 %v8308_v49 }
0x12c2   :  { %v8522_v43 = vpop.f32.mrf.mxu0 }
0x12c3   :  { %8243 = vmatpush.bf16.msra.mxu2 %v8193_v3  ;;  %v8540_v33 = vpack.c.bf16 %v8522_v43, %v17479_v54  ;;  %v15527_v3 = vld [vmem:[%s17436_s26 + $0xb0] sm:$0xff] }
0x12c4   :  { %14366 = vmatmul.msk.bf16.vlgmr.msra.gmra.mxu1 %vm7952_vm4, %v15517_v17 }
0x12c7   :  { %8244 = vmatpush.bf16.msra.mxu2 %v8192_v29  ;;  %v8012_v29 = vpop.permute.xlu2 %8011 }
0x12c8   :  { %v8406_v51 = vpop.f32.mrf.mxu3 }
0x12c9   :  { %v8424_v22 = vpack.c.bf16 %v8406_v51, %v17486_v2 }
0x12ca   :  { %14333 = vmatmul.msk.bf16.vlgmr.msra.gmra.mxu2 %vm7952_vm4, %v15513_v8  ;;  %v8525_v7 = vpop.f32.mrf.mxu0 }
0x12cd   :  { %14504 = vmatmul.msk.bf16.gmra.mxu3 %vm7874_vm3, %v17357_v52 }
0x12ce   :  { %14552 = vmatmul.msk.bf16.gmra.mxu0 %vm418_vm0, %v15542_v18  ;;  %v15523_v18 = vld [vmem:[%s17436_s26 + $0x90] sm:$0xff] }
0x12d0   :  { %v8409_v32 = vpop.f32.mrf.mxu3 }
0x12d2   :  { %v8527_v25 = vpop.f32.mrf.mxu0 }
0x12d3   :  { %v8541_v47 = vpack.c.bf16 %v8527_v25, %v8525_v7  ;;  %v17550_v25 = vpop.permute.xlu0 %8988 }
0x12d4   :  { %14367 = vmatmul.msk.bf16.gmra.mxu1 %vm7952_vm4, %v15518_v56 }
0x12d8   :  { %v8411_v36 = vpop.f32.mrf.mxu3 }
0x12d9   :  { %v8425_v62 = vpack.c.bf16 %v8411_v36, %v8409_v32 }
0x12da   :  { %14334 = vmatmul.msk.bf16.gmra.mxu2 %vm7952_vm4, %v15514_v57  ;;  %v8530_v24 = vpop.f32.mrf.mxu0 }
0x12dd   :  { %14505 = vmatmul.msk.bf16.gmra.mxu3 %vm7874_vm3, %v17374_v35 }
0x12de   :  { %14553 = vmatmul.msk.bf16.gmra.mxu0 %vm418_vm0, %v15543_v60 }
0x12e0   :  { %v8414_v52 = vpop.f32.mrf.mxu3 }
0x12e2   :  { %v8532_v10 = vpop.f32.mrf.mxu0 }
0x12e3   :  { %v8542_v50 = vpack.c.bf16 %v8532_v10, %v8530_v24  ;;  %v8017_v24 = vpop.permute.xlu2 %8016 }
0x12e4   :  { %14368 = vmatmul.msk.bf16.gmra.mxu1 %vm7952_vm4, %v15519_v6 }
0x12e8   :  { %v8416_v14 = vpop.f32.mrf.mxu3 }
0x12e9   :  { %v8426_v19 = vpack.c.bf16 %v8416_v14, %v8414_v52  ;;  %v17556_v14 = vpop.permute.xlu1 %8993 }
0x12ea   :  { %14335 = vmatmul.msk.bf16.gmra.mxu2 %vm7952_vm4, %v15515_v46  ;;  %v8535_v41 = vpop.f32.mrf.mxu0  ;;  %v15528_v46 = vld [vmem:[%s17436_s26 + $0xb8] sm:$0xff] }
0x12ed   :  { %14506 = vmatmul.msk.bf16.gmra.mxu3 %vm7874_vm3, %v17383_v58 }
0x12ee   :  { %14554 = vmatmul.msk.bf16.gmra.mxu0 %vm418_vm0, %v15544_v9  ;;  %v8022_v9 = vpop.permute.xlu0 %8021 }
0x12f0   :  { %v8419_v35 = vpop.f32.mrf.mxu3 }
0x12f2   :  { %v8537_v34 = vpop.f32.mrf.mxu0 }
0x12f3   :  { %v8543_v0 = vpack.c.bf16 %v8537_v34, %v8535_v41 }
0x12f4   :  { %14369 = vmatmul.msk.bf16.gmra.mxu1 %vm7952_vm4, %v15520_v26 }
0x12f5   :  { %8589 = vmatpush.bf16.msrb.mxu1 %v8543_v0 }
0x12f8   :  { %v8421_v11 = vpop.f32.mrf.mxu3 }
0x12f9   :  { %v8427_v28 = vpack.c.bf16 %v8421_v11, %v8419_v35  ;;  %8590 = vmatpush.bf16.msrb.mxu1 %v8542_v50 }
0x12fa   :  { %14336 = vmatmul.msk.bf16.gmra.mxu2 %vm7952_vm4, %v15516_v30  ;;  %v15524_v30 = vld [vmem:[%s17436_s26 + $0x98] sm:$0xff] }
0x12fb   :  { %v17517_v58 = vpop.f32.mrf.mxu0  ;;  %8473 = vmatpush.bf16.msrb.mxu2 %v8427_v28 }
0x12fd   :  { %8591 = vmatpush.bf16.msrb.mxu1 %v8541_v47 }
0x12ff   :  { %8474 = vmatpush.bf16.msrb.mxu2 %v8426_v19 }
0x1300   :  { %v17520_v12 = vpop.f32.mrf.mxu3 }
0x1301   :  { %8592 = vmatpush.bf16.msrb.mxu1 %v8540_v33  ;;  %v8130_v40 = vpop.f32.mrf.mxu1  ;;  %v17563_v33 = vpop.permute.xlu1 %8998 }
0x1303   :  { %v17523_v27 = vpop.f32.mrf.mxu0  ;;  %8475 = vmatpush.bf16.msrb.mxu2 %v8425_v62  ;;  %v8027_v62 = vpop.permute.xlu0 %8026 }
0x1304   :  { %14432 = vmatmul.msk.bf16.vlgmr.msrb.gmra.mxu1 %vm7952_vm4, %v15525_v55 }
0x1307   :  { %8476 = vmatpush.bf16.msrb.mxu2 %v8424_v22 }
0x1308   :  { %v17528_v20 = vpop.f32.mrf.mxu3 }
0x1309   :  { %v8132_v45 = vpop.f32.mrf.mxu1 }
0x130a   :  { %14399 = vmatmul.msk.bf16.vlgmr.msrb.gmra.mxu2 %vm7952_vm4, %v15521_v44 }
0x130b   :  { %v17531_v16 = vpop.f32.mrf.mxu0 }
0x130d   :  { %v7974_v59 = vpop.f32.mrf.mxu2 }
0x130e   :  { %v8034_v63 = vadd.f32 %v7997_v38, %v7974_v59 }
0x1310   :  { %v17533_v42 = vadd.f32 %v8130_v40, %v8034_v63  ;;  %v17535_v5 = vpop.f32.mrf.mxu3 }
0x1311   :  { %v8135_v37 = vpop.f32.mrf.mxu1 }
0x1313   :  { %v8759_v31 = vpop.f32.mrf.mxu0 }
0x1314   :  { %14433 = vmatmul.msk.bf16.gmra.mxu1 %vm7952_vm4, %v15526_v1  ;;  %v8773_v55 = vpack.c.bf16 %v8759_v31, %v17531_v16  ;;  %v8032_v16 = vpop.permute.xlu1 %8031  ;;  %v8656_v31 = vpack.c.bf16 %v17528_v20, %v17520_v12  ;;  %v15534_v20 = vld [vmem:[%s17436_s26 + $0xe8] sm:$0xff] }
0x1315   :  { %v7976_v4 = vpop.f32.mrf.mxu2 }
0x1316   :  { %v8035_v39 = vadd.f32 %v8002_v13, %v7976_v4 }
0x1318   :  { %v17540_v53 = vadd.f32 %v8132_v45, %v8035_v39  ;;  %v8643_v23 = vpop.f32.mrf.mxu3  ;;  %v8772_v45 = vpack.c.bf16 %v17523_v27, %v17517_v58  ;;  %v15529_v58 = vld [vmem:[%s17436_s26 + $0xc0] sm:$0xff] }
0x1319   :  { %v8137_v54 = vpop.f32.mrf.mxu1  ;;  %v8657_v63 = vpack.c.bf16 %v8643_v23, %v17535_v5 }
0x131a   :  { %14400 = vmatmul.msk.bf16.gmra.mxu2 %vm7952_vm4, %v15522_v15 }
0x131b   :  { %v8762_v48 = vpop.f32.mrf.mxu0 }
0x131d   :  { %v7979_v21 = vpop.f32.mrf.mxu2 }
0x131e   :  { %v8036_v49 = vadd.f32 %v8007_v61, %v7979_v21 }
0x1320   :  { %v17543_v2 = vadd.f32 %v8135_v37, %v8036_v49  ;;  %v8646_v17 = vpop.f32.mrf.mxu3  ;;  %v15533_v37 = vld [vmem:[%s17436_s26 + $0xe0] sm:$0xff]  ;;  %v15530_v49 = vld [vmem:[%s17436_s26 + $0xc8] sm:$0xff] }
0x1321   :  { %v8140_v43 = vpop.f32.mrf.mxu1 }
0x1323   :  { %v8764_v8 = vpop.f32.mrf.mxu0 }
0x1324   :  { %14434 = vmatmul.msk.bf16.gmra.mxu1 %vm7952_vm4, %v15527_v3  ;;  %v8774_v50 = vpack.c.bf16 %v8764_v8, %v8762_v48 }
0x1325   :  { %v7981_v51 = vpop.f32.mrf.mxu2 }
0x1326   :  { %v8037_v7 = vadd.f32 %v8012_v29, %v7981_v51 }
0x1328   :  { %v17548_v32 = vadd.f32 %v8137_v54, %v8037_v7  ;;  %v8648_v56 = vpop.f32.mrf.mxu3  ;;  %v15535_v7 = vld [vmem:[%s17436_s26 + $0xf0] sm:$0xff] }
0x1329   :  { %v8142_v57 = vpop.f32.mrf.mxu1  ;;  %v8658_v40 = vpack.c.bf16 %v8648_v56, %v8646_v17  ;;  %v15531_v56 = vld [vmem:[%s17436_s26 + $0xd0] sm:$0xff] }
0x132a   :  { %14401 = vmatmul.msk.bf16.gmra.mxu2 %vm7952_vm4, %v15523_v18 }
0x132b   :  { %v8767_v36 = vpop.f32.mrf.mxu0 }
0x132d   :  { %v7984_v60 = vpop.f32.mrf.mxu2 }
0x132e   :  { %v8038_v52 = vadd.f32 %v8017_v24, %v7984_v60 }
0x1330   :  { %v17553_v6 = vadd.f32 %v8140_v43, %v8038_v52  ;;  %v8651_v10 = vpop.f32.mrf.mxu3 }
0x1331   :  { %v8145_v41 = vpop.f32.mrf.mxu1 }
0x1333   :  { %v8769_v35 = vpop.f32.mrf.mxu0 }
0x1334   :  { %v8775_v26 = vpack.c.bf16 %v8769_v35, %v8767_v36  ;;  %14435 = vmatmul.msk.bf16.gmra.mxu1 %vm7952_vm4, %v15528_v46  ;;  %v15536_v46 = vld [vmem:[%s17436_s26 + $0xf8] sm:$0xff] }
0x1335   :  { %v7986_v34 = vpop.f32.mrf.mxu2 }
0x1336   :  { %v8039_v0 = vadd.f32 %v8022_v9, %v7986_v34  ;;  %8821 = vmatpush.bf16.msra.mxu1 %v8775_v26 }
0x1338   :  { %v17560_v11 = vadd.f32 %v8142_v57, %v8039_v0  ;;  %v8653_v28 = vpop.f32.mrf.mxu3 }
0x1339   :  { %v8659_v47 = vpack.c.bf16 %v8653_v28, %v8651_v10  ;;  %v8147_v19 = vpop.f32.mrf.mxu1 }
0x133a   :  { %8822 = vmatpush.bf16.msra.mxu1 %v8774_v50  ;;  %14402 = vmatmul.msk.bf16.gmra.mxu2 %vm7952_vm4, %v15524_v30 }
0x133b   :  { %8705 = vmatpush.bf16.msra.mxu2 %v8659_v47 }
0x133d   :  { %v7989_v22 = vpop.f32.mrf.mxu2 }
0x133e   :  { %v8040_v44 = vadd.f32 %v8027_v62, %v7989_v22  ;;  %8823 = vmatpush.bf16.msra.mxu1 %v8773_v55  ;;  %v15537_v62 = vld [vmem:[%s17436_s26 + $0x100] sm:$0xff] }
0x133f   :  { %8706 = vmatpush.bf16.msra.mxu2 %v8658_v40 }
0x1340   :  { %v8156_v38 = vadd.f32 %v8145_v41, %v8040_v44  ;;  %v17568_v59 = vpop.f32.mrf.mxu3 }
0x1341   :  { %v8362_v1 = vpop.f32.mrf.mxu1 }
0x1342   :  { %8824 = vmatpush.bf16.msra.mxu1 %v8772_v45 }
0x1343   :  { %8707 = vmatpush.bf16.msra.mxu2 %v8657_v63 }
0x1345   :  { %v7991_v13 = vpop.f32.mrf.mxu2  ;;  %14498 = vmatmul.msk.bf16.vlgmr.msra.gmra.mxu1 %vm7952_vm4, %v15533_v37 }
0x1346   :  { %v8041_v4 = vadd.f32 %v8032_v16, %v7991_v13 }
0x1347   :  { %8708 = vmatpush.bf16.msra.mxu2 %v8656_v31 }
0x1348   :  { %v8157_v27 = vadd.f32 %v8147_v19, %v8041_v4  ;;  %v8870_v39 = vpop.f32.mrf.mxu3  ;;  %v15539_v4 = vld [vmem:[%s17436_s26 + $0x110] sm:$0xff] }
0x1349   :  { %v17576_v15 = vpop.f32.mrf.mxu1 }
0x134a   :  { %14465 = vmatmul.msk.bf16.vlgmr.msra.gmra.mxu2 %vm7952_vm4, %v15529_v58 }
0x134d   :  { %v8246_v5 = vpop.f32.mrf.mxu2 }
0x134e   :  { %v8266_v23 = vadd.f32 %v8246_v5, %v17533_v42 }
0x1350   :  { %v8382_v54 = vadd.f32 %v8362_v1, %v8266_v23  ;;  %v8873_v48 = vpop.f32.mrf.mxu3  ;;  %v15538_v1 = vld [vmem:[%s17436_s26 + $0x108] sm:$0xff] }
0x1351   :  { %v8367_v12 = vpop.f32.mrf.mxu1 }
0x1355   :  { %v8248_v61 = vpop.f32.mrf.mxu2  ;;  %14499 = vmatmul.msk.bf16.gmra.mxu1 %vm7952_vm4, %v15534_v20 }
0x1356   :  { %v17583_v21 = vadd.f32 %v8248_v61, %v17540_v53 }
0x1358   :  { %v8875_v17 = vpop.f32.mrf.mxu3 }
0x1359   :  { %v17586_v3 = vpop.f32.mrf.mxu1  ;;  %v8889_v28 = vpack.c.bf16 %v8875_v17, %v8873_v48  ;;  %v15540_v48 = vld [vmem:[%s17436_s26 + $0x118] sm:$0xff] }
0x135a   :  { %14466 = vmatmul.msk.bf16.gmra.mxu2 %vm7952_vm4, %v15530_v49 }
0x135d   :  { %v8251_v43 = vpop.f32.mrf.mxu2 }
0x135e   :  { %v8268_v42 = vadd.f32 %v8251_v43, %v17543_v2 }
0x1360   :  { %v8384_v29 = vadd.f32 %v8367_v12, %v8268_v42  ;;  %v8878_v8 = vpop.f32.mrf.mxu3 }
0x1361   :  { %v8372_v51 = vpop.f32.mrf.mxu1 }
0x1365   :  { %v8253_v18 = vpop.f32.mrf.mxu2  ;;  %14500 = vmatmul.msk.bf16.gmra.mxu1 %vm7952_vm4, %v15535_v7 }
0x1366   :  { %v17593_v53 = vadd.f32 %v8253_v18, %v17548_v32  ;;  %v15532_v32 = vld [vmem:[%s17436_s26 + $0xd8] sm:$0xff] }
0x1368   :  { %v8880_v57 = vpop.f32.mrf.mxu3 }
0x1369   :  { %v17596_v36 = vpop.f32.mrf.mxu1 }
0x136a   :  { %14467 = vmatmul.msk.bf16.gmra.mxu2 %vm7952_vm4, %v15531_v56 }
0x136d   :  { %v8256_v24 = vpop.f32.mrf.mxu2 }
0x136e   :  { %v8270_v2 = vadd.f32 %v8256_v24, %v17553_v6  ;;  %v8890_v6 = vpack.c.bf16 %v8880_v57, %v8878_v8 }
0x1370   :  { %v8386_v60 = vadd.f32 %v8372_v51, %v8270_v2  ;;  %v8883_v52 = vpop.f32.mrf.mxu3  ;;  %v9123_v2 = vld [vmem:[%s17635_s11] sm:$0xf] }
0x1371   :  { %v8377_v10 = vpop.f32.mrf.mxu1 }
0x1375   :  { %v8258_v41 = vpop.f32.mrf.mxu2  ;;  %14501 = vmatmul.msk.bf16.gmra.mxu1 %vm7952_vm4, %v15536_v46 }
0x1376   :  { %v17603_v9 = vadd.f32 %v8258_v41, %v17560_v11  ;;  %v8888_v11 = vpack.c.bf16 %v8870_v39, %v17568_v59  ;;  %v9067_v41 = vpop.f32.mrf.mxu0 }
0x1378   :  { %v8885_v35 = vpop.f32.mrf.mxu3 }
0x1379   :  { %v8891_v26 = vpack.c.bf16 %v8885_v35, %v8883_v52  ;;  %v17606_v34 = vpop.f32.mrf.mxu1 }
0x137a   :  { %14468 = vmatmul.msk.bf16.gmra.mxu2 %vm7952_vm4, %v15532_v32 }
0x137b   :  { %8937 = vmatpush.bf16.msrb.mxu2 %v8891_v26 }
0x137d   :  { %v8261_v0 = vpop.f32.mrf.mxu2 }
0x137e   :  { %v8272_v30 = vadd.f32 %v8261_v0, %v8156_v38  ;;  %v9069_v0 = vpop.f32.mrf.mxu0 }
0x137f   :  { %8938 = vmatpush.bf16.msrb.mxu2 %v8890_v6 }
0x1380   :  { %v8388_v50 = vadd.f32 %v8377_v10, %v8272_v30  ;;  %v9137_v10 = vsel %vm7887_vm2, %v9123_v2, 0  ;;  %v8383_v30 = vadd.f32 %v17576_v15, %v17583_v21 }
0x1381   :  { %v8594_v47 = vpop.f32.mrf.mxu1  ;;  %9146 = vmatpush.bf16.msrb.mxu1 %v9137_v10  ;;  %v14676_v10 = vld [vmem:[%s17635_s11 + $0x8] sm:$0xf] }
0x1383   :  { %8939 = vmatpush.bf16.msrb.mxu2 %v8889_v28 }
0x1385   :  { %v8263_v19 = vpop.f32.mrf.mxu2 }
0x1386   :  { %v17610_v55 = vadd.f32 %v8263_v19, %v8157_v27 }
0x1387   :  { %8940 = vmatpush.bf16.msrb.mxu2 %v8888_v11 }
0x1389   :  { %v8596_v40 = vpop.f32.mrf.mxu1 }
0x138a   :  { %14531 = vmatmul.msk.bf16.vlgmr.msrb.gmra.mxu2 %vm7952_vm4, %v15537_v62 }
0x138d   :  { %v8478_v22 = vpop.f32.mrf.mxu2 }
0x138e   :  { %v8498_v44 = vadd.f32 %v8478_v22, %v8382_v54  ;;  %v9072_v22 = vpop.f32.mrf.mxu0 }
0x1390   :  { %v8614_v45 = vadd.f32 %v8594_v47, %v8498_v44 }
0x1391   :  { %v8599_v63 = vpop.f32.mrf.mxu1 }
0x1395   :  { %v8480_v38 = vpop.f32.mrf.mxu2 }
0x1399   :  { %v17616_v16 = vpop.f32.mrf.mxu1 }
0x139a   :  { %14532 = vmatmul.msk.bf16.gmra.mxu2 %vm7952_vm4, %v15538_v1 }
0x139d   :  { %v8483_v37 = vpop.f32.mrf.mxu2 }
0x139e   :  { %v8500_v59 = vadd.f32 %v8483_v37, %v8384_v29  ;;  %v9070_v37 = vadd.f32 %v9069_v0, %v17556_v14 }
0x13a0   :  { %v8616_v31 = vadd.f32 %v8599_v63, %v8500_v59 }
0x13a1   :  { %v8604_v58 = vpop.f32.mrf.mxu1 }
0x13a5   :  { %v8485_v13 = vpop.f32.mrf.mxu2 }
0x13a9   :  { %v17620_v23 = vpop.f32.mrf.mxu1 }
0x13aa   :  { %14533 = vmatmul.msk.bf16.gmra.mxu2 %vm7952_vm4, %v15539_v4  ;;  %v8385_v4 = vadd.f32 %v17586_v3, %v17593_v53 }
0x13ad   :  { %v8488_v27 = vpop.f32.mrf.mxu2 }
0x13ae   :  { %v8502_v39 = vadd.f32 %v8488_v27, %v8386_v60  ;;  %v14615_v60 = vld [vmem:[%s17635_s11 + $0x4] sm:$0xf]  ;;  %v9074_v27 = vpop.f32.mrf.mxu0 }
0x13af   :  { %v9401_v46 = vsel %vm7887_vm2, %v14615_v60, 0 }
0x13b0   :  { %v8618_v5 = vadd.f32 %v8604_v58, %v8502_v39  ;;  %9410 = vmatpush.bf16.msra.mxu2 %v9401_v46 }
0x13b1   :  { %v8609_v20 = vpop.f32.mrf.mxu1 }
0x13b5   :  { %v17622_v54 = vpop.f32.mrf.mxu2 }
0x13b9   :  { %v17630_v57 = vpop.f32.mrf.mxu1 }
0x13ba   :  { %14534 = vmatmul.msk.bf16.gmra.mxu2 %vm7952_vm4, %v15540_v48 }
0x13bd   :  { %v8493_v12 = vpop.f32.mrf.mxu2 }
0x13be   :  { %v8504_v61 = vadd.f32 %v8493_v12, %v8388_v50  ;;  %v8499_v50 = vadd.f32 %v8480_v38, %v8383_v30  ;;  %v8501_v38 = vadd.f32 %v8485_v13, %v8385_v4  ;;  %v9004_v12 = vpop.permute.xlu2 %9003  ;;  %v9073_v13 = vadd.f32 %v9072_v22, %v17563_v33 }
0x13c0   :  { %v8620_v49 = vadd.f32 %v8609_v20, %v8504_v61  ;;  %v8615_v47 = vadd.f32 %v8596_v40, %v8499_v50  ;;  %v9077_v61 = vpop.f32.mrf.mxu0 }
0x13c2   :  { %v8826_v52 = vpop.f32.mrf.mxu1 }
0x13c5   :  { %v17626_v17 = vpop.f32.mrf.mxu2 }
0x13c8   :  { %v9079_v46 = vpop.f32.mrf.mxu0 }
0x13ca   :  { %v8828_v26 = vpop.f32.mrf.mxu1 }
0x13cd   :  { %v8710_v43 = vpop.f32.mrf.mxu2 }
0x13ce   :  { %v8730_v42 = vadd.f32 %v8710_v43, %v8614_v45  ;;  %v9068_v45 = vadd.f32 %v9067_v41, %v17550_v25  ;;  %v8617_v25 = vadd.f32 %v17616_v16, %v8501_v38  ;;  %v9075_v43 = vadd.f32 %v9074_v27, %v9004_v12 }
0x13d0   :  { %v8846_v19 = vadd.f32 %v8826_v52, %v8730_v42  ;;  %v9082_v22 = vpop.f32.mrf.mxu0 }
0x13d2   :  { %v8831_v11 = vpop.f32.mrf.mxu1 }
0x13d5   :  { %v8712_v29 = vpop.f32.mrf.mxu2 }
0x13d6   :  { %v8731_v62 = vadd.f32 %v8712_v29, %v8615_v47  ;;  %v8387_v29 = vadd.f32 %v17596_v36, %v17603_v9  ;;  %v9585_v36 = vsel %vm7887_vm2, %v14676_v10, 0 }
0x13d7   :  { %9594 = vmatpush.bf16.msra.mxu1 %v9585_v36  ;;  %v15545_v36 = vld [vmem:[%s17702_s16 + $0x100] sm:$0xff] }
0x13d8   :  { %v8847_v63 = vadd.f32 %v8828_v26, %v8731_v62  ;;  %v9084_v4 = vpop.f32.mrf.mxu0 }
0x13da   :  { %v8833_v21 = vpop.f32.mrf.mxu1 }
0x13dd   :  { %v8715_v8 = vpop.f32.mrf.mxu2 }
0x13de   :  { %v8732_v51 = vadd.f32 %v8715_v8, %v8616_v31 }
0x13e0   :  { %v8848_v14 = vadd.f32 %v8831_v11, %v8732_v51 }
0x13e2   :  { %v8836_v53 = vpop.f32.mrf.mxu1 }
0x13e5   :  { %v8717_v7 = vpop.f32.mrf.mxu2 }
0x13e6   :  { %v8733_v48 = vadd.f32 %v8717_v7, %v8617_v25 }
0x13e8   :  { %v8849_v20 = vadd.f32 %v8833_v21, %v8733_v48 }
0x13ea   :  { %v8838_v60 = vpop.f32.mrf.mxu1 }
0x13ed   :  { %v8720_v18 = vpop.f32.mrf.mxu2 }
0x13ee   :  { %v17628_v56 = vadd.f32 %v8720_v18, %v8618_v5  ;;  %v8503_v18 = vadd.f32 %v17622_v54, %v8387_v29 }
0x13f0   :  { %v8619_v33 = vadd.f32 %v17620_v23, %v8503_v18  ;;  %v8850_v9 = vadd.f32 %v8836_v53, %v17628_v56  ;;  %v9014_v23 = vpop.permute.xlu0 %9013 }
0x13f1   :  { %v9080_v50 = vadd.f32 %v9079_v46, %v9014_v23 }
0x13f2   :  { %v8841_v11 = vpop.f32.mrf.mxu1 }
0x13f5   :  { %v17637_v24 = vpop.f32.mrf.mxu2 }
0x13f6   :  { %v8735_v54 = vadd.f32 %v17637_v24, %v8619_v33 }
0x13f8   :  { %v8851_v0 = vadd.f32 %v8838_v60, %v8735_v54 }
0x13fd   :  { %v8725_v32 = vpop.f32.mrf.mxu2 }
0x13fe   :  { %v17643_v35 = vadd.f32 %v8725_v32, %v8620_v49  ;;  %v9009_v32 = vpop.permute.xlu2 %9008 }
0x13ff   :  { %v9078_v26 = vadd.f32 %v9077_v61, %v9009_v32  ;;  %v15553_v32 = vld [vmem:[%s17702_s16 + $0x140] sm:$0xff] }
0x1405   :  { %v17645_v6 = vpop.f32.mrf.mxu2 }
0x1406   :  { %v9024_v21 = vpop.permute.xlu2 %9023 }
0x140d   :  { %v8942_v28 = vpop.f32.mrf.mxu2 }
0x140e   :  { %v8962_v44 = vadd.f32 %v8942_v28, %v8846_v19  ;;  %v8389_v19 = vadd.f32 %v17606_v34, %v17610_v55  ;;  %v9019_v55 = vpop.permute.xlu1 %9018 }
0x1410   :  { %v9087_v59 = vadd.f32 %v9068_v45, %v8962_v44  ;;  %v8505_v56 = vadd.f32 %v17626_v17, %v8389_v19  ;;  %v9083_v17 = vadd.f32 %v9082_v22, %v9019_v55 }
0x1412   :  { %v9095_v40 = vmax.f32 %v9087_v59, 0.0 }
0x1415   :  { %v8944_v1 = vpop.f32.mrf.mxu2 }
0x1416   :  { %v8963_v31 = vadd.f32 %v8944_v1, %v8847_v63  ;;  %v8621_v1 = vadd.f32 %v17630_v57, %v8505_v56 }
0x1418   :  { %v9088_v15 = vadd.f32 %v9070_v37, %v8963_v31  ;;  %v8852_v37 = vadd.f32 %v8841_v11, %v17643_v35  ;;  %v8737_v59 = vadd.f32 %v17645_v6, %v8621_v1  ;;  %v8843_v31 = vpop.f32.mrf.mxu1  ;;  %v14737_v35 = vld [vmem:[%s17635_s11 + $0xc] sm:$0xf]  ;;  %v15555_v11 = vld [vmem:[%s17702_s16 + $0x150] sm:$0xff] }
0x1419   :  { %v9769_v6 = vsel %vm7887_vm2, %v14737_v35, 0 }
0x141a   :  { %v9096_v58 = vmax.f32 %v9088_v15, 0.0  ;;  %v8853_v15 = vadd.f32 %v8843_v31, %v8737_v59  ;;  %v15561_v59 = vld [vmem:[%s17702_s16 + $0x1c0] sm:$0xff] }
0x141c   :  { %v17653_v39 = vpack.c.bf16 %v9096_v58, %v9095_v40  ;;  %v9085_v40 = vadd.f32 %v9084_v4, %v9024_v21  ;;  %v15550_v4 = vld [vmem:[%s17702_s16 + $0x128] sm:$0xff] }
0x141d   :  { %v8947_v5 = vpop.f32.mrf.mxu2  ;;  %v15558_v21 = vld [vmem:[%s17702_s16 + $0x168] sm:$0xff] }
0x141e   :  { %14555 = vmatmul.msk.bf16.vlgmr.msrb.gmra.mxu1 %vm7874_vm3, %v17653_v39  ;;  %14616 = vmatmul.msk.bf16.vlgmr.msra.gmra.mxu2 %vm7874_vm3, %v17653_v39  ;;  %v8964_v3 = vadd.f32 %v8947_v5, %v8848_v14 }
0x141f   :  { %9778 = vmatpush.bf16.msrb.mxu1 %v9769_v6 }
0x1420   :  { %v9089_v42 = vadd.f32 %v9073_v13, %v8964_v3 }
0x1422   :  { %v9097_v51 = vmax.f32 %v9089_v42, 0.0 }
0x1425   :  { %v8949_v49 = vpop.f32.mrf.mxu2 }
0x1426   :  { %v8965_v16 = vadd.f32 %v8949_v49, %v8849_v20 }
0x1428   :  { %v9090_v8 = vadd.f32 %v9075_v43, %v8965_v16 }
0x142a   :  { %v9098_v7 = vmax.f32 %v9090_v8, 0.0 }
0x142c   :  { %v17664_v2 = vpack.c.bf16 %v9098_v7, %v9097_v51 }
0x142d   :  { %v8952_v52 = vpop.f32.mrf.mxu2 }
0x142e   :  { %14556 = vmatmul.msk.bf16.gmra.mxu1 %vm7874_vm3, %v17664_v2  ;;  %14617 = vmatmul.msk.bf16.gmra.mxu2 %vm7874_vm3, %v17664_v2  ;;  %v8966_v41 = vadd.f32 %v8952_v52, %v8850_v9 }
0x1430   :  { %v9091_v28 = vadd.f32 %v9078_v26, %v8966_v41 }
0x1432   :  { %v9099_v44 = vmax.f32 %v9091_v28, 0.0  ;;  %v15547_v28 = vld [vmem:[%s17702_s16 + $0x110] sm:$0xff] }
0x1435   :  { %v8954_v30 = vpop.f32.mrf.mxu2 }
0x1436   :  { %v8967_v47 = vadd.f32 %v8954_v30, %v8851_v0  ;;  %v15546_v0 = vld [vmem:[%s17702_s16 + $0x108] sm:$0xff] }
0x1437   :  { %v15554_v30 = vld [vmem:[%s17702_s16 + $0x148] sm:$0xff] }
0x1438   :  { %v9092_v62 = vadd.f32 %v9080_v50, %v8967_v47 }
0x143a   :  { %v9100_v24 = vmax.f32 %v9092_v62, 0.0  ;;  %v15548_v62 = vld [vmem:[%s17702_s16 + $0x118] sm:$0xff] }
0x143c   :  { %v9105_v45 = vpack.c.bf16 %v9100_v24, %v9099_v44  ;;  %v15556_v44 = vld [vmem:[%s17702_s16 + $0x158] sm:$0xff] }
0x143d   :  { %v8957_v63 = vpop.f32.mrf.mxu2 }
0x143e   :  { %14557 = vmatmul.msk.bf16.gmra.mxu1 %vm7874_vm3, %v9105_v45  ;;  %14618 = vmatmul.msk.bf16.gmra.mxu2 %vm7874_vm3, %v9105_v45  ;;  %v8968_v34 = vadd.f32 %v8957_v63, %v8852_v37  ;;  %v15549_v37 = vld [vmem:[%s17702_s16 + $0x120] sm:$0xff] }
0x1440   :  { %v9093_v58 = vadd.f32 %v9083_v17, %v8968_v34  ;;  %v15557_v34 = vld [vmem:[%s17702_s16 + $0x160] sm:$0xff]  ;;  %v15562_v17 = vld [vmem:[%s17702_s16 + $0x1c8] sm:$0xff] }
0x1442   :  { %v9101_v5 = vmax.f32 %v9093_v58, 0.0  ;;  %v15563_v58 = vld [vmem:[%s17702_s16 + $0x1d0] sm:$0xff] }
0x1445   :  { %v8959_v38 = vpop.f32.mrf.mxu2 }
0x1446   :  { %v8969_v57 = vadd.f32 %v8959_v38, %v8853_v15 }
0x1448   :  { %v9094_v27 = vadd.f32 %v9085_v40, %v8969_v57  ;;  %v15551_v40 = vld [vmem:[%s17702_s16 + $0x130] sm:$0xff] }
0x144a   :  { %v9102_v25 = vmax.f32 %v9094_v27, 0.0  ;;  %v15559_v27 = vld [vmem:[%s17702_s16 + $0x170] sm:$0xff] }
0x144c   :  { %v9106_v14 = vpack.c.bf16 %v9102_v25, %v9101_v5  ;;  %v15552_v25 = vld [vmem:[%s17702_s16 + $0x138] sm:$0xff] }
0x144e   :  { %14558 = vmatmul.msk.bf16.gmra.mxu1 %vm7874_vm3, %v9106_v14  ;;  %14619 = vmatmul.msk.bf16.gmra.mxu2 %vm7874_vm3, %v9106_v14 }
0x145e   :  { %14677 = vmatmul.msk.bf16.vlgmr.msra.gmra.mxu1 %vm7874_vm3, %v17653_v39 }
0x146e   :  { %14678 = vmatmul.msk.bf16.gmra.mxu1 %vm7874_vm3, %v17664_v2 }
0x147e   :  { %14679 = vmatmul.msk.bf16.gmra.mxu1 %vm7874_vm3, %v9105_v45 }
0x148e   :  { %14680 = vmatmul.msk.bf16.gmra.mxu1 %vm7874_vm3, %v9106_v14 }
0x149b   :  { %v9148_v48 = vpop.f32.mrf.mxu1 }
0x149e   :  { %14738 = vmatmul.msk.bf16.vlgmr.msrb.gmra.mxu1 %vm7874_vm3, %v17653_v39 }
0x14a1   :  { %v9412_v3 = vpop.f32.mrf.mxu2 }
0x14a3   :  { %v9150_v53 = vpop.f32.mrf.mxu1 }
0x14a4   :  { %v9168_v46 = vpack.c.bf16 %v9150_v53, %v9148_v48  ;;  %v15560_v48 = vld [vmem:[%s17702_s16 + $0x178] sm:$0xff] }
0x14a9   :  { %v9414_v12 = vpop.f32.mrf.mxu2 }
0x14aa   :  { %v9432_v41 = vpack.c.bf16 %v9414_v12, %v9412_v3 }
0x14ab   :  { %v9153_v13 = vpop.f32.mrf.mxu1 }
0x14ae   :  { %14739 = vmatmul.msk.bf16.gmra.mxu1 %vm7874_vm3, %v17664_v2 }
0x14b1   :  { %v9417_v20 = vpop.f32.mrf.mxu2 }
0x14b3   :  { %v9155_v61 = vpop.f32.mrf.mxu1 }
0x14b4   :  { %v9169_v33 = vpack.c.bf16 %v9155_v61, %v9153_v13  ;;  %v15565_v13 = vld [vmem:[%s17702_s16 + $0x1e0] sm:$0xff] }
0x14b9   :  { %v9419_v49 = vpop.f32.mrf.mxu2 }
0x14ba   :  { %v9433_v9 = vpack.c.bf16 %v9419_v49, %v9417_v20  ;;  %v15569_v20 = vld [vmem:[%s17702_s16 + $0x200] sm:$0xff] }
0x14bb   :  { %v9158_v43 = vpop.f32.mrf.mxu1 }
0x14be   :  { %14740 = vmatmul.msk.bf16.gmra.mxu1 %vm7874_vm3, %v9105_v45 }
0x14c1   :  { %v9422_v42 = vpop.f32.mrf.mxu2 }
0x14c3   :  { %v9160_v16 = vpop.f32.mrf.mxu1 }
0x14c4   :  { %v9170_v7 = vpack.c.bf16 %v9160_v16, %v9158_v43  ;;  %v15566_v43 = vld [vmem:[%s17702_s16 + $0x1e8] sm:$0xff] }
0x14c9   :  { %v9424_v29 = vpop.f32.mrf.mxu2 }
0x14ca   :  { %v9434_v10 = vpack.c.bf16 %v9424_v29, %v9422_v42  ;;  %v15570_v42 = vld [vmem:[%s17702_s16 + $0x208] sm:$0xff] }
0x14cb   :  { %v9163_v8 = vpop.f32.mrf.mxu1 }
0x14ce   :  { %14741 = vmatmul.msk.bf16.gmra.mxu1 %vm7874_vm3, %v9106_v14  ;;  %v15564_v14 = vld [vmem:[%s17702_s16 + $0x1d8] sm:$0xff] }
0x14d1   :  { %v9427_v39 = vpop.f32.mrf.mxu2 }
0x14d3   :  { %v9165_v18 = vpop.f32.mrf.mxu1 }
0x14d4   :  { %v9171_v51 = vpack.c.bf16 %v9165_v18, %v9163_v8  ;;  %v15567_v8 = vld [vmem:[%s17702_s16 + $0x1f0] sm:$0xff] }
0x14d6   :  { %9257 = vmatpush.bf16.msrb.mxu3 %v9171_v51 }
0x14d9   :  { %v9429_v60 = vpop.f32.mrf.mxu2 }
0x14da   :  { %v9435_v2 = vpack.c.bf16 %v9429_v60, %v9427_v39  ;;  %9258 = vmatpush.bf16.msrb.mxu3 %v9170_v7  ;;  %v15571_v39 = vld [vmem:[%s17702_s16 + $0x210] sm:$0xff]  ;;  %v15572_v60 = vld [vmem:[%s17702_s16 + $0x218] sm:$0xff] }
0x14db   :  { %v9596_v52 = vpop.f32.mrf.mxu1 }
0x14dc   :  { %9521 = vmatpush.bf16.msra.mxu0 %v9435_v2 }
0x14de   :  { %9259 = vmatpush.bf16.msrb.mxu3 %v9169_v33 }
0x14e0   :  { %9522 = vmatpush.bf16.msra.mxu0 %v9434_v10  ;;  %v15585_v10 = vld [vmem:[%s17777_s23] sm:$0xff] }
0x14e2   :  { %9260 = vmatpush.bf16.msrb.mxu3 %v9168_v46 }
0x14e3   :  { %v9598_v54 = vpop.f32.mrf.mxu1 }
0x14e4   :  { %9523 = vmatpush.bf16.msra.mxu0 %v9433_v9  ;;  %v9616_v1 = vpack.c.bf16 %v9598_v54, %v9596_v52  ;;  %v15574_v9 = vld [vmem:[%s17702_s16 + $0x228] sm:$0xff] }
0x14e5   :  { %14607 = vmatmul.msk.bf16.vlgmr.msrb.gmra.mxu3 %vm7952_vm4, %v15545_v36  ;;  %v15586_v54 = vld [vmem:[%s17777_s23 + $0x8] sm:$0xff] }
0x14e8   :  { %9524 = vmatpush.bf16.msra.mxu0 %v9432_v41 }
0x14eb   :  { %v9601_v26 = vpop.f32.mrf.mxu1  ;;  %14668 = vmatmul.msk.bf16.vlgmr.msra.gmra.mxu0 %vm7952_vm4, %v15553_v32 }
0x14f3   :  { %v9603_v23 = vpop.f32.mrf.mxu1 }
0x14f4   :  { %v9617_v63 = vpack.c.bf16 %v9603_v23, %v9601_v26  ;;  %v15575_v26 = vld [vmem:[%s17702_s16 + $0x230] sm:$0xff] }
0x14f5   :  { %14608 = vmatmul.msk.bf16.gmra.mxu3 %vm7952_vm4, %v15546_v0  ;;  %v15587_v0 = vld [vmem:[%s17777_s23 + $0x10] sm:$0xff] }
0x14fb   :  { %v9606_v50 = vpop.f32.mrf.mxu1  ;;  %14669 = vmatmul.msk.bf16.gmra.mxu0 %vm7952_vm4, %v15554_v30 }
0x1503   :  { %v9608_v47 = vpop.f32.mrf.mxu1 }
0x1504   :  { %v9618_v24 = vpack.c.bf16 %v9608_v47, %v9606_v50 }
0x1505   :  { %14609 = vmatmul.msk.bf16.gmra.mxu3 %vm7952_vm4, %v15547_v28  ;;  %v9990_v28 = vld [vmem:[%s10699_s30] sm:$0x1] }
0x1506   :  { %v10018_v47 = vsel %vm10016_vm5, %v9990_v28, 0 }
0x1507   :  { %10027 = vmatpush.bf16.msrb.mxu0 %v10018_v47 }
0x150b   :  { %v9611_v19 = vpop.f32.mrf.mxu1  ;;  %14670 = vmatmul.msk.bf16.gmra.mxu0 %vm7952_vm4, %v15555_v11 }
0x1513   :  { %v9613_v22 = vpop.f32.mrf.mxu1 }
0x1514   :  { %v9619_v56 = vpack.c.bf16 %v9613_v22, %v9611_v19  ;;  %v15576_v22 = vld [vmem:[%s17702_s16 + $0x238] sm:$0xff] }
0x1515   :  { %14610 = vmatmul.msk.bf16.gmra.mxu3 %vm7952_vm4, %v15548_v62 }
0x1516   :  { %9705 = vmatpush.bf16.msrb.mxu2 %v9619_v56  ;;  %v15588_v56 = vld [vmem:[%s17777_s23 + $0x18] sm:$0xff] }
0x151a   :  { %9706 = vmatpush.bf16.msrb.mxu2 %v9618_v24 }
0x151b   :  { %v9780_v45 = vpop.f32.mrf.mxu1  ;;  %14671 = vmatmul.msk.bf16.gmra.mxu0 %vm7952_vm4, %v15556_v44 }
0x151e   :  { %9707 = vmatpush.bf16.msrb.mxu2 %v9617_v63 }
0x1522   :  { %9708 = vmatpush.bf16.msrb.mxu2 %v9616_v1  ;;  %v15589_v1 = vld [vmem:[%s17777_s23 + $0x20] sm:$0xff] }
0x1523   :  { %v9782_v31 = vpop.f32.mrf.mxu1 }
0x1524   :  { %v9800_v12 = vpack.c.bf16 %v9782_v31, %v9780_v45  ;;  %v9305_v31 = vpop.permute.xlu0 %9304 }
0x1525   :  { %14611 = vmatmul.msk.bf16.gmra.mxu3 %vm7952_vm4, %v15549_v37  ;;  %14729 = vmatmul.msk.bf16.vlgmr.msrb.gmra.mxu2 %vm7952_vm4, %v15561_v59 }
0x1526   :  { %10467 = vmatpush.bf16.msra.mxu2 %v9171_v51 }
0x152a   :  { %10468 = vmatpush.bf16.msra.mxu2 %v9170_v7  ;;  %v15568_v7 = vld [vmem:[%s17702_s16 + $0x1f8] sm:$0xff] }
0x152b   :  { %v9785_v55 = vpop.f32.mrf.mxu1  ;;  %14672 = vmatmul.msk.bf16.gmra.mxu0 %vm7952_vm4, %v15557_v34 }
0x152e   :  { %10469 = vmatpush.bf16.msra.mxu2 %v9169_v33  ;;  %v15573_v33 = vld [vmem:[%s17702_s16 + $0x220] sm:$0xff] }
0x1532   :  { %10470 = vmatpush.bf16.msra.mxu2 %v9168_v46 }
0x1533   :  { %v9787_v15 = vpop.f32.mrf.mxu1 }
0x1534   :  { %v9801_v53 = vpack.c.bf16 %v9787_v15, %v9785_v55  ;;  %v9310_v55 = vpop.permute.xlu1 %9309 }
0x1535   :  { %14612 = vmatmul.msk.bf16.gmra.mxu3 %vm7952_vm4, %v15550_v4  ;;  %14730 = vmatmul.msk.bf16.gmra.mxu2 %vm7952_vm4, %v15562_v17 }
0x153b   :  { %v9790_v38 = vpop.f32.mrf.mxu1  ;;  %14673 = vmatmul.msk.bf16.gmra.mxu0 %vm7952_vm4, %v15558_v21 }
0x1543   :  { %v9792_v57 = vpop.f32.mrf.mxu1 }
0x1544   :  { %v9802_v3 = vpack.c.bf16 %v9792_v57, %v9790_v38 }
0x1545   :  { %14613 = vmatmul.msk.bf16.gmra.mxu3 %vm7952_vm4, %v15551_v40  ;;  %14731 = vmatmul.msk.bf16.gmra.mxu2 %vm7952_vm4, %v15563_v58 }
0x154b   :  { %v9795_v5 = vpop.f32.mrf.mxu1  ;;  %14674 = vmatmul.msk.bf16.gmra.mxu0 %vm7952_vm4, %v15559_v27 }
0x1553   :  { %v9797_v35 = vpop.f32.mrf.mxu1 }
0x1554   :  { %v9803_v6 = vpack.c.bf16 %v9797_v35, %v9795_v5 }
0x1555   :  { %14614 = vmatmul.msk.bf16.gmra.mxu3 %vm7952_vm4, %v15552_v25  ;;  %14732 = vmatmul.msk.bf16.gmra.mxu2 %vm7952_vm4, %v15564_v14  ;;  %v15590_v14 = vld [vmem:[%s17777_s23 + $0x28] sm:$0xff] }
0x1556   :  { %9889 = vmatpush.bf16.msra.mxu3 %v9803_v6 }
0x155a   :  { %9890 = vmatpush.bf16.msra.mxu3 %v9802_v3  ;;  %v9315_v3 = vpop.permute.xlu2 %9314 }
0x155b   :  { %14675 = vmatmul.msk.bf16.gmra.mxu0 %vm7952_vm4, %v15560_v48 }
0x155e   :  { %9891 = vmatpush.bf16.msra.mxu3 %v9801_v53 }
0x1562   :  { %9892 = vmatpush.bf16.msra.mxu3 %v9800_v12  ;;  %v9320_v12 = vpop.permute.xlu0 %9319 }
0x1565   :  { %14733 = vmatmul.msk.bf16.gmra.mxu2 %vm7952_vm4, %v15565_v13  ;;  %14790 = vmatmul.msk.bf16.vlgmr.msra.gmra.mxu3 %vm7952_vm4, %v15569_v20 }
0x1568   :  { %v17748_v61 = vpop.f32.mrf.mxu3  ;;  %v9526_v23 = vpop.f32.mrf.mxu0 }
0x1569   :  { %v9382_v34 = vadd.f32 %v9305_v31, %v17748_v61  ;;  %v15592_v31 = vld [vmem:[%s17777_s23 + $0x38] sm:$0xff] }
0x156b   :  { %v9566_v15 = vadd.f32 %v9526_v23, %v9382_v34 }
0x1570   :  { %v17750_v49 = vpop.f32.mrf.mxu3  ;;  %v9528_v11 = vpop.f32.mrf.mxu0 }
0x1571   :  { %v9383_v17 = vadd.f32 %v9310_v55, %v17750_v49 }
0x1573   :  { %v9567_v38 = vadd.f32 %v9528_v11, %v9383_v17  ;;  %v9335_v17 = vpop.permute.xlu0 %9334 }
0x1575   :  { %14734 = vmatmul.msk.bf16.gmra.mxu2 %vm7952_vm4, %v15566_v43  ;;  %14791 = vmatmul.msk.bf16.gmra.mxu3 %vm7952_vm4, %v15570_v42 }
0x1578   :  { %v17756_v16 = vpop.f32.mrf.mxu3  ;;  %v9531_v44 = vpop.f32.mrf.mxu0 }
0x1579   :  { %v9384_v13 = vadd.f32 %v9315_v3, %v17756_v16  ;;  %v9325_v16 = vpop.permute.xlu1 %9324 }
0x157b   :  { %v9568_v43 = vadd.f32 %v9531_v44, %v9384_v13 }
0x1580   :  { %v17758_v29 = vpop.f32.mrf.mxu3  ;;  %v9533_v37 = vpop.f32.mrf.mxu0 }
0x1581   :  { %v9385_v49 = vadd.f32 %v9320_v12, %v17758_v29  ;;  %v9330_v29 = vpop.permute.xlu2 %9329 }
0x1583   :  { %v9569_v42 = vadd.f32 %v9533_v37, %v9385_v49 }
0x1585   :  { %14735 = vmatmul.msk.bf16.gmra.mxu2 %vm7952_vm4, %v15567_v8  ;;  %14792 = vmatmul.msk.bf16.gmra.mxu3 %vm7952_vm4, %v15571_v39 }
0x1588   :  { %v17764_v18 = vpop.f32.mrf.mxu3  ;;  %v9536_v21 = vpop.f32.mrf.mxu0 }
0x1589   :  { %v9345_v13 = vpop.permute.xlu2 %9344 }
0x1590   :  { %v17766_v51 = vpop.f32.mrf.mxu3  ;;  %v9538_v53 = vpop.f32.mrf.mxu0 }
0x1591   :  { %v9387_v47 = vadd.f32 %v9330_v29, %v17766_v51 }
0x1595   :  { %14736 = vmatmul.msk.bf16.gmra.mxu2 %vm7952_vm4, %v15568_v7  ;;  %14793 = vmatmul.msk.bf16.gmra.mxu3 %vm7952_vm4, %v15572_v60 }
0x1598   :  { %v17772_v2 = vpop.f32.mrf.mxu3  ;;  %v9541_v60 = vpop.f32.mrf.mxu0 }
0x1599   :  { %v9388_v51 = vadd.f32 %v9335_v17, %v17772_v2  ;;  %v9350_v2 = vpop.permute.xlu0 %9349 }
0x15a0   :  { %v17779_v52 = vpop.f32.mrf.mxu3  ;;  %v9543_v11 = vpop.f32.mrf.mxu0 }
0x15a5   :  { %14794 = vmatmul.msk.bf16.gmra.mxu3 %vm7952_vm4, %v15573_v33  ;;  %14886 = vmatmul.msk.bf16.vlgmr.msra.gmra.mxu2 %vm7952_vm4, %v15585_v10 }
0x15a8   :  { %v17785_v46 = vpop.f32.mrf.mxu3  ;;  %v9710_v30 = vpop.f32.mrf.mxu2 }
0x15a9   :  { %v9750_v40 = vadd.f32 %v9710_v30, %v9566_v15  ;;  %v9386_v30 = vadd.f32 %v9325_v16, %v17764_v18 }
0x15b0   :  { %v17787_v36 = vpop.f32.mrf.mxu3  ;;  %v9712_v19 = vpop.f32.mrf.mxu2 }
0x15b1   :  { %v9751_v57 = vadd.f32 %v9712_v19, %v9567_v38  ;;  %v9570_v19 = vadd.f32 %v9536_v21, %v9386_v30  ;;  %v9340_v21 = vpop.permute.xlu1 %9339  ;;  %v9391_v49 = vadd.f32 %v9350_v2, %v17787_v36  ;;  %v9360_v30 = vpop.permute.xlu2 %9359 }
0x15b5   :  { %14795 = vmatmul.msk.bf16.gmra.mxu3 %vm7952_vm4, %v15574_v9  ;;  %14887 = vmatmul.msk.bf16.gmra.mxu2 %vm7952_vm4, %v15586_v54  ;;  %v15591_v9 = vld [vmem:[%s17777_s23 + $0x30] sm:$0xff] }
0x15b8   :  { %v17793_v41 = vpop.f32.mrf.mxu3  ;;  %v9715_v45 = vpop.f32.mrf.mxu2 }
0x15b9   :  { %v9752_v8 = vadd.f32 %v9715_v45, %v9568_v43 }
0x15c0   :  { %v17795_v32 = vpop.f32.mrf.mxu3  ;;  %v9717_v59 = vpop.f32.mrf.mxu2 }
0x15c1   :  { %v9753_v39 = vadd.f32 %v9717_v59, %v9569_v42  ;;  %v9393_v29 = vadd.f32 %v9360_v30, %v17795_v32 }
0x15c5   :  { %14796 = vmatmul.msk.bf16.gmra.mxu3 %vm7952_vm4, %v15575_v26  ;;  %14888 = vmatmul.msk.bf16.gmra.mxu2 %vm7952_vm4, %v15587_v0 }
0x15c8   :  { %v17804_v50 = vpop.f32.mrf.mxu3  ;;  %v9720_v58 = vpop.f32.mrf.mxu2 }
0x15c9   :  { %v9754_v44 = vadd.f32 %v9720_v58, %v9570_v19  ;;  %v9572_v58 = vadd.f32 %v9541_v60, %v9388_v51 }
0x15d0   :  { %v17807_v62 = vpop.f32.mrf.mxu3  ;;  %v9722_v20 = vpop.f32.mrf.mxu2 }
0x15d5   :  { %14797 = vmatmul.msk.bf16.gmra.mxu3 %vm7952_vm4, %v15576_v22  ;;  %14889 = vmatmul.msk.bf16.gmra.mxu2 %vm7952_vm4, %v15588_v56  ;;  %v9571_v56 = vadd.f32 %v9538_v53, %v9387_v47 }
0x15d7   :  { %v9755_v45 = vadd.f32 %v9722_v20, %v9571_v56  ;;  %v9390_v20 = vadd.f32 %v9345_v13, %v17785_v46  ;;  %v9355_v46 = vpop.permute.xlu1 %9354 }
0x15d8   :  { %v17813_v24 = vpop.f32.mrf.mxu3  ;;  %v9725_v54 = vpop.f32.mrf.mxu2  ;;  %v9392_v16 = vadd.f32 %v9355_v46, %v17793_v41 }
0x15e0   :  { %v17815_v63 = vpop.f32.mrf.mxu3  ;;  %v9727_v22 = vpop.f32.mrf.mxu2 }
0x15e5   :  { %14890 = vmatmul.msk.bf16.gmra.mxu2 %vm7952_vm4, %v15589_v1 }
0x15e8   :  { %v9894_v4 = vpop.f32.mrf.mxu3  ;;  %v9730_v15 = vpop.f32.mrf.mxu2 }
0x15e9   :  { %v9934_v27 = vadd.f32 %v9894_v4, %v9750_v40  ;;  %v9546_v4 = vpop.f32.mrf.mxu0  ;;  %v9389_v40 = vadd.f32 %v9340_v21, %v17779_v52 }
0x15ea   :  { %v9574_v42 = vadd.f32 %v9546_v4, %v9390_v20 }
0x15eb   :  { %v9950_v35 = vmax.f32 %v9934_v27, 0.0  ;;  %v9756_v27 = vadd.f32 %v9725_v54, %v9572_v58 }
0x15f0   :  { %v9896_v5 = vpop.f32.mrf.mxu3 }
0x15f1   :  { %v9935_v25 = vadd.f32 %v9896_v5, %v9751_v57  ;;  %v9573_v57 = vadd.f32 %v9543_v11, %v9389_v40  ;;  %v9548_v5 = vpop.f32.mrf.mxu0 }
0x15f3   :  { %v9951_v6 = vmax.f32 %v9935_v25, 0.0  ;;  %v9757_v25 = vadd.f32 %v9727_v22, %v9573_v57 }
0x15f5   :  { %v9966_v48 = vpack.c.bf16 %v9951_v6, %v9950_v35  ;;  %14891 = vmatmul.msk.bf16.gmra.mxu2 %vm7952_vm4, %v15590_v14  ;;  %v9732_v35 = vpop.f32.mrf.mxu2 }
0x15f7   :  { %14798 = vmatmul.msk.bf16.vlgmr.msrb.gmra.mxu0 %vm9991_vm6, %v9966_v48 }
0x15f8   :  { %v9899_v61 = vpop.f32.mrf.mxu3 }
0x15f9   :  { %v9936_v7 = vadd.f32 %v9899_v61, %v9752_v8  ;;  %v9551_v61 = vpop.f32.mrf.mxu0  ;;  %v9575_v8 = vadd.f32 %v9548_v5, %v9391_v49 }
0x15fb   :  { %v9952_v26 = vmax.f32 %v9936_v7, 0.0  ;;  %v9759_v7 = vadd.f32 %v9732_v35, %v9575_v8 }
0x15fd   :  { %v9735_v43 = vpop.f32.mrf.mxu2 }
0x1600   :  { %v9901_v33 = vpop.f32.mrf.mxu3 }
0x1601   :  { %v9937_v10 = vadd.f32 %v9901_v33, %v9753_v39  ;;  %v9758_v39 = vadd.f32 %v9730_v15, %v9574_v42 }
0x1603   :  { %v9953_v0 = vmax.f32 %v9937_v10, 0.0 }
0x1605   :  { %v9967_v23 = vpack.c.bf16 %v9953_v0, %v9952_v26  ;;  %14892 = vmatmul.msk.bf16.gmra.mxu2 %vm7952_vm4, %v15591_v9  ;;  %v9553_v9 = vpop.f32.mrf.mxu0  ;;  %v9737_v0 = vpop.f32.mrf.mxu2 }
0x1606   :  { %v9577_v11 = vadd.f32 %v9553_v9, %v9393_v29 }
0x1607   :  { %14799 = vmatmul.msk.bf16.gmra.mxu0 %vm9991_vm6, %v9967_v23 }
0x1608   :  { %v9904_v28 = vpop.f32.mrf.mxu3  ;;  %v9761_v56 = vadd.f32 %v9737_v0, %v9577_v11 }
0x1609   :  { %v9938_v1 = vadd.f32 %v9904_v28, %v9754_v44  ;;  %v9576_v28 = vadd.f32 %v9551_v61, %v9392_v16 }
0x160b   :  { %v9954_v34 = vmax.f32 %v9938_v1, 0.0  ;;  %v9760_v19 = vadd.f32 %v9735_v43, %v9576_v28 }
0x160d   :  { %v9556_v47 = vpop.f32.mrf.mxu0  ;;  %v9740_v22 = vpop.f32.mrf.mxu2 }
0x1610   :  { %v9906_v37 = vpop.f32.mrf.mxu3 }
0x1611   :  { %v9939_v59 = vadd.f32 %v9906_v37, %v9755_v45 }
0x1613   :  { %v9955_v55 = vmax.f32 %v9939_v59, 0.0 }
0x1615   :  { %v9968_v18 = vpack.c.bf16 %v9955_v55, %v9954_v34  ;;  %14893 = vmatmul.msk.bf16.gmra.mxu2 %vm7952_vm4, %v15592_v31  ;;  %v9365_v34 = vpop.permute.xlu0 %9364  ;;  %v9558_v41 = vpop.f32.mrf.mxu0 }
0x1616   :  { %v9370_v55 = vpop.permute.xlu1 %9369  ;;  %v9394_v4 = vadd.f32 %v9365_v34, %v17804_v50  ;;  %v9742_v32 = vpop.f32.mrf.mxu2  ;;  %v15581_v34 = vld [vmem:[%s10702_s29 + $0x120] sm:$0xff] }
0x1617   :  { %14800 = vmatmul.msk.bf16.gmra.mxu0 %vm9991_vm6, %v9968_v18  ;;  %v9395_v17 = vadd.f32 %v9370_v55, %v17807_v62  ;;  %v15583_v55 = vld [vmem:[%s10702_s29 + $0x130] sm:$0xff] }
0x1618   :  { %v9909_v38 = vpop.f32.mrf.mxu3  ;;  %v9578_v15 = vadd.f32 %v9556_v47, %v9394_v4 }
0x1619   :  { %v9940_v14 = vadd.f32 %v9909_v38, %v9756_v27  ;;  %v9579_v51 = vadd.f32 %v9558_v41, %v9395_v17  ;;  %v15582_v41 = vld [vmem:[%s10702_s29 + $0x128] sm:$0xff] }
0x161a   :  { %v9762_v21 = vadd.f32 %v9740_v22, %v9578_v15  ;;  %v15584_v15 = vld [vmem:[%s10702_s29 + $0x138] sm:$0xff] }
0x161b   :  { %v9956_v3 = vmax.f32 %v9940_v14, 0.0  ;;  %v9763_v38 = vadd.f32 %v9742_v32, %v9579_v51  ;;  %v10552_v32 = vld [vmem:[%s10706_s1] sm:$0x1] }
0x161d   :  { %v9561_v58 = vpop.f32.mrf.mxu0 }
0x161e   :  { %v9745_v5 = vpop.f32.mrf.mxu2 }
0x1620   :  { %v9911_v6 = vpop.f32.mrf.mxu3 }
0x1621   :  { %v9941_v48 = vadd.f32 %v9911_v6, %v9757_v25  ;;  %v9375_v6 = vpop.permute.xlu2 %9374 }
0x1622   :  { %v9396_v50 = vadd.f32 %v9375_v6, %v17813_v24 }
0x1623   :  { %v9957_v53 = vmax.f32 %v9941_v48, 0.0  ;;  %v9380_v48 = vpop.permute.xlu0 %9379 }
0x1624   :  { %v9397_v62 = vadd.f32 %v9380_v48, %v17815_v63 }
0x1625   :  { %v9969_v12 = vpack.c.bf16 %v9957_v53, %v9956_v3  ;;  %v9563_v53 = vpop.f32.mrf.mxu0 }
0x1626   :  { %v9747_v13 = vpop.f32.mrf.mxu2  ;;  %v9581_v2 = vadd.f32 %v9563_v53, %v9397_v62 }
0x1627   :  { %14801 = vmatmul.msk.bf16.gmra.mxu0 %vm9991_vm6, %v9969_v12  ;;  %v9580_v12 = vadd.f32 %v9561_v58, %v9396_v50 }
0x1628   :  { %v9914_v52 = vpop.f32.mrf.mxu3  ;;  %v9765_v61 = vadd.f32 %v9747_v13, %v9581_v2 }
0x1629   :  { %v9942_v60 = vadd.f32 %v9914_v52, %v9758_v39  ;;  %v9764_v20 = vadd.f32 %v9745_v5, %v9580_v12  ;;  %v10199_v58 = vpop.permute.xlu2 %10198 }
0x162b   :  { %v9958_v54 = vmax.f32 %v9942_v60, 0.0 }
0x162e   :  { %v10472_v4 = vpop.f32.mrf.mxu2 }
0x1630   :  { %v9916_v33 = vpop.f32.mrf.mxu3 }
0x1631   :  { %v9943_v10 = vadd.f32 %v9916_v33, %v9759_v7  ;;  %v10204_v12 = vpop.permute.xlu2 %10203 }
0x1633   :  { %v9959_v26 = vmax.f32 %v9943_v10, 0.0 }
0x1635   :  { %v9970_v23 = vpack.c.bf16 %v9959_v26, %v9958_v54 }
0x1636   :  { %v10474_v17 = vpop.f32.mrf.mxu2 }
0x1637   :  { %14802 = vmatmul.msk.bf16.gmra.mxu0 %vm9991_vm6, %v9970_v23 }
0x1638   :  { %v9919_v36 = vpop.f32.mrf.mxu3 }
0x1639   :  { %v9944_v44 = vadd.f32 %v9919_v36, %v9760_v19 }
0x163b   :  { %v9960_v37 = vmax.f32 %v9944_v44, 0.0 }
0x163e   :  { %v10477_v51 = vpop.f32.mrf.mxu2 }
0x1640   :  { %v9921_v45 = vpop.f32.mrf.mxu3 }
0x1641   :  { %v9945_v1 = vadd.f32 %v9921_v45, %v9761_v56 }
0x1643   :  { %v9961_v59 = vmax.f32 %v9945_v1, 0.0  ;;  %v15577_v1 = vld [vmem:[%s10702_s29 + $0x100] sm:$0xff] }
0x1645   :  { %v9971_v31 = vpack.c.bf16 %v9961_v59, %v9960_v37  ;;  %v15578_v37 = vld [vmem:[%s10702_s29 + $0x108] sm:$0xff]  ;;  %v15579_v59 = vld [vmem:[%s10702_s29 + $0x110] sm:$0xff] }
0x1647   :  { %14803 = vmatmul.msk.bf16.gmra.mxu0 %vm9991_vm6, %v9971_v31  ;;  %v15580_v31 = vld [vmem:[%s10702_s29 + $0x118] sm:$0xff] }
0x1648   :  { %v9924_v18 = vpop.f32.mrf.mxu3 }
0x1649   :  { %v9946_v40 = vadd.f32 %v9924_v18, %v9762_v21  ;;  %v10578_v18 = vsel %vm10016_vm5, %v10552_v32, 0  ;;  %v10194_v21 = vpop.permute.xlu1 %10193 }
0x164a   :  { %10587 = vmatpush.bf16.msrb.mxu3 %v10578_v18 }
0x164b   :  { %v9962_v25 = vmax.f32 %v9946_v40, 0.0 }
0x1650   :  { %v9926_v57 = vpop.f32.mrf.mxu3 }
0x1651   :  { %v9947_v27 = vadd.f32 %v9926_v57, %v9763_v38  ;;  %v10479_v38 = vpop.f32.mrf.mxu2  ;;  %v10327_v5 = vpop.permute.xlu1 %10326 }
0x1652   :  { %v10475_v6 = vadd.f32 %v10474_v17, %v10327_v5 }
0x1653   :  { %v9963_v14 = vmax.f32 %v9947_v27, 0.0  ;;  %v10322_v27 = vpop.permute.xlu0 %10321 }
0x1655   :  { %v9972_v35 = vpack.c.bf16 %v9963_v14, %v9962_v25  ;;  %v10473_v25 = vadd.f32 %v10472_v4, %v10322_v27 }
0x1657   :  { %14804 = vmatmul.msk.bf16.gmra.mxu0 %vm9991_vm6, %v9972_v35 }
0x1658   :  { %v9929_v3 = vpop.f32.mrf.mxu3 }
0x1659   :  { %v9948_v52 = vadd.f32 %v9929_v3, %v9764_v20  ;;  %v10482_v14 = vpop.f32.mrf.mxu2 }
0x165b   :  { %v9964_v42 = vmax.f32 %v9948_v52, 0.0 }
0x1660   :  { %v9931_v49 = vpop.f32.mrf.mxu3 }
0x1661   :  { %v9949_v43 = vadd.f32 %v9931_v49, %v9765_v61  ;;  %v10484_v20 = vpop.f32.mrf.mxu2  ;;  %v10209_v61 = vpop.permute.xlu0 %10208 }
0x1662   :  { %v10332_v49 = vpop.permute.xlu1 %10331 }
0x1663   :  { %v9965_v8 = vmax.f32 %v9949_v43, 0.0  ;;  %v10478_v43 = vadd.f32 %v10477_v51, %v10332_v49 }
0x1665   :  { %v9973_v39 = vpack.c.bf16 %v9965_v8, %v9964_v42  ;;  %v10337_v42 = vpop.permute.xlu2 %10336 }
0x1667   :  { %14805 = vmatmul.msk.bf16.gmra.mxu0 %vm9991_vm6, %v9973_v39  ;;  %v10480_v39 = vadd.f32 %v10479_v38, %v10337_v42 }
0x1674   :  { %v10029_v24 = vpop.f32.mrf.mxu0 }
0x167c   :  { %v10031_v7 = vpop.f32.mrf.mxu0 }
0x167d   :  { %v10069_v60 = vpack.c.bf16 %v10031_v7, %v10029_v24 }
0x1684   :  { %v10034_v33 = vpop.f32.mrf.mxu0 }
0x168c   :  { %v10036_v10 = vpop.f32.mrf.mxu0 }
0x168d   :  { %v10070_v63 = vpack.c.bf16 %v10036_v10, %v10034_v33  ;;  %v10487_v33 = vpop.f32.mrf.mxu2 }
0x1694   :  { %v10039_v9 = vpop.f32.mrf.mxu0 }
0x169c   :  { %v10041_v54 = vpop.f32.mrf.mxu0 }
0x169d   :  { %v10071_v26 = vpack.c.bf16 %v10041_v54, %v10039_v9  ;;  %v10214_v9 = vpop.permute.xlu0 %10213 }
0x16a4   :  { %v10044_v0 = vpop.f32.mrf.mxu0 }
0x16ac   :  { %v10046_v23 = vpop.f32.mrf.mxu0 }
0x16ad   :  { %v10072_v46 = vpack.c.bf16 %v10046_v23, %v10044_v0  ;;  %v10219_v0 = vpop.permute.xlu1 %10218 }
0x16b4   :  { %v10049_v16 = vpop.f32.mrf.mxu0 }
0x16bc   :  { %v10051_v30 = vpop.f32.mrf.mxu0 }
0x16bd   :  { %v10073_v45 = vpack.c.bf16 %v10051_v30, %v10049_v16  ;;  %v10489_v16 = vpop.f32.mrf.mxu2 }
0x16c4   :  { %v10054_v36 = vpop.f32.mrf.mxu0 }
0x16cc   :  { %v10056_v29 = vpop.f32.mrf.mxu0 }
0x16cd   :  { %v10074_v44 = vpack.c.bf16 %v10056_v29, %v10054_v36  ;;  %v10347_v36 = vpop.permute.xlu0 %10346 }
0x16d4   :  { %v10059_v28 = vpop.f32.mrf.mxu0 }
0x16dc   :  { %v10061_v47 = vpop.f32.mrf.mxu0 }
0x16dd   :  { %v10075_v56 = vpack.c.bf16 %v10061_v47, %v10059_v28  ;;  %v10485_v28 = vadd.f32 %v10484_v20, %v10347_v36 }
0x16e4   :  { %v10064_v11 = vpop.f32.mrf.mxu0 }
0x16ec   :  { %v10066_v19 = vpop.f32.mrf.mxu0 }
0x16ed   :  { %v10076_v22 = vpack.c.bf16 %v10066_v19, %v10064_v11 }
0x16ef   :  { %10142 = vmatpush.bf16.msra.mxu1 %v10076_v22 }
0x16f3   :  { %10143 = vmatpush.bf16.msra.mxu1 %v10075_v56 }
0x16f7   :  { %10144 = vmatpush.bf16.msra.mxu1 %v10074_v44  ;;  %v10224_v44 = vpop.permute.xlu1 %10223 }
0x16fb   :  { %10145 = vmatpush.bf16.msra.mxu1 %v10073_v45 }
0x16ff   :  { %10146 = vmatpush.bf16.msra.mxu1 %v10072_v46  ;;  %v10342_v46 = vpop.permute.xlu2 %10341 }
0x1700   :  { %v10483_v30 = vadd.f32 %v10482_v14, %v10342_v46 }
0x1703   :  { %10147 = vmatpush.bf16.msra.mxu1 %v10071_v26 }
0x1707   :  { %10148 = vmatpush.bf16.msra.mxu1 %v10070_v63 }
0x170b   :  { %10149 = vmatpush.bf16.msra.mxu1 %v10069_v60 }
0x170e   :  { %10150 = vmatmul.bf16.vlgmr.msra.gmra.mxu1 %v15577_v1  ;;  %v10492_v1 = vpop.f32.mrf.mxu2 }
0x171e   :  { %10155 = vmatmul.bf16.gmra.mxu1 %v15578_v37 }
0x172e   :  { %10160 = vmatmul.bf16.gmra.mxu1 %v15579_v59  ;;  %v10229_v59 = vpop.permute.xlu2 %10228 }
0x173e   :  { %10165 = vmatmul.bf16.gmra.mxu1 %v15580_v31 }
0x174e   :  { %10170 = vmatmul.bf16.gmra.mxu1 %v15581_v34  ;;  %v10352_v34 = vpop.permute.xlu0 %10351 }
0x1756   :  { %v10239_v27 = vpop.permute.xlu0 %10238 }
0x175e   :  { %10175 = vmatmul.bf16.gmra.mxu1 %v15582_v41  ;;  %v10488_v41 = vadd.f32 %v10487_v33, %v10352_v34 }
0x176e   :  { %10180 = vmatmul.bf16.gmra.mxu1 %v15583_v55  ;;  %v10357_v55 = vpop.permute.xlu1 %10356 }
0x176f   :  { %v10490_v32 = vadd.f32 %v10489_v16, %v10357_v55 }
0x1776   :  { %v10362_v14 = vpop.permute.xlu1 %10361 }
0x177e   :  { %10185 = vmatmul.bf16.gmra.mxu1 %v15584_v15  ;;  %v10494_v15 = vpop.f32.mrf.mxu2  ;;  %v10249_v49 = vpop.permute.xlu1 %10248 }
0x1786   :  { %v10497_v5 = vpop.f32.mrf.mxu2 }
0x178b   :  { %v10151_v40 = vpop.f32.mrf.mxu1 }
0x178c   :  { %v10271_v57 = vadd.f32 %v10194_v21, %v10151_v40  ;;  %v10234_v40 = vpop.permute.xlu2 %10233 }
0x178e   :  { %v10512_v50 = vadd.f32 %v10473_v25, %v10271_v57  ;;  %v10499_v20 = vpop.f32.mrf.mxu2 }
0x1790   :  { %v10528_v62 = vmax.f32 %v10512_v50, 0.0 }
0x1793   :  { %v10153_v35 = vpop.f32.mrf.mxu1 }
0x1794   :  { %v10272_v48 = vadd.f32 %v10199_v58, %v10153_v35  ;;  %v10493_v35 = vadd.f32 %v10492_v1, %v10362_v14 }
0x1796   :  { %v10513_v3 = vadd.f32 %v10475_v6, %v10272_v48  ;;  %v10367_v6 = vpop.permute.xlu2 %10366 }
0x1797   :  { %v10495_v48 = vadd.f32 %v10494_v15, %v10367_v6 }
0x1798   :  { %v10529_v53 = vmax.f32 %v10513_v3, 0.0 }
0x179a   :  { %v10544_v13 = vpack.c.bf16 %v10529_v53, %v10528_v62 }
0x179b   :  { %v10156_v2 = vpop.f32.mrf.mxu1 }
0x179c   :  { %14894 = vmatmul.msk.bf16.vlgmr.msrb.gmra.mxu3 %vm9991_vm6, %v10544_v13  ;;  %v10273_v52 = vadd.f32 %v10204_v12, %v10156_v2  ;;  %v10244_v12 = vpop.permute.xlu0 %10243 }
0x179e   :  { %v10514_v24 = vadd.f32 %v10478_v43, %v10273_v52  ;;  %v10372_v42 = vpop.permute.xlu2 %10371 }
0x17a0   :  { %v10530_v10 = vmax.f32 %v10514_v24, 0.0  ;;  %v10502_v24 = vpop.f32.mrf.mxu2 }
0x17a3   :  { %v10158_v8 = vpop.f32.mrf.mxu1 }
0x17a4   :  { %v10274_v7 = vadd.f32 %v10209_v61, %v10158_v8  ;;  %v10377_v8 = vpop.permute.xlu0 %10376 }
0x17a6   :  { %v10515_v60 = vadd.f32 %v10480_v39, %v10274_v7  ;;  %v10498_v39 = vadd.f32 %v10497_v5, %v10372_v42  ;;  %v10259_v16 = vpop.permute.xlu2 %10258 }
0x17a8   :  { %v10531_v63 = vmax.f32 %v10515_v60, 0.0  ;;  %v10500_v60 = vadd.f32 %v10499_v20, %v10377_v8  ;;  %v10504_v46 = vpop.f32.mrf.mxu2 }
0x17aa   :  { %v10545_v54 = vpack.c.bf16 %v10531_v63, %v10530_v10 }
0x17ab   :  { %v10161_v26 = vpop.f32.mrf.mxu1 }
0x17ac   :  { %14895 = vmatmul.msk.bf16.gmra.mxu3 %vm9991_vm6, %v10545_v54  ;;  %v10275_v23 = vadd.f32 %v10214_v9, %v10161_v26  ;;  %v10254_v26 = vpop.permute.xlu1 %10253  ;;  %v10382_v36 = vpop.permute.xlu0 %10381 }
0x17ae   :  { %v10516_v47 = vadd.f32 %v10483_v30, %v10275_v23 }
0x17b0   :  { %v10532_v22 = vmax.f32 %v10516_v47, 0.0 }
0x17b3   :  { %v10163_v29 = vpop.f32.mrf.mxu1 }
0x17b4   :  { %v10276_v11 = vadd.f32 %v10219_v0, %v10163_v29  ;;  %v10503_v29 = vadd.f32 %v10502_v24, %v10382_v36 }
0x17b6   :  { %v10517_v19 = vadd.f32 %v10485_v28, %v10276_v11  ;;  %v10387_v28 = vpop.permute.xlu1 %10386 }
0x17b7   :  { %v10505_v11 = vadd.f32 %v10504_v46, %v10387_v28 }
0x17b8   :  { %v10533_v56 = vmax.f32 %v10517_v19, 0.0 }
0x17ba   :  { %v10546_v45 = vpack.c.bf16 %v10533_v56, %v10532_v22 }
0x17bb   :  { %v10166_v37 = vpop.f32.mrf.mxu1 }
0x17bc   :  { %14896 = vmatmul.msk.bf16.gmra.mxu3 %vm9991_vm6, %v10546_v45  ;;  %v10277_v31 = vadd.f32 %v10224_v44, %v10166_v37  ;;  %v10507_v44 = vpop.f32.mrf.mxu2  ;;  %v10264_v37 = vpop.permute.xlu2 %10263 }
0x17be   :  { %v10518_v18 = vadd.f32 %v10488_v41, %v10277_v31  ;;  %v10392_v41 = vpop.permute.xlu1 %10391 }
0x17c0   :  { %v10534_v21 = vmax.f32 %v10518_v18, 0.0 }
0x17c3   :  { %v10168_v4 = vpop.f32.mrf.mxu1 }
0x17c4   :  { %v10278_v17 = vadd.f32 %v10229_v59, %v10168_v4  ;;  %v10509_v55 = vpop.f32.mrf.mxu2  ;;  %v10269_v4 = vpop.permute.xlu0 %10268 }
0x17c5   :  { %v10397_v18 = vpop.permute.xlu2 %10396 }
0x17c6   :  { %v10519_v51 = vadd.f32 %v10490_v32, %v10278_v17  ;;  %v10508_v32 = vadd.f32 %v10507_v44, %v10392_v41  ;;  %v10510_v15 = vadd.f32 %v10509_v55, %v10397_v18 }
0x17c8   :  { %v10535_v38 = vmax.f32 %v10519_v51, 0.0 }
0x17ca   :  { %v10547_v58 = vpack.c.bf16 %v10535_v38, %v10534_v21 }
0x17cb   :  { %v10171_v57 = vpop.f32.mrf.mxu1 }
0x17cc   :  { %14897 = vmatmul.msk.bf16.gmra.mxu3 %vm9991_vm6, %v10547_v58  ;;  %v10279_v25 = vadd.f32 %v10234_v40, %v10171_v57 }
0x17ce   :  { %v10520_v3 = vadd.f32 %v10493_v35, %v10279_v25 }
0x17d0   :  { %v10536_v13 = vmax.f32 %v10520_v3, 0.0 }
0x17d3   :  { %v10173_v50 = vpop.f32.mrf.mxu1 }
0x17d4   :  { %v10280_v62 = vadd.f32 %v10239_v27, %v10173_v50 }
0x17d6   :  { %v10521_v53 = vadd.f32 %v10495_v48, %v10280_v62 }
0x17d8   :  { %v10537_v2 = vmax.f32 %v10521_v53, 0.0 }
0x17da   :  { %v10548_v61 = vpack.c.bf16 %v10537_v2, %v10536_v13 }
0x17db   :  { %v10176_v52 = vpop.f32.mrf.mxu1 }
0x17dc   :  { %14898 = vmatmul.msk.bf16.gmra.mxu3 %vm9991_vm6, %v10548_v61  ;;  %v10281_v43 = vadd.f32 %v10244_v12, %v10176_v52  ;;  %v10629_v52 = vld [vmem:[%s10707_s4] sm:$0xff] }
0x17de   :  { %v10522_v33 = vadd.f32 %v10498_v39, %v10281_v43  ;;  %v10636_v43 = vpop.permute.xlu0 %10635  ;;  %v10641_v39 = vpop.permute.xlu1 %10640 }
0x17e0   :  { %v10538_v9 = vmax.f32 %v10522_v33, 0.0 }
0x17e3   :  { %v10178_v7 = vpop.f32.mrf.mxu1 }
0x17e4   :  { %v10282_v10 = vadd.f32 %v10249_v49, %v10178_v7  ;;  %v10630_v49 = vld [vmem:[%s10707_s4 + $0x8] sm:$0x3] }
0x17e6   :  { %v10523_v63 = vadd.f32 %v10500_v60, %v10282_v10 }
0x17e8   :  { %v10539_v54 = vmax.f32 %v10523_v63, 0.0 }
0x17ea   :  { %v10549_v0 = vpack.c.bf16 %v10539_v54, %v10538_v9 }
0x17eb   :  { %v10181_v23 = vpop.f32.mrf.mxu1 }
0x17ec   :  { %14899 = vmatmul.msk.bf16.gmra.mxu3 %vm9991_vm6, %v10549_v0  ;;  %v10283_v30 = vadd.f32 %v10254_v26, %v10181_v23 }
0x17ee   :  { %v10524_v19 = vadd.f32 %v10503_v29, %v10283_v30 }
0x17f0   :  { %v10540_v45 = vmax.f32 %v10524_v19, 0.0 }
0x17f3   :  { %v10183_v47 = vpop.f32.mrf.mxu1 }
0x17f4   :  { %v10284_v22 = vadd.f32 %v10259_v16, %v10183_v47 }
0x17f6   :  { %v10525_v56 = vadd.f32 %v10505_v11, %v10284_v22 }
0x17f8   :  { %v10541_v1 = vmax.f32 %v10525_v56, 0.0 }
0x17fa   :  { %v10550_v59 = vpack.c.bf16 %v10541_v1, %v10540_v45 }
0x17fb   :  { %v10186_v31 = vpop.f32.mrf.mxu1 }
0x17fc   :  { %14900 = vmatmul.msk.bf16.gmra.mxu3 %vm9991_vm6, %v10550_v59  ;;  %v10285_v34 = vadd.f32 %v10264_v37, %v10186_v31 }
0x17fe   :  { %v10526_v51 = vadd.f32 %v10508_v32, %v10285_v34 }
0x1800   :  { %v10542_v40 = vmax.f32 %v10526_v51, 0.0 }
0x1803   :  { %v10188_v17 = vpop.f32.mrf.mxu1 }
0x1804   :  { %v10286_v21 = vadd.f32 %v10269_v4, %v10188_v17 }
0x1806   :  { %v10527_v38 = vadd.f32 %v10510_v15, %v10286_v21 }
0x1808   :  { %v10543_v58 = vmax.f32 %v10527_v38, 0.0 }
0x180a   :  { %v10551_v57 = vpack.c.bf16 %v10543_v58, %v10542_v40 }
0x180c   :  { %14901 = vmatmul.msk.bf16.gmra.mxu3 %vm9991_vm6, %v10551_v57 }
0x181f   :  { %v10589_v27 = vpop.f32.mrf.mxu3 }
0x1827   :  { %v10591_v5 = vpop.f32.mrf.mxu3 }
0x182f   :  { %v10594_v25 = vpop.f32.mrf.mxu3 }
0x1837   :  { %v10596_v14 = vpop.f32.mrf.mxu3 }
0x183f   :  { %v10599_v35 = vpop.f32.mrf.mxu3 }
0x1847   :  { %v10601_v6 = vpop.f32.mrf.mxu3 }
0x184f   :  { %v10604_v50 = vpop.f32.mrf.mxu3 }
0x1857   :  { %v10606_v48 = vpop.f32.mrf.mxu3 }
0x185f   :  { %v10609_v3 = vpop.f32.mrf.mxu3 }
0x1867   :  { %v10611_v62 = vpop.f32.mrf.mxu3 }
0x186f   :  { %v10614_v53 = vpop.f32.mrf.mxu3 }
0x1877   :  { %v10616_v12 = vpop.f32.mrf.mxu3 }
0x187f   :  { %v10619_v13 = vpop.f32.mrf.mxu3 }
0x1887   :  { %v10621_v2 = vpop.f32.mrf.mxu3 }
0x188f   :  { %v10624_v20 = vpop.f32.mrf.mxu3 }
0x1897   :  { %v10626_v61 = vpop.f32.mrf.mxu3 }
0x1898   :  { %10643 = vmatpush.msra.mxu0 %v10626_v61 }
0x189a   :  { %10644 = vmatpush.msra.mxu0 %v10624_v20 }
0x189c   :  { %10645 = vmatpush.msra.mxu0 %v10621_v2 }
0x189e   :  { %10646 = vmatpush.msra.mxu0 %v10619_v13 }
0x18a0   :  { %10647 = vmatpush.msra.mxu0 %v10616_v12 }
0x18a2   :  { %10648 = vmatpush.msra.mxu0 %v10614_v53 }
0x18a4   :  { %10649 = vmatpush.msra.mxu0 %v10611_v62 }
0x18a6   :  { %10650 = vmatpush.msra.mxu0 %v10609_v3 }
0x18a8   :  { %10651 = vmatpush.msra.mxu0 %v10606_v48 }
0x18aa   :  { %10652 = vmatpush.msra.mxu0 %v10604_v50 }
0x18ac   :  { %10653 = vmatpush.msra.mxu0 %v10601_v6 }
0x18ae   :  { %10654 = vmatpush.msra.mxu0 %v10599_v35 }
0x18b0   :  { %10655 = vmatpush.msra.mxu0 %v10596_v14 }
0x18b2   :  { %10656 = vmatpush.msra.mxu0 %v10594_v25 }
0x18b4   :  { %10657 = vmatpush.msra.mxu0 %v10591_v5 }
0x18b6   :  { %10658 = vmatpush.msra.mxu0 %v10589_v27 }
0x18b7   :  { %10659 = vmatmul.f32.vlgmr.msra.gmra.mxu0 %v10629_v52 }
0x18bf   :  { %10662 = vmatmul.f32.gmra.mxu0 %v10630_v49 }
0x1934   :  { %v10660_v42 = vpop.f32.mrf.mxu0 }
0x1935   :  { %v10661_v8 = vadd.f32 %v10660_v42, %v10636_v43 }
0x1937   :  { %10666 = vst.msk [vmem:[%s10709_s9] sm:$0xff] %vm9991_vm6, %v10661_v8 }
0x193c   :  { %v10663_v24 = vpop.f32.mrf.mxu0 }
0x193d   :  { %v10664_v7 = vadd.f32 %v10663_v24, %v10641_v39 }
0x193f   :  { %10668 = vst.msk [vmem:[%s10709_s9 + $0x8] sm:$0x3] %vm10667_vm7, %v10664_v7 }

</bundles_post_ra>
